<compile_context>
chip_gen: v6e
topology: v6e:2x2x1
jax: 0.10.0
libtpu: 0.0.40
codegen_flags: <defaults>
</compile_context>

<pallas_src>
from functools import partial

import jax
import jax.numpy as jnp
from jax.experimental import pallas as pl
from jax.experimental.pallas import tpu as pltpu


def _gather_kernel(tok_ref, w_hbm, out_ref, sem_ref, *, t_tile):
    """One grid step gathers t_tile packed rows of the fused table directly
    into the pipelined output block via manual row DMAs.

    tok_ref : SMEM int32  [T_pad]        scalar-prefetched token ids
    w_hbm   : HBM  uint32 [V, PW]        fused, pre-scaled, bf16x2-packed table
    out_ref : VMEM uint32 [t_tile, PW]   output tile (DMA target, no vst pass)
    sem_ref : DMA semaphore [1]          shared by all row copies of this step
    """
    base = pl.program_id(0) * t_tile
    copies = []
    # Static unroll: keep all t_tile row-DMAs in flight before waiting so HBM
    # latency is exposed once per tile, not once per row.
    for j in range(t_tile):
        row = tok_ref[base + j]
        cp = pltpu.make_async_copy(
            w_hbm.at[pl.ds(row, 1), :],      # (1, PW) row in HBM
            out_ref.at[pl.ds(j, 1), :],      # (1, PW) row of the output block
            sem_ref.at[0],                   # shared byte-counting semaphore
        )
        cp.start()
        copies.append(cp)
    for cp in copies:                        # t_tile equal-size waits == wait-for-all
        cp.wait()


def _build_fused_table(tables, projs, dim_proj, scale):
    """Fuse gather+projection+scale into one table, quantize to bf16 and pack
    bf16 column pairs into uint32 so each row is a dense 32-bit row."""
    parts = []
    for tab, proj in zip(tables, projs):
        t32 = tab.astype(jnp.float32)
        if proj is None:                     # div_val == 1 and dim_proj == dim_embed
            fused = t32 * scale
        else:
            fused = (t32 @ proj.astype(jnp.float32).T) * scale
        parts.append(fused)
    w = jnp.concatenate(parts, axis=0)                         # (V, dim_proj) f32
    w_bf16 = w.astype(jnp.bfloat16)                            # halves gathered bytes
    v, p = w_bf16.shape
    if p % 2:                                                  # packing needs even width
        w_pack_src = jnp.pad(w_bf16, ((0, 0), (0, 1)))
        p += 1
    else:
        w_pack_src = w_bf16
    pw = p // 2
    w_u32 = jax.lax.bitcast_convert_type(                      # (V, pw) uint32
        w_pack_src.reshape(v, pw, 2), jnp.uint32)
    return w_u32, w_bf16


def adaptive_embedding_forward(input_, tables, projs, dim_proj, *, t_tile=128):
    """input_: int32 [B, S]; tables[i]: (n_i, d_i); projs[i]: (dim_proj, d_i) or None."""
    scale = float(dim_proj) ** 0.5

    # One-time weight preprocessing (cached across forward calls in practice).
    w_packed, _ = _build_fused_table(tables, projs, dim_proj, scale)
    _, pw = w_packed.shape

    tok_flat = input_.reshape(-1).astype(jnp.int32)
    num_tok = tok_flat.shape[0]
    t_pad = pl.cdiv(num_tok, t_tile) * t_tile
    if t_pad != num_tok:
        tok_flat = jnp.pad(tok_flat, (0, t_pad - num_tok))     # pad with token 0

    out_packed = pl.pallas_call(
        partial(_gather_kernel, t_tile=t_tile),
        out_shape=jax.ShapeDtypeStruct((t_pad, pw), jnp.uint32),
        grid_spec=pltpu.PrefetchScalarGridSpec(
            num_scalar_prefetch=1,                 # token ids land in SMEM
            grid=(t_pad // t_tile,),               # one step per 128-token tile
            in_specs=[
                pl.BlockSpec(memory_space=pl.ANY),  # fused table stays in HBM
            ],
            out_specs=pl.BlockSpec((t_tile, pw), lambda i, tok: (i, 0)),
            scratch_shapes=[
                pltpu.SemaphoreType.DMA((1,)),      # one shared DMA semaphore
            ],
        ),
        compiler_params=pltpu.CompilerParams(
            dimension_semantics=("parallel",),      # tiles shard across TCs (v7x)
        ),
    )(tok_flat, w_packed)

    # Unpack u32 -> bf16, drop padding, return f32 to match the module's dtype.
    out_bf16 = jax.lax.bitcast_convert_type(out_packed, jnp.bfloat16)
    out_bf16 = out_bf16.reshape(t_pad, 2 * pw)[:num_tok, :dim_proj]
    return out_bf16.astype(jnp.float32).reshape(*input_.shape, dim_proj)


def build_params(key, num_tokens, dim_embed, dim_proj, cutoffs, div_val):
    """Deterministic synthetic parameters, shapes matching the torch module."""
    cutoff_ends = [0] + cutoffs + [num_tokens]
    tables, projs = [], []
    if div_val == 1:
        k0, k1 = jax.random.split(key)
        tables.append(jax.random.normal(k0, (num_tokens, dim_embed), jnp.float32) * 0.02)
        if dim_proj != dim_embed:
            projs.append(jax.random.normal(k1, (dim_proj, dim_embed), jnp.float32) * 0.02)
        else:
            projs.append(None)               # torch applies no projection in this case
        cutoff_ends = [0, num_tokens]
    else:
        keys = jax.random.split(key, 2 * len(cutoff_ends))
        for i in range(len(cutoff_ends) - 1):
            l_idx, r_idx = cutoff_ends[i], cutoff_ends[i + 1]
            d_i = dim_embed // (div_val ** i)
            tables.append(
                jax.random.normal(keys[2 * i], (r_idx - l_idx, d_i), jnp.float32) * 0.02
            )
            projs.append(
                jax.random.normal(keys[2 * i + 1], (dim_proj, d_i), jnp.float32) * 0.02
            )
    return tables, projs, cutoff_ends


def reference_forward(input_, tables, projs, cutoff_ends, dim_proj):
    """Pure-JAX f32 reference mirroring the PyTorch forward."""
    flat = input_.reshape(-1)
    out = jnp.zeros((flat.shape[0], dim_proj), jnp.float32)
    for i, (tab, proj) in enumerate(zip(tables, projs)):
        l_idx, r_idx = cutoff_ends[i], cutoff_ends[i + 1]
        mask = (flat >= l_idx) & (flat < r_idx)
        rel = jnp.clip(flat - l_idx, 0, tab.shape[0] - 1)
        emb = tab[rel]
        if proj is not None:
            emb = emb @ proj.T
        out = out + jnp.where(mask[:, None], emb, 0.0)
    out = out * (float(dim_proj) ** 0.5)
    return out.reshape(*input_.shape, dim_proj)


if __name__ == "__main__":
    # Small config: vocab=100, dim_embed=32, dim_proj=32, cutoffs=[20, 60], div_val=2
    num_tokens, dim_embed, dim_proj = 100, 32, 32
    cutoffs, div_val = [20, 60], 2
    batch, seq = 2, 8

    key = jax.random.PRNGKey(0)
    k_par, k_tok = jax.random.split(key)
    tables, projs, cutoff_ends = build_params(
        k_par, num_tokens, dim_embed, dim_proj, cutoffs, div_val
    )
    input_ = jax.random.randint(k_tok, (batch, seq), 0, num_tokens, dtype=jnp.int32)

    out = adaptive_embedding_forward(input_, tables, projs, dim_proj)
    out = jax.block_until_ready(out)
    assert out.shape == (batch, seq, dim_proj)

    # Loose check vs the full-f32 reference (bf16 fused-table quantization noise).
    ref = reference_forward(input_, tables, projs, cutoff_ends, dim_proj)
    assert jnp.allclose(out, ref, atol=1e-3, rtol=5e-2), "mismatch vs f32 reference"

    # Tight check: the kernel must be an EXACT row gather of the bf16 fused table.
    _, w_bf16 = _build_fused_table(tables, projs, dim_proj, float(dim_proj) ** 0.5)
    expect_rows = w_bf16[input_.reshape(-1)]
    got_rows = out.reshape(-1, dim_proj).astype(jnp.bfloat16)
    assert jnp.array_equal(got_rows, expect_rows), "gather mismatch vs fused table"

    print("KERNEL_OK")
</pallas_src>

<mosaic_0001>
module attributes {stable_mosaic.version = 11 : i64} {
  func.func @_gather_kernel(%arg0: i32, %arg1: memref<128xi32, #tpu.memory_space<smem>>, %arg2: memref<100x16xi32, #tpu.memory_space<any>>, %arg3: memref<128x16xi32, #tpu.memory_space<vmem>>, %arg4: memref<1x!tpu.dma_semaphore, #tpu.memory_space<semaphore_mem>>) attributes {dimension_semantics = [#tpu.dimension_semantics<parallel>], iteration_bounds = array<i64: 1>, scalar_prefetch = 1 : i64, scratch_operands = 1 : i64, tpu.core_type = #tpu.core_type<tc>, window_params = [{}, {transform_indices = @transform_1, window_bounds = array<i64: 128, 16>}]} {
    %c128_i32 = arith.constant 128 : i32
    %0 = arith.muli %arg0, %c128_i32 : i32
    %c0_i32 = arith.constant 0 : i32
    %1 = arith.addi %0, %c0_i32 : i32
    %2 = arith.index_cast %1 : i32 to index
    %3 = memref.load %arg1[%2] : memref<128xi32, #tpu.memory_space<smem>>
    %c0_i32_0 = arith.constant 0 : i32
    %c0_i32_1 = arith.constant 0 : i32
    %4 = tpu.memref_slice %arg2[%3, %c0_i32_1] : memref<100x16xi32, #tpu.memory_space<any>> -> memref<1x16xi32, #tpu.memory_space<any>>
    %c0_i32_2 = arith.constant 0 : i32
    %c0_i32_3 = arith.constant 0 : i32
    %5 = tpu.memref_slice %arg3[%c0_i32_2, %c0_i32_3] : memref<128x16xi32, #tpu.memory_space<vmem>> -> memref<1x16xi32, #tpu.memory_space<vmem>>
    %6 = tpu.memref_slice %arg4[%c0_i32_0] : memref<1x!tpu.dma_semaphore, #tpu.memory_space<semaphore_mem>> -> memref<1x!tpu.dma_semaphore, #tpu.memory_space<semaphore_mem>>
    %7 = tpu.memref_squeeze %6 : memref<1x!tpu.dma_semaphore, #tpu.memory_space<semaphore_mem>> -> memref<!tpu.dma_semaphore, #tpu.memory_space<semaphore_mem>>
    tpu.enqueue_dma source(%4 : memref<1x16xi32, #tpu.memory_space<any>>) target(%5 : memref<1x16xi32, #tpu.memory_space<vmem>>) target_semaphore(%7 : memref<!tpu.dma_semaphore, #tpu.memory_space<semaphore_mem>>)
    %c1_i32 = arith.constant 1 : i32
    %8 = arith.addi %0, %c1_i32 : i32
    %9 = arith.index_cast %8 : i32 to index
    %10 = memref.load %arg1[%9] : memref<128xi32, #tpu.memory_space<smem>>
    %c0_i32_4 = arith.constant 0 : i32
    %c0_i32_5 = arith.constant 0 : i32
    %11 = tpu.memref_slice %arg2[%10, %c0_i32_5] : memref<100x16xi32, #tpu.memory_space<any>> -> memref<1x16xi32, #tpu.memory_space<any>>
    %c1_i32_6 = arith.constant 1 : i32
    %c0_i32_7 = arith.constant 0 : i32
    %12 = tpu.memref_slice %arg3[%c1_i32_6, %c0_i32_7] : memref<128x16xi32, #tpu.memory_space<vmem>> -> memref<1x16xi32, #tpu.memory_space<vmem>>
    %13 = tpu.memref_slice %arg4[%c0_i32_4] : memref<1x!tpu.dma_semaphore, #tpu.memory_space<semaphore_mem>> -> memref<1x!tpu.dma_semaphore, #tpu.memory_space<semaphore_mem>>
    %14 = tpu.memref_squeeze %13 : memref<1x!tpu.dma_semaphore, #tpu.memory_space<semaphore_mem>> -> memref<!tpu.dma_semaphore, #tpu.memory_space<semaphore_mem>>
    tpu.enqueue_dma source(%11 : memref<1x16xi32, #tpu.memory_space<any>>) target(%12 : memref<1x16xi32, #tpu.memory_space<vmem>>) target_semaphore(%14 : memref<!tpu.dma_semaphore, #tpu.memory_space<semaphore_mem>>)
    %c2_i32 = arith.constant 2 : i32
    %15 = arith.addi %0, %c2_i32 : i32
    %16 = arith.index_cast %15 : i32 to index
    %17 = memref.load %arg1[%16] : memref<128xi32, #tpu.memory_space<smem>>
    %c0_i32_8 = arith.constant 0 : i32
    %c0_i32_9 = arith.constant 0 : i32
    %18 = tpu.memref_slice %arg2[%17, %c0_i32_9] : memref<100x16xi32, #tpu.memory_space<any>> -> memref<1x16xi32, #tpu.memory_space<any>>
    %c2_i32_10 = arith.constant 2 : i32
    %c0_i32_11 = arith.constant 0 : i32
    %19 = tpu.memref_slice %arg3[%c2_i32_10, %c0_i32_11] : memref<128x16xi32, #tpu.memory_space<vmem>> -> memref<1x16xi32, #tpu.memory_space<vmem>>
    %20 = tpu.memref_slice %arg4[%c0_i32_8] : memref<1x!tpu.dma_semaphore, #tpu.memory_space<semaphore_mem>> -> memref<1x!tpu.dma_semaphore, #tpu.memory_space<semaphore_mem>>
    %21 = tpu.memref_squeeze %20 : memref<1x!tpu.dma_semaphore, #tpu.memory_space<semaphore_mem>> -> memref<!tpu.dma_semaphore, #tpu.memory_space<semaphore_mem>>
    tpu.enqueue_dma source(%18 : memref<1x16xi32, #tpu.memory_space<any>>) target(%19 : memref<1x16xi32, #tpu.memory_space<vmem>>) target_semaphore(%21 : memref<!tpu.dma_semaphore, #tpu.memory_space<semaphore_mem>>)
    %c3_i32 = arith.constant 3 : i32
    %22 = arith.addi %0, %c3_i32 : i32
    %23 = arith.index_cast %22 : i32 to index
    %24 = memref.load %arg1[%23] : memref<128xi32, #tpu.memory_space<smem>>
    %c0_i32_12 = arith.constant 0 : i32
    %c0_i32_13 = arith.constant 0 : i32
    %25 = tpu.memref_slice %arg2[%24, %c0_i32_13] : memref<100x16xi32, #tpu.memory_space<any>> -> memref<1x16xi32, #tpu.memory_space<any>>
    %c3_i32_14 = arith.constant 3 : i32
    %c0_i32_15 = arith.constant 0 : i32
    %26 = tpu.memref_slice %arg3[%c3_i32_14, %c0_i32_15] : memref<128x16xi32, #tpu.memory_space<vmem>> -> memref<1x16xi32, #tpu.memory_space<vmem>>
    %27 = tpu.memref_slice %arg4[%c0_i32_12] : memref<1x!tpu.dma_semaphore, #tpu.memory_space<semaphore_mem>> -> memref<1x!tpu.dma_semaphore, #tpu.memory_space<semaphore_mem>>
    %28 = tpu.memref_squeeze %27 : memref<1x!tpu.dma_semaphore, #tpu.memory_space<semaphore_mem>> -> memref<!tpu.dma_semaphore, #tpu.memory_space<semaphore_mem>>
    tpu.enqueue_dma source(%25 : memref<1x16xi32, #tpu.memory_space<any>>) target(%26 : memref<1x16xi32, #tpu.memory_space<vmem>>) target_semaphore(%28 : memref<!tpu.dma_semaphore, #tpu.memory_space<semaphore_mem>>)
    %c4_i32 = arith.constant 4 : i32
    %29 = arith.addi %0, %c4_i32 : i32
    %30 = arith.index_cast %29 : i32 to index
    %31 = memref.load %arg1[%30] : memref<128xi32, #tpu.memory_space<smem>>
    %c0_i32_16 = arith.constant 0 : i32
    %c0_i32_17 = arith.constant 0 : i32
    %32 = tpu.memref_slice %arg2[%31, %c0_i32_17] : memref<100x16xi32, #tpu.memory_space<any>> -> memref<1x16xi32, #tpu.memory_space<any>>
    %c4_i32_18 = arith.constant 4 : i32
    %c0_i32_19 = arith.constant 0 : i32
    %33 = tpu.memref_slice %arg3[%c4_i32_18, %c0_i32_19] : memref<128x16xi32, #tpu.memory_space<vmem>> -> memref<1x16xi32, #tpu.memory_space<vmem>>
    %34 = tpu.memref_slice %arg4[%c0_i32_16] : memref<1x!tpu.dma_semaphore, #tpu.memory_space<semaphore_mem>> -> memref<1x!tpu.dma_semaphore, #tpu.memory_space<semaphore_mem>>
    %35 = tpu.memref_squeeze %34 : memref<1x!tpu.dma_semaphore, #tpu.memory_space<semaphore_mem>> -> memref<!tpu.dma_semaphore, #tpu.memory_space<semaphore_mem>>
    tpu.enqueue_dma source(%32 : memref<1x16xi32, #tpu.memory_space<any>>) target(%33 : memref<1x16xi32, #tpu.memory_space<vmem>>) target_semaphore(%35 : memref<!tpu.dma_semaphore, #tpu.memory_space<semaphore_mem>>)
    %c5_i32 = arith.constant 5 : i32
    %36 = arith.addi %0, %c5_i32 : i32
    %37 = arith.index_cast %36 : i32 to index
    %38 = memref.load %arg1[%37] : memref<128xi32, #tpu.memory_space<smem>>
    %c0_i32_20 = arith.constant 0 : i32
    %c0_i32_21 = arith.constant 0 : i32
    %39 = tpu.memref_slice %arg2[%38, %c0_i32_21] : memref<100x16xi32, #tpu.memory_space<any>> -> memref<1x16xi32, #tpu.memory_space<any>>
    %c5_i32_22 = arith.constant 5 : i32
    %c0_i32_23 = arith.constant 0 : i32
    %40 = tpu.memref_slice %arg3[%c5_i32_22, %c0_i32_23] : memref<128x16xi32, #tpu.memory_space<vmem>> -> memref<1x16xi32, #tpu.memory_space<vmem>>
    %41 = tpu.memref_slice %arg4[%c0_i32_20] : memref<1x!tpu.dma_semaphore, #tpu.memory_space<semaphore_mem>> -> memref<1x!tpu.dma_semaphore, #tpu.memory_space<semaphore_mem>>
    %42 = tpu.memref_squeeze %41 : memref<1x!tpu.dma_semaphore, #tpu.memory_space<semaphore_mem>> -> memref<!tpu.dma_semaphore, #tpu.memory_space<semaphore_mem>>
    tpu.enqueue_dma source(%39 : memref<1x16xi32, #tpu.memory_space<any>>) target(%40 : memref<1x16xi32, #tpu.memory_space<vmem>>) target_semaphore(%42 : memref<!tpu.dma_semaphore, #tpu.memory_space<semaphore_mem>>)
    %c6_i32 = arith.constant 6 : i32
    %43 = arith.addi %0, %c6_i32 : i32
    %44 = arith.index_cast %43 : i32 to index
    %45 = memref.load %arg1[%44] : memref<128xi32, #tpu.memory_space<smem>>
    %c0_i32_24 = arith.constant 0 : i32
    %c0_i32_25 = arith.constant 0 : i32
    %46 = tpu.memref_slice %arg2[%45, %c0_i32_25] : memref<100x16xi32, #tpu.memory_space<any>> -> memref<1x16xi32, #tpu.memory_space<any>>
    %c6_i32_26 = arith.constant 6 : i32
    %c0_i32_27 = arith.constant 0 : i32
    %47 = tpu.memref_slice %arg3[%c6_i32_26, %c0_i32_27] : memref<128x16xi32, #tpu.memory_space<vmem>> -> memref<1x16xi32, #tpu.memory_space<vmem>>
    %48 = tpu.memref_slice %arg4[%c0_i32_24] : memref<1x!tpu.dma_semaphore, #tpu.memory_space<semaphore_mem>> -> memref<1x!tpu.dma_semaphore, #tpu.memory_space<semaphore_mem>>
    %49 = tpu.memref_squeeze %48 : memref<1x!tpu.dma_semaphore, #tpu.memory_space<semaphore_mem>> -> memref<!tpu.dma_semaphore, #tpu.memory_space<semaphore_mem>>
    tpu.enqueue_dma source(%46 : memref<1x16xi32, #tpu.memory_space<any>>) target(%47 : memref<1x16xi32, #tpu.memory_space<vmem>>) target_semaphore(%49 : memref<!tpu.dma_semaphore, #tpu.memory_space<semaphore_mem>>)
    %c7_i32 = arith.constant 7 : i32
    %50 = arith.addi %0, %c7_i32 : i32
    %51 = arith.index_cast %50 : i32 to index
    %52 = memref.load %arg1[%51] : memref<128xi32, #tpu.memory_space<smem>>
    %c0_i32_28 = arith.constant 0 : i32
    %c0_i32_29 = arith.constant 0 : i32
    %53 = tpu.memref_slice %arg2[%52, %c0_i32_29] : memref<100x16xi32, #tpu.memory_space<any>> -> memref<1x16xi32, #tpu.memory_space<any>>
    %c7_i32_30 = arith.constant 7 : i32
    %c0_i32_31 = arith.constant 0 : i32
    %54 = tpu.memref_slice %arg3[%c7_i32_30, %c0_i32_31] : memref<128x16xi32, #tpu.memory_space<vmem>> -> memref<1x16xi32, #tpu.memory_space<vmem>>
    %55 = tpu.memref_slice %arg4[%c0_i32_28] : memref<1x!tpu.dma_semaphore, #tpu.memory_space<semaphore_mem>> -> memref<1x!tpu.dma_semaphore, #tpu.memory_space<semaphore_mem>>
    %56 = tpu.memref_squeeze %55 : memref<1x!tpu.dma_semaphore, #tpu.memory_space<semaphore_mem>> -> memref<!tpu.dma_semaphore, #tpu.memory_space<semaphore_mem>>
    tpu.enqueue_dma source(%53 : memref<1x16xi32, #tpu.memory_space<any>>) target(%54 : memref<1x16xi32, #tpu.memory_space<vmem>>) target_semaphore(%56 : memref<!tpu.dma_semaphore, #tpu.memory_space<semaphore_mem>>)
    %c8_i32 = arith.constant 8 : i32
    %57 = arith.addi %0, %c8_i32 : i32
    %58 = arith.index_cast %57 : i32 to index
    %59 = memref.load %arg1[%58] : memref<128xi32, #tpu.memory_space<smem>>
    %c0_i32_32 = arith.constant 0 : i32
    %c0_i32_33 = arith.constant 0 : i32
    %60 = tpu.memref_slice %arg2[%59, %c0_i32_33] : memref<100x16xi32, #tpu.memory_space<any>> -> memref<1x16xi32, #tpu.memory_space<any>>
    %c8_i32_34 = arith.constant 8 : i32
    %c0_i32_35 = arith.constant 0 : i32
    %61 = tpu.memref_slice %arg3[%c8_i32_34, %c0_i32_35] : memref<128x16xi32, #tpu.memory_space<vmem>> -> memref<1x16xi32, #tpu.memory_space<vmem>>
    %62 = tpu.memref_slice %arg4[%c0_i32_32] : memref<1x!tpu.dma_semaphore, #tpu.memory_space<semaphore_mem>> -> memref<1x!tpu.dma_semaphore, #tpu.memory_space<semaphore_mem>>
    %63 = tpu.memref_squeeze %62 : memref<1x!tpu.dma_semaphore, #tpu.memory_space<semaphore_mem>> -> memref<!tpu.dma_semaphore, #tpu.memory_space<semaphore_mem>>
    tpu.enqueue_dma source(%60 : memref<1x16xi32, #tpu.memory_space<any>>) target(%61 : memref<1x16xi32, #tpu.memory_space<vmem>>) target_semaphore(%63 : memref<!tpu.dma_semaphore, #tpu.memory_space<semaphore_mem>>)
    %c9_i32 = arith.constant 9 : i32
    %64 = arith.addi %0, %c9_i32 : i32
    %65 = arith.index_cast %64 : i32 to index
    %66 = memref.load %arg1[%65] : memref<128xi32, #tpu.memory_space<smem>>
    %c0_i32_36 = arith.constant 0 : i32
    %c0_i32_37 = arith.constant 0 : i32
    %67 = tpu.memref_slice %arg2[%66, %c0_i32_37] : memref<100x16xi32, #tpu.memory_space<any>> -> memref<1x16xi32, #tpu.memory_space<any>>
    %c9_i32_38 = arith.constant 9 : i32
    %c0_i32_39 = arith.constant 0 : i32
    %68 = tpu.memref_slice %arg3[%c9_i32_38, %c0_i32_39] : memref<128x16xi32, #tpu.memory_space<vmem>> -> memref<1x16xi32, #tpu.memory_space<vmem>>
    %69 = tpu.memref_slice %arg4[%c0_i32_36] : memref<1x!tpu.dma_semaphore, #tpu.memory_space<semaphore_mem>> -> memref<1x!tpu.dma_semaphore, #tpu.memory_space<semaphore_mem>>
    %70 = tpu.memref_squeeze %69 : memref<1x!tpu.dma_semaphore, #tpu.memory_space<semaphore_mem>> -> memref<!tpu.dma_semaphore, #tpu.memory_space<semaphore_mem>>
    tpu.enqueue_dma source(%67 : memref<1x16xi32, #tpu.memory_space<any>>) target(%68 : memref<1x16xi32, #tpu.memory_space<vmem>>) target_semaphore(%70 : memref<!tpu.dma_semaphore, #tpu.memory_space<semaphore_mem>>)
    %c10_i32 = arith.constant 10 : i32
    %71 = arith.addi %0, %c10_i32 : i32
    %72 = arith.index_cast %71 : i32 to index
    %73 = memref.load %arg1[%72] : memref<128xi32, #tpu.memory_space<smem>>
    %c0_i32_40 = arith.constant 0 : i32
    %c0_i32_41 = arith.constant 0 : i32
    %74 = tpu.memref_slice %arg2[%73, %c0_i32_41] : memref<100x16xi32, #tpu.memory_space<any>> -> memref<1x16xi32, #tpu.memory_space<any>>
    %c10_i32_42 = arith.constant 10 : i32
    %c0_i32_43 = arith.constant 0 : i32
    %75 = tpu.memref_slice %arg3[%c10_i32_42, %c0_i32_43] : memref<128x16xi32, #tpu.memory_space<vmem>> -> memref<1x16xi32, #tpu.memory_space<vmem>>
    %76 = tpu.memref_slice %arg4[%c0_i32_40] : memref<1x!tpu.dma_semaphore, #tpu.memory_space<semaphore_mem>> -> memref<1x!tpu.dma_semaphore, #tpu.memory_space<semaphore_mem>>
    %77 = tpu.memref_squeeze %76 : memref<1x!tpu.dma_semaphore, #tpu.memory_space<semaphore_mem>> -> memref<!tpu.dma_semaphore, #tpu.memory_space<semaphore_mem>>
    tpu.enqueue_dma source(%74 : memref<1x16xi32, #tpu.memory_space<any>>) target(%75 : memref<1x16xi32, #tpu.memory_space<vmem>>) target_semaphore(%77 : memref<!tpu.dma_semaphore, #tpu.memory_space<semaphore_mem>>)
    %c11_i32 = arith.constant 11 : i32
    %78 = arith.addi %0, %c11_i32 : i32
    %79 = arith.index_cast %78 : i32 to index
    %80 = memref.load %arg1[%79] : memref<128xi32, #tpu.memory_space<smem>>
    %c0_i32_44 = arith.constant 0 : i32
    %c0_i32_45 = arith.constant 0 : i32
    %81 = tpu.memref_slice %arg2[%80, %c0_i32_45] : memref<100x16xi32, #tpu.memory_space<any>> -> memref<1x16xi32, #tpu.memory_space<any>>
    %c11_i32_46 = arith.constant 11 : i32
    %c0_i32_47 = arith.constant 0 : i32
    %82 = tpu.memref_slice %arg3[%c11_i32_46, %c0_i32_47] : memref<128x16xi32, #tpu.memory_space<vmem>> -> memref<1x16xi32, #tpu.memory_space<vmem>>
    %83 = tpu.memref_slice %arg4[%c0_i32_44] : memref<1x!tpu.dma_semaphore, #tpu.memory_space<semaphore_mem>> -> memref<1x!tpu.dma_semaphore, #tpu.memory_space<semaphore_mem>>
    %84 = tpu.memref_squeeze %83 : memref<1x!tpu.dma_semaphore, #tpu.memory_space<semaphore_mem>> -> memref<!tpu.dma_semaphore, #tpu.memory_space<semaphore_mem>>
    tpu.enqueue_dma source(%81 : memref<1x16xi32, #tpu.memory_space<any>>) target(%82 : memref<1x16xi32, #tpu.memory_space<vmem>>) target_semaphore(%84 : memref<!tpu.dma_semaphore, #tpu.memory_space<semaphore_mem>>)
    %c12_i32 = arith.constant 12 : i32
    %85 = arith.addi %0, %c12_i32 : i32
    %86 = arith.index_cast %85 : i32 to index
    %87 = memref.load %arg1[%86] : memref<128xi32, #tpu.memory_space<smem>>
    %c0_i32_48 = arith.constant 0 : i32
    %c0_i32_49 = arith.constant 0 : i32
    %88 = tpu.memref_slice %arg2[%87, %c0_i32_49] : memref<100x16xi32, #tpu.memory_space<any>> -> memref<1x16xi32, #tpu.memory_space<any>>
    %c12_i32_50 = arith.constant 12 : i32
    %c0_i32_51 = arith.constant 0 : i32
    %89 = tpu.memref_slice %arg3[%c12_i32_50, %c0_i32_51] : memref<128x16xi32, #tpu.memory_space<vmem>> -> memref<1x16xi32, #tpu.memory_space<vmem>>
    %90 = tpu.memref_slice %arg4[%c0_i32_48] : memref<1x!tpu.dma_semaphore, #tpu.memory_space<semaphore_mem>> -> memref<1x!tpu.dma_semaphore, #tpu.memory_space<semaphore_mem>>
    %91 = tpu.memref_squeeze %90 : memref<1x!tpu.dma_semaphore, #tpu.memory_space<semaphore_mem>> -> memref<!tpu.dma_semaphore, #tpu.memory_space<semaphore_mem>>
    tpu.enqueue_dma source(%88 : memref<1x16xi32, #tpu.memory_space<any>>) target(%89 : memref<1x16xi32, #tpu.memory_space<vmem>>) target_semaphore(%91 : memref<!tpu.dma_semaphore, #tpu.memory_space<semaphore_mem>>)
    %c13_i32 = arith.constant 13 : i32
    %92 = arith.addi %0, %c13_i32 : i32
    %93 = arith.index_cast %92 : i32 to index
    %94 = memref.load %arg1[%93] : memref<128xi32, #tpu.memory_space<smem>>
    %c0_i32_52 = arith.constant 0 : i32
    %c0_i32_53 = arith.constant 0 : i32
    %95 = tpu.memref_slice %arg2[%94, %c0_i32_53] : memref<100x16xi32, #tpu.memory_space<any>> -> memref<1x16xi32, #tpu.memory_space<any>>
    %c13_i32_54 = arith.constant 13 : i32
    %c0_i32_55 = arith.constant 0 : i32
    %96 = tpu.memref_slice %arg3[%c13_i32_54, %c0_i32_55] : memref<128x16xi32, #tpu.memory_space<vmem>> -> memref<1x16xi32, #tpu.memory_space<vmem>>
    %97 = tpu.memref_slice %arg4[%c0_i32_52] : memref<1x!tpu.dma_semaphore, #tpu.memory_space<semaphore_mem>> -> memref<1x!tpu.dma_semaphore, #tpu.memory_space<semaphore_mem>>
    %98 = tpu.memref_squeeze %97 : memref<1x!tpu.dma_semaphore, #tpu.memory_space<semaphore_mem>> -> memref<!tpu.dma_semaphore, #tpu.memory_space<semaphore_mem>>
    tpu.enqueue_dma source(%95 : memref<1x16xi32, #tpu.memory_space<any>>) target(%96 : memref<1x16xi32, #tpu.memory_space<vmem>>) target_semaphore(%98 : memref<!tpu.dma_semaphore, #tpu.memory_space<semaphore_mem>>)
    %c14_i32 = arith.constant 14 : i32
    %99 = arith.addi %0, %c14_i32 : i32
    %100 = arith.index_cast %99 : i32 to index
    %101 = memref.load %arg1[%100] : memref<128xi32, #tpu.memory_space<smem>>
    %c0_i32_56 = arith.constant 0 : i32
    %c0_i32_57 = arith.constant 0 : i32
    %102 = tpu.memref_slice %arg2[%101, %c0_i32_57] : memref<100x16xi32, #tpu.memory_space<any>> -> memref<1x16xi32, #tpu.memory_space<any>>
    %c14_i32_58 = arith.constant 14 : i32
    %c0_i32_59 = arith.constant 0 : i32
    %103 = tpu.memref_slice %arg3[%c14_i32_58, %c0_i32_59] : memref<128x16xi32, #tpu.memory_space<vmem>> -> memref<1x16xi32, #tpu.memory_space<vmem>>
    %104 = tpu.memref_slice %arg4[%c0_i32_56] : memref<1x!tpu.dma_semaphore, #tpu.memory_space<semaphore_mem>> -> memref<1x!tpu.dma_semaphore, #tpu.memory_space<semaphore_mem>>
    %105 = tpu.memref_squeeze %104 : memref<1x!tpu.dma_semaphore, #tpu.memory_space<semaphore_mem>> -> memref<!tpu.dma_semaphore, #tpu.memory_space<semaphore_mem>>
    tpu.enqueue_dma source(%102 : memref<1x16xi32, #tpu.memory_space<any>>) target(%103 : memref<1x16xi32, #tpu.memory_space<vmem>>) target_semaphore(%105 : memref<!tpu.dma_semaphore, #tpu.memory_space<semaphore_mem>>)
    %c15_i32 = arith.constant 15 : i32
    %106 = arith.addi %0, %c15_i32 : i32
    %107 = arith.index_cast %106 : i32 to index
    %108 = memref.load %arg1[%107] : memref<128xi32, #tpu.memory_space<smem>>
    %c0_i32_60 = arith.constant 0 : i32
    %c0_i32_61 = arith.constant 0 : i32
    %109 = tpu.memref_slice %arg2[%108, %c0_i32_61] : memref<100x16xi32, #tpu.memory_space<any>> -> memref<1x16xi32, #tpu.memory_space<any>>
    %c15_i32_62 = arith.constant 15 : i32
    %c0_i32_63 = arith.constant 0 : i32
    %110 = tpu.memref_slice %arg3[%c15_i32_62, %c0_i32_63] : memref<128x16xi32, #tpu.memory_space<vmem>> -> memref<1x16xi32, #tpu.memory_space<vmem>>
    %111 = tpu.memref_slice %arg4[%c0_i32_60] : memref<1x!tpu.dma_semaphore, #tpu.memory_space<semaphore_mem>> -> memref<1x!tpu.dma_semaphore, #tpu.memory_space<semaphore_mem>>
    %112 = tpu.memref_squeeze %111 : memref<1x!tpu.dma_semaphore, #tpu.memory_space<semaphore_mem>> -> memref<!tpu.dma_semaphore, #tpu.memory_space<semaphore_mem>>
    tpu.enqueue_dma source(%109 : memref<1x16xi32, #tpu.memory_space<any>>) target(%110 : memref<1x16xi32, #tpu.memory_space<vmem>>) target_semaphore(%112 : memref<!tpu.dma_semaphore, #tpu.memory_space<semaphore_mem>>)
    %c16_i32 = arith.constant 16 : i32
    %113 = arith.addi %0, %c16_i32 : i32
    %114 = arith.index_cast %113 : i32 to index
    %115 = memref.load %arg1[%114] : memref<128xi32, #tpu.memory_space<smem>>
    %c0_i32_64 = arith.constant 0 : i32
    %c0_i32_65 = arith.constant 0 : i32
    %116 = tpu.memref_slice %arg2[%115, %c0_i32_65] : memref<100x16xi32, #tpu.memory_space<any>> -> memref<1x16xi32, #tpu.memory_space<any>>
    %c16_i32_66 = arith.constant 16 : i32
    %c0_i32_67 = arith.constant 0 : i32
    %117 = tpu.memref_slice %arg3[%c16_i32_66, %c0_i32_67] : memref<128x16xi32, #tpu.memory_space<vmem>> -> memref<1x16xi32, #tpu.memory_space<vmem>>
    %118 = tpu.memref_slice %arg4[%c0_i32_64] : memref<1x!tpu.dma_semaphore, #tpu.memory_space<semaphore_mem>> -> memref<1x!tpu.dma_semaphore, #tpu.memory_space<semaphore_mem>>
    %119 = tpu.memref_squeeze %118 : memref<1x!tpu.dma_semaphore, #tpu.memory_space<semaphore_mem>> -> memref<!tpu.dma_semaphore, #tpu.memory_space<semaphore_mem>>
    tpu.enqueue_dma source(%116 : memref<1x16xi32, #tpu.memory_space<any>>) target(%117 : memref<1x16xi32, #tpu.memory_space<vmem>>) target_semaphore(%119 : memref<!tpu.dma_semaphore, #tpu.memory_space<semaphore_mem>>)
    %c17_i32 = arith.constant 17 : i32
    %120 = arith.addi %0, %c17_i32 : i32
    %121 = arith.index_cast %120 : i32 to index
    %122 = memref.load %arg1[%121] : memref<128xi32, #tpu.memory_space<smem>>
    %c0_i32_68 = arith.constant 0 : i32
    %c0_i32_69 = arith.constant 0 : i32
    %123 = tpu.memref_slice %arg2[%122, %c0_i32_69] : memref<100x16xi32, #tpu.memory_space<any>> -> memref<1x16xi32, #tpu.memory_space<any>>
    %c17_i32_70 = arith.constant 17 : i32
    %c0_i32_71 = arith.constant 0 : i32
    %124 = tpu.memref_slice %arg3[%c17_i32_70, %c0_i32_71] : memref<128x16xi32, #tpu.memory_space<vmem>> -> memref<1x16xi32, #tpu.memory_space<vmem>>
    %125 = tpu.memref_slice %arg4[%c0_i32_68] : memref<1x!tpu.dma_semaphore, #tpu.memory_space<semaphore_mem>> -> memref<1x!tpu.dma_semaphore, #tpu.memory_space<semaphore_mem>>
    %126 = tpu.memref_squeeze %125 : memref<1x!tpu.dma_semaphore, #tpu.memory_space<semaphore_mem>> -> memref<!tpu.dma_semaphore, #tpu.memory_space<semaphore_mem>>
    tpu.enqueue_dma source(%123 : memref<1x16xi32, #tpu.memory_space<any>>) target(%124 : memref<1x16xi32, #tpu.memory_space<vmem>>) target_semaphore(%126 : memref<!tpu.dma_semaphore, #tpu.memory_space<semaphore_mem>>)
    %c18_i32 = arith.constant 18 : i32
    %127 = arith.addi %0, %c18_i32 : i32
    %128 = arith.index_cast %127 : i32 to index
    %129 = memref.load %arg1[%128] : memref<128xi32, #tpu.memory_space<smem>>
    %c0_i32_72 = arith.constant 0 : i32
    %c0_i32_73 = arith.constant 0 : i32
    %130 = tpu.memref_slice %arg2[%129, %c0_i32_73] : memref<100x16xi32, #tpu.memory_space<any>> -> memref<1x16xi32, #tpu.memory_space<any>>
    %c18_i32_74 = arith.constant 18 : i32
    %c0_i32_75 = arith.constant 0 : i32
    %131 = tpu.memref_slice %arg3[%c18_i32_74, %c0_i32_75] : memref<128x16xi32, #tpu.memory_space<vmem>> -> memref<1x16xi32, #tpu.memory_space<vmem>>
    %132 = tpu.memref_slice %arg4[%c0_i32_72] : memref<1x!tpu.dma_semaphore, #tpu.memory_space<semaphore_mem>> -> memref<1x!tpu.dma_semaphore, #tpu.memory_space<semaphore_mem>>
    %133 = tpu.memref_squeeze %132 : memref<1x!tpu.dma_semaphore, #tpu.memory_space<semaphore_mem>> -> memref<!tpu.dma_semaphore, #tpu.memory_space<semaphore_mem>>
    tpu.enqueue_dma source(%130 : memref<1x16xi32, #tpu.memory_space<any>>) target(%131 : memref<1x16xi32, #tpu.memory_space<vmem>>) target_semaphore(%133 : memref<!tpu.dma_semaphore, #tpu.memory_space<semaphore_mem>>)
    %c19_i32 = arith.constant 19 : i32
    %134 = arith.addi %0, %c19_i32 : i32
    %135 = arith.index_cast %134 : i32 to index
    %136 = memref.load %arg1[%135] : memref<128xi32, #tpu.memory_space<smem>>
    %c0_i32_76 = arith.constant 0 : i32
    %c0_i32_77 = arith.constant 0 : i32
    %137 = tpu.memref_slice %arg2[%136, %c0_i32_77] : memref<100x16xi32, #tpu.memory_space<any>> -> memref<1x16xi32, #tpu.memory_space<any>>
    %c19_i32_78 = arith.constant 19 : i32
    %c0_i32_79 = arith.constant 0 : i32
    %138 = tpu.memref_slice %arg3[%c19_i32_78, %c0_i32_79] : memref<128x16xi32, #tpu.memory_space<vmem>> -> memref<1x16xi32, #tpu.memory_space<vmem>>
    %139 = tpu.memref_slice %arg4[%c0_i32_76] : memref<1x!tpu.dma_semaphore, #tpu.memory_space<semaphore_mem>> -> memref<1x!tpu.dma_semaphore, #tpu.memory_space<semaphore_mem>>
    %140 = tpu.memref_squeeze %139 : memref<1x!tpu.dma_semaphore, #tpu.memory_space<semaphore_mem>> -> memref<!tpu.dma_semaphore, #tpu.memory_space<semaphore_mem>>
    tpu.enqueue_dma source(%137 : memref<1x16xi32, #tpu.memory_space<any>>) target(%138 : memref<1x16xi32, #tpu.memory_space<vmem>>) target_semaphore(%140 : memref<!tpu.dma_semaphore, #tpu.memory_space<semaphore_mem>>)
    %c20_i32 = arith.constant 20 : i32
    %141 = arith.addi %0, %c20_i32 : i32
    %142 = arith.index_cast %141 : i32 to index
    %143 = memref.load %arg1[%142] : memref<128xi32, #tpu.memory_space<smem>>
    %c0_i32_80 = arith.constant 0 : i32
    %c0_i32_81 = arith.constant 0 : i32
    %144 = tpu.memref_slice %arg2[%143, %c0_i32_81] : memref<100x16xi32, #tpu.memory_space<any>> -> memref<1x16xi32, #tpu.memory_space<any>>
    %c20_i32_82 = arith.constant 20 : i32
    %c0_i32_83 = arith.constant 0 : i32
    %145 = tpu.memref_slice %arg3[%c20_i32_82, %c0_i32_83] : memref<128x16xi32, #tpu.memory_space<vmem>> -> memref<1x16xi32, #tpu.memory_space<vmem>>
    %146 = tpu.memref_slice %arg4[%c0_i32_80] : memref<1x!tpu.dma_semaphore, #tpu.memory_space<semaphore_mem>> -> memref<1x!tpu.dma_semaphore, #tpu.memory_space<semaphore_mem>>
    %147 = tpu.memref_squeeze %146 : memref<1x!tpu.dma_semaphore, #tpu.memory_space<semaphore_mem>> -> memref<!tpu.dma_semaphore, #tpu.memory_space<semaphore_mem>>
    tpu.enqueue_dma source(%144 : memref<1x16xi32, #tpu.memory_space<any>>) target(%145 : memref<1x16xi32, #tpu.memory_space<vmem>>) target_semaphore(%147 : memref<!tpu.dma_semaphore, #tpu.memory_space<semaphore_mem>>)
    %c21_i32 = arith.constant 21 : i32
    %148 = arith.addi %0, %c21_i32 : i32
    %149 = arith.index_cast %148 : i32 to index
    %150 = memref.load %arg1[%149] : memref<128xi32, #tpu.memory_space<smem>>
    %c0_i32_84 = arith.constant 0 : i32
    %c0_i32_85 = arith.constant 0 : i32
    %151 = tpu.memref_slice %arg2[%150, %c0_i32_85] : memref<100x16xi32, #tpu.memory_space<any>> -> memref<1x16xi32, #tpu.memory_space<any>>
    %c21_i32_86 = arith.constant 21 : i32
    %c0_i32_87 = arith.constant 0 : i32
    %152 = tpu.memref_slice %arg3[%c21_i32_86, %c0_i32_87] : memref<128x16xi32, #tpu.memory_space<vmem>> -> memref<1x16xi32, #tpu.memory_space<vmem>>
    %153 = tpu.memref_slice %arg4[%c0_i32_84] : memref<1x!tpu.dma_semaphore, #tpu.memory_space<semaphore_mem>> -> memref<1x!tpu.dma_semaphore, #tpu.memory_space<semaphore_mem>>
    %154 = tpu.memref_squeeze %153 : memref<1x!tpu.dma_semaphore, #tpu.memory_space<semaphore_mem>> -> memref<!tpu.dma_semaphore, #tpu.memory_space<semaphore_mem>>
    tpu.enqueue_dma source(%151 : memref<1x16xi32, #tpu.memory_space<any>>) target(%152 : memref<1x16xi32, #tpu.memory_space<vmem>>) target_semaphore(%154 : memref<!tpu.dma_semaphore, #tpu.memory_space<semaphore_mem>>)
    %c22_i32 = arith.constant 22 : i32
    %155 = arith.addi %0, %c22_i32 : i32
    %156 = arith.index_cast %155 : i32 to index
    %157 = memref.load %arg1[%156] : memref<128xi32, #tpu.memory_space<smem>>
    %c0_i32_88 = arith.constant 0 : i32
    %c0_i32_89 = arith.constant 0 : i32
    %158 = tpu.memref_slice %arg2[%157, %c0_i32_89] : memref<100x16xi32, #tpu.memory_space<any>> -> memref<1x16xi32, #tpu.memory_space<any>>
    %c22_i32_90 = arith.constant 22 : i32
    %c0_i32_91 = arith.constant 0 : i32
    %159 = tpu.memref_slice %arg3[%c22_i32_90, %c0_i32_91] : memref<128x16xi32, #tpu.memory_space<vmem>> -> memref<1x16xi32, #tpu.memory_space<vmem>>
    %160 = tpu.memref_slice %arg4[%c0_i32_88] : memref<1x!tpu.dma_semaphore, #tpu.memory_space<semaphore_mem>> -> memref<1x!tpu.dma_semaphore, #tpu.memory_space<semaphore_mem>>
    %161 = tpu.memref_squeeze %160 : memref<1x!tpu.dma_semaphore, #tpu.memory_space<semaphore_mem>> -> memref<!tpu.dma_semaphore, #tpu.memory_space<semaphore_mem>>
    tpu.enqueue_dma source(%158 : memref<1x16xi32, #tpu.memory_space<any>>) target(%159 : memref<1x16xi32, #tpu.memory_space<vmem>>) target_semaphore(%161 : memref<!tpu.dma_semaphore, #tpu.memory_space<semaphore_mem>>)
    %c23_i32 = arith.constant 23 : i32
    %162 = arith.addi %0, %c23_i32 : i32
    %163 = arith.index_cast %162 : i32 to index
    %164 = memref.load %arg1[%163] : memref<128xi32, #tpu.memory_space<smem>>
    %c0_i32_92 = arith.constant 0 : i32
    %c0_i32_93 = arith.constant 0 : i32
    %165 = tpu.memref_slice %arg2[%164, %c0_i32_93] : memref<100x16xi32, #tpu.memory_space<any>> -> memref<1x16xi32, #tpu.memory_space<any>>
    %c23_i32_94 = arith.constant 23 : i32
    %c0_i32_95 = arith.constant 0 : i32
    %166 = tpu.memref_slice %arg3[%c23_i32_94, %c0_i32_95] : memref<128x16xi32, #tpu.memory_space<vmem>> -> memref<1x16xi32, #tpu.memory_space<vmem>>
    %167 = tpu.memref_slice %arg4[%c0_i32_92] : memref<1x!tpu.dma_semaphore, #tpu.memory_space<semaphore_mem>> -> memref<1x!tpu.dma_semaphore, #tpu.memory_space<semaphore_mem>>
    %168 = tpu.memref_squeeze %167 : memref<1x!tpu.dma_semaphore, #tpu.memory_space<semaphore_mem>> -> memref<!tpu.dma_semaphore, #tpu.memory_space<semaphore_mem>>
    tpu.enqueue_dma source(%165 : memref<1x16xi32, #tpu.memory_space<any>>) target(%166 : memref<1x16xi32, #tpu.memory_space<vmem>>) target_semaphore(%168 : memref<!tpu.dma_semaphore, #tpu.memory_space<semaphore_mem>>)
    %c24_i32 = arith.constant 24 : i32
    %169 = arith.addi %0, %c24_i32 : i32
    %170 = arith.index_cast %169 : i32 to index
    %171 = memref.load %arg1[%170] : memref<128xi32, #tpu.memory_space<smem>>
    %c0_i32_96 = arith.constant 0 : i32
    %c0_i32_97 = arith.constant 0 : i32
    %172 = tpu.memref_slice %arg2[%171, %c0_i32_97] : memref<100x16xi32, #tpu.memory_space<any>> -> memref<1x16xi32, #tpu.memory_space<any>>
    %c24_i32_98 = arith.constant 24 : i32
    %c0_i32_99 = arith.constant 0 : i32
    %173 = tpu.memref_slice %arg3[%c24_i32_98, %c0_i32_99] : memref<128x16xi32, #tpu.memory_space<vmem>> -> memref<1x16xi32, #tpu.memory_space<vmem>>
    %174 = tpu.memref_slice %arg4[%c0_i32_96] : memref<1x!tpu.dma_semaphore, #tpu.memory_space<semaphore_mem>> -> memref<1x!tpu.dma_semaphore, #tpu.memory_space<semaphore_mem>>
    %175 = tpu.memref_squeeze %174 : memref<1x!tpu.dma_semaphore, #tpu.memory_space<semaphore_mem>> -> memref<!tpu.dma_semaphore, #tpu.memory_space<semaphore_mem>>
    tpu.enqueue_dma source(%172 : memref<1x16xi32, #tpu.memory_space<any>>) target(%173 : memref<1x16xi32, #tpu.memory_space<vmem>>) target_semaphore(%175 : memref<!tpu.dma_semaphore, #tpu.memory_space<semaphore_mem>>)
    %c25_i32 = arith.constant 25 : i32
    %176 = arith.addi %0, %c25_i32 : i32
    %177 = arith.index_cast %176 : i32 to index
    %178 = memref.load %arg1[%177] : memref<128xi32, #tpu.memory_space<smem>>
    %c0_i32_100 = arith.constant 0 : i32
    %c0_i32_101 = arith.constant 0 : i32
    %179 = tpu.memref_slice %arg2[%178, %c0_i32_101] : memref<100x16xi32, #tpu.memory_space<any>> -> memref<1x16xi32, #tpu.memory_space<any>>
    %c25_i32_102 = arith.constant 25 : i32
    %c0_i32_103 = arith.constant 0 : i32
    %180 = tpu.memref_slice %arg3[%c25_i32_102, %c0_i32_103] : memref<128x16xi32, #tpu.memory_space<vmem>> -> memref<1x16xi32, #tpu.memory_space<vmem>>
    %181 = tpu.memref_slice %arg4[%c0_i32_100] : memref<1x!tpu.dma_semaphore, #tpu.memory_space<semaphore_mem>> -> memref<1x!tpu.dma_semaphore, #tpu.memory_space<semaphore_mem>>
    %182 = tpu.memref_squeeze %181 : memref<1x!tpu.dma_semaphore, #tpu.memory_space<semaphore_mem>> -> memref<!tpu.dma_semaphore, #tpu.memory_space<semaphore_mem>>
    tpu.enqueue_dma source(%179 : memref<1x16xi32, #tpu.memory_space<any>>) target(%180 : memref<1x16xi32, #tpu.memory_space<vmem>>) target_semaphore(%182 : memref<!tpu.dma_semaphore, #tpu.memory_space<semaphore_mem>>)
    %c26_i32 = arith.constant 26 : i32
    %183 = arith.addi %0, %c26_i32 : i32
    %184 = arith.index_cast %183 : i32 to index
    %185 = memref.load %arg1[%184] : memref<128xi32, #tpu.memory_space<smem>>
    %c0_i32_104 = arith.constant 0 : i32
    %c0_i32_105 = arith.constant 0 : i32
    %186 = tpu.memref_slice %arg2[%185, %c0_i32_105] : memref<100x16xi32, #tpu.memory_space<any>> -> memref<1x16xi32, #tpu.memory_space<any>>
    %c26_i32_106 = arith.constant 26 : i32
    %c0_i32_107 = arith.constant 0 : i32
    %187 = tpu.memref_slice %arg3[%c26_i32_106, %c0_i32_107] : memref<128x16xi32, #tpu.memory_space<vmem>> -> memref<1x16xi32, #tpu.memory_space<vmem>>
    %188 = tpu.memref_slice %arg4[%c0_i32_104] : memref<1x!tpu.dma_semaphore, #tpu.memory_space<semaphore_mem>> -> memref<1x!tpu.dma_semaphore, #tpu.memory_space<semaphore_mem>>
    %189 = tpu.memref_squeeze %188 : memref<1x!tpu.dma_semaphore, #tpu.memory_space<semaphore_mem>> -> memref<!tpu.dma_semaphore, #tpu.memory_space<semaphore_mem>>
    tpu.enqueue_dma source(%186 : memref<1x16xi32, #tpu.memory_space<any>>) target(%187 : memref<1x16xi32, #tpu.memory_space<vmem>>) target_semaphore(%189 : memref<!tpu.dma_semaphore, #tpu.memory_space<semaphore_mem>>)
    %c27_i32 = arith.constant 27 : i32
    %190 = arith.addi %0, %c27_i32 : i32
    %191 = arith.index_cast %190 : i32 to index
    %192 = memref.load %arg1[%191] : memref<128xi32, #tpu.memory_space<smem>>
    %c0_i32_108 = arith.constant 0 : i32
    %c0_i32_109 = arith.constant 0 : i32
    %193 = tpu.memref_slice %arg2[%192, %c0_i32_109] : memref<100x16xi32, #tpu.memory_space<any>> -> memref<1x16xi32, #tpu.memory_space<any>>
    %c27_i32_110 = arith.constant 27 : i32
    %c0_i32_111 = arith.constant 0 : i32
    %194 = tpu.memref_slice %arg3[%c27_i32_110, %c0_i32_111] : memref<128x16xi32, #tpu.memory_space<vmem>> -> memref<1x16xi32, #tpu.memory_space<vmem>>
    %195 = tpu.memref_slice %arg4[%c0_i32_108] : memref<1x!tpu.dma_semaphore, #tpu.memory_space<semaphore_mem>> -> memref<1x!tpu.dma_semaphore, #tpu.memory_space<semaphore_mem>>
    %196 = tpu.memref_squeeze %195 : memref<1x!tpu.dma_semaphore, #tpu.memory_space<semaphore_mem>> -> memref<!tpu.dma_semaphore, #tpu.memory_space<semaphore_mem>>
    tpu.enqueue_dma source(%193 : memref<1x16xi32, #tpu.memory_space<any>>) target(%194 : memref<1x16xi32, #tpu.memory_space<vmem>>) target_semaphore(%196 : memref<!tpu.dma_semaphore, #tpu.memory_space<semaphore_mem>>)
    %c28_i32 = arith.constant 28 : i32
    %197 = arith.addi %0, %c28_i32 : i32
    %198 = arith.index_cast %197 : i32 to index
    %199 = memref.load %arg1[%198] : memref<128xi32, #tpu.memory_space<smem>>
    %c0_i32_112 = arith.constant 0 : i32
    %c0_i32_113 = arith.constant 0 : i32
    %200 = tpu.memref_slice %arg2[%199, %c0_i32_113] : memref<100x16xi32, #tpu.memory_space<any>> -> memref<1x16xi32, #tpu.memory_space<any>>
    %c28_i32_114 = arith.constant 28 : i32
    %c0_i32_115 = arith.constant 0 : i32
    %201 = tpu.memref_slice %arg3[%c28_i32_114, %c0_i32_115] : memref<128x16xi32, #tpu.memory_space<vmem>> -> memref<1x16xi32, #tpu.memory_space<vmem>>
    %202 = tpu.memref_slice %arg4[%c0_i32_112] : memref<1x!tpu.dma_semaphore, #tpu.memory_space<semaphore_mem>> -> memref<1x!tpu.dma_semaphore, #tpu.memory_space<semaphore_mem>>
    %203 = tpu.memref_squeeze %202 : memref<1x!tpu.dma_semaphore, #tpu.memory_space<semaphore_mem>> -> memref<!tpu.dma_semaphore, #tpu.memory_space<semaphore_mem>>
    tpu.enqueue_dma source(%200 : memref<1x16xi32, #tpu.memory_space<any>>) target(%201 : memref<1x16xi32, #tpu.memory_space<vmem>>) target_semaphore(%203 : memref<!tpu.dma_semaphore, #tpu.memory_space<semaphore_mem>>)
    %c29_i32 = arith.constant 29 : i32
    %204 = arith.addi %0, %c29_i32 : i32
    %205 = arith.index_cast %204 : i32 to index
    %206 = memref.load %arg1[%205] : memref<128xi32, #tpu.memory_space<smem>>
    %c0_i32_116 = arith.constant 0 : i32
    %c0_i32_117 = arith.constant 0 : i32
    %207 = tpu.memref_slice %arg2[%206, %c0_i32_117] : memref<100x16xi32, #tpu.memory_space<any>> -> memref<1x16xi32, #tpu.memory_space<any>>
    %c29_i32_118 = arith.constant 29 : i32
    %c0_i32_119 = arith.constant 0 : i32
    %208 = tpu.memref_slice %arg3[%c29_i32_118, %c0_i32_119] : memref<128x16xi32, #tpu.memory_space<vmem>> -> memref<1x16xi32, #tpu.memory_space<vmem>>
    %209 = tpu.memref_slice %arg4[%c0_i32_116] : memref<1x!tpu.dma_semaphore, #tpu.memory_space<semaphore_mem>> -> memref<1x!tpu.dma_semaphore, #tpu.memory_space<semaphore_mem>>
    %210 = tpu.memref_squeeze %209 : memref<1x!tpu.dma_semaphore, #tpu.memory_space<semaphore_mem>> -> memref<!tpu.dma_semaphore, #tpu.memory_space<semaphore_mem>>
    tpu.enqueue_dma source(%207 : memref<1x16xi32, #tpu.memory_space<any>>) target(%208 : memref<1x16xi32, #tpu.memory_space<vmem>>) target_semaphore(%210 : memref<!tpu.dma_semaphore, #tpu.memory_space<semaphore_mem>>)
    %c30_i32 = arith.constant 30 : i32
    %211 = arith.addi %0, %c30_i32 : i32
    %212 = arith.index_cast %211 : i32 to index
    %213 = memref.load %arg1[%212] : memref<128xi32, #tpu.memory_space<smem>>
    %c0_i32_120 = arith.constant 0 : i32
    %c0_i32_121 = arith.constant 0 : i32
    %214 = tpu.memref_slice %arg2[%213, %c0_i32_121] : memref<100x16xi32, #tpu.memory_space<any>> -> memref<1x16xi32, #tpu.memory_space<any>>
    %c30_i32_122 = arith.constant 30 : i32
    %c0_i32_123 = arith.constant 0 : i32
    %215 = tpu.memref_slice %arg3[%c30_i32_122, %c0_i32_123] : memref<128x16xi32, #tpu.memory_space<vmem>> -> memref<1x16xi32, #tpu.memory_space<vmem>>
    %216 = tpu.memref_slice %arg4[%c0_i32_120] : memref<1x!tpu.dma_semaphore, #tpu.memory_space<semaphore_mem>> -> memref<1x!tpu.dma_semaphore, #tpu.memory_space<semaphore_mem>>
    %217 = tpu.memref_squeeze %216 : memref<1x!tpu.dma_semaphore, #tpu.memory_space<semaphore_mem>> -> memref<!tpu.dma_semaphore, #tpu.memory_space<semaphore_mem>>
    tpu.enqueue_dma source(%214 : memref<1x16xi32, #tpu.memory_space<any>>) target(%215 : memref<1x16xi32, #tpu.memory_space<vmem>>) target_semaphore(%217 : memref<!tpu.dma_semaphore, #tpu.memory_space<semaphore_mem>>)
    %c31_i32 = arith.constant 31 : i32
    %218 = arith.addi %0, %c31_i32 : i32
    %219 = arith.index_cast %218 : i32 to index
    %220 = memref.load %arg1[%219] : memref<128xi32, #tpu.memory_space<smem>>
    %c0_i32_124 = arith.constant 0 : i32
    %c0_i32_125 = arith.constant 0 : i32
    %221 = tpu.memref_slice %arg2[%220, %c0_i32_125] : memref<100x16xi32, #tpu.memory_space<any>> -> memref<1x16xi32, #tpu.memory_space<any>>
    %c31_i32_126 = arith.constant 31 : i32
    %c0_i32_127 = arith.constant 0 : i32
    %222 = tpu.memref_slice %arg3[%c31_i32_126, %c0_i32_127] : memref<128x16xi32, #tpu.memory_space<vmem>> -> memref<1x16xi32, #tpu.memory_space<vmem>>
    %223 = tpu.memref_slice %arg4[%c0_i32_124] : memref<1x!tpu.dma_semaphore, #tpu.memory_space<semaphore_mem>> -> memref<1x!tpu.dma_semaphore, #tpu.memory_space<semaphore_mem>>
    %224 = tpu.memref_squeeze %223 : memref<1x!tpu.dma_semaphore, #tpu.memory_space<semaphore_mem>> -> memref<!tpu.dma_semaphore, #tpu.memory_space<semaphore_mem>>
    tpu.enqueue_dma source(%221 : memref<1x16xi32, #tpu.memory_space<any>>) target(%222 : memref<1x16xi32, #tpu.memory_space<vmem>>) target_semaphore(%224 : memref<!tpu.dma_semaphore, #tpu.memory_space<semaphore_mem>>)
    %c32_i32 = arith.constant 32 : i32
    %225 = arith.addi %0, %c32_i32 : i32
    %226 = arith.index_cast %225 : i32 to index
    %227 = memref.load %arg1[%226] : memref<128xi32, #tpu.memory_space<smem>>
    %c0_i32_128 = arith.constant 0 : i32
    %c0_i32_129 = arith.constant 0 : i32
    %228 = tpu.memref_slice %arg2[%227, %c0_i32_129] : memref<100x16xi32, #tpu.memory_space<any>> -> memref<1x16xi32, #tpu.memory_space<any>>
    %c32_i32_130 = arith.constant 32 : i32
    %c0_i32_131 = arith.constant 0 : i32
    %229 = tpu.memref_slice %arg3[%c32_i32_130, %c0_i32_131] : memref<128x16xi32, #tpu.memory_space<vmem>> -> memref<1x16xi32, #tpu.memory_space<vmem>>
    %230 = tpu.memref_slice %arg4[%c0_i32_128] : memref<1x!tpu.dma_semaphore, #tpu.memory_space<semaphore_mem>> -> memref<1x!tpu.dma_semaphore, #tpu.memory_space<semaphore_mem>>
    %231 = tpu.memref_squeeze %230 : memref<1x!tpu.dma_semaphore, #tpu.memory_space<semaphore_mem>> -> memref<!tpu.dma_semaphore, #tpu.memory_space<semaphore_mem>>
    tpu.enqueue_dma source(%228 : memref<1x16xi32, #tpu.memory_space<any>>) target(%229 : memref<1x16xi32, #tpu.memory_space<vmem>>) target_semaphore(%231 : memref<!tpu.dma_semaphore, #tpu.memory_space<semaphore_mem>>)
    %c33_i32 = arith.constant 33 : i32
    %232 = arith.addi %0, %c33_i32 : i32
    %233 = arith.index_cast %232 : i32 to index
    %234 = memref.load %arg1[%233] : memref<128xi32, #tpu.memory_space<smem>>
    %c0_i32_132 = arith.constant 0 : i32
    %c0_i32_133 = arith.constant 0 : i32
    %235 = tpu.memref_slice %arg2[%234, %c0_i32_133] : memref<100x16xi32, #tpu.memory_space<any>> -> memref<1x16xi32, #tpu.memory_space<any>>
    %c33_i32_134 = arith.constant 33 : i32
    %c0_i32_135 = arith.constant 0 : i32
    %236 = tpu.memref_slice %arg3[%c33_i32_134, %c0_i32_135] : memref<128x16xi32, #tpu.memory_space<vmem>> -> memref<1x16xi32, #tpu.memory_space<vmem>>
    %237 = tpu.memref_slice %arg4[%c0_i32_132] : memref<1x!tpu.dma_semaphore, #tpu.memory_space<semaphore_mem>> -> memref<1x!tpu.dma_semaphore, #tpu.memory_space<semaphore_mem>>
    %238 = tpu.memref_squeeze %237 : memref<1x!tpu.dma_semaphore, #tpu.memory_space<semaphore_mem>> -> memref<!tpu.dma_semaphore, #tpu.memory_space<semaphore_mem>>
    tpu.enqueue_dma source(%235 : memref<1x16xi32, #tpu.memory_space<any>>) target(%236 : memref<1x16xi32, #tpu.memory_space<vmem>>) target_semaphore(%238 : memref<!tpu.dma_semaphore, #tpu.memory_space<semaphore_mem>>)
    %c34_i32 = arith.constant 34 : i32
    %239 = arith.addi %0, %c34_i32 : i32
    %240 = arith.index_cast %239 : i32 to index
    %241 = memref.load %arg1[%240] : memref<128xi32, #tpu.memory_space<smem>>
    %c0_i32_136 = arith.constant 0 : i32
    %c0_i32_137 = arith.constant 0 : i32
    %242 = tpu.memref_slice %arg2[%241, %c0_i32_137] : memref<100x16xi32, #tpu.memory_space<any>> -> memref<1x16xi32, #tpu.memory_space<any>>
    %c34_i32_138 = arith.constant 34 : i32
    %c0_i32_139 = arith.constant 0 : i32
    %243 = tpu.memref_slice %arg3[%c34_i32_138, %c0_i32_139] : memref<128x16xi32, #tpu.memory_space<vmem>> -> memref<1x16xi32, #tpu.memory_space<vmem>>
    %244 = tpu.memref_slice %arg4[%c0_i32_136] : memref<1x!tpu.dma_semaphore, #tpu.memory_space<semaphore_mem>> -> memref<1x!tpu.dma_semaphore, #tpu.memory_space<semaphore_mem>>
    %245 = tpu.memref_squeeze %244 : memref<1x!tpu.dma_semaphore, #tpu.memory_space<semaphore_mem>> -> memref<!tpu.dma_semaphore, #tpu.memory_space<semaphore_mem>>
    tpu.enqueue_dma source(%242 : memref<1x16xi32, #tpu.memory_space<any>>) target(%243 : memref<1x16xi32, #tpu.memory_space<vmem>>) target_semaphore(%245 : memref<!tpu.dma_semaphore, #tpu.memory_space<semaphore_mem>>)
    %c35_i32 = arith.constant 35 : i32
    %246 = arith.addi %0, %c35_i32 : i32
    %247 = arith.index_cast %246 : i32 to index
    %248 = memref.load %arg1[%247] : memref<128xi32, #tpu.memory_space<smem>>
    %c0_i32_140 = arith.constant 0 : i32
    %c0_i32_141 = arith.constant 0 : i32
    %249 = tpu.memref_slice %arg2[%248, %c0_i32_141] : memref<100x16xi32, #tpu.memory_space<any>> -> memref<1x16xi32, #tpu.memory_space<any>>
    %c35_i32_142 = arith.constant 35 : i32
    %c0_i32_143 = arith.constant 0 : i32
    %250 = tpu.memref_slice %arg3[%c35_i32_142, %c0_i32_143] : memref<128x16xi32, #tpu.memory_space<vmem>> -> memref<1x16xi32, #tpu.memory_space<vmem>>
    %251 = tpu.memref_slice %arg4[%c0_i32_140] : memref<1x!tpu.dma_semaphore, #tpu.memory_space<semaphore_mem>> -> memref<1x!tpu.dma_semaphore, #tpu.memory_space<semaphore_mem>>
    %252 = tpu.memref_squeeze %251 : memref<1x!tpu.dma_semaphore, #tpu.memory_space<semaphore_mem>> -> memref<!tpu.dma_semaphore, #tpu.memory_space<semaphore_mem>>
    tpu.enqueue_dma source(%249 : memref<1x16xi32, #tpu.memory_space<any>>) target(%250 : memref<1x16xi32, #tpu.memory_space<vmem>>) target_semaphore(%252 : memref<!tpu.dma_semaphore, #tpu.memory_space<semaphore_mem>>)
    %c36_i32 = arith.constant 36 : i32
    %253 = arith.addi %0, %c36_i32 : i32
    %254 = arith.index_cast %253 : i32 to index
    %255 = memref.load %arg1[%254] : memref<128xi32, #tpu.memory_space<smem>>
    %c0_i32_144 = arith.constant 0 : i32
    %c0_i32_145 = arith.constant 0 : i32
    %256 = tpu.memref_slice %arg2[%255, %c0_i32_145] : memref<100x16xi32, #tpu.memory_space<any>> -> memref<1x16xi32, #tpu.memory_space<any>>
    %c36_i32_146 = arith.constant 36 : i32
    %c0_i32_147 = arith.constant 0 : i32
    %257 = tpu.memref_slice %arg3[%c36_i32_146, %c0_i32_147] : memref<128x16xi32, #tpu.memory_space<vmem>> -> memref<1x16xi32, #tpu.memory_space<vmem>>
    %258 = tpu.memref_slice %arg4[%c0_i32_144] : memref<1x!tpu.dma_semaphore, #tpu.memory_space<semaphore_mem>> -> memref<1x!tpu.dma_semaphore, #tpu.memory_space<semaphore_mem>>
    %259 = tpu.memref_squeeze %258 : memref<1x!tpu.dma_semaphore, #tpu.memory_space<semaphore_mem>> -> memref<!tpu.dma_semaphore, #tpu.memory_space<semaphore_mem>>
    tpu.enqueue_dma source(%256 : memref<1x16xi32, #tpu.memory_space<any>>) target(%257 : memref<1x16xi32, #tpu.memory_space<vmem>>) target_semaphore(%259 : memref<!tpu.dma_semaphore, #tpu.memory_space<semaphore_mem>>)
    %c37_i32 = arith.constant 37 : i32
    %260 = arith.addi %0, %c37_i32 : i32
    %261 = arith.index_cast %260 : i32 to index
    %262 = memref.load %arg1[%261] : memref<128xi32, #tpu.memory_space<smem>>
    %c0_i32_148 = arith.constant 0 : i32
    %c0_i32_149 = arith.constant 0 : i32
    %263 = tpu.memref_slice %arg2[%262, %c0_i32_149] : memref<100x16xi32, #tpu.memory_space<any>> -> memref<1x16xi32, #tpu.memory_space<any>>
    %c37_i32_150 = arith.constant 37 : i32
    %c0_i32_151 = arith.constant 0 : i32
    %264 = tpu.memref_slice %arg3[%c37_i32_150, %c0_i32_151] : memref<128x16xi32, #tpu.memory_space<vmem>> -> memref<1x16xi32, #tpu.memory_space<vmem>>
    %265 = tpu.memref_slice %arg4[%c0_i32_148] : memref<1x!tpu.dma_semaphore, #tpu.memory_space<semaphore_mem>> -> memref<1x!tpu.dma_semaphore, #tpu.memory_space<semaphore_mem>>
    %266 = tpu.memref_squeeze %265 : memref<1x!tpu.dma_semaphore, #tpu.memory_space<semaphore_mem>> -> memref<!tpu.dma_semaphore, #tpu.memory_space<semaphore_mem>>
    tpu.enqueue_dma source(%263 : memref<1x16xi32, #tpu.memory_space<any>>) target(%264 : memref<1x16xi32, #tpu.memory_space<vmem>>) target_semaphore(%266 : memref<!tpu.dma_semaphore, #tpu.memory_space<semaphore_mem>>)
    %c38_i32 = arith.constant 38 : i32
    %267 = arith.addi %0, %c38_i32 : i32
    %268 = arith.index_cast %267 : i32 to index
    %269 = memref.load %arg1[%268] : memref<128xi32, #tpu.memory_space<smem>>
    %c0_i32_152 = arith.constant 0 : i32
    %c0_i32_153 = arith.constant 0 : i32
    %270 = tpu.memref_slice %arg2[%269, %c0_i32_153] : memref<100x16xi32, #tpu.memory_space<any>> -> memref<1x16xi32, #tpu.memory_space<any>>
    %c38_i32_154 = arith.constant 38 : i32
    %c0_i32_155 = arith.constant 0 : i32
    %271 = tpu.memref_slice %arg3[%c38_i32_154, %c0_i32_155] : memref<128x16xi32, #tpu.memory_space<vmem>> -> memref<1x16xi32, #tpu.memory_space<vmem>>
    %272 = tpu.memref_slice %arg4[%c0_i32_152] : memref<1x!tpu.dma_semaphore, #tpu.memory_space<semaphore_mem>> -> memref<1x!tpu.dma_semaphore, #tpu.memory_space<semaphore_mem>>
    %273 = tpu.memref_squeeze %272 : memref<1x!tpu.dma_semaphore, #tpu.memory_space<semaphore_mem>> -> memref<!tpu.dma_semaphore, #tpu.memory_space<semaphore_mem>>
    tpu.enqueue_dma source(%270 : memref<1x16xi32, #tpu.memory_space<any>>) target(%271 : memref<1x16xi32, #tpu.memory_space<vmem>>) target_semaphore(%273 : memref<!tpu.dma_semaphore, #tpu.memory_space<semaphore_mem>>)
    %c39_i32 = arith.constant 39 : i32
    %274 = arith.addi %0, %c39_i32 : i32
    %275 = arith.index_cast %274 : i32 to index
    %276 = memref.load %arg1[%275] : memref<128xi32, #tpu.memory_space<smem>>
    %c0_i32_156 = arith.constant 0 : i32
    %c0_i32_157 = arith.constant 0 : i32
    %277 = tpu.memref_slice %arg2[%276, %c0_i32_157] : memref<100x16xi32, #tpu.memory_space<any>> -> memref<1x16xi32, #tpu.memory_space<any>>
    %c39_i32_158 = arith.constant 39 : i32
    %c0_i32_159 = arith.constant 0 : i32
    %278 = tpu.memref_slice %arg3[%c39_i32_158, %c0_i32_159] : memref<128x16xi32, #tpu.memory_space<vmem>> -> memref<1x16xi32, #tpu.memory_space<vmem>>
    %279 = tpu.memref_slice %arg4[%c0_i32_156] : memref<1x!tpu.dma_semaphore, #tpu.memory_space<semaphore_mem>> -> memref<1x!tpu.dma_semaphore, #tpu.memory_space<semaphore_mem>>
    %280 = tpu.memref_squeeze %279 : memref<1x!tpu.dma_semaphore, #tpu.memory_space<semaphore_mem>> -> memref<!tpu.dma_semaphore, #tpu.memory_space<semaphore_mem>>
    tpu.enqueue_dma source(%277 : memref<1x16xi32, #tpu.memory_space<any>>) target(%278 : memref<1x16xi32, #tpu.memory_space<vmem>>) target_semaphore(%280 : memref<!tpu.dma_semaphore, #tpu.memory_space<semaphore_mem>>)
    %c40_i32 = arith.constant 40 : i32
    %281 = arith.addi %0, %c40_i32 : i32
    %282 = arith.index_cast %281 : i32 to index
    %283 = memref.load %arg1[%282] : memref<128xi32, #tpu.memory_space<smem>>
    %c0_i32_160 = arith.constant 0 : i32
    %c0_i32_161 = arith.constant 0 : i32
    %284 = tpu.memref_slice %arg2[%283, %c0_i32_161] : memref<100x16xi32, #tpu.memory_space<any>> -> memref<1x16xi32, #tpu.memory_space<any>>
    %c40_i32_162 = arith.constant 40 : i32
    %c0_i32_163 = arith.constant 0 : i32
    %285 = tpu.memref_slice %arg3[%c40_i32_162, %c0_i32_163] : memref<128x16xi32, #tpu.memory_space<vmem>> -> memref<1x16xi32, #tpu.memory_space<vmem>>
    %286 = tpu.memref_slice %arg4[%c0_i32_160] : memref<1x!tpu.dma_semaphore, #tpu.memory_space<semaphore_mem>> -> memref<1x!tpu.dma_semaphore, #tpu.memory_space<semaphore_mem>>
    %287 = tpu.memref_squeeze %286 : memref<1x!tpu.dma_semaphore, #tpu.memory_space<semaphore_mem>> -> memref<!tpu.dma_semaphore, #tpu.memory_space<semaphore_mem>>
    tpu.enqueue_dma source(%284 : memref<1x16xi32, #tpu.memory_space<any>>) target(%285 : memref<1x16xi32, #tpu.memory_space<vmem>>) target_semaphore(%287 : memref<!tpu.dma_semaphore, #tpu.memory_space<semaphore_mem>>)
    %c41_i32 = arith.constant 41 : i32
    %288 = arith.addi %0, %c41_i32 : i32
    %289 = arith.index_cast %288 : i32 to index
    %290 = memref.load %arg1[%289] : memref<128xi32, #tpu.memory_space<smem>>
    %c0_i32_164 = arith.constant 0 : i32
    %c0_i32_165 = arith.constant 0 : i32
    %291 = tpu.memref_slice %arg2[%290, %c0_i32_165] : memref<100x16xi32, #tpu.memory_space<any>> -> memref<1x16xi32, #tpu.memory_space<any>>
    %c41_i32_166 = arith.constant 41 : i32
    %c0_i32_167 = arith.constant 0 : i32
    %292 = tpu.memref_slice %arg3[%c41_i32_166, %c0_i32_167] : memref<128x16xi32, #tpu.memory_space<vmem>> -> memref<1x16xi32, #tpu.memory_space<vmem>>
    %293 = tpu.memref_slice %arg4[%c0_i32_164] : memref<1x!tpu.dma_semaphore, #tpu.memory_space<semaphore_mem>> -> memref<1x!tpu.dma_semaphore, #tpu.memory_space<semaphore_mem>>
    %294 = tpu.memref_squeeze %293 : memref<1x!tpu.dma_semaphore, #tpu.memory_space<semaphore_mem>> -> memref<!tpu.dma_semaphore, #tpu.memory_space<semaphore_mem>>
    tpu.enqueue_dma source(%291 : memref<1x16xi32, #tpu.memory_space<any>>) target(%292 : memref<1x16xi32, #tpu.memory_space<vmem>>) target_semaphore(%294 : memref<!tpu.dma_semaphore, #tpu.memory_space<semaphore_mem>>)
    %c42_i32 = arith.constant 42 : i32
    %295 = arith.addi %0, %c42_i32 : i32
    %296 = arith.index_cast %295 : i32 to index
    %297 = memref.load %arg1[%296] : memref<128xi32, #tpu.memory_space<smem>>
    %c0_i32_168 = arith.constant 0 : i32
    %c0_i32_169 = arith.constant 0 : i32
    %298 = tpu.memref_slice %arg2[%297, %c0_i32_169] : memref<100x16xi32, #tpu.memory_space<any>> -> memref<1x16xi32, #tpu.memory_space<any>>
    %c42_i32_170 = arith.constant 42 : i32
    %c0_i32_171 = arith.constant 0 : i32
    %299 = tpu.memref_slice %arg3[%c42_i32_170, %c0_i32_171] : memref<128x16xi32, #tpu.memory_space<vmem>> -> memref<1x16xi32, #tpu.memory_space<vmem>>
    %300 = tpu.memref_slice %arg4[%c0_i32_168] : memref<1x!tpu.dma_semaphore, #tpu.memory_space<semaphore_mem>> -> memref<1x!tpu.dma_semaphore, #tpu.memory_space<semaphore_mem>>
    %301 = tpu.memref_squeeze %300 : memref<1x!tpu.dma_semaphore, #tpu.memory_space<semaphore_mem>> -> memref<!tpu.dma_semaphore, #tpu.memory_space<semaphore_mem>>
    tpu.enqueue_dma source(%298 : memref<1x16xi32, #tpu.memory_space<any>>) target(%299 : memref<1x16xi32, #tpu.memory_space<vmem>>) target_semaphore(%301 : memref<!tpu.dma_semaphore, #tpu.memory_space<semaphore_mem>>)
    %c43_i32 = arith.constant 43 : i32
    %302 = arith.addi %0, %c43_i32 : i32
    %303 = arith.index_cast %302 : i32 to index
    %304 = memref.load %arg1[%303] : memref<128xi32, #tpu.memory_space<smem>>
    %c0_i32_172 = arith.constant 0 : i32
    %c0_i32_173 = arith.constant 0 : i32
    %305 = tpu.memref_slice %arg2[%304, %c0_i32_173] : memref<100x16xi32, #tpu.memory_space<any>> -> memref<1x16xi32, #tpu.memory_space<any>>
    %c43_i32_174 = arith.constant 43 : i32
    %c0_i32_175 = arith.constant 0 : i32
    %306 = tpu.memref_slice %arg3[%c43_i32_174, %c0_i32_175] : memref<128x16xi32, #tpu.memory_space<vmem>> -> memref<1x16xi32, #tpu.memory_space<vmem>>
    %307 = tpu.memref_slice %arg4[%c0_i32_172] : memref<1x!tpu.dma_semaphore, #tpu.memory_space<semaphore_mem>> -> memref<1x!tpu.dma_semaphore, #tpu.memory_space<semaphore_mem>>
    %308 = tpu.memref_squeeze %307 : memref<1x!tpu.dma_semaphore, #tpu.memory_space<semaphore_mem>> -> memref<!tpu.dma_semaphore, #tpu.memory_space<semaphore_mem>>
    tpu.enqueue_dma source(%305 : memref<1x16xi32, #tpu.memory_space<any>>) target(%306 : memref<1x16xi32, #tpu.memory_space<vmem>>) target_semaphore(%308 : memref<!tpu.dma_semaphore, #tpu.memory_space<semaphore_mem>>)
    %c44_i32 = arith.constant 44 : i32
    %309 = arith.addi %0, %c44_i32 : i32
    %310 = arith.index_cast %309 : i32 to index
    %311 = memref.load %arg1[%310] : memref<128xi32, #tpu.memory_space<smem>>
    %c0_i32_176 = arith.constant 0 : i32
    %c0_i32_177 = arith.constant 0 : i32
    %312 = tpu.memref_slice %arg2[%311, %c0_i32_177] : memref<100x16xi32, #tpu.memory_space<any>> -> memref<1x16xi32, #tpu.memory_space<any>>
    %c44_i32_178 = arith.constant 44 : i32
    %c0_i32_179 = arith.constant 0 : i32
    %313 = tpu.memref_slice %arg3[%c44_i32_178, %c0_i32_179] : memref<128x16xi32, #tpu.memory_space<vmem>> -> memref<1x16xi32, #tpu.memory_space<vmem>>
    %314 = tpu.memref_slice %arg4[%c0_i32_176] : memref<1x!tpu.dma_semaphore, #tpu.memory_space<semaphore_mem>> -> memref<1x!tpu.dma_semaphore, #tpu.memory_space<semaphore_mem>>
    %315 = tpu.memref_squeeze %314 : memref<1x!tpu.dma_semaphore, #tpu.memory_space<semaphore_mem>> -> memref<!tpu.dma_semaphore, #tpu.memory_space<semaphore_mem>>
    tpu.enqueue_dma source(%312 : memref<1x16xi32, #tpu.memory_space<any>>) target(%313 : memref<1x16xi32, #tpu.memory_space<vmem>>) target_semaphore(%315 : memref<!tpu.dma_semaphore, #tpu.memory_space<semaphore_mem>>)
    %c45_i32 = arith.constant 45 : i32
    %316 = arith.addi %0, %c45_i32 : i32
    %317 = arith.index_cast %316 : i32 to index
    %318 = memref.load %arg1[%317] : memref<128xi32, #tpu.memory_space<smem>>
    %c0_i32_180 = arith.constant 0 : i32
    %c0_i32_181 = arith.constant 0 : i32
    %319 = tpu.memref_slice %arg2[%318, %c0_i32_181] : memref<100x16xi32, #tpu.memory_space<any>> -> memref<1x16xi32, #tpu.memory_space<any>>
    %c45_i32_182 = arith.constant 45 : i32
    %c0_i32_183 = arith.constant 0 : i32
    %320 = tpu.memref_slice %arg3[%c45_i32_182, %c0_i32_183] : memref<128x16xi32, #tpu.memory_space<vmem>> -> memref<1x16xi32, #tpu.memory_space<vmem>>
    %321 = tpu.memref_slice %arg4[%c0_i32_180] : memref<1x!tpu.dma_semaphore, #tpu.memory_space<semaphore_mem>> -> memref<1x!tpu.dma_semaphore, #tpu.memory_space<semaphore_mem>>
    %322 = tpu.memref_squeeze %321 : memref<1x!tpu.dma_semaphore, #tpu.memory_space<semaphore_mem>> -> memref<!tpu.dma_semaphore, #tpu.memory_space<semaphore_mem>>
    tpu.enqueue_dma source(%319 : memref<1x16xi32, #tpu.memory_space<any>>) target(%320 : memref<1x16xi32, #tpu.memory_space<vmem>>) target_semaphore(%322 : memref<!tpu.dma_semaphore, #tpu.memory_space<semaphore_mem>>)
    %c46_i32 = arith.constant 46 : i32
    %323 = arith.addi %0, %c46_i32 : i32
    %324 = arith.index_cast %323 : i32 to index
    %325 = memref.load %arg1[%324] : memref<128xi32, #tpu.memory_space<smem>>
    %c0_i32_184 = arith.constant 0 : i32
    %c0_i32_185 = arith.constant 0 : i32
    %326 = tpu.memref_slice %arg2[%325, %c0_i32_185] : memref<100x16xi32, #tpu.memory_space<any>> -> memref<1x16xi32, #tpu.memory_space<any>>
    %c46_i32_186 = arith.constant 46 : i32
    %c0_i32_187 = arith.constant 0 : i32
    %327 = tpu.memref_slice %arg3[%c46_i32_186, %c0_i32_187] : memref<128x16xi32, #tpu.memory_space<vmem>> -> memref<1x16xi32, #tpu.memory_space<vmem>>
    %328 = tpu.memref_slice %arg4[%c0_i32_184] : memref<1x!tpu.dma_semaphore, #tpu.memory_space<semaphore_mem>> -> memref<1x!tpu.dma_semaphore, #tpu.memory_space<semaphore_mem>>
    %329 = tpu.memref_squeeze %328 : memref<1x!tpu.dma_semaphore, #tpu.memory_space<semaphore_mem>> -> memref<!tpu.dma_semaphore, #tpu.memory_space<semaphore_mem>>
    tpu.enqueue_dma source(%326 : memref<1x16xi32, #tpu.memory_space<any>>) target(%327 : memref<1x16xi32, #tpu.memory_space<vmem>>) target_semaphore(%329 : memref<!tpu.dma_semaphore, #tpu.memory_space<semaphore_mem>>)
    %c47_i32 = arith.constant 47 : i32
    %330 = arith.addi %0, %c47_i32 : i32
    %331 = arith.index_cast %330 : i32 to index
    %332 = memref.load %arg1[%331] : memref<128xi32, #tpu.memory_space<smem>>
    %c0_i32_188 = arith.constant 0 : i32
    %c0_i32_189 = arith.constant 0 : i32
    %333 = tpu.memref_slice %arg2[%332, %c0_i32_189] : memref<100x16xi32, #tpu.memory_space<any>> -> memref<1x16xi32, #tpu.memory_space<any>>
    %c47_i32_190 = arith.constant 47 : i32
    %c0_i32_191 = arith.constant 0 : i32
    %334 = tpu.memref_slice %arg3[%c47_i32_190, %c0_i32_191] : memref<128x16xi32, #tpu.memory_space<vmem>> -> memref<1x16xi32, #tpu.memory_space<vmem>>
    %335 = tpu.memref_slice %arg4[%c0_i32_188] : memref<1x!tpu.dma_semaphore, #tpu.memory_space<semaphore_mem>> -> memref<1x!tpu.dma_semaphore, #tpu.memory_space<semaphore_mem>>
    %336 = tpu.memref_squeeze %335 : memref<1x!tpu.dma_semaphore, #tpu.memory_space<semaphore_mem>> -> memref<!tpu.dma_semaphore, #tpu.memory_space<semaphore_mem>>
    tpu.enqueue_dma source(%333 : memref<1x16xi32, #tpu.memory_space<any>>) target(%334 : memref<1x16xi32, #tpu.memory_space<vmem>>) target_semaphore(%336 : memref<!tpu.dma_semaphore, #tpu.memory_space<semaphore_mem>>)
    %c48_i32 = arith.constant 48 : i32
    %337 = arith.addi %0, %c48_i32 : i32
    %338 = arith.index_cast %337 : i32 to index
    %339 = memref.load %arg1[%338] : memref<128xi32, #tpu.memory_space<smem>>
    %c0_i32_192 = arith.constant 0 : i32
    %c0_i32_193 = arith.constant 0 : i32
    %340 = tpu.memref_slice %arg2[%339, %c0_i32_193] : memref<100x16xi32, #tpu.memory_space<any>> -> memref<1x16xi32, #tpu.memory_space<any>>
    %c48_i32_194 = arith.constant 48 : i32
    %c0_i32_195 = arith.constant 0 : i32
    %341 = tpu.memref_slice %arg3[%c48_i32_194, %c0_i32_195] : memref<128x16xi32, #tpu.memory_space<vmem>> -> memref<1x16xi32, #tpu.memory_space<vmem>>
    %342 = tpu.memref_slice %arg4[%c0_i32_192] : memref<1x!tpu.dma_semaphore, #tpu.memory_space<semaphore_mem>> -> memref<1x!tpu.dma_semaphore, #tpu.memory_space<semaphore_mem>>
    %343 = tpu.memref_squeeze %342 : memref<1x!tpu.dma_semaphore, #tpu.memory_space<semaphore_mem>> -> memref<!tpu.dma_semaphore, #tpu.memory_space<semaphore_mem>>
    tpu.enqueue_dma source(%340 : memref<1x16xi32, #tpu.memory_space<any>>) target(%341 : memref<1x16xi32, #tpu.memory_space<vmem>>) target_semaphore(%343 : memref<!tpu.dma_semaphore, #tpu.memory_space<semaphore_mem>>)
    %c49_i32 = arith.constant 49 : i32
    %344 = arith.addi %0, %c49_i32 : i32
    %345 = arith.index_cast %344 : i32 to index
    %346 = memref.load %arg1[%345] : memref<128xi32, #tpu.memory_space<smem>>
    %c0_i32_196 = arith.constant 0 : i32
    %c0_i32_197 = arith.constant 0 : i32
    %347 = tpu.memref_slice %arg2[%346, %c0_i32_197] : memref<100x16xi32, #tpu.memory_space<any>> -> memref<1x16xi32, #tpu.memory_space<any>>
    %c49_i32_198 = arith.constant 49 : i32
    %c0_i32_199 = arith.constant 0 : i32
    %348 = tpu.memref_slice %arg3[%c49_i32_198, %c0_i32_199] : memref<128x16xi32, #tpu.memory_space<vmem>> -> memref<1x16xi32, #tpu.memory_space<vmem>>
    %349 = tpu.memref_slice %arg4[%c0_i32_196] : memref<1x!tpu.dma_semaphore, #tpu.memory_space<semaphore_mem>> -> memref<1x!tpu.dma_semaphore, #tpu.memory_space<semaphore_mem>>
    %350 = tpu.memref_squeeze %349 : memref<1x!tpu.dma_semaphore, #tpu.memory_space<semaphore_mem>> -> memref<!tpu.dma_semaphore, #tpu.memory_space<semaphore_mem>>
    tpu.enqueue_dma source(%347 : memref<1x16xi32, #tpu.memory_space<any>>) target(%348 : memref<1x16xi32, #tpu.memory_space<vmem>>) target_semaphore(%350 : memref<!tpu.dma_semaphore, #tpu.memory_space<semaphore_mem>>)
    %c50_i32 = arith.constant 50 : i32
    %351 = arith.addi %0, %c50_i32 : i32
    %352 = arith.index_cast %351 : i32 to index
    %353 = memref.load %arg1[%352] : memref<128xi32, #tpu.memory_space<smem>>
    %c0_i32_200 = arith.constant 0 : i32
    %c0_i32_201 = arith.constant 0 : i32
    %354 = tpu.memref_slice %arg2[%353, %c0_i32_201] : memref<100x16xi32, #tpu.memory_space<any>> -> memref<1x16xi32, #tpu.memory_space<any>>
    %c50_i32_202 = arith.constant 50 : i32
    %c0_i32_203 = arith.constant 0 : i32
    %355 = tpu.memref_slice %arg3[%c50_i32_202, %c0_i32_203] : memref<128x16xi32, #tpu.memory_space<vmem>> -> memref<1x16xi32, #tpu.memory_space<vmem>>
    %356 = tpu.memref_slice %arg4[%c0_i32_200] : memref<1x!tpu.dma_semaphore, #tpu.memory_space<semaphore_mem>> -> memref<1x!tpu.dma_semaphore, #tpu.memory_space<semaphore_mem>>
    %357 = tpu.memref_squeeze %356 : memref<1x!tpu.dma_semaphore, #tpu.memory_space<semaphore_mem>> -> memref<!tpu.dma_semaphore, #tpu.memory_space<semaphore_mem>>
    tpu.enqueue_dma source(%354 : memref<1x16xi32, #tpu.memory_space<any>>) target(%355 : memref<1x16xi32, #tpu.memory_space<vmem>>) target_semaphore(%357 : memref<!tpu.dma_semaphore, #tpu.memory_space<semaphore_mem>>)
    %c51_i32 = arith.constant 51 : i32
    %358 = arith.addi %0, %c51_i32 : i32
    %359 = arith.index_cast %358 : i32 to index
    %360 = memref.load %arg1[%359] : memref<128xi32, #tpu.memory_space<smem>>
    %c0_i32_204 = arith.constant 0 : i32
    %c0_i32_205 = arith.constant 0 : i32
    %361 = tpu.memref_slice %arg2[%360, %c0_i32_205] : memref<100x16xi32, #tpu.memory_space<any>> -> memref<1x16xi32, #tpu.memory_space<any>>
    %c51_i32_206 = arith.constant 51 : i32
    %c0_i32_207 = arith.constant 0 : i32
    %362 = tpu.memref_slice %arg3[%c51_i32_206, %c0_i32_207] : memref<128x16xi32, #tpu.memory_space<vmem>> -> memref<1x16xi32, #tpu.memory_space<vmem>>
    %363 = tpu.memref_slice %arg4[%c0_i32_204] : memref<1x!tpu.dma_semaphore, #tpu.memory_space<semaphore_mem>> -> memref<1x!tpu.dma_semaphore, #tpu.memory_space<semaphore_mem>>
    %364 = tpu.memref_squeeze %363 : memref<1x!tpu.dma_semaphore, #tpu.memory_space<semaphore_mem>> -> memref<!tpu.dma_semaphore, #tpu.memory_space<semaphore_mem>>
    tpu.enqueue_dma source(%361 : memref<1x16xi32, #tpu.memory_space<any>>) target(%362 : memref<1x16xi32, #tpu.memory_space<vmem>>) target_semaphore(%364 : memref<!tpu.dma_semaphore, #tpu.memory_space<semaphore_mem>>)
    %c52_i32 = arith.constant 52 : i32
    %365 = arith.addi %0, %c52_i32 : i32
    %366 = arith.index_cast %365 : i32 to index
    %367 = memref.load %arg1[%366] : memref<128xi32, #tpu.memory_space<smem>>
    %c0_i32_208 = arith.constant 0 : i32
    %c0_i32_209 = arith.constant 0 : i32
    %368 = tpu.memref_slice %arg2[%367, %c0_i32_209] : memref<100x16xi32, #tpu.memory_space<any>> -> memref<1x16xi32, #tpu.memory_space<any>>
    %c52_i32_210 = arith.constant 52 : i32
    %c0_i32_211 = arith.constant 0 : i32
    %369 = tpu.memref_slice %arg3[%c52_i32_210, %c0_i32_211] : memref<128x16xi32, #tpu.memory_space<vmem>> -> memref<1x16xi32, #tpu.memory_space<vmem>>
    %370 = tpu.memref_slice %arg4[%c0_i32_208] : memref<1x!tpu.dma_semaphore, #tpu.memory_space<semaphore_mem>> -> memref<1x!tpu.dma_semaphore, #tpu.memory_space<semaphore_mem>>
    %371 = tpu.memref_squeeze %370 : memref<1x!tpu.dma_semaphore, #tpu.memory_space<semaphore_mem>> -> memref<!tpu.dma_semaphore, #tpu.memory_space<semaphore_mem>>
    tpu.enqueue_dma source(%368 : memref<1x16xi32, #tpu.memory_space<any>>) target(%369 : memref<1x16xi32, #tpu.memory_space<vmem>>) target_semaphore(%371 : memref<!tpu.dma_semaphore, #tpu.memory_space<semaphore_mem>>)
    %c53_i32 = arith.constant 53 : i32
    %372 = arith.addi %0, %c53_i32 : i32
    %373 = arith.index_cast %372 : i32 to index
    %374 = memref.load %arg1[%373] : memref<128xi32, #tpu.memory_space<smem>>
    %c0_i32_212 = arith.constant 0 : i32
    %c0_i32_213 = arith.constant 0 : i32
    %375 = tpu.memref_slice %arg2[%374, %c0_i32_213] : memref<100x16xi32, #tpu.memory_space<any>> -> memref<1x16xi32, #tpu.memory_space<any>>
    %c53_i32_214 = arith.constant 53 : i32
    %c0_i32_215 = arith.constant 0 : i32
    %376 = tpu.memref_slice %arg3[%c53_i32_214, %c0_i32_215] : memref<128x16xi32, #tpu.memory_space<vmem>> -> memref<1x16xi32, #tpu.memory_space<vmem>>
    %377 = tpu.memref_slice %arg4[%c0_i32_212] : memref<1x!tpu.dma_semaphore, #tpu.memory_space<semaphore_mem>> -> memref<1x!tpu.dma_semaphore, #tpu.memory_space<semaphore_mem>>
    %378 = tpu.memref_squeeze %377 : memref<1x!tpu.dma_semaphore, #tpu.memory_space<semaphore_mem>> -> memref<!tpu.dma_semaphore, #tpu.memory_space<semaphore_mem>>
    tpu.enqueue_dma source(%375 : memref<1x16xi32, #tpu.memory_space<any>>) target(%376 : memref<1x16xi32, #tpu.memory_space<vmem>>) target_semaphore(%378 : memref<!tpu.dma_semaphore, #tpu.memory_space<semaphore_mem>>)
    %c54_i32 = arith.constant 54 : i32
    %379 = arith.addi %0, %c54_i32 : i32
    %380 = arith.index_cast %379 : i32 to index
    %381 = memref.load %arg1[%380] : memref<128xi32, #tpu.memory_space<smem>>
    %c0_i32_216 = arith.constant 0 : i32
    %c0_i32_217 = arith.constant 0 : i32
    %382 = tpu.memref_slice %arg2[%381, %c0_i32_217] : memref<100x16xi32, #tpu.memory_space<any>> -> memref<1x16xi32, #tpu.memory_space<any>>
    %c54_i32_218 = arith.constant 54 : i32
    %c0_i32_219 = arith.constant 0 : i32
    %383 = tpu.memref_slice %arg3[%c54_i32_218, %c0_i32_219] : memref<128x16xi32, #tpu.memory_space<vmem>> -> memref<1x16xi32, #tpu.memory_space<vmem>>
    %384 = tpu.memref_slice %arg4[%c0_i32_216] : memref<1x!tpu.dma_semaphore, #tpu.memory_space<semaphore_mem>> -> memref<1x!tpu.dma_semaphore, #tpu.memory_space<semaphore_mem>>
    %385 = tpu.memref_squeeze %384 : memref<1x!tpu.dma_semaphore, #tpu.memory_space<semaphore_mem>> -> memref<!tpu.dma_semaphore, #tpu.memory_space<semaphore_mem>>
    tpu.enqueue_dma source(%382 : memref<1x16xi32, #tpu.memory_space<any>>) target(%383 : memref<1x16xi32, #tpu.memory_space<vmem>>) target_semaphore(%385 : memref<!tpu.dma_semaphore, #tpu.memory_space<semaphore_mem>>)
    %c55_i32 = arith.constant 55 : i32
    %386 = arith.addi %0, %c55_i32 : i32
    %387 = arith.index_cast %386 : i32 to index
    %388 = memref.load %arg1[%387] : memref<128xi32, #tpu.memory_space<smem>>
    %c0_i32_220 = arith.constant 0 : i32
    %c0_i32_221 = arith.constant 0 : i32
    %389 = tpu.memref_slice %arg2[%388, %c0_i32_221] : memref<100x16xi32, #tpu.memory_space<any>> -> memref<1x16xi32, #tpu.memory_space<any>>
    %c55_i32_222 = arith.constant 55 : i32
    %c0_i32_223 = arith.constant 0 : i32
    %390 = tpu.memref_slice %arg3[%c55_i32_222, %c0_i32_223] : memref<128x16xi32, #tpu.memory_space<vmem>> -> memref<1x16xi32, #tpu.memory_space<vmem>>
    %391 = tpu.memref_slice %arg4[%c0_i32_220] : memref<1x!tpu.dma_semaphore, #tpu.memory_space<semaphore_mem>> -> memref<1x!tpu.dma_semaphore, #tpu.memory_space<semaphore_mem>>
    %392 = tpu.memref_squeeze %391 : memref<1x!tpu.dma_semaphore, #tpu.memory_space<semaphore_mem>> -> memref<!tpu.dma_semaphore, #tpu.memory_space<semaphore_mem>>
    tpu.enqueue_dma source(%389 : memref<1x16xi32, #tpu.memory_space<any>>) target(%390 : memref<1x16xi32, #tpu.memory_space<vmem>>) target_semaphore(%392 : memref<!tpu.dma_semaphore, #tpu.memory_space<semaphore_mem>>)
    %c56_i32 = arith.constant 56 : i32
    %393 = arith.addi %0, %c56_i32 : i32
    %394 = arith.index_cast %393 : i32 to index
    %395 = memref.load %arg1[%394] : memref<128xi32, #tpu.memory_space<smem>>
    %c0_i32_224 = arith.constant 0 : i32
    %c0_i32_225 = arith.constant 0 : i32
    %396 = tpu.memref_slice %arg2[%395, %c0_i32_225] : memref<100x16xi32, #tpu.memory_space<any>> -> memref<1x16xi32, #tpu.memory_space<any>>
    %c56_i32_226 = arith.constant 56 : i32
    %c0_i32_227 = arith.constant 0 : i32
    %397 = tpu.memref_slice %arg3[%c56_i32_226, %c0_i32_227] : memref<128x16xi32, #tpu.memory_space<vmem>> -> memref<1x16xi32, #tpu.memory_space<vmem>>
    %398 = tpu.memref_slice %arg4[%c0_i32_224] : memref<1x!tpu.dma_semaphore, #tpu.memory_space<semaphore_mem>> -> memref<1x!tpu.dma_semaphore, #tpu.memory_space<semaphore_mem>>
    %399 = tpu.memref_squeeze %398 : memref<1x!tpu.dma_semaphore, #tpu.memory_space<semaphore_mem>> -> memref<!tpu.dma_semaphore, #tpu.memory_space<semaphore_mem>>
    tpu.enqueue_dma source(%396 : memref<1x16xi32, #tpu.memory_space<any>>) target(%397 : memref<1x16xi32, #tpu.memory_space<vmem>>) target_semaphore(%399 : memref<!tpu.dma_semaphore, #tpu.memory_space<semaphore_mem>>)
    %c57_i32 = arith.constant 57 : i32
    %400 = arith.addi %0, %c57_i32 : i32
    %401 = arith.index_cast %400 : i32 to index
    %402 = memref.load %arg1[%401] : memref<128xi32, #tpu.memory_space<smem>>
    %c0_i32_228 = arith.constant 0 : i32
    %c0_i32_229 = arith.constant 0 : i32
    %403 = tpu.memref_slice %arg2[%402, %c0_i32_229] : memref<100x16xi32, #tpu.memory_space<any>> -> memref<1x16xi32, #tpu.memory_space<any>>
    %c57_i32_230 = arith.constant 57 : i32
    %c0_i32_231 = arith.constant 0 : i32
    %404 = tpu.memref_slice %arg3[%c57_i32_230, %c0_i32_231] : memref<128x16xi32, #tpu.memory_space<vmem>> -> memref<1x16xi32, #tpu.memory_space<vmem>>
    %405 = tpu.memref_slice %arg4[%c0_i32_228] : memref<1x!tpu.dma_semaphore, #tpu.memory_space<semaphore_mem>> -> memref<1x!tpu.dma_semaphore, #tpu.memory_space<semaphore_mem>>
    %406 = tpu.memref_squeeze %405 : memref<1x!tpu.dma_semaphore, #tpu.memory_space<semaphore_mem>> -> memref<!tpu.dma_semaphore, #tpu.memory_space<semaphore_mem>>
    tpu.enqueue_dma source(%403 : memref<1x16xi32, #tpu.memory_space<any>>) target(%404 : memref<1x16xi32, #tpu.memory_space<vmem>>) target_semaphore(%406 : memref<!tpu.dma_semaphore, #tpu.memory_space<semaphore_mem>>)
    %c58_i32 = arith.constant 58 : i32
    %407 = arith.addi %0, %c58_i32 : i32
    %408 = arith.index_cast %407 : i32 to index
    %409 = memref.load %arg1[%408] : memref<128xi32, #tpu.memory_space<smem>>
    %c0_i32_232 = arith.constant 0 : i32
    %c0_i32_233 = arith.constant 0 : i32
    %410 = tpu.memref_slice %arg2[%409, %c0_i32_233] : memref<100x16xi32, #tpu.memory_space<any>> -> memref<1x16xi32, #tpu.memory_space<any>>
    %c58_i32_234 = arith.constant 58 : i32
    %c0_i32_235 = arith.constant 0 : i32
    %411 = tpu.memref_slice %arg3[%c58_i32_234, %c0_i32_235] : memref<128x16xi32, #tpu.memory_space<vmem>> -> memref<1x16xi32, #tpu.memory_space<vmem>>
    %412 = tpu.memref_slice %arg4[%c0_i32_232] : memref<1x!tpu.dma_semaphore, #tpu.memory_space<semaphore_mem>> -> memref<1x!tpu.dma_semaphore, #tpu.memory_space<semaphore_mem>>
    %413 = tpu.memref_squeeze %412 : memref<1x!tpu.dma_semaphore, #tpu.memory_space<semaphore_mem>> -> memref<!tpu.dma_semaphore, #tpu.memory_space<semaphore_mem>>
    tpu.enqueue_dma source(%410 : memref<1x16xi32, #tpu.memory_space<any>>) target(%411 : memref<1x16xi32, #tpu.memory_space<vmem>>) target_semaphore(%413 : memref<!tpu.dma_semaphore, #tpu.memory_space<semaphore_mem>>)
    %c59_i32 = arith.constant 59 : i32
    %414 = arith.addi %0, %c59_i32 : i32
    %415 = arith.index_cast %414 : i32 to index
    %416 = memref.load %arg1[%415] : memref<128xi32, #tpu.memory_space<smem>>
    %c0_i32_236 = arith.constant 0 : i32
    %c0_i32_237 = arith.constant 0 : i32
    %417 = tpu.memref_slice %arg2[%416, %c0_i32_237] : memref<100x16xi32, #tpu.memory_space<any>> -> memref<1x16xi32, #tpu.memory_space<any>>
    %c59_i32_238 = arith.constant 59 : i32
    %c0_i32_239 = arith.constant 0 : i32
    %418 = tpu.memref_slice %arg3[%c59_i32_238, %c0_i32_239] : memref<128x16xi32, #tpu.memory_space<vmem>> -> memref<1x16xi32, #tpu.memory_space<vmem>>
    %419 = tpu.memref_slice %arg4[%c0_i32_236] : memref<1x!tpu.dma_semaphore, #tpu.memory_space<semaphore_mem>> -> memref<1x!tpu.dma_semaphore, #tpu.memory_space<semaphore_mem>>
    %420 = tpu.memref_squeeze %419 : memref<1x!tpu.dma_semaphore, #tpu.memory_space<semaphore_mem>> -> memref<!tpu.dma_semaphore, #tpu.memory_space<semaphore_mem>>
    tpu.enqueue_dma source(%417 : memref<1x16xi32, #tpu.memory_space<any>>) target(%418 : memref<1x16xi32, #tpu.memory_space<vmem>>) target_semaphore(%420 : memref<!tpu.dma_semaphore, #tpu.memory_space<semaphore_mem>>)
    %c60_i32 = arith.constant 60 : i32
    %421 = arith.addi %0, %c60_i32 : i32
    %422 = arith.index_cast %421 : i32 to index
    %423 = memref.load %arg1[%422] : memref<128xi32, #tpu.memory_space<smem>>
    %c0_i32_240 = arith.constant 0 : i32
    %c0_i32_241 = arith.constant 0 : i32
    %424 = tpu.memref_slice %arg2[%423, %c0_i32_241] : memref<100x16xi32, #tpu.memory_space<any>> -> memref<1x16xi32, #tpu.memory_space<any>>
    %c60_i32_242 = arith.constant 60 : i32
    %c0_i32_243 = arith.constant 0 : i32
    %425 = tpu.memref_slice %arg3[%c60_i32_242, %c0_i32_243] : memref<128x16xi32, #tpu.memory_space<vmem>> -> memref<1x16xi32, #tpu.memory_space<vmem>>
    %426 = tpu.memref_slice %arg4[%c0_i32_240] : memref<1x!tpu.dma_semaphore, #tpu.memory_space<semaphore_mem>> -> memref<1x!tpu.dma_semaphore, #tpu.memory_space<semaphore_mem>>
    %427 = tpu.memref_squeeze %426 : memref<1x!tpu.dma_semaphore, #tpu.memory_space<semaphore_mem>> -> memref<!tpu.dma_semaphore, #tpu.memory_space<semaphore_mem>>
    tpu.enqueue_dma source(%424 : memref<1x16xi32, #tpu.memory_space<any>>) target(%425 : memref<1x16xi32, #tpu.memory_space<vmem>>) target_semaphore(%427 : memref<!tpu.dma_semaphore, #tpu.memory_space<semaphore_mem>>)
    %c61_i32 = arith.constant 61 : i32
    %428 = arith.addi %0, %c61_i32 : i32
    %429 = arith.index_cast %428 : i32 to index
    %430 = memref.load %arg1[%429] : memref<128xi32, #tpu.memory_space<smem>>
    %c0_i32_244 = arith.constant 0 : i32
    %c0_i32_245 = arith.constant 0 : i32
    %431 = tpu.memref_slice %arg2[%430, %c0_i32_245] : memref<100x16xi32, #tpu.memory_space<any>> -> memref<1x16xi32, #tpu.memory_space<any>>
    %c61_i32_246 = arith.constant 61 : i32
    %c0_i32_247 = arith.constant 0 : i32
    %432 = tpu.memref_slice %arg3[%c61_i32_246, %c0_i32_247] : memref<128x16xi32, #tpu.memory_space<vmem>> -> memref<1x16xi32, #tpu.memory_space<vmem>>
    %433 = tpu.memref_slice %arg4[%c0_i32_244] : memref<1x!tpu.dma_semaphore, #tpu.memory_space<semaphore_mem>> -> memref<1x!tpu.dma_semaphore, #tpu.memory_space<semaphore_mem>>
    %434 = tpu.memref_squeeze %433 : memref<1x!tpu.dma_semaphore, #tpu.memory_space<semaphore_mem>> -> memref<!tpu.dma_semaphore, #tpu.memory_space<semaphore_mem>>
    tpu.enqueue_dma source(%431 : memref<1x16xi32, #tpu.memory_space<any>>) target(%432 : memref<1x16xi32, #tpu.memory_space<vmem>>) target_semaphore(%434 : memref<!tpu.dma_semaphore, #tpu.memory_space<semaphore_mem>>)
    %c62_i32 = arith.constant 62 : i32
    %435 = arith.addi %0, %c62_i32 : i32
    %436 = arith.index_cast %435 : i32 to index
    %437 = memref.load %arg1[%436] : memref<128xi32, #tpu.memory_space<smem>>
    %c0_i32_248 = arith.constant 0 : i32
    %c0_i32_249 = arith.constant 0 : i32
    %438 = tpu.memref_slice %arg2[%437, %c0_i32_249] : memref<100x16xi32, #tpu.memory_space<any>> -> memref<1x16xi32, #tpu.memory_space<any>>
    %c62_i32_250 = arith.constant 62 : i32
    %c0_i32_251 = arith.constant 0 : i32
    %439 = tpu.memref_slice %arg3[%c62_i32_250, %c0_i32_251] : memref<128x16xi32, #tpu.memory_space<vmem>> -> memref<1x16xi32, #tpu.memory_space<vmem>>
    %440 = tpu.memref_slice %arg4[%c0_i32_248] : memref<1x!tpu.dma_semaphore, #tpu.memory_space<semaphore_mem>> -> memref<1x!tpu.dma_semaphore, #tpu.memory_space<semaphore_mem>>
    %441 = tpu.memref_squeeze %440 : memref<1x!tpu.dma_semaphore, #tpu.memory_space<semaphore_mem>> -> memref<!tpu.dma_semaphore, #tpu.memory_space<semaphore_mem>>
    tpu.enqueue_dma source(%438 : memref<1x16xi32, #tpu.memory_space<any>>) target(%439 : memref<1x16xi32, #tpu.memory_space<vmem>>) target_semaphore(%441 : memref<!tpu.dma_semaphore, #tpu.memory_space<semaphore_mem>>)
    %c63_i32 = arith.constant 63 : i32
    %442 = arith.addi %0, %c63_i32 : i32
    %443 = arith.index_cast %442 : i32 to index
    %444 = memref.load %arg1[%443] : memref<128xi32, #tpu.memory_space<smem>>
    %c0_i32_252 = arith.constant 0 : i32
    %c0_i32_253 = arith.constant 0 : i32
    %445 = tpu.memref_slice %arg2[%444, %c0_i32_253] : memref<100x16xi32, #tpu.memory_space<any>> -> memref<1x16xi32, #tpu.memory_space<any>>
    %c63_i32_254 = arith.constant 63 : i32
    %c0_i32_255 = arith.constant 0 : i32
    %446 = tpu.memref_slice %arg3[%c63_i32_254, %c0_i32_255] : memref<128x16xi32, #tpu.memory_space<vmem>> -> memref<1x16xi32, #tpu.memory_space<vmem>>
    %447 = tpu.memref_slice %arg4[%c0_i32_252] : memref<1x!tpu.dma_semaphore, #tpu.memory_space<semaphore_mem>> -> memref<1x!tpu.dma_semaphore, #tpu.memory_space<semaphore_mem>>
    %448 = tpu.memref_squeeze %447 : memref<1x!tpu.dma_semaphore, #tpu.memory_space<semaphore_mem>> -> memref<!tpu.dma_semaphore, #tpu.memory_space<semaphore_mem>>
    tpu.enqueue_dma source(%445 : memref<1x16xi32, #tpu.memory_space<any>>) target(%446 : memref<1x16xi32, #tpu.memory_space<vmem>>) target_semaphore(%448 : memref<!tpu.dma_semaphore, #tpu.memory_space<semaphore_mem>>)
    %c64_i32 = arith.constant 64 : i32
    %449 = arith.addi %0, %c64_i32 : i32
    %450 = arith.index_cast %449 : i32 to index
    %451 = memref.load %arg1[%450] : memref<128xi32, #tpu.memory_space<smem>>
    %c0_i32_256 = arith.constant 0 : i32
    %c0_i32_257 = arith.constant 0 : i32
    %452 = tpu.memref_slice %arg2[%451, %c0_i32_257] : memref<100x16xi32, #tpu.memory_space<any>> -> memref<1x16xi32, #tpu.memory_space<any>>
    %c64_i32_258 = arith.constant 64 : i32
    %c0_i32_259 = arith.constant 0 : i32
    %453 = tpu.memref_slice %arg3[%c64_i32_258, %c0_i32_259] : memref<128x16xi32, #tpu.memory_space<vmem>> -> memref<1x16xi32, #tpu.memory_space<vmem>>
    %454 = tpu.memref_slice %arg4[%c0_i32_256] : memref<1x!tpu.dma_semaphore, #tpu.memory_space<semaphore_mem>> -> memref<1x!tpu.dma_semaphore, #tpu.memory_space<semaphore_mem>>
    %455 = tpu.memref_squeeze %454 : memref<1x!tpu.dma_semaphore, #tpu.memory_space<semaphore_mem>> -> memref<!tpu.dma_semaphore, #tpu.memory_space<semaphore_mem>>
    tpu.enqueue_dma source(%452 : memref<1x16xi32, #tpu.memory_space<any>>) target(%453 : memref<1x16xi32, #tpu.memory_space<vmem>>) target_semaphore(%455 : memref<!tpu.dma_semaphore, #tpu.memory_space<semaphore_mem>>)
    %c65_i32 = arith.constant 65 : i32
    %456 = arith.addi %0, %c65_i32 : i32
    %457 = arith.index_cast %456 : i32 to index
    %458 = memref.load %arg1[%457] : memref<128xi32, #tpu.memory_space<smem>>
    %c0_i32_260 = arith.constant 0 : i32
    %c0_i32_261 = arith.constant 0 : i32
    %459 = tpu.memref_slice %arg2[%458, %c0_i32_261] : memref<100x16xi32, #tpu.memory_space<any>> -> memref<1x16xi32, #tpu.memory_space<any>>
    %c65_i32_262 = arith.constant 65 : i32
    %c0_i32_263 = arith.constant 0 : i32
    %460 = tpu.memref_slice %arg3[%c65_i32_262, %c0_i32_263] : memref<128x16xi32, #tpu.memory_space<vmem>> -> memref<1x16xi32, #tpu.memory_space<vmem>>
    %461 = tpu.memref_slice %arg4[%c0_i32_260] : memref<1x!tpu.dma_semaphore, #tpu.memory_space<semaphore_mem>> -> memref<1x!tpu.dma_semaphore, #tpu.memory_space<semaphore_mem>>
    %462 = tpu.memref_squeeze %461 : memref<1x!tpu.dma_semaphore, #tpu.memory_space<semaphore_mem>> -> memref<!tpu.dma_semaphore, #tpu.memory_space<semaphore_mem>>
    tpu.enqueue_dma source(%459 : memref<1x16xi32, #tpu.memory_space<any>>) target(%460 : memref<1x16xi32, #tpu.memory_space<vmem>>) target_semaphore(%462 : memref<!tpu.dma_semaphore, #tpu.memory_space<semaphore_mem>>)
    %c66_i32 = arith.constant 66 : i32
    %463 = arith.addi %0, %c66_i32 : i32
    %464 = arith.index_cast %463 : i32 to index
    %465 = memref.load %arg1[%464] : memref<128xi32, #tpu.memory_space<smem>>
    %c0_i32_264 = arith.constant 0 : i32
    %c0_i32_265 = arith.constant 0 : i32
    %466 = tpu.memref_slice %arg2[%465, %c0_i32_265] : memref<100x16xi32, #tpu.memory_space<any>> -> memref<1x16xi32, #tpu.memory_space<any>>
    %c66_i32_266 = arith.constant 66 : i32
    %c0_i32_267 = arith.constant 0 : i32
    %467 = tpu.memref_slice %arg3[%c66_i32_266, %c0_i32_267] : memref<128x16xi32, #tpu.memory_space<vmem>> -> memref<1x16xi32, #tpu.memory_space<vmem>>
    %468 = tpu.memref_slice %arg4[%c0_i32_264] : memref<1x!tpu.dma_semaphore, #tpu.memory_space<semaphore_mem>> -> memref<1x!tpu.dma_semaphore, #tpu.memory_space<semaphore_mem>>
    %469 = tpu.memref_squeeze %468 : memref<1x!tpu.dma_semaphore, #tpu.memory_space<semaphore_mem>> -> memref<!tpu.dma_semaphore, #tpu.memory_space<semaphore_mem>>
    tpu.enqueue_dma source(%466 : memref<1x16xi32, #tpu.memory_space<any>>) target(%467 : memref<1x16xi32, #tpu.memory_space<vmem>>) target_semaphore(%469 : memref<!tpu.dma_semaphore, #tpu.memory_space<semaphore_mem>>)
    %c67_i32 = arith.constant 67 : i32
    %470 = arith.addi %0, %c67_i32 : i32
    %471 = arith.index_cast %470 : i32 to index
    %472 = memref.load %arg1[%471] : memref<128xi32, #tpu.memory_space<smem>>
    %c0_i32_268 = arith.constant 0 : i32
    %c0_i32_269 = arith.constant 0 : i32
    %473 = tpu.memref_slice %arg2[%472, %c0_i32_269] : memref<100x16xi32, #tpu.memory_space<any>> -> memref<1x16xi32, #tpu.memory_space<any>>
    %c67_i32_270 = arith.constant 67 : i32
    %c0_i32_271 = arith.constant 0 : i32
    %474 = tpu.memref_slice %arg3[%c67_i32_270, %c0_i32_271] : memref<128x16xi32, #tpu.memory_space<vmem>> -> memref<1x16xi32, #tpu.memory_space<vmem>>
    %475 = tpu.memref_slice %arg4[%c0_i32_268] : memref<1x!tpu.dma_semaphore, #tpu.memory_space<semaphore_mem>> -> memref<1x!tpu.dma_semaphore, #tpu.memory_space<semaphore_mem>>
    %476 = tpu.memref_squeeze %475 : memref<1x!tpu.dma_semaphore, #tpu.memory_space<semaphore_mem>> -> memref<!tpu.dma_semaphore, #tpu.memory_space<semaphore_mem>>
    tpu.enqueue_dma source(%473 : memref<1x16xi32, #tpu.memory_space<any>>) target(%474 : memref<1x16xi32, #tpu.memory_space<vmem>>) target_semaphore(%476 : memref<!tpu.dma_semaphore, #tpu.memory_space<semaphore_mem>>)
    %c68_i32 = arith.constant 68 : i32
    %477 = arith.addi %0, %c68_i32 : i32
    %478 = arith.index_cast %477 : i32 to index
    %479 = memref.load %arg1[%478] : memref<128xi32, #tpu.memory_space<smem>>
    %c0_i32_272 = arith.constant 0 : i32
    %c0_i32_273 = arith.constant 0 : i32
    %480 = tpu.memref_slice %arg2[%479, %c0_i32_273] : memref<100x16xi32, #tpu.memory_space<any>> -> memref<1x16xi32, #tpu.memory_space<any>>
    %c68_i32_274 = arith.constant 68 : i32
    %c0_i32_275 = arith.constant 0 : i32
    %481 = tpu.memref_slice %arg3[%c68_i32_274, %c0_i32_275] : memref<128x16xi32, #tpu.memory_space<vmem>> -> memref<1x16xi32, #tpu.memory_space<vmem>>
    %482 = tpu.memref_slice %arg4[%c0_i32_272] : memref<1x!tpu.dma_semaphore, #tpu.memory_space<semaphore_mem>> -> memref<1x!tpu.dma_semaphore, #tpu.memory_space<semaphore_mem>>
    %483 = tpu.memref_squeeze %482 : memref<1x!tpu.dma_semaphore, #tpu.memory_space<semaphore_mem>> -> memref<!tpu.dma_semaphore, #tpu.memory_space<semaphore_mem>>
    tpu.enqueue_dma source(%480 : memref<1x16xi32, #tpu.memory_space<any>>) target(%481 : memref<1x16xi32, #tpu.memory_space<vmem>>) target_semaphore(%483 : memref<!tpu.dma_semaphore, #tpu.memory_space<semaphore_mem>>)
    %c69_i32 = arith.constant 69 : i32
    %484 = arith.addi %0, %c69_i32 : i32
    %485 = arith.index_cast %484 : i32 to index
    %486 = memref.load %arg1[%485] : memref<128xi32, #tpu.memory_space<smem>>
    %c0_i32_276 = arith.constant 0 : i32
    %c0_i32_277 = arith.constant 0 : i32
    %487 = tpu.memref_slice %arg2[%486, %c0_i32_277] : memref<100x16xi32, #tpu.memory_space<any>> -> memref<1x16xi32, #tpu.memory_space<any>>
    %c69_i32_278 = arith.constant 69 : i32
    %c0_i32_279 = arith.constant 0 : i32
    %488 = tpu.memref_slice %arg3[%c69_i32_278, %c0_i32_279] : memref<128x16xi32, #tpu.memory_space<vmem>> -> memref<1x16xi32, #tpu.memory_space<vmem>>
    %489 = tpu.memref_slice %arg4[%c0_i32_276] : memref<1x!tpu.dma_semaphore, #tpu.memory_space<semaphore_mem>> -> memref<1x!tpu.dma_semaphore, #tpu.memory_space<semaphore_mem>>
    %490 = tpu.memref_squeeze %489 : memref<1x!tpu.dma_semaphore, #tpu.memory_space<semaphore_mem>> -> memref<!tpu.dma_semaphore, #tpu.memory_space<semaphore_mem>>
    tpu.enqueue_dma source(%487 : memref<1x16xi32, #tpu.memory_space<any>>) target(%488 : memref<1x16xi32, #tpu.memory_space<vmem>>) target_semaphore(%490 : memref<!tpu.dma_semaphore, #tpu.memory_space<semaphore_mem>>)
    %c70_i32 = arith.constant 70 : i32
    %491 = arith.addi %0, %c70_i32 : i32
    %492 = arith.index_cast %491 : i32 to index
    %493 = memref.load %arg1[%492] : memref<128xi32, #tpu.memory_space<smem>>
    %c0_i32_280 = arith.constant 0 : i32
    %c0_i32_281 = arith.constant 0 : i32
    %494 = tpu.memref_slice %arg2[%493, %c0_i32_281] : memref<100x16xi32, #tpu.memory_space<any>> -> memref<1x16xi32, #tpu.memory_space<any>>
    %c70_i32_282 = arith.constant 70 : i32
    %c0_i32_283 = arith.constant 0 : i32
    %495 = tpu.memref_slice %arg3[%c70_i32_282, %c0_i32_283] : memref<128x16xi32, #tpu.memory_space<vmem>> -> memref<1x16xi32, #tpu.memory_space<vmem>>
    %496 = tpu.memref_slice %arg4[%c0_i32_280] : memref<1x!tpu.dma_semaphore, #tpu.memory_space<semaphore_mem>> -> memref<1x!tpu.dma_semaphore, #tpu.memory_space<semaphore_mem>>
    %497 = tpu.memref_squeeze %496 : memref<1x!tpu.dma_semaphore, #tpu.memory_space<semaphore_mem>> -> memref<!tpu.dma_semaphore, #tpu.memory_space<semaphore_mem>>
    tpu.enqueue_dma source(%494 : memref<1x16xi32, #tpu.memory_space<any>>) target(%495 : memref<1x16xi32, #tpu.memory_space<vmem>>) target_semaphore(%497 : memref<!tpu.dma_semaphore, #tpu.memory_space<semaphore_mem>>)
    %c71_i32 = arith.constant 71 : i32
    %498 = arith.addi %0, %c71_i32 : i32
    %499 = arith.index_cast %498 : i32 to index
    %500 = memref.load %arg1[%499] : memref<128xi32, #tpu.memory_space<smem>>
    %c0_i32_284 = arith.constant 0 : i32
    %c0_i32_285 = arith.constant 0 : i32
    %501 = tpu.memref_slice %arg2[%500, %c0_i32_285] : memref<100x16xi32, #tpu.memory_space<any>> -> memref<1x16xi32, #tpu.memory_space<any>>
    %c71_i32_286 = arith.constant 71 : i32
    %c0_i32_287 = arith.constant 0 : i32
    %502 = tpu.memref_slice %arg3[%c71_i32_286, %c0_i32_287] : memref<128x16xi32, #tpu.memory_space<vmem>> -> memref<1x16xi32, #tpu.memory_space<vmem>>
    %503 = tpu.memref_slice %arg4[%c0_i32_284] : memref<1x!tpu.dma_semaphore, #tpu.memory_space<semaphore_mem>> -> memref<1x!tpu.dma_semaphore, #tpu.memory_space<semaphore_mem>>
    %504 = tpu.memref_squeeze %503 : memref<1x!tpu.dma_semaphore, #tpu.memory_space<semaphore_mem>> -> memref<!tpu.dma_semaphore, #tpu.memory_space<semaphore_mem>>
    tpu.enqueue_dma source(%501 : memref<1x16xi32, #tpu.memory_space<any>>) target(%502 : memref<1x16xi32, #tpu.memory_space<vmem>>) target_semaphore(%504 : memref<!tpu.dma_semaphore, #tpu.memory_space<semaphore_mem>>)
    %c72_i32 = arith.constant 72 : i32
    %505 = arith.addi %0, %c72_i32 : i32
    %506 = arith.index_cast %505 : i32 to index
    %507 = memref.load %arg1[%506] : memref<128xi32, #tpu.memory_space<smem>>
    %c0_i32_288 = arith.constant 0 : i32
    %c0_i32_289 = arith.constant 0 : i32
    %508 = tpu.memref_slice %arg2[%507, %c0_i32_289] : memref<100x16xi32, #tpu.memory_space<any>> -> memref<1x16xi32, #tpu.memory_space<any>>
    %c72_i32_290 = arith.constant 72 : i32
    %c0_i32_291 = arith.constant 0 : i32
    %509 = tpu.memref_slice %arg3[%c72_i32_290, %c0_i32_291] : memref<128x16xi32, #tpu.memory_space<vmem>> -> memref<1x16xi32, #tpu.memory_space<vmem>>
    %510 = tpu.memref_slice %arg4[%c0_i32_288] : memref<1x!tpu.dma_semaphore, #tpu.memory_space<semaphore_mem>> -> memref<1x!tpu.dma_semaphore, #tpu.memory_space<semaphore_mem>>
    %511 = tpu.memref_squeeze %510 : memref<1x!tpu.dma_semaphore, #tpu.memory_space<semaphore_mem>> -> memref<!tpu.dma_semaphore, #tpu.memory_space<semaphore_mem>>
    tpu.enqueue_dma source(%508 : memref<1x16xi32, #tpu.memory_space<any>>) target(%509 : memref<1x16xi32, #tpu.memory_space<vmem>>) target_semaphore(%511 : memref<!tpu.dma_semaphore, #tpu.memory_space<semaphore_mem>>)
    %c73_i32 = arith.constant 73 : i32
    %512 = arith.addi %0, %c73_i32 : i32
    %513 = arith.index_cast %512 : i32 to index
    %514 = memref.load %arg1[%513] : memref<128xi32, #tpu.memory_space<smem>>
    %c0_i32_292 = arith.constant 0 : i32
    %c0_i32_293 = arith.constant 0 : i32
    %515 = tpu.memref_slice %arg2[%514, %c0_i32_293] : memref<100x16xi32, #tpu.memory_space<any>> -> memref<1x16xi32, #tpu.memory_space<any>>
    %c73_i32_294 = arith.constant 73 : i32
    %c0_i32_295 = arith.constant 0 : i32
    %516 = tpu.memref_slice %arg3[%c73_i32_294, %c0_i32_295] : memref<128x16xi32, #tpu.memory_space<vmem>> -> memref<1x16xi32, #tpu.memory_space<vmem>>
    %517 = tpu.memref_slice %arg4[%c0_i32_292] : memref<1x!tpu.dma_semaphore, #tpu.memory_space<semaphore_mem>> -> memref<1x!tpu.dma_semaphore, #tpu.memory_space<semaphore_mem>>
    %518 = tpu.memref_squeeze %517 : memref<1x!tpu.dma_semaphore, #tpu.memory_space<semaphore_mem>> -> memref<!tpu.dma_semaphore, #tpu.memory_space<semaphore_mem>>
    tpu.enqueue_dma source(%515 : memref<1x16xi32, #tpu.memory_space<any>>) target(%516 : memref<1x16xi32, #tpu.memory_space<vmem>>) target_semaphore(%518 : memref<!tpu.dma_semaphore, #tpu.memory_space<semaphore_mem>>)
    %c74_i32 = arith.constant 74 : i32
    %519 = arith.addi %0, %c74_i32 : i32
    %520 = arith.index_cast %519 : i32 to index
    %521 = memref.load %arg1[%520] : memref<128xi32, #tpu.memory_space<smem>>
    %c0_i32_296 = arith.constant 0 : i32
    %c0_i32_297 = arith.constant 0 : i32
    %522 = tpu.memref_slice %arg2[%521, %c0_i32_297] : memref<100x16xi32, #tpu.memory_space<any>> -> memref<1x16xi32, #tpu.memory_space<any>>
    %c74_i32_298 = arith.constant 74 : i32
    %c0_i32_299 = arith.constant 0 : i32
    %523 = tpu.memref_slice %arg3[%c74_i32_298, %c0_i32_299] : memref<128x16xi32, #tpu.memory_space<vmem>> -> memref<1x16xi32, #tpu.memory_space<vmem>>
    %524 = tpu.memref_slice %arg4[%c0_i32_296] : memref<1x!tpu.dma_semaphore, #tpu.memory_space<semaphore_mem>> -> memref<1x!tpu.dma_semaphore, #tpu.memory_space<semaphore_mem>>
    %525 = tpu.memref_squeeze %524 : memref<1x!tpu.dma_semaphore, #tpu.memory_space<semaphore_mem>> -> memref<!tpu.dma_semaphore, #tpu.memory_space<semaphore_mem>>
    tpu.enqueue_dma source(%522 : memref<1x16xi32, #tpu.memory_space<any>>) target(%523 : memref<1x16xi32, #tpu.memory_space<vmem>>) target_semaphore(%525 : memref<!tpu.dma_semaphore, #tpu.memory_space<semaphore_mem>>)
    %c75_i32 = arith.constant 75 : i32
    %526 = arith.addi %0, %c75_i32 : i32
    %527 = arith.index_cast %526 : i32 to index
    %528 = memref.load %arg1[%527] : memref<128xi32, #tpu.memory_space<smem>>
    %c0_i32_300 = arith.constant 0 : i32
    %c0_i32_301 = arith.constant 0 : i32
    %529 = tpu.memref_slice %arg2[%528, %c0_i32_301] : memref<100x16xi32, #tpu.memory_space<any>> -> memref<1x16xi32, #tpu.memory_space<any>>
    %c75_i32_302 = arith.constant 75 : i32
    %c0_i32_303 = arith.constant 0 : i32
    %530 = tpu.memref_slice %arg3[%c75_i32_302, %c0_i32_303] : memref<128x16xi32, #tpu.memory_space<vmem>> -> memref<1x16xi32, #tpu.memory_space<vmem>>
    %531 = tpu.memref_slice %arg4[%c0_i32_300] : memref<1x!tpu.dma_semaphore, #tpu.memory_space<semaphore_mem>> -> memref<1x!tpu.dma_semaphore, #tpu.memory_space<semaphore_mem>>
    %532 = tpu.memref_squeeze %531 : memref<1x!tpu.dma_semaphore, #tpu.memory_space<semaphore_mem>> -> memref<!tpu.dma_semaphore, #tpu.memory_space<semaphore_mem>>
    tpu.enqueue_dma source(%529 : memref<1x16xi32, #tpu.memory_space<any>>) target(%530 : memref<1x16xi32, #tpu.memory_space<vmem>>) target_semaphore(%532 : memref<!tpu.dma_semaphore, #tpu.memory_space<semaphore_mem>>)
    %c76_i32 = arith.constant 76 : i32
    %533 = arith.addi %0, %c76_i32 : i32
    %534 = arith.index_cast %533 : i32 to index
    %535 = memref.load %arg1[%534] : memref<128xi32, #tpu.memory_space<smem>>
    %c0_i32_304 = arith.constant 0 : i32
    %c0_i32_305 = arith.constant 0 : i32
    %536 = tpu.memref_slice %arg2[%535, %c0_i32_305] : memref<100x16xi32, #tpu.memory_space<any>> -> memref<1x16xi32, #tpu.memory_space<any>>
    %c76_i32_306 = arith.constant 76 : i32
    %c0_i32_307 = arith.constant 0 : i32
    %537 = tpu.memref_slice %arg3[%c76_i32_306, %c0_i32_307] : memref<128x16xi32, #tpu.memory_space<vmem>> -> memref<1x16xi32, #tpu.memory_space<vmem>>
    %538 = tpu.memref_slice %arg4[%c0_i32_304] : memref<1x!tpu.dma_semaphore, #tpu.memory_space<semaphore_mem>> -> memref<1x!tpu.dma_semaphore, #tpu.memory_space<semaphore_mem>>
    %539 = tpu.memref_squeeze %538 : memref<1x!tpu.dma_semaphore, #tpu.memory_space<semaphore_mem>> -> memref<!tpu.dma_semaphore, #tpu.memory_space<semaphore_mem>>
    tpu.enqueue_dma source(%536 : memref<1x16xi32, #tpu.memory_space<any>>) target(%537 : memref<1x16xi32, #tpu.memory_space<vmem>>) target_semaphore(%539 : memref<!tpu.dma_semaphore, #tpu.memory_space<semaphore_mem>>)
    %c77_i32 = arith.constant 77 : i32
    %540 = arith.addi %0, %c77_i32 : i32
    %541 = arith.index_cast %540 : i32 to index
    %542 = memref.load %arg1[%541] : memref<128xi32, #tpu.memory_space<smem>>
    %c0_i32_308 = arith.constant 0 : i32
    %c0_i32_309 = arith.constant 0 : i32
    %543 = tpu.memref_slice %arg2[%542, %c0_i32_309] : memref<100x16xi32, #tpu.memory_space<any>> -> memref<1x16xi32, #tpu.memory_space<any>>
    %c77_i32_310 = arith.constant 77 : i32
    %c0_i32_311 = arith.constant 0 : i32
    %544 = tpu.memref_slice %arg3[%c77_i32_310, %c0_i32_311] : memref<128x16xi32, #tpu.memory_space<vmem>> -> memref<1x16xi32, #tpu.memory_space<vmem>>
    %545 = tpu.memref_slice %arg4[%c0_i32_308] : memref<1x!tpu.dma_semaphore, #tpu.memory_space<semaphore_mem>> -> memref<1x!tpu.dma_semaphore, #tpu.memory_space<semaphore_mem>>
    %546 = tpu.memref_squeeze %545 : memref<1x!tpu.dma_semaphore, #tpu.memory_space<semaphore_mem>> -> memref<!tpu.dma_semaphore, #tpu.memory_space<semaphore_mem>>
    tpu.enqueue_dma source(%543 : memref<1x16xi32, #tpu.memory_space<any>>) target(%544 : memref<1x16xi32, #tpu.memory_space<vmem>>) target_semaphore(%546 : memref<!tpu.dma_semaphore, #tpu.memory_space<semaphore_mem>>)
    %c78_i32 = arith.constant 78 : i32
    %547 = arith.addi %0, %c78_i32 : i32
    %548 = arith.index_cast %547 : i32 to index
    %549 = memref.load %arg1[%548] : memref<128xi32, #tpu.memory_space<smem>>
    %c0_i32_312 = arith.constant 0 : i32
    %c0_i32_313 = arith.constant 0 : i32
    %550 = tpu.memref_slice %arg2[%549, %c0_i32_313] : memref<100x16xi32, #tpu.memory_space<any>> -> memref<1x16xi32, #tpu.memory_space<any>>
    %c78_i32_314 = arith.constant 78 : i32
    %c0_i32_315 = arith.constant 0 : i32
    %551 = tpu.memref_slice %arg3[%c78_i32_314, %c0_i32_315] : memref<128x16xi32, #tpu.memory_space<vmem>> -> memref<1x16xi32, #tpu.memory_space<vmem>>
    %552 = tpu.memref_slice %arg4[%c0_i32_312] : memref<1x!tpu.dma_semaphore, #tpu.memory_space<semaphore_mem>> -> memref<1x!tpu.dma_semaphore, #tpu.memory_space<semaphore_mem>>
    %553 = tpu.memref_squeeze %552 : memref<1x!tpu.dma_semaphore, #tpu.memory_space<semaphore_mem>> -> memref<!tpu.dma_semaphore, #tpu.memory_space<semaphore_mem>>
    tpu.enqueue_dma source(%550 : memref<1x16xi32, #tpu.memory_space<any>>) target(%551 : memref<1x16xi32, #tpu.memory_space<vmem>>) target_semaphore(%553 : memref<!tpu.dma_semaphore, #tpu.memory_space<semaphore_mem>>)
    %c79_i32 = arith.constant 79 : i32
    %554 = arith.addi %0, %c79_i32 : i32
    %555 = arith.index_cast %554 : i32 to index
    %556 = memref.load %arg1[%555] : memref<128xi32, #tpu.memory_space<smem>>
    %c0_i32_316 = arith.constant 0 : i32
    %c0_i32_317 = arith.constant 0 : i32
    %557 = tpu.memref_slice %arg2[%556, %c0_i32_317] : memref<100x16xi32, #tpu.memory_space<any>> -> memref<1x16xi32, #tpu.memory_space<any>>
    %c79_i32_318 = arith.constant 79 : i32
    %c0_i32_319 = arith.constant 0 : i32
    %558 = tpu.memref_slice %arg3[%c79_i32_318, %c0_i32_319] : memref<128x16xi32, #tpu.memory_space<vmem>> -> memref<1x16xi32, #tpu.memory_space<vmem>>
    %559 = tpu.memref_slice %arg4[%c0_i32_316] : memref<1x!tpu.dma_semaphore, #tpu.memory_space<semaphore_mem>> -> memref<1x!tpu.dma_semaphore, #tpu.memory_space<semaphore_mem>>
    %560 = tpu.memref_squeeze %559 : memref<1x!tpu.dma_semaphore, #tpu.memory_space<semaphore_mem>> -> memref<!tpu.dma_semaphore, #tpu.memory_space<semaphore_mem>>
    tpu.enqueue_dma source(%557 : memref<1x16xi32, #tpu.memory_space<any>>) target(%558 : memref<1x16xi32, #tpu.memory_space<vmem>>) target_semaphore(%560 : memref<!tpu.dma_semaphore, #tpu.memory_space<semaphore_mem>>)
    %c80_i32 = arith.constant 80 : i32
    %561 = arith.addi %0, %c80_i32 : i32
    %562 = arith.index_cast %561 : i32 to index
    %563 = memref.load %arg1[%562] : memref<128xi32, #tpu.memory_space<smem>>
    %c0_i32_320 = arith.constant 0 : i32
    %c0_i32_321 = arith.constant 0 : i32
    %564 = tpu.memref_slice %arg2[%563, %c0_i32_321] : memref<100x16xi32, #tpu.memory_space<any>> -> memref<1x16xi32, #tpu.memory_space<any>>
    %c80_i32_322 = arith.constant 80 : i32
    %c0_i32_323 = arith.constant 0 : i32
    %565 = tpu.memref_slice %arg3[%c80_i32_322, %c0_i32_323] : memref<128x16xi32, #tpu.memory_space<vmem>> -> memref<1x16xi32, #tpu.memory_space<vmem>>
    %566 = tpu.memref_slice %arg4[%c0_i32_320] : memref<1x!tpu.dma_semaphore, #tpu.memory_space<semaphore_mem>> -> memref<1x!tpu.dma_semaphore, #tpu.memory_space<semaphore_mem>>
    %567 = tpu.memref_squeeze %566 : memref<1x!tpu.dma_semaphore, #tpu.memory_space<semaphore_mem>> -> memref<!tpu.dma_semaphore, #tpu.memory_space<semaphore_mem>>
    tpu.enqueue_dma source(%564 : memref<1x16xi32, #tpu.memory_space<any>>) target(%565 : memref<1x16xi32, #tpu.memory_space<vmem>>) target_semaphore(%567 : memref<!tpu.dma_semaphore, #tpu.memory_space<semaphore_mem>>)
    %c81_i32 = arith.constant 81 : i32
    %568 = arith.addi %0, %c81_i32 : i32
    %569 = arith.index_cast %568 : i32 to index
    %570 = memref.load %arg1[%569] : memref<128xi32, #tpu.memory_space<smem>>
    %c0_i32_324 = arith.constant 0 : i32
    %c0_i32_325 = arith.constant 0 : i32
    %571 = tpu.memref_slice %arg2[%570, %c0_i32_325] : memref<100x16xi32, #tpu.memory_space<any>> -> memref<1x16xi32, #tpu.memory_space<any>>
    %c81_i32_326 = arith.constant 81 : i32
    %c0_i32_327 = arith.constant 0 : i32
    %572 = tpu.memref_slice %arg3[%c81_i32_326, %c0_i32_327] : memref<128x16xi32, #tpu.memory_space<vmem>> -> memref<1x16xi32, #tpu.memory_space<vmem>>
    %573 = tpu.memref_slice %arg4[%c0_i32_324] : memref<1x!tpu.dma_semaphore, #tpu.memory_space<semaphore_mem>> -> memref<1x!tpu.dma_semaphore, #tpu.memory_space<semaphore_mem>>
    %574 = tpu.memref_squeeze %573 : memref<1x!tpu.dma_semaphore, #tpu.memory_space<semaphore_mem>> -> memref<!tpu.dma_semaphore, #tpu.memory_space<semaphore_mem>>
    tpu.enqueue_dma source(%571 : memref<1x16xi32, #tpu.memory_space<any>>) target(%572 : memref<1x16xi32, #tpu.memory_space<vmem>>) target_semaphore(%574 : memref<!tpu.dma_semaphore, #tpu.memory_space<semaphore_mem>>)
    %c82_i32 = arith.constant 82 : i32
    %575 = arith.addi %0, %c82_i32 : i32
    %576 = arith.index_cast %575 : i32 to index
    %577 = memref.load %arg1[%576] : memref<128xi32, #tpu.memory_space<smem>>
    %c0_i32_328 = arith.constant 0 : i32
    %c0_i32_329 = arith.constant 0 : i32
    %578 = tpu.memref_slice %arg2[%577, %c0_i32_329] : memref<100x16xi32, #tpu.memory_space<any>> -> memref<1x16xi32, #tpu.memory_space<any>>
    %c82_i32_330 = arith.constant 82 : i32
    %c0_i32_331 = arith.constant 0 : i32
    %579 = tpu.memref_slice %arg3[%c82_i32_330, %c0_i32_331] : memref<128x16xi32, #tpu.memory_space<vmem>> -> memref<1x16xi32, #tpu.memory_space<vmem>>
    %580 = tpu.memref_slice %arg4[%c0_i32_328] : memref<1x!tpu.dma_semaphore, #tpu.memory_space<semaphore_mem>> -> memref<1x!tpu.dma_semaphore, #tpu.memory_space<semaphore_mem>>
    %581 = tpu.memref_squeeze %580 : memref<1x!tpu.dma_semaphore, #tpu.memory_space<semaphore_mem>> -> memref<!tpu.dma_semaphore, #tpu.memory_space<semaphore_mem>>
    tpu.enqueue_dma source(%578 : memref<1x16xi32, #tpu.memory_space<any>>) target(%579 : memref<1x16xi32, #tpu.memory_space<vmem>>) target_semaphore(%581 : memref<!tpu.dma_semaphore, #tpu.memory_space<semaphore_mem>>)
    %c83_i32 = arith.constant 83 : i32
    %582 = arith.addi %0, %c83_i32 : i32
    %583 = arith.index_cast %582 : i32 to index
    %584 = memref.load %arg1[%583] : memref<128xi32, #tpu.memory_space<smem>>
    %c0_i32_332 = arith.constant 0 : i32
    %c0_i32_333 = arith.constant 0 : i32
    %585 = tpu.memref_slice %arg2[%584, %c0_i32_333] : memref<100x16xi32, #tpu.memory_space<any>> -> memref<1x16xi32, #tpu.memory_space<any>>
    %c83_i32_334 = arith.constant 83 : i32
    %c0_i32_335 = arith.constant 0 : i32
    %586 = tpu.memref_slice %arg3[%c83_i32_334, %c0_i32_335] : memref<128x16xi32, #tpu.memory_space<vmem>> -> memref<1x16xi32, #tpu.memory_space<vmem>>
    %587 = tpu.memref_slice %arg4[%c0_i32_332] : memref<1x!tpu.dma_semaphore, #tpu.memory_space<semaphore_mem>> -> memref<1x!tpu.dma_semaphore, #tpu.memory_space<semaphore_mem>>
    %588 = tpu.memref_squeeze %587 : memref<1x!tpu.dma_semaphore, #tpu.memory_space<semaphore_mem>> -> memref<!tpu.dma_semaphore, #tpu.memory_space<semaphore_mem>>
    tpu.enqueue_dma source(%585 : memref<1x16xi32, #tpu.memory_space<any>>) target(%586 : memref<1x16xi32, #tpu.memory_space<vmem>>) target_semaphore(%588 : memref<!tpu.dma_semaphore, #tpu.memory_space<semaphore_mem>>)
    %c84_i32 = arith.constant 84 : i32
    %589 = arith.addi %0, %c84_i32 : i32
    %590 = arith.index_cast %589 : i32 to index
    %591 = memref.load %arg1[%590] : memref<128xi32, #tpu.memory_space<smem>>
    %c0_i32_336 = arith.constant 0 : i32
    %c0_i32_337 = arith.constant 0 : i32
    %592 = tpu.memref_slice %arg2[%591, %c0_i32_337] : memref<100x16xi32, #tpu.memory_space<any>> -> memref<1x16xi32, #tpu.memory_space<any>>
    %c84_i32_338 = arith.constant 84 : i32
    %c0_i32_339 = arith.constant 0 : i32
    %593 = tpu.memref_slice %arg3[%c84_i32_338, %c0_i32_339] : memref<128x16xi32, #tpu.memory_space<vmem>> -> memref<1x16xi32, #tpu.memory_space<vmem>>
    %594 = tpu.memref_slice %arg4[%c0_i32_336] : memref<1x!tpu.dma_semaphore, #tpu.memory_space<semaphore_mem>> -> memref<1x!tpu.dma_semaphore, #tpu.memory_space<semaphore_mem>>
    %595 = tpu.memref_squeeze %594 : memref<1x!tpu.dma_semaphore, #tpu.memory_space<semaphore_mem>> -> memref<!tpu.dma_semaphore, #tpu.memory_space<semaphore_mem>>
    tpu.enqueue_dma source(%592 : memref<1x16xi32, #tpu.memory_space<any>>) target(%593 : memref<1x16xi32, #tpu.memory_space<vmem>>) target_semaphore(%595 : memref<!tpu.dma_semaphore, #tpu.memory_space<semaphore_mem>>)
    %c85_i32 = arith.constant 85 : i32
    %596 = arith.addi %0, %c85_i32 : i32
    %597 = arith.index_cast %596 : i32 to index
    %598 = memref.load %arg1[%597] : memref<128xi32, #tpu.memory_space<smem>>
    %c0_i32_340 = arith.constant 0 : i32
    %c0_i32_341 = arith.constant 0 : i32
    %599 = tpu.memref_slice %arg2[%598, %c0_i32_341] : memref<100x16xi32, #tpu.memory_space<any>> -> memref<1x16xi32, #tpu.memory_space<any>>
    %c85_i32_342 = arith.constant 85 : i32
    %c0_i32_343 = arith.constant 0 : i32
    %600 = tpu.memref_slice %arg3[%c85_i32_342, %c0_i32_343] : memref<128x16xi32, #tpu.memory_space<vmem>> -> memref<1x16xi32, #tpu.memory_space<vmem>>
    %601 = tpu.memref_slice %arg4[%c0_i32_340] : memref<1x!tpu.dma_semaphore, #tpu.memory_space<semaphore_mem>> -> memref<1x!tpu.dma_semaphore, #tpu.memory_space<semaphore_mem>>
    %602 = tpu.memref_squeeze %601 : memref<1x!tpu.dma_semaphore, #tpu.memory_space<semaphore_mem>> -> memref<!tpu.dma_semaphore, #tpu.memory_space<semaphore_mem>>
    tpu.enqueue_dma source(%599 : memref<1x16xi32, #tpu.memory_space<any>>) target(%600 : memref<1x16xi32, #tpu.memory_space<vmem>>) target_semaphore(%602 : memref<!tpu.dma_semaphore, #tpu.memory_space<semaphore_mem>>)
    %c86_i32 = arith.constant 86 : i32
    %603 = arith.addi %0, %c86_i32 : i32
    %604 = arith.index_cast %603 : i32 to index
    %605 = memref.load %arg1[%604] : memref<128xi32, #tpu.memory_space<smem>>
    %c0_i32_344 = arith.constant 0 : i32
    %c0_i32_345 = arith.constant 0 : i32
    %606 = tpu.memref_slice %arg2[%605, %c0_i32_345] : memref<100x16xi32, #tpu.memory_space<any>> -> memref<1x16xi32, #tpu.memory_space<any>>
    %c86_i32_346 = arith.constant 86 : i32
    %c0_i32_347 = arith.constant 0 : i32
    %607 = tpu.memref_slice %arg3[%c86_i32_346, %c0_i32_347] : memref<128x16xi32, #tpu.memory_space<vmem>> -> memref<1x16xi32, #tpu.memory_space<vmem>>
    %608 = tpu.memref_slice %arg4[%c0_i32_344] : memref<1x!tpu.dma_semaphore, #tpu.memory_space<semaphore_mem>> -> memref<1x!tpu.dma_semaphore, #tpu.memory_space<semaphore_mem>>
    %609 = tpu.memref_squeeze %608 : memref<1x!tpu.dma_semaphore, #tpu.memory_space<semaphore_mem>> -> memref<!tpu.dma_semaphore, #tpu.memory_space<semaphore_mem>>
    tpu.enqueue_dma source(%606 : memref<1x16xi32, #tpu.memory_space<any>>) target(%607 : memref<1x16xi32, #tpu.memory_space<vmem>>) target_semaphore(%609 : memref<!tpu.dma_semaphore, #tpu.memory_space<semaphore_mem>>)
    %c87_i32 = arith.constant 87 : i32
    %610 = arith.addi %0, %c87_i32 : i32
    %611 = arith.index_cast %610 : i32 to index
    %612 = memref.load %arg1[%611] : memref<128xi32, #tpu.memory_space<smem>>
    %c0_i32_348 = arith.constant 0 : i32
    %c0_i32_349 = arith.constant 0 : i32
    %613 = tpu.memref_slice %arg2[%612, %c0_i32_349] : memref<100x16xi32, #tpu.memory_space<any>> -> memref<1x16xi32, #tpu.memory_space<any>>
    %c87_i32_350 = arith.constant 87 : i32
    %c0_i32_351 = arith.constant 0 : i32
    %614 = tpu.memref_slice %arg3[%c87_i32_350, %c0_i32_351] : memref<128x16xi32, #tpu.memory_space<vmem>> -> memref<1x16xi32, #tpu.memory_space<vmem>>
    %615 = tpu.memref_slice %arg4[%c0_i32_348] : memref<1x!tpu.dma_semaphore, #tpu.memory_space<semaphore_mem>> -> memref<1x!tpu.dma_semaphore, #tpu.memory_space<semaphore_mem>>
    %616 = tpu.memref_squeeze %615 : memref<1x!tpu.dma_semaphore, #tpu.memory_space<semaphore_mem>> -> memref<!tpu.dma_semaphore, #tpu.memory_space<semaphore_mem>>
    tpu.enqueue_dma source(%613 : memref<1x16xi32, #tpu.memory_space<any>>) target(%614 : memref<1x16xi32, #tpu.memory_space<vmem>>) target_semaphore(%616 : memref<!tpu.dma_semaphore, #tpu.memory_space<semaphore_mem>>)
    %c88_i32 = arith.constant 88 : i32
    %617 = arith.addi %0, %c88_i32 : i32
    %618 = arith.index_cast %617 : i32 to index
    %619 = memref.load %arg1[%618] : memref<128xi32, #tpu.memory_space<smem>>
    %c0_i32_352 = arith.constant 0 : i32
    %c0_i32_353 = arith.constant 0 : i32
    %620 = tpu.memref_slice %arg2[%619, %c0_i32_353] : memref<100x16xi32, #tpu.memory_space<any>> -> memref<1x16xi32, #tpu.memory_space<any>>
    %c88_i32_354 = arith.constant 88 : i32
    %c0_i32_355 = arith.constant 0 : i32
    %621 = tpu.memref_slice %arg3[%c88_i32_354, %c0_i32_355] : memref<128x16xi32, #tpu.memory_space<vmem>> -> memref<1x16xi32, #tpu.memory_space<vmem>>
    %622 = tpu.memref_slice %arg4[%c0_i32_352] : memref<1x!tpu.dma_semaphore, #tpu.memory_space<semaphore_mem>> -> memref<1x!tpu.dma_semaphore, #tpu.memory_space<semaphore_mem>>
    %623 = tpu.memref_squeeze %622 : memref<1x!tpu.dma_semaphore, #tpu.memory_space<semaphore_mem>> -> memref<!tpu.dma_semaphore, #tpu.memory_space<semaphore_mem>>
    tpu.enqueue_dma source(%620 : memref<1x16xi32, #tpu.memory_space<any>>) target(%621 : memref<1x16xi32, #tpu.memory_space<vmem>>) target_semaphore(%623 : memref<!tpu.dma_semaphore, #tpu.memory_space<semaphore_mem>>)
    %c89_i32 = arith.constant 89 : i32
    %624 = arith.addi %0, %c89_i32 : i32
    %625 = arith.index_cast %624 : i32 to index
    %626 = memref.load %arg1[%625] : memref<128xi32, #tpu.memory_space<smem>>
    %c0_i32_356 = arith.constant 0 : i32
    %c0_i32_357 = arith.constant 0 : i32
    %627 = tpu.memref_slice %arg2[%626, %c0_i32_357] : memref<100x16xi32, #tpu.memory_space<any>> -> memref<1x16xi32, #tpu.memory_space<any>>
    %c89_i32_358 = arith.constant 89 : i32
    %c0_i32_359 = arith.constant 0 : i32
    %628 = tpu.memref_slice %arg3[%c89_i32_358, %c0_i32_359] : memref<128x16xi32, #tpu.memory_space<vmem>> -> memref<1x16xi32, #tpu.memory_space<vmem>>
    %629 = tpu.memref_slice %arg4[%c0_i32_356] : memref<1x!tpu.dma_semaphore, #tpu.memory_space<semaphore_mem>> -> memref<1x!tpu.dma_semaphore, #tpu.memory_space<semaphore_mem>>
    %630 = tpu.memref_squeeze %629 : memref<1x!tpu.dma_semaphore, #tpu.memory_space<semaphore_mem>> -> memref<!tpu.dma_semaphore, #tpu.memory_space<semaphore_mem>>
    tpu.enqueue_dma source(%627 : memref<1x16xi32, #tpu.memory_space<any>>) target(%628 : memref<1x16xi32, #tpu.memory_space<vmem>>) target_semaphore(%630 : memref<!tpu.dma_semaphore, #tpu.memory_space<semaphore_mem>>)
    %c90_i32 = arith.constant 90 : i32
    %631 = arith.addi %0, %c90_i32 : i32
    %632 = arith.index_cast %631 : i32 to index
    %633 = memref.load %arg1[%632] : memref<128xi32, #tpu.memory_space<smem>>
    %c0_i32_360 = arith.constant 0 : i32
    %c0_i32_361 = arith.constant 0 : i32
    %634 = tpu.memref_slice %arg2[%633, %c0_i32_361] : memref<100x16xi32, #tpu.memory_space<any>> -> memref<1x16xi32, #tpu.memory_space<any>>
    %c90_i32_362 = arith.constant 90 : i32
    %c0_i32_363 = arith.constant 0 : i32
    %635 = tpu.memref_slice %arg3[%c90_i32_362, %c0_i32_363] : memref<128x16xi32, #tpu.memory_space<vmem>> -> memref<1x16xi32, #tpu.memory_space<vmem>>
    %636 = tpu.memref_slice %arg4[%c0_i32_360] : memref<1x!tpu.dma_semaphore, #tpu.memory_space<semaphore_mem>> -> memref<1x!tpu.dma_semaphore, #tpu.memory_space<semaphore_mem>>
    %637 = tpu.memref_squeeze %636 : memref<1x!tpu.dma_semaphore, #tpu.memory_space<semaphore_mem>> -> memref<!tpu.dma_semaphore, #tpu.memory_space<semaphore_mem>>
    tpu.enqueue_dma source(%634 : memref<1x16xi32, #tpu.memory_space<any>>) target(%635 : memref<1x16xi32, #tpu.memory_space<vmem>>) target_semaphore(%637 : memref<!tpu.dma_semaphore, #tpu.memory_space<semaphore_mem>>)
    %c91_i32 = arith.constant 91 : i32
    %638 = arith.addi %0, %c91_i32 : i32
    %639 = arith.index_cast %638 : i32 to index
    %640 = memref.load %arg1[%639] : memref<128xi32, #tpu.memory_space<smem>>
    %c0_i32_364 = arith.constant 0 : i32
    %c0_i32_365 = arith.constant 0 : i32
    %641 = tpu.memref_slice %arg2[%640, %c0_i32_365] : memref<100x16xi32, #tpu.memory_space<any>> -> memref<1x16xi32, #tpu.memory_space<any>>
    %c91_i32_366 = arith.constant 91 : i32
    %c0_i32_367 = arith.constant 0 : i32
    %642 = tpu.memref_slice %arg3[%c91_i32_366, %c0_i32_367] : memref<128x16xi32, #tpu.memory_space<vmem>> -> memref<1x16xi32, #tpu.memory_space<vmem>>
    %643 = tpu.memref_slice %arg4[%c0_i32_364] : memref<1x!tpu.dma_semaphore, #tpu.memory_space<semaphore_mem>> -> memref<1x!tpu.dma_semaphore, #tpu.memory_space<semaphore_mem>>
    %644 = tpu.memref_squeeze %643 : memref<1x!tpu.dma_semaphore, #tpu.memory_space<semaphore_mem>> -> memref<!tpu.dma_semaphore, #tpu.memory_space<semaphore_mem>>
    tpu.enqueue_dma source(%641 : memref<1x16xi32, #tpu.memory_space<any>>) target(%642 : memref<1x16xi32, #tpu.memory_space<vmem>>) target_semaphore(%644 : memref<!tpu.dma_semaphore, #tpu.memory_space<semaphore_mem>>)
    %c92_i32 = arith.constant 92 : i32
    %645 = arith.addi %0, %c92_i32 : i32
    %646 = arith.index_cast %645 : i32 to index
    %647 = memref.load %arg1[%646] : memref<128xi32, #tpu.memory_space<smem>>
    %c0_i32_368 = arith.constant 0 : i32
    %c0_i32_369 = arith.constant 0 : i32
    %648 = tpu.memref_slice %arg2[%647, %c0_i32_369] : memref<100x16xi32, #tpu.memory_space<any>> -> memref<1x16xi32, #tpu.memory_space<any>>
    %c92_i32_370 = arith.constant 92 : i32
    %c0_i32_371 = arith.constant 0 : i32
    %649 = tpu.memref_slice %arg3[%c92_i32_370, %c0_i32_371] : memref<128x16xi32, #tpu.memory_space<vmem>> -> memref<1x16xi32, #tpu.memory_space<vmem>>
    %650 = tpu.memref_slice %arg4[%c0_i32_368] : memref<1x!tpu.dma_semaphore, #tpu.memory_space<semaphore_mem>> -> memref<1x!tpu.dma_semaphore, #tpu.memory_space<semaphore_mem>>
    %651 = tpu.memref_squeeze %650 : memref<1x!tpu.dma_semaphore, #tpu.memory_space<semaphore_mem>> -> memref<!tpu.dma_semaphore, #tpu.memory_space<semaphore_mem>>
    tpu.enqueue_dma source(%648 : memref<1x16xi32, #tpu.memory_space<any>>) target(%649 : memref<1x16xi32, #tpu.memory_space<vmem>>) target_semaphore(%651 : memref<!tpu.dma_semaphore, #tpu.memory_space<semaphore_mem>>)
    %c93_i32 = arith.constant 93 : i32
    %652 = arith.addi %0, %c93_i32 : i32
    %653 = arith.index_cast %652 : i32 to index
    %654 = memref.load %arg1[%653] : memref<128xi32, #tpu.memory_space<smem>>
    %c0_i32_372 = arith.constant 0 : i32
    %c0_i32_373 = arith.constant 0 : i32
    %655 = tpu.memref_slice %arg2[%654, %c0_i32_373] : memref<100x16xi32, #tpu.memory_space<any>> -> memref<1x16xi32, #tpu.memory_space<any>>
    %c93_i32_374 = arith.constant 93 : i32
    %c0_i32_375 = arith.constant 0 : i32
    %656 = tpu.memref_slice %arg3[%c93_i32_374, %c0_i32_375] : memref<128x16xi32, #tpu.memory_space<vmem>> -> memref<1x16xi32, #tpu.memory_space<vmem>>
    %657 = tpu.memref_slice %arg4[%c0_i32_372] : memref<1x!tpu.dma_semaphore, #tpu.memory_space<semaphore_mem>> -> memref<1x!tpu.dma_semaphore, #tpu.memory_space<semaphore_mem>>
    %658 = tpu.memref_squeeze %657 : memref<1x!tpu.dma_semaphore, #tpu.memory_space<semaphore_mem>> -> memref<!tpu.dma_semaphore, #tpu.memory_space<semaphore_mem>>
    tpu.enqueue_dma source(%655 : memref<1x16xi32, #tpu.memory_space<any>>) target(%656 : memref<1x16xi32, #tpu.memory_space<vmem>>) target_semaphore(%658 : memref<!tpu.dma_semaphore, #tpu.memory_space<semaphore_mem>>)
    %c94_i32 = arith.constant 94 : i32
    %659 = arith.addi %0, %c94_i32 : i32
    %660 = arith.index_cast %659 : i32 to index
    %661 = memref.load %arg1[%660] : memref<128xi32, #tpu.memory_space<smem>>
    %c0_i32_376 = arith.constant 0 : i32
    %c0_i32_377 = arith.constant 0 : i32
    %662 = tpu.memref_slice %arg2[%661, %c0_i32_377] : memref<100x16xi32, #tpu.memory_space<any>> -> memref<1x16xi32, #tpu.memory_space<any>>
    %c94_i32_378 = arith.constant 94 : i32
    %c0_i32_379 = arith.constant 0 : i32
    %663 = tpu.memref_slice %arg3[%c94_i32_378, %c0_i32_379] : memref<128x16xi32, #tpu.memory_space<vmem>> -> memref<1x16xi32, #tpu.memory_space<vmem>>
    %664 = tpu.memref_slice %arg4[%c0_i32_376] : memref<1x!tpu.dma_semaphore, #tpu.memory_space<semaphore_mem>> -> memref<1x!tpu.dma_semaphore, #tpu.memory_space<semaphore_mem>>
    %665 = tpu.memref_squeeze %664 : memref<1x!tpu.dma_semaphore, #tpu.memory_space<semaphore_mem>> -> memref<!tpu.dma_semaphore, #tpu.memory_space<semaphore_mem>>
    tpu.enqueue_dma source(%662 : memref<1x16xi32, #tpu.memory_space<any>>) target(%663 : memref<1x16xi32, #tpu.memory_space<vmem>>) target_semaphore(%665 : memref<!tpu.dma_semaphore, #tpu.memory_space<semaphore_mem>>)
    %c95_i32 = arith.constant 95 : i32
    %666 = arith.addi %0, %c95_i32 : i32
    %667 = arith.index_cast %666 : i32 to index
    %668 = memref.load %arg1[%667] : memref<128xi32, #tpu.memory_space<smem>>
    %c0_i32_380 = arith.constant 0 : i32
    %c0_i32_381 = arith.constant 0 : i32
    %669 = tpu.memref_slice %arg2[%668, %c0_i32_381] : memref<100x16xi32, #tpu.memory_space<any>> -> memref<1x16xi32, #tpu.memory_space<any>>
    %c95_i32_382 = arith.constant 95 : i32
    %c0_i32_383 = arith.constant 0 : i32
    %670 = tpu.memref_slice %arg3[%c95_i32_382, %c0_i32_383] : memref<128x16xi32, #tpu.memory_space<vmem>> -> memref<1x16xi32, #tpu.memory_space<vmem>>
    %671 = tpu.memref_slice %arg4[%c0_i32_380] : memref<1x!tpu.dma_semaphore, #tpu.memory_space<semaphore_mem>> -> memref<1x!tpu.dma_semaphore, #tpu.memory_space<semaphore_mem>>
    %672 = tpu.memref_squeeze %671 : memref<1x!tpu.dma_semaphore, #tpu.memory_space<semaphore_mem>> -> memref<!tpu.dma_semaphore, #tpu.memory_space<semaphore_mem>>
    tpu.enqueue_dma source(%669 : memref<1x16xi32, #tpu.memory_space<any>>) target(%670 : memref<1x16xi32, #tpu.memory_space<vmem>>) target_semaphore(%672 : memref<!tpu.dma_semaphore, #tpu.memory_space<semaphore_mem>>)
    %c96_i32 = arith.constant 96 : i32
    %673 = arith.addi %0, %c96_i32 : i32
    %674 = arith.index_cast %673 : i32 to index
    %675 = memref.load %arg1[%674] : memref<128xi32, #tpu.memory_space<smem>>
    %c0_i32_384 = arith.constant 0 : i32
    %c0_i32_385 = arith.constant 0 : i32
    %676 = tpu.memref_slice %arg2[%675, %c0_i32_385] : memref<100x16xi32, #tpu.memory_space<any>> -> memref<1x16xi32, #tpu.memory_space<any>>
    %c96_i32_386 = arith.constant 96 : i32
    %c0_i32_387 = arith.constant 0 : i32
    %677 = tpu.memref_slice %arg3[%c96_i32_386, %c0_i32_387] : memref<128x16xi32, #tpu.memory_space<vmem>> -> memref<1x16xi32, #tpu.memory_space<vmem>>
    %678 = tpu.memref_slice %arg4[%c0_i32_384] : memref<1x!tpu.dma_semaphore, #tpu.memory_space<semaphore_mem>> -> memref<1x!tpu.dma_semaphore, #tpu.memory_space<semaphore_mem>>
    %679 = tpu.memref_squeeze %678 : memref<1x!tpu.dma_semaphore, #tpu.memory_space<semaphore_mem>> -> memref<!tpu.dma_semaphore, #tpu.memory_space<semaphore_mem>>
    tpu.enqueue_dma source(%676 : memref<1x16xi32, #tpu.memory_space<any>>) target(%677 : memref<1x16xi32, #tpu.memory_space<vmem>>) target_semaphore(%679 : memref<!tpu.dma_semaphore, #tpu.memory_space<semaphore_mem>>)
    %c97_i32 = arith.constant 97 : i32
    %680 = arith.addi %0, %c97_i32 : i32
    %681 = arith.index_cast %680 : i32 to index
    %682 = memref.load %arg1[%681] : memref<128xi32, #tpu.memory_space<smem>>
    %c0_i32_388 = arith.constant 0 : i32
    %c0_i32_389 = arith.constant 0 : i32
    %683 = tpu.memref_slice %arg2[%682, %c0_i32_389] : memref<100x16xi32, #tpu.memory_space<any>> -> memref<1x16xi32, #tpu.memory_space<any>>
    %c97_i32_390 = arith.constant 97 : i32
    %c0_i32_391 = arith.constant 0 : i32
    %684 = tpu.memref_slice %arg3[%c97_i32_390, %c0_i32_391] : memref<128x16xi32, #tpu.memory_space<vmem>> -> memref<1x16xi32, #tpu.memory_space<vmem>>
    %685 = tpu.memref_slice %arg4[%c0_i32_388] : memref<1x!tpu.dma_semaphore, #tpu.memory_space<semaphore_mem>> -> memref<1x!tpu.dma_semaphore, #tpu.memory_space<semaphore_mem>>
    %686 = tpu.memref_squeeze %685 : memref<1x!tpu.dma_semaphore, #tpu.memory_space<semaphore_mem>> -> memref<!tpu.dma_semaphore, #tpu.memory_space<semaphore_mem>>
    tpu.enqueue_dma source(%683 : memref<1x16xi32, #tpu.memory_space<any>>) target(%684 : memref<1x16xi32, #tpu.memory_space<vmem>>) target_semaphore(%686 : memref<!tpu.dma_semaphore, #tpu.memory_space<semaphore_mem>>)
    %c98_i32 = arith.constant 98 : i32
    %687 = arith.addi %0, %c98_i32 : i32
    %688 = arith.index_cast %687 : i32 to index
    %689 = memref.load %arg1[%688] : memref<128xi32, #tpu.memory_space<smem>>
    %c0_i32_392 = arith.constant 0 : i32
    %c0_i32_393 = arith.constant 0 : i32
    %690 = tpu.memref_slice %arg2[%689, %c0_i32_393] : memref<100x16xi32, #tpu.memory_space<any>> -> memref<1x16xi32, #tpu.memory_space<any>>
    %c98_i32_394 = arith.constant 98 : i32
    %c0_i32_395 = arith.constant 0 : i32
    %691 = tpu.memref_slice %arg3[%c98_i32_394, %c0_i32_395] : memref<128x16xi32, #tpu.memory_space<vmem>> -> memref<1x16xi32, #tpu.memory_space<vmem>>
    %692 = tpu.memref_slice %arg4[%c0_i32_392] : memref<1x!tpu.dma_semaphore, #tpu.memory_space<semaphore_mem>> -> memref<1x!tpu.dma_semaphore, #tpu.memory_space<semaphore_mem>>
    %693 = tpu.memref_squeeze %692 : memref<1x!tpu.dma_semaphore, #tpu.memory_space<semaphore_mem>> -> memref<!tpu.dma_semaphore, #tpu.memory_space<semaphore_mem>>
    tpu.enqueue_dma source(%690 : memref<1x16xi32, #tpu.memory_space<any>>) target(%691 : memref<1x16xi32, #tpu.memory_space<vmem>>) target_semaphore(%693 : memref<!tpu.dma_semaphore, #tpu.memory_space<semaphore_mem>>)
    %c99_i32 = arith.constant 99 : i32
    %694 = arith.addi %0, %c99_i32 : i32
    %695 = arith.index_cast %694 : i32 to index
    %696 = memref.load %arg1[%695] : memref<128xi32, #tpu.memory_space<smem>>
    %c0_i32_396 = arith.constant 0 : i32
    %c0_i32_397 = arith.constant 0 : i32
    %697 = tpu.memref_slice %arg2[%696, %c0_i32_397] : memref<100x16xi32, #tpu.memory_space<any>> -> memref<1x16xi32, #tpu.memory_space<any>>
    %c99_i32_398 = arith.constant 99 : i32
    %c0_i32_399 = arith.constant 0 : i32
    %698 = tpu.memref_slice %arg3[%c99_i32_398, %c0_i32_399] : memref<128x16xi32, #tpu.memory_space<vmem>> -> memref<1x16xi32, #tpu.memory_space<vmem>>
    %699 = tpu.memref_slice %arg4[%c0_i32_396] : memref<1x!tpu.dma_semaphore, #tpu.memory_space<semaphore_mem>> -> memref<1x!tpu.dma_semaphore, #tpu.memory_space<semaphore_mem>>
    %700 = tpu.memref_squeeze %699 : memref<1x!tpu.dma_semaphore, #tpu.memory_space<semaphore_mem>> -> memref<!tpu.dma_semaphore, #tpu.memory_space<semaphore_mem>>
    tpu.enqueue_dma source(%697 : memref<1x16xi32, #tpu.memory_space<any>>) target(%698 : memref<1x16xi32, #tpu.memory_space<vmem>>) target_semaphore(%700 : memref<!tpu.dma_semaphore, #tpu.memory_space<semaphore_mem>>)
    %c100_i32 = arith.constant 100 : i32
    %701 = arith.addi %0, %c100_i32 : i32
    %702 = arith.index_cast %701 : i32 to index
    %703 = memref.load %arg1[%702] : memref<128xi32, #tpu.memory_space<smem>>
    %c0_i32_400 = arith.constant 0 : i32
    %c0_i32_401 = arith.constant 0 : i32
    %704 = tpu.memref_slice %arg2[%703, %c0_i32_401] : memref<100x16xi32, #tpu.memory_space<any>> -> memref<1x16xi32, #tpu.memory_space<any>>
    %c100_i32_402 = arith.constant 100 : i32
    %c0_i32_403 = arith.constant 0 : i32
    %705 = tpu.memref_slice %arg3[%c100_i32_402, %c0_i32_403] : memref<128x16xi32, #tpu.memory_space<vmem>> -> memref<1x16xi32, #tpu.memory_space<vmem>>
    %706 = tpu.memref_slice %arg4[%c0_i32_400] : memref<1x!tpu.dma_semaphore, #tpu.memory_space<semaphore_mem>> -> memref<1x!tpu.dma_semaphore, #tpu.memory_space<semaphore_mem>>
    %707 = tpu.memref_squeeze %706 : memref<1x!tpu.dma_semaphore, #tpu.memory_space<semaphore_mem>> -> memref<!tpu.dma_semaphore, #tpu.memory_space<semaphore_mem>>
    tpu.enqueue_dma source(%704 : memref<1x16xi32, #tpu.memory_space<any>>) target(%705 : memref<1x16xi32, #tpu.memory_space<vmem>>) target_semaphore(%707 : memref<!tpu.dma_semaphore, #tpu.memory_space<semaphore_mem>>)
    %c101_i32 = arith.constant 101 : i32
    %708 = arith.addi %0, %c101_i32 : i32
    %709 = arith.index_cast %708 : i32 to index
    %710 = memref.load %arg1[%709] : memref<128xi32, #tpu.memory_space<smem>>
    %c0_i32_404 = arith.constant 0 : i32
    %c0_i32_405 = arith.constant 0 : i32
    %711 = tpu.memref_slice %arg2[%710, %c0_i32_405] : memref<100x16xi32, #tpu.memory_space<any>> -> memref<1x16xi32, #tpu.memory_space<any>>
    %c101_i32_406 = arith.constant 101 : i32
    %c0_i32_407 = arith.constant 0 : i32
    %712 = tpu.memref_slice %arg3[%c101_i32_406, %c0_i32_407] : memref<128x16xi32, #tpu.memory_space<vmem>> -> memref<1x16xi32, #tpu.memory_space<vmem>>
    %713 = tpu.memref_slice %arg4[%c0_i32_404] : memref<1x!tpu.dma_semaphore, #tpu.memory_space<semaphore_mem>> -> memref<1x!tpu.dma_semaphore, #tpu.memory_space<semaphore_mem>>
    %714 = tpu.memref_squeeze %713 : memref<1x!tpu.dma_semaphore, #tpu.memory_space<semaphore_mem>> -> memref<!tpu.dma_semaphore, #tpu.memory_space<semaphore_mem>>
    tpu.enqueue_dma source(%711 : memref<1x16xi32, #tpu.memory_space<any>>) target(%712 : memref<1x16xi32, #tpu.memory_space<vmem>>) target_semaphore(%714 : memref<!tpu.dma_semaphore, #tpu.memory_space<semaphore_mem>>)
    %c102_i32 = arith.constant 102 : i32
    %715 = arith.addi %0, %c102_i32 : i32
    %716 = arith.index_cast %715 : i32 to index
    %717 = memref.load %arg1[%716] : memref<128xi32, #tpu.memory_space<smem>>
    %c0_i32_408 = arith.constant 0 : i32
    %c0_i32_409 = arith.constant 0 : i32
    %718 = tpu.memref_slice %arg2[%717, %c0_i32_409] : memref<100x16xi32, #tpu.memory_space<any>> -> memref<1x16xi32, #tpu.memory_space<any>>
    %c102_i32_410 = arith.constant 102 : i32
    %c0_i32_411 = arith.constant 0 : i32
    %719 = tpu.memref_slice %arg3[%c102_i32_410, %c0_i32_411] : memref<128x16xi32, #tpu.memory_space<vmem>> -> memref<1x16xi32, #tpu.memory_space<vmem>>
    %720 = tpu.memref_slice %arg4[%c0_i32_408] : memref<1x!tpu.dma_semaphore, #tpu.memory_space<semaphore_mem>> -> memref<1x!tpu.dma_semaphore, #tpu.memory_space<semaphore_mem>>
    %721 = tpu.memref_squeeze %720 : memref<1x!tpu.dma_semaphore, #tpu.memory_space<semaphore_mem>> -> memref<!tpu.dma_semaphore, #tpu.memory_space<semaphore_mem>>
    tpu.enqueue_dma source(%718 : memref<1x16xi32, #tpu.memory_space<any>>) target(%719 : memref<1x16xi32, #tpu.memory_space<vmem>>) target_semaphore(%721 : memref<!tpu.dma_semaphore, #tpu.memory_space<semaphore_mem>>)
    %c103_i32 = arith.constant 103 : i32
    %722 = arith.addi %0, %c103_i32 : i32
    %723 = arith.index_cast %722 : i32 to index
    %724 = memref.load %arg1[%723] : memref<128xi32, #tpu.memory_space<smem>>
    %c0_i32_412 = arith.constant 0 : i32
    %c0_i32_413 = arith.constant 0 : i32
    %725 = tpu.memref_slice %arg2[%724, %c0_i32_413] : memref<100x16xi32, #tpu.memory_space<any>> -> memref<1x16xi32, #tpu.memory_space<any>>
    %c103_i32_414 = arith.constant 103 : i32
    %c0_i32_415 = arith.constant 0 : i32
    %726 = tpu.memref_slice %arg3[%c103_i32_414, %c0_i32_415] : memref<128x16xi32, #tpu.memory_space<vmem>> -> memref<1x16xi32, #tpu.memory_space<vmem>>
    %727 = tpu.memref_slice %arg4[%c0_i32_412] : memref<1x!tpu.dma_semaphore, #tpu.memory_space<semaphore_mem>> -> memref<1x!tpu.dma_semaphore, #tpu.memory_space<semaphore_mem>>
    %728 = tpu.memref_squeeze %727 : memref<1x!tpu.dma_semaphore, #tpu.memory_space<semaphore_mem>> -> memref<!tpu.dma_semaphore, #tpu.memory_space<semaphore_mem>>
    tpu.enqueue_dma source(%725 : memref<1x16xi32, #tpu.memory_space<any>>) target(%726 : memref<1x16xi32, #tpu.memory_space<vmem>>) target_semaphore(%728 : memref<!tpu.dma_semaphore, #tpu.memory_space<semaphore_mem>>)
    %c104_i32 = arith.constant 104 : i32
    %729 = arith.addi %0, %c104_i32 : i32
    %730 = arith.index_cast %729 : i32 to index
    %731 = memref.load %arg1[%730] : memref<128xi32, #tpu.memory_space<smem>>
    %c0_i32_416 = arith.constant 0 : i32
    %c0_i32_417 = arith.constant 0 : i32
    %732 = tpu.memref_slice %arg2[%731, %c0_i32_417] : memref<100x16xi32, #tpu.memory_space<any>> -> memref<1x16xi32, #tpu.memory_space<any>>
    %c104_i32_418 = arith.constant 104 : i32
    %c0_i32_419 = arith.constant 0 : i32
    %733 = tpu.memref_slice %arg3[%c104_i32_418, %c0_i32_419] : memref<128x16xi32, #tpu.memory_space<vmem>> -> memref<1x16xi32, #tpu.memory_space<vmem>>
    %734 = tpu.memref_slice %arg4[%c0_i32_416] : memref<1x!tpu.dma_semaphore, #tpu.memory_space<semaphore_mem>> -> memref<1x!tpu.dma_semaphore, #tpu.memory_space<semaphore_mem>>
    %735 = tpu.memref_squeeze %734 : memref<1x!tpu.dma_semaphore, #tpu.memory_space<semaphore_mem>> -> memref<!tpu.dma_semaphore, #tpu.memory_space<semaphore_mem>>
    tpu.enqueue_dma source(%732 : memref<1x16xi32, #tpu.memory_space<any>>) target(%733 : memref<1x16xi32, #tpu.memory_space<vmem>>) target_semaphore(%735 : memref<!tpu.dma_semaphore, #tpu.memory_space<semaphore_mem>>)
    %c105_i32 = arith.constant 105 : i32
    %736 = arith.addi %0, %c105_i32 : i32
    %737 = arith.index_cast %736 : i32 to index
    %738 = memref.load %arg1[%737] : memref<128xi32, #tpu.memory_space<smem>>
    %c0_i32_420 = arith.constant 0 : i32
    %c0_i32_421 = arith.constant 0 : i32
    %739 = tpu.memref_slice %arg2[%738, %c0_i32_421] : memref<100x16xi32, #tpu.memory_space<any>> -> memref<1x16xi32, #tpu.memory_space<any>>
    %c105_i32_422 = arith.constant 105 : i32
    %c0_i32_423 = arith.constant 0 : i32
    %740 = tpu.memref_slice %arg3[%c105_i32_422, %c0_i32_423] : memref<128x16xi32, #tpu.memory_space<vmem>> -> memref<1x16xi32, #tpu.memory_space<vmem>>
    %741 = tpu.memref_slice %arg4[%c0_i32_420] : memref<1x!tpu.dma_semaphore, #tpu.memory_space<semaphore_mem>> -> memref<1x!tpu.dma_semaphore, #tpu.memory_space<semaphore_mem>>
    %742 = tpu.memref_squeeze %741 : memref<1x!tpu.dma_semaphore, #tpu.memory_space<semaphore_mem>> -> memref<!tpu.dma_semaphore, #tpu.memory_space<semaphore_mem>>
    tpu.enqueue_dma source(%739 : memref<1x16xi32, #tpu.memory_space<any>>) target(%740 : memref<1x16xi32, #tpu.memory_space<vmem>>) target_semaphore(%742 : memref<!tpu.dma_semaphore, #tpu.memory_space<semaphore_mem>>)
    %c106_i32 = arith.constant 106 : i32
    %743 = arith.addi %0, %c106_i32 : i32
    %744 = arith.index_cast %743 : i32 to index
    %745 = memref.load %arg1[%744] : memref<128xi32, #tpu.memory_space<smem>>
    %c0_i32_424 = arith.constant 0 : i32
    %c0_i32_425 = arith.constant 0 : i32
    %746 = tpu.memref_slice %arg2[%745, %c0_i32_425] : memref<100x16xi32, #tpu.memory_space<any>> -> memref<1x16xi32, #tpu.memory_space<any>>
    %c106_i32_426 = arith.constant 106 : i32
    %c0_i32_427 = arith.constant 0 : i32
    %747 = tpu.memref_slice %arg3[%c106_i32_426, %c0_i32_427] : memref<128x16xi32, #tpu.memory_space<vmem>> -> memref<1x16xi32, #tpu.memory_space<vmem>>
    %748 = tpu.memref_slice %arg4[%c0_i32_424] : memref<1x!tpu.dma_semaphore, #tpu.memory_space<semaphore_mem>> -> memref<1x!tpu.dma_semaphore, #tpu.memory_space<semaphore_mem>>
    %749 = tpu.memref_squeeze %748 : memref<1x!tpu.dma_semaphore, #tpu.memory_space<semaphore_mem>> -> memref<!tpu.dma_semaphore, #tpu.memory_space<semaphore_mem>>
    tpu.enqueue_dma source(%746 : memref<1x16xi32, #tpu.memory_space<any>>) target(%747 : memref<1x16xi32, #tpu.memory_space<vmem>>) target_semaphore(%749 : memref<!tpu.dma_semaphore, #tpu.memory_space<semaphore_mem>>)
    %c107_i32 = arith.constant 107 : i32
    %750 = arith.addi %0, %c107_i32 : i32
    %751 = arith.index_cast %750 : i32 to index
    %752 = memref.load %arg1[%751] : memref<128xi32, #tpu.memory_space<smem>>
    %c0_i32_428 = arith.constant 0 : i32
    %c0_i32_429 = arith.constant 0 : i32
    %753 = tpu.memref_slice %arg2[%752, %c0_i32_429] : memref<100x16xi32, #tpu.memory_space<any>> -> memref<1x16xi32, #tpu.memory_space<any>>
    %c107_i32_430 = arith.constant 107 : i32
    %c0_i32_431 = arith.constant 0 : i32
    %754 = tpu.memref_slice %arg3[%c107_i32_430, %c0_i32_431] : memref<128x16xi32, #tpu.memory_space<vmem>> -> memref<1x16xi32, #tpu.memory_space<vmem>>
    %755 = tpu.memref_slice %arg4[%c0_i32_428] : memref<1x!tpu.dma_semaphore, #tpu.memory_space<semaphore_mem>> -> memref<1x!tpu.dma_semaphore, #tpu.memory_space<semaphore_mem>>
    %756 = tpu.memref_squeeze %755 : memref<1x!tpu.dma_semaphore, #tpu.memory_space<semaphore_mem>> -> memref<!tpu.dma_semaphore, #tpu.memory_space<semaphore_mem>>
    tpu.enqueue_dma source(%753 : memref<1x16xi32, #tpu.memory_space<any>>) target(%754 : memref<1x16xi32, #tpu.memory_space<vmem>>) target_semaphore(%756 : memref<!tpu.dma_semaphore, #tpu.memory_space<semaphore_mem>>)
    %c108_i32 = arith.constant 108 : i32
    %757 = arith.addi %0, %c108_i32 : i32
    %758 = arith.index_cast %757 : i32 to index
    %759 = memref.load %arg1[%758] : memref<128xi32, #tpu.memory_space<smem>>
    %c0_i32_432 = arith.constant 0 : i32
    %c0_i32_433 = arith.constant 0 : i32
    %760 = tpu.memref_slice %arg2[%759, %c0_i32_433] : memref<100x16xi32, #tpu.memory_space<any>> -> memref<1x16xi32, #tpu.memory_space<any>>
    %c108_i32_434 = arith.constant 108 : i32
    %c0_i32_435 = arith.constant 0 : i32
    %761 = tpu.memref_slice %arg3[%c108_i32_434, %c0_i32_435] : memref<128x16xi32, #tpu.memory_space<vmem>> -> memref<1x16xi32, #tpu.memory_space<vmem>>
    %762 = tpu.memref_slice %arg4[%c0_i32_432] : memref<1x!tpu.dma_semaphore, #tpu.memory_space<semaphore_mem>> -> memref<1x!tpu.dma_semaphore, #tpu.memory_space<semaphore_mem>>
    %763 = tpu.memref_squeeze %762 : memref<1x!tpu.dma_semaphore, #tpu.memory_space<semaphore_mem>> -> memref<!tpu.dma_semaphore, #tpu.memory_space<semaphore_mem>>
    tpu.enqueue_dma source(%760 : memref<1x16xi32, #tpu.memory_space<any>>) target(%761 : memref<1x16xi32, #tpu.memory_space<vmem>>) target_semaphore(%763 : memref<!tpu.dma_semaphore, #tpu.memory_space<semaphore_mem>>)
    %c109_i32 = arith.constant 109 : i32
    %764 = arith.addi %0, %c109_i32 : i32
    %765 = arith.index_cast %764 : i32 to index
    %766 = memref.load %arg1[%765] : memref<128xi32, #tpu.memory_space<smem>>
    %c0_i32_436 = arith.constant 0 : i32
    %c0_i32_437 = arith.constant 0 : i32
    %767 = tpu.memref_slice %arg2[%766, %c0_i32_437] : memref<100x16xi32, #tpu.memory_space<any>> -> memref<1x16xi32, #tpu.memory_space<any>>
    %c109_i32_438 = arith.constant 109 : i32
    %c0_i32_439 = arith.constant 0 : i32
    %768 = tpu.memref_slice %arg3[%c109_i32_438, %c0_i32_439] : memref<128x16xi32, #tpu.memory_space<vmem>> -> memref<1x16xi32, #tpu.memory_space<vmem>>
    %769 = tpu.memref_slice %arg4[%c0_i32_436] : memref<1x!tpu.dma_semaphore, #tpu.memory_space<semaphore_mem>> -> memref<1x!tpu.dma_semaphore, #tpu.memory_space<semaphore_mem>>
    %770 = tpu.memref_squeeze %769 : memref<1x!tpu.dma_semaphore, #tpu.memory_space<semaphore_mem>> -> memref<!tpu.dma_semaphore, #tpu.memory_space<semaphore_mem>>
    tpu.enqueue_dma source(%767 : memref<1x16xi32, #tpu.memory_space<any>>) target(%768 : memref<1x16xi32, #tpu.memory_space<vmem>>) target_semaphore(%770 : memref<!tpu.dma_semaphore, #tpu.memory_space<semaphore_mem>>)
    %c110_i32 = arith.constant 110 : i32
    %771 = arith.addi %0, %c110_i32 : i32
    %772 = arith.index_cast %771 : i32 to index
    %773 = memref.load %arg1[%772] : memref<128xi32, #tpu.memory_space<smem>>
    %c0_i32_440 = arith.constant 0 : i32
    %c0_i32_441 = arith.constant 0 : i32
    %774 = tpu.memref_slice %arg2[%773, %c0_i32_441] : memref<100x16xi32, #tpu.memory_space<any>> -> memref<1x16xi32, #tpu.memory_space<any>>
    %c110_i32_442 = arith.constant 110 : i32
    %c0_i32_443 = arith.constant 0 : i32
    %775 = tpu.memref_slice %arg3[%c110_i32_442, %c0_i32_443] : memref<128x16xi32, #tpu.memory_space<vmem>> -> memref<1x16xi32, #tpu.memory_space<vmem>>
    %776 = tpu.memref_slice %arg4[%c0_i32_440] : memref<1x!tpu.dma_semaphore, #tpu.memory_space<semaphore_mem>> -> memref<1x!tpu.dma_semaphore, #tpu.memory_space<semaphore_mem>>
    %777 = tpu.memref_squeeze %776 : memref<1x!tpu.dma_semaphore, #tpu.memory_space<semaphore_mem>> -> memref<!tpu.dma_semaphore, #tpu.memory_space<semaphore_mem>>
    tpu.enqueue_dma source(%774 : memref<1x16xi32, #tpu.memory_space<any>>) target(%775 : memref<1x16xi32, #tpu.memory_space<vmem>>) target_semaphore(%777 : memref<!tpu.dma_semaphore, #tpu.memory_space<semaphore_mem>>)
    %c111_i32 = arith.constant 111 : i32
    %778 = arith.addi %0, %c111_i32 : i32
    %779 = arith.index_cast %778 : i32 to index
    %780 = memref.load %arg1[%779] : memref<128xi32, #tpu.memory_space<smem>>
    %c0_i32_444 = arith.constant 0 : i32
    %c0_i32_445 = arith.constant 0 : i32
    %781 = tpu.memref_slice %arg2[%780, %c0_i32_445] : memref<100x16xi32, #tpu.memory_space<any>> -> memref<1x16xi32, #tpu.memory_space<any>>
    %c111_i32_446 = arith.constant 111 : i32
    %c0_i32_447 = arith.constant 0 : i32
    %782 = tpu.memref_slice %arg3[%c111_i32_446, %c0_i32_447] : memref<128x16xi32, #tpu.memory_space<vmem>> -> memref<1x16xi32, #tpu.memory_space<vmem>>
    %783 = tpu.memref_slice %arg4[%c0_i32_444] : memref<1x!tpu.dma_semaphore, #tpu.memory_space<semaphore_mem>> -> memref<1x!tpu.dma_semaphore, #tpu.memory_space<semaphore_mem>>
    %784 = tpu.memref_squeeze %783 : memref<1x!tpu.dma_semaphore, #tpu.memory_space<semaphore_mem>> -> memref<!tpu.dma_semaphore, #tpu.memory_space<semaphore_mem>>
    tpu.enqueue_dma source(%781 : memref<1x16xi32, #tpu.memory_space<any>>) target(%782 : memref<1x16xi32, #tpu.memory_space<vmem>>) target_semaphore(%784 : memref<!tpu.dma_semaphore, #tpu.memory_space<semaphore_mem>>)
    %c112_i32 = arith.constant 112 : i32
    %785 = arith.addi %0, %c112_i32 : i32
    %786 = arith.index_cast %785 : i32 to index
    %787 = memref.load %arg1[%786] : memref<128xi32, #tpu.memory_space<smem>>
    %c0_i32_448 = arith.constant 0 : i32
    %c0_i32_449 = arith.constant 0 : i32
    %788 = tpu.memref_slice %arg2[%787, %c0_i32_449] : memref<100x16xi32, #tpu.memory_space<any>> -> memref<1x16xi32, #tpu.memory_space<any>>
    %c112_i32_450 = arith.constant 112 : i32
    %c0_i32_451 = arith.constant 0 : i32
    %789 = tpu.memref_slice %arg3[%c112_i32_450, %c0_i32_451] : memref<128x16xi32, #tpu.memory_space<vmem>> -> memref<1x16xi32, #tpu.memory_space<vmem>>
    %790 = tpu.memref_slice %arg4[%c0_i32_448] : memref<1x!tpu.dma_semaphore, #tpu.memory_space<semaphore_mem>> -> memref<1x!tpu.dma_semaphore, #tpu.memory_space<semaphore_mem>>
    %791 = tpu.memref_squeeze %790 : memref<1x!tpu.dma_semaphore, #tpu.memory_space<semaphore_mem>> -> memref<!tpu.dma_semaphore, #tpu.memory_space<semaphore_mem>>
    tpu.enqueue_dma source(%788 : memref<1x16xi32, #tpu.memory_space<any>>) target(%789 : memref<1x16xi32, #tpu.memory_space<vmem>>) target_semaphore(%791 : memref<!tpu.dma_semaphore, #tpu.memory_space<semaphore_mem>>)
    %c113_i32 = arith.constant 113 : i32
    %792 = arith.addi %0, %c113_i32 : i32
    %793 = arith.index_cast %792 : i32 to index
    %794 = memref.load %arg1[%793] : memref<128xi32, #tpu.memory_space<smem>>
    %c0_i32_452 = arith.constant 0 : i32
    %c0_i32_453 = arith.constant 0 : i32
    %795 = tpu.memref_slice %arg2[%794, %c0_i32_453] : memref<100x16xi32, #tpu.memory_space<any>> -> memref<1x16xi32, #tpu.memory_space<any>>
    %c113_i32_454 = arith.constant 113 : i32
    %c0_i32_455 = arith.constant 0 : i32
    %796 = tpu.memref_slice %arg3[%c113_i32_454, %c0_i32_455] : memref<128x16xi32, #tpu.memory_space<vmem>> -> memref<1x16xi32, #tpu.memory_space<vmem>>
    %797 = tpu.memref_slice %arg4[%c0_i32_452] : memref<1x!tpu.dma_semaphore, #tpu.memory_space<semaphore_mem>> -> memref<1x!tpu.dma_semaphore, #tpu.memory_space<semaphore_mem>>
    %798 = tpu.memref_squeeze %797 : memref<1x!tpu.dma_semaphore, #tpu.memory_space<semaphore_mem>> -> memref<!tpu.dma_semaphore, #tpu.memory_space<semaphore_mem>>
    tpu.enqueue_dma source(%795 : memref<1x16xi32, #tpu.memory_space<any>>) target(%796 : memref<1x16xi32, #tpu.memory_space<vmem>>) target_semaphore(%798 : memref<!tpu.dma_semaphore, #tpu.memory_space<semaphore_mem>>)
    %c114_i32 = arith.constant 114 : i32
    %799 = arith.addi %0, %c114_i32 : i32
    %800 = arith.index_cast %799 : i32 to index
    %801 = memref.load %arg1[%800] : memref<128xi32, #tpu.memory_space<smem>>
    %c0_i32_456 = arith.constant 0 : i32
    %c0_i32_457 = arith.constant 0 : i32
    %802 = tpu.memref_slice %arg2[%801, %c0_i32_457] : memref<100x16xi32, #tpu.memory_space<any>> -> memref<1x16xi32, #tpu.memory_space<any>>
    %c114_i32_458 = arith.constant 114 : i32
    %c0_i32_459 = arith.constant 0 : i32
    %803 = tpu.memref_slice %arg3[%c114_i32_458, %c0_i32_459] : memref<128x16xi32, #tpu.memory_space<vmem>> -> memref<1x16xi32, #tpu.memory_space<vmem>>
    %804 = tpu.memref_slice %arg4[%c0_i32_456] : memref<1x!tpu.dma_semaphore, #tpu.memory_space<semaphore_mem>> -> memref<1x!tpu.dma_semaphore, #tpu.memory_space<semaphore_mem>>
    %805 = tpu.memref_squeeze %804 : memref<1x!tpu.dma_semaphore, #tpu.memory_space<semaphore_mem>> -> memref<!tpu.dma_semaphore, #tpu.memory_space<semaphore_mem>>
    tpu.enqueue_dma source(%802 : memref<1x16xi32, #tpu.memory_space<any>>) target(%803 : memref<1x16xi32, #tpu.memory_space<vmem>>) target_semaphore(%805 : memref<!tpu.dma_semaphore, #tpu.memory_space<semaphore_mem>>)
    %c115_i32 = arith.constant 115 : i32
    %806 = arith.addi %0, %c115_i32 : i32
    %807 = arith.index_cast %806 : i32 to index
    %808 = memref.load %arg1[%807] : memref<128xi32, #tpu.memory_space<smem>>
    %c0_i32_460 = arith.constant 0 : i32
    %c0_i32_461 = arith.constant 0 : i32
    %809 = tpu.memref_slice %arg2[%808, %c0_i32_461] : memref<100x16xi32, #tpu.memory_space<any>> -> memref<1x16xi32, #tpu.memory_space<any>>
    %c115_i32_462 = arith.constant 115 : i32
    %c0_i32_463 = arith.constant 0 : i32
    %810 = tpu.memref_slice %arg3[%c115_i32_462, %c0_i32_463] : memref<128x16xi32, #tpu.memory_space<vmem>> -> memref<1x16xi32, #tpu.memory_space<vmem>>
    %811 = tpu.memref_slice %arg4[%c0_i32_460] : memref<1x!tpu.dma_semaphore, #tpu.memory_space<semaphore_mem>> -> memref<1x!tpu.dma_semaphore, #tpu.memory_space<semaphore_mem>>
    %812 = tpu.memref_squeeze %811 : memref<1x!tpu.dma_semaphore, #tpu.memory_space<semaphore_mem>> -> memref<!tpu.dma_semaphore, #tpu.memory_space<semaphore_mem>>
    tpu.enqueue_dma source(%809 : memref<1x16xi32, #tpu.memory_space<any>>) target(%810 : memref<1x16xi32, #tpu.memory_space<vmem>>) target_semaphore(%812 : memref<!tpu.dma_semaphore, #tpu.memory_space<semaphore_mem>>)
    %c116_i32 = arith.constant 116 : i32
    %813 = arith.addi %0, %c116_i32 : i32
    %814 = arith.index_cast %813 : i32 to index
    %815 = memref.load %arg1[%814] : memref<128xi32, #tpu.memory_space<smem>>
    %c0_i32_464 = arith.constant 0 : i32
    %c0_i32_465 = arith.constant 0 : i32
    %816 = tpu.memref_slice %arg2[%815, %c0_i32_465] : memref<100x16xi32, #tpu.memory_space<any>> -> memref<1x16xi32, #tpu.memory_space<any>>
    %c116_i32_466 = arith.constant 116 : i32
    %c0_i32_467 = arith.constant 0 : i32
    %817 = tpu.memref_slice %arg3[%c116_i32_466, %c0_i32_467] : memref<128x16xi32, #tpu.memory_space<vmem>> -> memref<1x16xi32, #tpu.memory_space<vmem>>
    %818 = tpu.memref_slice %arg4[%c0_i32_464] : memref<1x!tpu.dma_semaphore, #tpu.memory_space<semaphore_mem>> -> memref<1x!tpu.dma_semaphore, #tpu.memory_space<semaphore_mem>>
    %819 = tpu.memref_squeeze %818 : memref<1x!tpu.dma_semaphore, #tpu.memory_space<semaphore_mem>> -> memref<!tpu.dma_semaphore, #tpu.memory_space<semaphore_mem>>
    tpu.enqueue_dma source(%816 : memref<1x16xi32, #tpu.memory_space<any>>) target(%817 : memref<1x16xi32, #tpu.memory_space<vmem>>) target_semaphore(%819 : memref<!tpu.dma_semaphore, #tpu.memory_space<semaphore_mem>>)
    %c117_i32 = arith.constant 117 : i32
    %820 = arith.addi %0, %c117_i32 : i32
    %821 = arith.index_cast %820 : i32 to index
    %822 = memref.load %arg1[%821] : memref<128xi32, #tpu.memory_space<smem>>
    %c0_i32_468 = arith.constant 0 : i32
    %c0_i32_469 = arith.constant 0 : i32
    %823 = tpu.memref_slice %arg2[%822, %c0_i32_469] : memref<100x16xi32, #tpu.memory_space<any>> -> memref<1x16xi32, #tpu.memory_space<any>>
    %c117_i32_470 = arith.constant 117 : i32
    %c0_i32_471 = arith.constant 0 : i32
    %824 = tpu.memref_slice %arg3[%c117_i32_470, %c0_i32_471] : memref<128x16xi32, #tpu.memory_space<vmem>> -> memref<1x16xi32, #tpu.memory_space<vmem>>
    %825 = tpu.memref_slice %arg4[%c0_i32_468] : memref<1x!tpu.dma_semaphore, #tpu.memory_space<semaphore_mem>> -> memref<1x!tpu.dma_semaphore, #tpu.memory_space<semaphore_mem>>
    %826 = tpu.memref_squeeze %825 : memref<1x!tpu.dma_semaphore, #tpu.memory_space<semaphore_mem>> -> memref<!tpu.dma_semaphore, #tpu.memory_space<semaphore_mem>>
    tpu.enqueue_dma source(%823 : memref<1x16xi32, #tpu.memory_space<any>>) target(%824 : memref<1x16xi32, #tpu.memory_space<vmem>>) target_semaphore(%826 : memref<!tpu.dma_semaphore, #tpu.memory_space<semaphore_mem>>)
    %c118_i32 = arith.constant 118 : i32
    %827 = arith.addi %0, %c118_i32 : i32
    %828 = arith.index_cast %827 : i32 to index
    %829 = memref.load %arg1[%828] : memref<128xi32, #tpu.memory_space<smem>>
    %c0_i32_472 = arith.constant 0 : i32
    %c0_i32_473 = arith.constant 0 : i32
    %830 = tpu.memref_slice %arg2[%829, %c0_i32_473] : memref<100x16xi32, #tpu.memory_space<any>> -> memref<1x16xi32, #tpu.memory_space<any>>
    %c118_i32_474 = arith.constant 118 : i32
    %c0_i32_475 = arith.constant 0 : i32
    %831 = tpu.memref_slice %arg3[%c118_i32_474, %c0_i32_475] : memref<128x16xi32, #tpu.memory_space<vmem>> -> memref<1x16xi32, #tpu.memory_space<vmem>>
    %832 = tpu.memref_slice %arg4[%c0_i32_472] : memref<1x!tpu.dma_semaphore, #tpu.memory_space<semaphore_mem>> -> memref<1x!tpu.dma_semaphore, #tpu.memory_space<semaphore_mem>>
    %833 = tpu.memref_squeeze %832 : memref<1x!tpu.dma_semaphore, #tpu.memory_space<semaphore_mem>> -> memref<!tpu.dma_semaphore, #tpu.memory_space<semaphore_mem>>
    tpu.enqueue_dma source(%830 : memref<1x16xi32, #tpu.memory_space<any>>) target(%831 : memref<1x16xi32, #tpu.memory_space<vmem>>) target_semaphore(%833 : memref<!tpu.dma_semaphore, #tpu.memory_space<semaphore_mem>>)
    %c119_i32 = arith.constant 119 : i32
    %834 = arith.addi %0, %c119_i32 : i32
    %835 = arith.index_cast %834 : i32 to index
    %836 = memref.load %arg1[%835] : memref<128xi32, #tpu.memory_space<smem>>
    %c0_i32_476 = arith.constant 0 : i32
    %c0_i32_477 = arith.constant 0 : i32
    %837 = tpu.memref_slice %arg2[%836, %c0_i32_477] : memref<100x16xi32, #tpu.memory_space<any>> -> memref<1x16xi32, #tpu.memory_space<any>>
    %c119_i32_478 = arith.constant 119 : i32
    %c0_i32_479 = arith.constant 0 : i32
    %838 = tpu.memref_slice %arg3[%c119_i32_478, %c0_i32_479] : memref<128x16xi32, #tpu.memory_space<vmem>> -> memref<1x16xi32, #tpu.memory_space<vmem>>
    %839 = tpu.memref_slice %arg4[%c0_i32_476] : memref<1x!tpu.dma_semaphore, #tpu.memory_space<semaphore_mem>> -> memref<1x!tpu.dma_semaphore, #tpu.memory_space<semaphore_mem>>
    %840 = tpu.memref_squeeze %839 : memref<1x!tpu.dma_semaphore, #tpu.memory_space<semaphore_mem>> -> memref<!tpu.dma_semaphore, #tpu.memory_space<semaphore_mem>>
    tpu.enqueue_dma source(%837 : memref<1x16xi32, #tpu.memory_space<any>>) target(%838 : memref<1x16xi32, #tpu.memory_space<vmem>>) target_semaphore(%840 : memref<!tpu.dma_semaphore, #tpu.memory_space<semaphore_mem>>)
    %c120_i32 = arith.constant 120 : i32
    %841 = arith.addi %0, %c120_i32 : i32
    %842 = arith.index_cast %841 : i32 to index
    %843 = memref.load %arg1[%842] : memref<128xi32, #tpu.memory_space<smem>>
    %c0_i32_480 = arith.constant 0 : i32
    %c0_i32_481 = arith.constant 0 : i32
    %844 = tpu.memref_slice %arg2[%843, %c0_i32_481] : memref<100x16xi32, #tpu.memory_space<any>> -> memref<1x16xi32, #tpu.memory_space<any>>
    %c120_i32_482 = arith.constant 120 : i32
    %c0_i32_483 = arith.constant 0 : i32
    %845 = tpu.memref_slice %arg3[%c120_i32_482, %c0_i32_483] : memref<128x16xi32, #tpu.memory_space<vmem>> -> memref<1x16xi32, #tpu.memory_space<vmem>>
    %846 = tpu.memref_slice %arg4[%c0_i32_480] : memref<1x!tpu.dma_semaphore, #tpu.memory_space<semaphore_mem>> -> memref<1x!tpu.dma_semaphore, #tpu.memory_space<semaphore_mem>>
    %847 = tpu.memref_squeeze %846 : memref<1x!tpu.dma_semaphore, #tpu.memory_space<semaphore_mem>> -> memref<!tpu.dma_semaphore, #tpu.memory_space<semaphore_mem>>
    tpu.enqueue_dma source(%844 : memref<1x16xi32, #tpu.memory_space<any>>) target(%845 : memref<1x16xi32, #tpu.memory_space<vmem>>) target_semaphore(%847 : memref<!tpu.dma_semaphore, #tpu.memory_space<semaphore_mem>>)
    %c121_i32 = arith.constant 121 : i32
    %848 = arith.addi %0, %c121_i32 : i32
    %849 = arith.index_cast %848 : i32 to index
    %850 = memref.load %arg1[%849] : memref<128xi32, #tpu.memory_space<smem>>
    %c0_i32_484 = arith.constant 0 : i32
    %c0_i32_485 = arith.constant 0 : i32
    %851 = tpu.memref_slice %arg2[%850, %c0_i32_485] : memref<100x16xi32, #tpu.memory_space<any>> -> memref<1x16xi32, #tpu.memory_space<any>>
    %c121_i32_486 = arith.constant 121 : i32
    %c0_i32_487 = arith.constant 0 : i32
    %852 = tpu.memref_slice %arg3[%c121_i32_486, %c0_i32_487] : memref<128x16xi32, #tpu.memory_space<vmem>> -> memref<1x16xi32, #tpu.memory_space<vmem>>
    %853 = tpu.memref_slice %arg4[%c0_i32_484] : memref<1x!tpu.dma_semaphore, #tpu.memory_space<semaphore_mem>> -> memref<1x!tpu.dma_semaphore, #tpu.memory_space<semaphore_mem>>
    %854 = tpu.memref_squeeze %853 : memref<1x!tpu.dma_semaphore, #tpu.memory_space<semaphore_mem>> -> memref<!tpu.dma_semaphore, #tpu.memory_space<semaphore_mem>>
    tpu.enqueue_dma source(%851 : memref<1x16xi32, #tpu.memory_space<any>>) target(%852 : memref<1x16xi32, #tpu.memory_space<vmem>>) target_semaphore(%854 : memref<!tpu.dma_semaphore, #tpu.memory_space<semaphore_mem>>)
    %c122_i32 = arith.constant 122 : i32
    %855 = arith.addi %0, %c122_i32 : i32
    %856 = arith.index_cast %855 : i32 to index
    %857 = memref.load %arg1[%856] : memref<128xi32, #tpu.memory_space<smem>>
    %c0_i32_488 = arith.constant 0 : i32
    %c0_i32_489 = arith.constant 0 : i32
    %858 = tpu.memref_slice %arg2[%857, %c0_i32_489] : memref<100x16xi32, #tpu.memory_space<any>> -> memref<1x16xi32, #tpu.memory_space<any>>
    %c122_i32_490 = arith.constant 122 : i32
    %c0_i32_491 = arith.constant 0 : i32
    %859 = tpu.memref_slice %arg3[%c122_i32_490, %c0_i32_491] : memref<128x16xi32, #tpu.memory_space<vmem>> -> memref<1x16xi32, #tpu.memory_space<vmem>>
    %860 = tpu.memref_slice %arg4[%c0_i32_488] : memref<1x!tpu.dma_semaphore, #tpu.memory_space<semaphore_mem>> -> memref<1x!tpu.dma_semaphore, #tpu.memory_space<semaphore_mem>>
    %861 = tpu.memref_squeeze %860 : memref<1x!tpu.dma_semaphore, #tpu.memory_space<semaphore_mem>> -> memref<!tpu.dma_semaphore, #tpu.memory_space<semaphore_mem>>
    tpu.enqueue_dma source(%858 : memref<1x16xi32, #tpu.memory_space<any>>) target(%859 : memref<1x16xi32, #tpu.memory_space<vmem>>) target_semaphore(%861 : memref<!tpu.dma_semaphore, #tpu.memory_space<semaphore_mem>>)
    %c123_i32 = arith.constant 123 : i32
    %862 = arith.addi %0, %c123_i32 : i32
    %863 = arith.index_cast %862 : i32 to index
    %864 = memref.load %arg1[%863] : memref<128xi32, #tpu.memory_space<smem>>
    %c0_i32_492 = arith.constant 0 : i32
    %c0_i32_493 = arith.constant 0 : i32
    %865 = tpu.memref_slice %arg2[%864, %c0_i32_493] : memref<100x16xi32, #tpu.memory_space<any>> -> memref<1x16xi32, #tpu.memory_space<any>>
    %c123_i32_494 = arith.constant 123 : i32
    %c0_i32_495 = arith.constant 0 : i32
    %866 = tpu.memref_slice %arg3[%c123_i32_494, %c0_i32_495] : memref<128x16xi32, #tpu.memory_space<vmem>> -> memref<1x16xi32, #tpu.memory_space<vmem>>
    %867 = tpu.memref_slice %arg4[%c0_i32_492] : memref<1x!tpu.dma_semaphore, #tpu.memory_space<semaphore_mem>> -> memref<1x!tpu.dma_semaphore, #tpu.memory_space<semaphore_mem>>
    %868 = tpu.memref_squeeze %867 : memref<1x!tpu.dma_semaphore, #tpu.memory_space<semaphore_mem>> -> memref<!tpu.dma_semaphore, #tpu.memory_space<semaphore_mem>>
    tpu.enqueue_dma source(%865 : memref<1x16xi32, #tpu.memory_space<any>>) target(%866 : memref<1x16xi32, #tpu.memory_space<vmem>>) target_semaphore(%868 : memref<!tpu.dma_semaphore, #tpu.memory_space<semaphore_mem>>)
    %c124_i32 = arith.constant 124 : i32
    %869 = arith.addi %0, %c124_i32 : i32
    %870 = arith.index_cast %869 : i32 to index
    %871 = memref.load %arg1[%870] : memref<128xi32, #tpu.memory_space<smem>>
    %c0_i32_496 = arith.constant 0 : i32
    %c0_i32_497 = arith.constant 0 : i32
    %872 = tpu.memref_slice %arg2[%871, %c0_i32_497] : memref<100x16xi32, #tpu.memory_space<any>> -> memref<1x16xi32, #tpu.memory_space<any>>
    %c124_i32_498 = arith.constant 124 : i32
    %c0_i32_499 = arith.constant 0 : i32
    %873 = tpu.memref_slice %arg3[%c124_i32_498, %c0_i32_499] : memref<128x16xi32, #tpu.memory_space<vmem>> -> memref<1x16xi32, #tpu.memory_space<vmem>>
    %874 = tpu.memref_slice %arg4[%c0_i32_496] : memref<1x!tpu.dma_semaphore, #tpu.memory_space<semaphore_mem>> -> memref<1x!tpu.dma_semaphore, #tpu.memory_space<semaphore_mem>>
    %875 = tpu.memref_squeeze %874 : memref<1x!tpu.dma_semaphore, #tpu.memory_space<semaphore_mem>> -> memref<!tpu.dma_semaphore, #tpu.memory_space<semaphore_mem>>
    tpu.enqueue_dma source(%872 : memref<1x16xi32, #tpu.memory_space<any>>) target(%873 : memref<1x16xi32, #tpu.memory_space<vmem>>) target_semaphore(%875 : memref<!tpu.dma_semaphore, #tpu.memory_space<semaphore_mem>>)
    %c125_i32 = arith.constant 125 : i32
    %876 = arith.addi %0, %c125_i32 : i32
    %877 = arith.index_cast %876 : i32 to index
    %878 = memref.load %arg1[%877] : memref<128xi32, #tpu.memory_space<smem>>
    %c0_i32_500 = arith.constant 0 : i32
    %c0_i32_501 = arith.constant 0 : i32
    %879 = tpu.memref_slice %arg2[%878, %c0_i32_501] : memref<100x16xi32, #tpu.memory_space<any>> -> memref<1x16xi32, #tpu.memory_space<any>>
    %c125_i32_502 = arith.constant 125 : i32
    %c0_i32_503 = arith.constant 0 : i32
    %880 = tpu.memref_slice %arg3[%c125_i32_502, %c0_i32_503] : memref<128x16xi32, #tpu.memory_space<vmem>> -> memref<1x16xi32, #tpu.memory_space<vmem>>
    %881 = tpu.memref_slice %arg4[%c0_i32_500] : memref<1x!tpu.dma_semaphore, #tpu.memory_space<semaphore_mem>> -> memref<1x!tpu.dma_semaphore, #tpu.memory_space<semaphore_mem>>
    %882 = tpu.memref_squeeze %881 : memref<1x!tpu.dma_semaphore, #tpu.memory_space<semaphore_mem>> -> memref<!tpu.dma_semaphore, #tpu.memory_space<semaphore_mem>>
    tpu.enqueue_dma source(%879 : memref<1x16xi32, #tpu.memory_space<any>>) target(%880 : memref<1x16xi32, #tpu.memory_space<vmem>>) target_semaphore(%882 : memref<!tpu.dma_semaphore, #tpu.memory_space<semaphore_mem>>)
    %c126_i32 = arith.constant 126 : i32
    %883 = arith.addi %0, %c126_i32 : i32
    %884 = arith.index_cast %883 : i32 to index
    %885 = memref.load %arg1[%884] : memref<128xi32, #tpu.memory_space<smem>>
    %c0_i32_504 = arith.constant 0 : i32
    %c0_i32_505 = arith.constant 0 : i32
    %886 = tpu.memref_slice %arg2[%885, %c0_i32_505] : memref<100x16xi32, #tpu.memory_space<any>> -> memref<1x16xi32, #tpu.memory_space<any>>
    %c126_i32_506 = arith.constant 126 : i32
    %c0_i32_507 = arith.constant 0 : i32
    %887 = tpu.memref_slice %arg3[%c126_i32_506, %c0_i32_507] : memref<128x16xi32, #tpu.memory_space<vmem>> -> memref<1x16xi32, #tpu.memory_space<vmem>>
    %888 = tpu.memref_slice %arg4[%c0_i32_504] : memref<1x!tpu.dma_semaphore, #tpu.memory_space<semaphore_mem>> -> memref<1x!tpu.dma_semaphore, #tpu.memory_space<semaphore_mem>>
    %889 = tpu.memref_squeeze %888 : memref<1x!tpu.dma_semaphore, #tpu.memory_space<semaphore_mem>> -> memref<!tpu.dma_semaphore, #tpu.memory_space<semaphore_mem>>
    tpu.enqueue_dma source(%886 : memref<1x16xi32, #tpu.memory_space<any>>) target(%887 : memref<1x16xi32, #tpu.memory_space<vmem>>) target_semaphore(%889 : memref<!tpu.dma_semaphore, #tpu.memory_space<semaphore_mem>>)
    %c127_i32 = arith.constant 127 : i32
    %890 = arith.addi %0, %c127_i32 : i32
    %891 = arith.index_cast %890 : i32 to index
    %892 = memref.load %arg1[%891] : memref<128xi32, #tpu.memory_space<smem>>
    %c0_i32_508 = arith.constant 0 : i32
    %c0_i32_509 = arith.constant 0 : i32
    %893 = tpu.memref_slice %arg2[%892, %c0_i32_509] : memref<100x16xi32, #tpu.memory_space<any>> -> memref<1x16xi32, #tpu.memory_space<any>>
    %c127_i32_510 = arith.constant 127 : i32
    %c0_i32_511 = arith.constant 0 : i32
    %894 = tpu.memref_slice %arg3[%c127_i32_510, %c0_i32_511] : memref<128x16xi32, #tpu.memory_space<vmem>> -> memref<1x16xi32, #tpu.memory_space<vmem>>
    %895 = tpu.memref_slice %arg4[%c0_i32_508] : memref<1x!tpu.dma_semaphore, #tpu.memory_space<semaphore_mem>> -> memref<1x!tpu.dma_semaphore, #tpu.memory_space<semaphore_mem>>
    %896 = tpu.memref_squeeze %895 : memref<1x!tpu.dma_semaphore, #tpu.memory_space<semaphore_mem>> -> memref<!tpu.dma_semaphore, #tpu.memory_space<semaphore_mem>>
    tpu.enqueue_dma source(%893 : memref<1x16xi32, #tpu.memory_space<any>>) target(%894 : memref<1x16xi32, #tpu.memory_space<vmem>>) target_semaphore(%896 : memref<!tpu.dma_semaphore, #tpu.memory_space<semaphore_mem>>)
    %c0_i32_512 = arith.constant 0 : i32
    %c0_i32_513 = arith.constant 0 : i32
    %897 = tpu.memref_slice %arg2[%3, %c0_i32_513] : memref<100x16xi32, #tpu.memory_space<any>> -> memref<1x16xi32, #tpu.memory_space<any>>
    %c0_i32_514 = arith.constant 0 : i32
    %c0_i32_515 = arith.constant 0 : i32
    %898 = tpu.memref_slice %arg3[%c0_i32_514, %c0_i32_515] : memref<128x16xi32, #tpu.memory_space<vmem>> -> memref<1x16xi32, #tpu.memory_space<vmem>>
    %899 = tpu.memref_slice %arg4[%c0_i32_512] : memref<1x!tpu.dma_semaphore, #tpu.memory_space<semaphore_mem>> -> memref<1x!tpu.dma_semaphore, #tpu.memory_space<semaphore_mem>>
    %900 = tpu.memref_squeeze %899 : memref<1x!tpu.dma_semaphore, #tpu.memory_space<semaphore_mem>> -> memref<!tpu.dma_semaphore, #tpu.memory_space<semaphore_mem>>
    tpu.wait_dma2 semaphore(%900 : memref<!tpu.dma_semaphore, #tpu.memory_space<semaphore_mem>>) src(%897 : memref<1x16xi32, #tpu.memory_space<any>>) dst(%898 : memref<1x16xi32, #tpu.memory_space<vmem>>)
    %c0_i32_516 = arith.constant 0 : i32
    %c0_i32_517 = arith.constant 0 : i32
    %901 = tpu.memref_slice %arg2[%10, %c0_i32_517] : memref<100x16xi32, #tpu.memory_space<any>> -> memref<1x16xi32, #tpu.memory_space<any>>
    %c1_i32_518 = arith.constant 1 : i32
    %c0_i32_519 = arith.constant 0 : i32
    %902 = tpu.memref_slice %arg3[%c1_i32_518, %c0_i32_519] : memref<128x16xi32, #tpu.memory_space<vmem>> -> memref<1x16xi32, #tpu.memory_space<vmem>>
    %903 = tpu.memref_slice %arg4[%c0_i32_516] : memref<1x!tpu.dma_semaphore, #tpu.memory_space<semaphore_mem>> -> memref<1x!tpu.dma_semaphore, #tpu.memory_space<semaphore_mem>>
    %904 = tpu.memref_squeeze %903 : memref<1x!tpu.dma_semaphore, #tpu.memory_space<semaphore_mem>> -> memref<!tpu.dma_semaphore, #tpu.memory_space<semaphore_mem>>
    tpu.wait_dma2 semaphore(%904 : memref<!tpu.dma_semaphore, #tpu.memory_space<semaphore_mem>>) src(%901 : memref<1x16xi32, #tpu.memory_space<any>>) dst(%902 : memref<1x16xi32, #tpu.memory_space<vmem>>)
    %c0_i32_520 = arith.constant 0 : i32
    %c0_i32_521 = arith.constant 0 : i32
    %905 = tpu.memref_slice %arg2[%17, %c0_i32_521] : memref<100x16xi32, #tpu.memory_space<any>> -> memref<1x16xi32, #tpu.memory_space<any>>
    %c2_i32_522 = arith.constant 2 : i32
    %c0_i32_523 = arith.constant 0 : i32
    %906 = tpu.memref_slice %arg3[%c2_i32_522, %c0_i32_523] : memref<128x16xi32, #tpu.memory_space<vmem>> -> memref<1x16xi32, #tpu.memory_space<vmem>>
    %907 = tpu.memref_slice %arg4[%c0_i32_520] : memref<1x!tpu.dma_semaphore, #tpu.memory_space<semaphore_mem>> -> memref<1x!tpu.dma_semaphore, #tpu.memory_space<semaphore_mem>>
    %908 = tpu.memref_squeeze %907 : memref<1x!tpu.dma_semaphore, #tpu.memory_space<semaphore_mem>> -> memref<!tpu.dma_semaphore, #tpu.memory_space<semaphore_mem>>
    tpu.wait_dma2 semaphore(%908 : memref<!tpu.dma_semaphore, #tpu.memory_space<semaphore_mem>>) src(%905 : memref<1x16xi32, #tpu.memory_space<any>>) dst(%906 : memref<1x16xi32, #tpu.memory_space<vmem>>)
    %c0_i32_524 = arith.constant 0 : i32
    %c0_i32_525 = arith.constant 0 : i32
    %909 = tpu.memref_slice %arg2[%24, %c0_i32_525] : memref<100x16xi32, #tpu.memory_space<any>> -> memref<1x16xi32, #tpu.memory_space<any>>
    %c3_i32_526 = arith.constant 3 : i32
    %c0_i32_527 = arith.constant 0 : i32
    %910 = tpu.memref_slice %arg3[%c3_i32_526, %c0_i32_527] : memref<128x16xi32, #tpu.memory_space<vmem>> -> memref<1x16xi32, #tpu.memory_space<vmem>>
    %911 = tpu.memref_slice %arg4[%c0_i32_524] : memref<1x!tpu.dma_semaphore, #tpu.memory_space<semaphore_mem>> -> memref<1x!tpu.dma_semaphore, #tpu.memory_space<semaphore_mem>>
    %912 = tpu.memref_squeeze %911 : memref<1x!tpu.dma_semaphore, #tpu.memory_space<semaphore_mem>> -> memref<!tpu.dma_semaphore, #tpu.memory_space<semaphore_mem>>
    tpu.wait_dma2 semaphore(%912 : memref<!tpu.dma_semaphore, #tpu.memory_space<semaphore_mem>>) src(%909 : memref<1x16xi32, #tpu.memory_space<any>>) dst(%910 : memref<1x16xi32, #tpu.memory_space<vmem>>)
    %c0_i32_528 = arith.constant 0 : i32
    %c0_i32_529 = arith.constant 0 : i32
    %913 = tpu.memref_slice %arg2[%31, %c0_i32_529] : memref<100x16xi32, #tpu.memory_space<any>> -> memref<1x16xi32, #tpu.memory_space<any>>
    %c4_i32_530 = arith.constant 4 : i32
    %c0_i32_531 = arith.constant 0 : i32
    %914 = tpu.memref_slice %arg3[%c4_i32_530, %c0_i32_531] : memref<128x16xi32, #tpu.memory_space<vmem>> -> memref<1x16xi32, #tpu.memory_space<vmem>>
    %915 = tpu.memref_slice %arg4[%c0_i32_528] : memref<1x!tpu.dma_semaphore, #tpu.memory_space<semaphore_mem>> -> memref<1x!tpu.dma_semaphore, #tpu.memory_space<semaphore_mem>>
    %916 = tpu.memref_squeeze %915 : memref<1x!tpu.dma_semaphore, #tpu.memory_space<semaphore_mem>> -> memref<!tpu.dma_semaphore, #tpu.memory_space<semaphore_mem>>
    tpu.wait_dma2 semaphore(%916 : memref<!tpu.dma_semaphore, #tpu.memory_space<semaphore_mem>>) src(%913 : memref<1x16xi32, #tpu.memory_space<any>>) dst(%914 : memref<1x16xi32, #tpu.memory_space<vmem>>)
    %c0_i32_532 = arith.constant 0 : i32
    %c0_i32_533 = arith.constant 0 : i32
    %917 = tpu.memref_slice %arg2[%38, %c0_i32_533] : memref<100x16xi32, #tpu.memory_space<any>> -> memref<1x16xi32, #tpu.memory_space<any>>
    %c5_i32_534 = arith.constant 5 : i32
    %c0_i32_535 = arith.constant 0 : i32
    %918 = tpu.memref_slice %arg3[%c5_i32_534, %c0_i32_535] : memref<128x16xi32, #tpu.memory_space<vmem>> -> memref<1x16xi32, #tpu.memory_space<vmem>>
    %919 = tpu.memref_slice %arg4[%c0_i32_532] : memref<1x!tpu.dma_semaphore, #tpu.memory_space<semaphore_mem>> -> memref<1x!tpu.dma_semaphore, #tpu.memory_space<semaphore_mem>>
    %920 = tpu.memref_squeeze %919 : memref<1x!tpu.dma_semaphore, #tpu.memory_space<semaphore_mem>> -> memref<!tpu.dma_semaphore, #tpu.memory_space<semaphore_mem>>
    tpu.wait_dma2 semaphore(%920 : memref<!tpu.dma_semaphore, #tpu.memory_space<semaphore_mem>>) src(%917 : memref<1x16xi32, #tpu.memory_space<any>>) dst(%918 : memref<1x16xi32, #tpu.memory_space<vmem>>)
    %c0_i32_536 = arith.constant 0 : i32
    %c0_i32_537 = arith.constant 0 : i32
    %921 = tpu.memref_slice %arg2[%45, %c0_i32_537] : memref<100x16xi32, #tpu.memory_space<any>> -> memref<1x16xi32, #tpu.memory_space<any>>
    %c6_i32_538 = arith.constant 6 : i32
    %c0_i32_539 = arith.constant 0 : i32
    %922 = tpu.memref_slice %arg3[%c6_i32_538, %c0_i32_539] : memref<128x16xi32, #tpu.memory_space<vmem>> -> memref<1x16xi32, #tpu.memory_space<vmem>>
    %923 = tpu.memref_slice %arg4[%c0_i32_536] : memref<1x!tpu.dma_semaphore, #tpu.memory_space<semaphore_mem>> -> memref<1x!tpu.dma_semaphore, #tpu.memory_space<semaphore_mem>>
    %924 = tpu.memref_squeeze %923 : memref<1x!tpu.dma_semaphore, #tpu.memory_space<semaphore_mem>> -> memref<!tpu.dma_semaphore, #tpu.memory_space<semaphore_mem>>
    tpu.wait_dma2 semaphore(%924 : memref<!tpu.dma_semaphore, #tpu.memory_space<semaphore_mem>>) src(%921 : memref<1x16xi32, #tpu.memory_space<any>>) dst(%922 : memref<1x16xi32, #tpu.memory_space<vmem>>)
    %c0_i32_540 = arith.constant 0 : i32
    %c0_i32_541 = arith.constant 0 : i32
    %925 = tpu.memref_slice %arg2[%52, %c0_i32_541] : memref<100x16xi32, #tpu.memory_space<any>> -> memref<1x16xi32, #tpu.memory_space<any>>
    %c7_i32_542 = arith.constant 7 : i32
    %c0_i32_543 = arith.constant 0 : i32
    %926 = tpu.memref_slice %arg3[%c7_i32_542, %c0_i32_543] : memref<128x16xi32, #tpu.memory_space<vmem>> -> memref<1x16xi32, #tpu.memory_space<vmem>>
    %927 = tpu.memref_slice %arg4[%c0_i32_540] : memref<1x!tpu.dma_semaphore, #tpu.memory_space<semaphore_mem>> -> memref<1x!tpu.dma_semaphore, #tpu.memory_space<semaphore_mem>>
    %928 = tpu.memref_squeeze %927 : memref<1x!tpu.dma_semaphore, #tpu.memory_space<semaphore_mem>> -> memref<!tpu.dma_semaphore, #tpu.memory_space<semaphore_mem>>
    tpu.wait_dma2 semaphore(%928 : memref<!tpu.dma_semaphore, #tpu.memory_space<semaphore_mem>>) src(%925 : memref<1x16xi32, #tpu.memory_space<any>>) dst(%926 : memref<1x16xi32, #tpu.memory_space<vmem>>)
    %c0_i32_544 = arith.constant 0 : i32
    %c0_i32_545 = arith.constant 0 : i32
    %929 = tpu.memref_slice %arg2[%59, %c0_i32_545] : memref<100x16xi32, #tpu.memory_space<any>> -> memref<1x16xi32, #tpu.memory_space<any>>
    %c8_i32_546 = arith.constant 8 : i32
    %c0_i32_547 = arith.constant 0 : i32
    %930 = tpu.memref_slice %arg3[%c8_i32_546, %c0_i32_547] : memref<128x16xi32, #tpu.memory_space<vmem>> -> memref<1x16xi32, #tpu.memory_space<vmem>>
    %931 = tpu.memref_slice %arg4[%c0_i32_544] : memref<1x!tpu.dma_semaphore, #tpu.memory_space<semaphore_mem>> -> memref<1x!tpu.dma_semaphore, #tpu.memory_space<semaphore_mem>>
    %932 = tpu.memref_squeeze %931 : memref<1x!tpu.dma_semaphore, #tpu.memory_space<semaphore_mem>> -> memref<!tpu.dma_semaphore, #tpu.memory_space<semaphore_mem>>
    tpu.wait_dma2 semaphore(%932 : memref<!tpu.dma_semaphore, #tpu.memory_space<semaphore_mem>>) src(%929 : memref<1x16xi32, #tpu.memory_space<any>>) dst(%930 : memref<1x16xi32, #tpu.memory_space<vmem>>)
    %c0_i32_548 = arith.constant 0 : i32
    %c0_i32_549 = arith.constant 0 : i32
    %933 = tpu.memref_slice %arg2[%66, %c0_i32_549] : memref<100x16xi32, #tpu.memory_space<any>> -> memref<1x16xi32, #tpu.memory_space<any>>
    %c9_i32_550 = arith.constant 9 : i32
    %c0_i32_551 = arith.constant 0 : i32
    %934 = tpu.memref_slice %arg3[%c9_i32_550, %c0_i32_551] : memref<128x16xi32, #tpu.memory_space<vmem>> -> memref<1x16xi32, #tpu.memory_space<vmem>>
    %935 = tpu.memref_slice %arg4[%c0_i32_548] : memref<1x!tpu.dma_semaphore, #tpu.memory_space<semaphore_mem>> -> memref<1x!tpu.dma_semaphore, #tpu.memory_space<semaphore_mem>>
    %936 = tpu.memref_squeeze %935 : memref<1x!tpu.dma_semaphore, #tpu.memory_space<semaphore_mem>> -> memref<!tpu.dma_semaphore, #tpu.memory_space<semaphore_mem>>
    tpu.wait_dma2 semaphore(%936 : memref<!tpu.dma_semaphore, #tpu.memory_space<semaphore_mem>>) src(%933 : memref<1x16xi32, #tpu.memory_space<any>>) dst(%934 : memref<1x16xi32, #tpu.memory_space<vmem>>)
    %c0_i32_552 = arith.constant 0 : i32
    %c0_i32_553 = arith.constant 0 : i32
    %937 = tpu.memref_slice %arg2[%73, %c0_i32_553] : memref<100x16xi32, #tpu.memory_space<any>> -> memref<1x16xi32, #tpu.memory_space<any>>
    %c10_i32_554 = arith.constant 10 : i32
    %c0_i32_555 = arith.constant 0 : i32
    %938 = tpu.memref_slice %arg3[%c10_i32_554, %c0_i32_555] : memref<128x16xi32, #tpu.memory_space<vmem>> -> memref<1x16xi32, #tpu.memory_space<vmem>>
    %939 = tpu.memref_slice %arg4[%c0_i32_552] : memref<1x!tpu.dma_semaphore, #tpu.memory_space<semaphore_mem>> -> memref<1x!tpu.dma_semaphore, #tpu.memory_space<semaphore_mem>>
    %940 = tpu.memref_squeeze %939 : memref<1x!tpu.dma_semaphore, #tpu.memory_space<semaphore_mem>> -> memref<!tpu.dma_semaphore, #tpu.memory_space<semaphore_mem>>
    tpu.wait_dma2 semaphore(%940 : memref<!tpu.dma_semaphore, #tpu.memory_space<semaphore_mem>>) src(%937 : memref<1x16xi32, #tpu.memory_space<any>>) dst(%938 : memref<1x16xi32, #tpu.memory_space<vmem>>)
    %c0_i32_556 = arith.constant 0 : i32
    %c0_i32_557 = arith.constant 0 : i32
    %941 = tpu.memref_slice %arg2[%80, %c0_i32_557] : memref<100x16xi32, #tpu.memory_space<any>> -> memref<1x16xi32, #tpu.memory_space<any>>
    %c11_i32_558 = arith.constant 11 : i32
    %c0_i32_559 = arith.constant 0 : i32
    %942 = tpu.memref_slice %arg3[%c11_i32_558, %c0_i32_559] : memref<128x16xi32, #tpu.memory_space<vmem>> -> memref<1x16xi32, #tpu.memory_space<vmem>>
    %943 = tpu.memref_slice %arg4[%c0_i32_556] : memref<1x!tpu.dma_semaphore, #tpu.memory_space<semaphore_mem>> -> memref<1x!tpu.dma_semaphore, #tpu.memory_space<semaphore_mem>>
    %944 = tpu.memref_squeeze %943 : memref<1x!tpu.dma_semaphore, #tpu.memory_space<semaphore_mem>> -> memref<!tpu.dma_semaphore, #tpu.memory_space<semaphore_mem>>
    tpu.wait_dma2 semaphore(%944 : memref<!tpu.dma_semaphore, #tpu.memory_space<semaphore_mem>>) src(%941 : memref<1x16xi32, #tpu.memory_space<any>>) dst(%942 : memref<1x16xi32, #tpu.memory_space<vmem>>)
    %c0_i32_560 = arith.constant 0 : i32
    %c0_i32_561 = arith.constant 0 : i32
    %945 = tpu.memref_slice %arg2[%87, %c0_i32_561] : memref<100x16xi32, #tpu.memory_space<any>> -> memref<1x16xi32, #tpu.memory_space<any>>
    %c12_i32_562 = arith.constant 12 : i32
    %c0_i32_563 = arith.constant 0 : i32
    %946 = tpu.memref_slice %arg3[%c12_i32_562, %c0_i32_563] : memref<128x16xi32, #tpu.memory_space<vmem>> -> memref<1x16xi32, #tpu.memory_space<vmem>>
    %947 = tpu.memref_slice %arg4[%c0_i32_560] : memref<1x!tpu.dma_semaphore, #tpu.memory_space<semaphore_mem>> -> memref<1x!tpu.dma_semaphore, #tpu.memory_space<semaphore_mem>>
    %948 = tpu.memref_squeeze %947 : memref<1x!tpu.dma_semaphore, #tpu.memory_space<semaphore_mem>> -> memref<!tpu.dma_semaphore, #tpu.memory_space<semaphore_mem>>
    tpu.wait_dma2 semaphore(%948 : memref<!tpu.dma_semaphore, #tpu.memory_space<semaphore_mem>>) src(%945 : memref<1x16xi32, #tpu.memory_space<any>>) dst(%946 : memref<1x16xi32, #tpu.memory_space<vmem>>)
    %c0_i32_564 = arith.constant 0 : i32
    %c0_i32_565 = arith.constant 0 : i32
    %949 = tpu.memref_slice %arg2[%94, %c0_i32_565] : memref<100x16xi32, #tpu.memory_space<any>> -> memref<1x16xi32, #tpu.memory_space<any>>
    %c13_i32_566 = arith.constant 13 : i32
    %c0_i32_567 = arith.constant 0 : i32
    %950 = tpu.memref_slice %arg3[%c13_i32_566, %c0_i32_567] : memref<128x16xi32, #tpu.memory_space<vmem>> -> memref<1x16xi32, #tpu.memory_space<vmem>>
    %951 = tpu.memref_slice %arg4[%c0_i32_564] : memref<1x!tpu.dma_semaphore, #tpu.memory_space<semaphore_mem>> -> memref<1x!tpu.dma_semaphore, #tpu.memory_space<semaphore_mem>>
    %952 = tpu.memref_squeeze %951 : memref<1x!tpu.dma_semaphore, #tpu.memory_space<semaphore_mem>> -> memref<!tpu.dma_semaphore, #tpu.memory_space<semaphore_mem>>
    tpu.wait_dma2 semaphore(%952 : memref<!tpu.dma_semaphore, #tpu.memory_space<semaphore_mem>>) src(%949 : memref<1x16xi32, #tpu.memory_space<any>>) dst(%950 : memref<1x16xi32, #tpu.memory_space<vmem>>)
    %c0_i32_568 = arith.constant 0 : i32
    %c0_i32_569 = arith.constant 0 : i32
    %953 = tpu.memref_slice %arg2[%101, %c0_i32_569] : memref<100x16xi32, #tpu.memory_space<any>> -> memref<1x16xi32, #tpu.memory_space<any>>
    %c14_i32_570 = arith.constant 14 : i32
    %c0_i32_571 = arith.constant 0 : i32
    %954 = tpu.memref_slice %arg3[%c14_i32_570, %c0_i32_571] : memref<128x16xi32, #tpu.memory_space<vmem>> -> memref<1x16xi32, #tpu.memory_space<vmem>>
    %955 = tpu.memref_slice %arg4[%c0_i32_568] : memref<1x!tpu.dma_semaphore, #tpu.memory_space<semaphore_mem>> -> memref<1x!tpu.dma_semaphore, #tpu.memory_space<semaphore_mem>>
    %956 = tpu.memref_squeeze %955 : memref<1x!tpu.dma_semaphore, #tpu.memory_space<semaphore_mem>> -> memref<!tpu.dma_semaphore, #tpu.memory_space<semaphore_mem>>
    tpu.wait_dma2 semaphore(%956 : memref<!tpu.dma_semaphore, #tpu.memory_space<semaphore_mem>>) src(%953 : memref<1x16xi32, #tpu.memory_space<any>>) dst(%954 : memref<1x16xi32, #tpu.memory_space<vmem>>)
    %c0_i32_572 = arith.constant 0 : i32
    %c0_i32_573 = arith.constant 0 : i32
    %957 = tpu.memref_slice %arg2[%108, %c0_i32_573] : memref<100x16xi32, #tpu.memory_space<any>> -> memref<1x16xi32, #tpu.memory_space<any>>
    %c15_i32_574 = arith.constant 15 : i32
    %c0_i32_575 = arith.constant 0 : i32
    %958 = tpu.memref_slice %arg3[%c15_i32_574, %c0_i32_575] : memref<128x16xi32, #tpu.memory_space<vmem>> -> memref<1x16xi32, #tpu.memory_space<vmem>>
    %959 = tpu.memref_slice %arg4[%c0_i32_572] : memref<1x!tpu.dma_semaphore, #tpu.memory_space<semaphore_mem>> -> memref<1x!tpu.dma_semaphore, #tpu.memory_space<semaphore_mem>>
    %960 = tpu.memref_squeeze %959 : memref<1x!tpu.dma_semaphore, #tpu.memory_space<semaphore_mem>> -> memref<!tpu.dma_semaphore, #tpu.memory_space<semaphore_mem>>
    tpu.wait_dma2 semaphore(%960 : memref<!tpu.dma_semaphore, #tpu.memory_space<semaphore_mem>>) src(%957 : memref<1x16xi32, #tpu.memory_space<any>>) dst(%958 : memref<1x16xi32, #tpu.memory_space<vmem>>)
    %c0_i32_576 = arith.constant 0 : i32
    %c0_i32_577 = arith.constant 0 : i32
    %961 = tpu.memref_slice %arg2[%115, %c0_i32_577] : memref<100x16xi32, #tpu.memory_space<any>> -> memref<1x16xi32, #tpu.memory_space<any>>
    %c16_i32_578 = arith.constant 16 : i32
    %c0_i32_579 = arith.constant 0 : i32
    %962 = tpu.memref_slice %arg3[%c16_i32_578, %c0_i32_579] : memref<128x16xi32, #tpu.memory_space<vmem>> -> memref<1x16xi32, #tpu.memory_space<vmem>>
    %963 = tpu.memref_slice %arg4[%c0_i32_576] : memref<1x!tpu.dma_semaphore, #tpu.memory_space<semaphore_mem>> -> memref<1x!tpu.dma_semaphore, #tpu.memory_space<semaphore_mem>>
    %964 = tpu.memref_squeeze %963 : memref<1x!tpu.dma_semaphore, #tpu.memory_space<semaphore_mem>> -> memref<!tpu.dma_semaphore, #tpu.memory_space<semaphore_mem>>
    tpu.wait_dma2 semaphore(%964 : memref<!tpu.dma_semaphore, #tpu.memory_space<semaphore_mem>>) src(%961 : memref<1x16xi32, #tpu.memory_space<any>>) dst(%962 : memref<1x16xi32, #tpu.memory_space<vmem>>)
    %c0_i32_580 = arith.constant 0 : i32
    %c0_i32_581 = arith.constant 0 : i32
    %965 = tpu.memref_slice %arg2[%122, %c0_i32_581] : memref<100x16xi32, #tpu.memory_space<any>> -> memref<1x16xi32, #tpu.memory_space<any>>
    %c17_i32_582 = arith.constant 17 : i32
    %c0_i32_583 = arith.constant 0 : i32
    %966 = tpu.memref_slice %arg3[%c17_i32_582, %c0_i32_583] : memref<128x16xi32, #tpu.memory_space<vmem>> -> memref<1x16xi32, #tpu.memory_space<vmem>>
    %967 = tpu.memref_slice %arg4[%c0_i32_580] : memref<1x!tpu.dma_semaphore, #tpu.memory_space<semaphore_mem>> -> memref<1x!tpu.dma_semaphore, #tpu.memory_space<semaphore_mem>>
    %968 = tpu.memref_squeeze %967 : memref<1x!tpu.dma_semaphore, #tpu.memory_space<semaphore_mem>> -> memref<!tpu.dma_semaphore, #tpu.memory_space<semaphore_mem>>
    tpu.wait_dma2 semaphore(%968 : memref<!tpu.dma_semaphore, #tpu.memory_space<semaphore_mem>>) src(%965 : memref<1x16xi32, #tpu.memory_space<any>>) dst(%966 : memref<1x16xi32, #tpu.memory_space<vmem>>)
    %c0_i32_584 = arith.constant 0 : i32
    %c0_i32_585 = arith.constant 0 : i32
    %969 = tpu.memref_slice %arg2[%129, %c0_i32_585] : memref<100x16xi32, #tpu.memory_space<any>> -> memref<1x16xi32, #tpu.memory_space<any>>
    %c18_i32_586 = arith.constant 18 : i32
    %c0_i32_587 = arith.constant 0 : i32
    %970 = tpu.memref_slice %arg3[%c18_i32_586, %c0_i32_587] : memref<128x16xi32, #tpu.memory_space<vmem>> -> memref<1x16xi32, #tpu.memory_space<vmem>>
    %971 = tpu.memref_slice %arg4[%c0_i32_584] : memref<1x!tpu.dma_semaphore, #tpu.memory_space<semaphore_mem>> -> memref<1x!tpu.dma_semaphore, #tpu.memory_space<semaphore_mem>>
    %972 = tpu.memref_squeeze %971 : memref<1x!tpu.dma_semaphore, #tpu.memory_space<semaphore_mem>> -> memref<!tpu.dma_semaphore, #tpu.memory_space<semaphore_mem>>
    tpu.wait_dma2 semaphore(%972 : memref<!tpu.dma_semaphore, #tpu.memory_space<semaphore_mem>>) src(%969 : memref<1x16xi32, #tpu.memory_space<any>>) dst(%970 : memref<1x16xi32, #tpu.memory_space<vmem>>)
    %c0_i32_588 = arith.constant 0 : i32
    %c0_i32_589 = arith.constant 0 : i32
    %973 = tpu.memref_slice %arg2[%136, %c0_i32_589] : memref<100x16xi32, #tpu.memory_space<any>> -> memref<1x16xi32, #tpu.memory_space<any>>
    %c19_i32_590 = arith.constant 19 : i32
    %c0_i32_591 = arith.constant 0 : i32
    %974 = tpu.memref_slice %arg3[%c19_i32_590, %c0_i32_591] : memref<128x16xi32, #tpu.memory_space<vmem>> -> memref<1x16xi32, #tpu.memory_space<vmem>>
    %975 = tpu.memref_slice %arg4[%c0_i32_588] : memref<1x!tpu.dma_semaphore, #tpu.memory_space<semaphore_mem>> -> memref<1x!tpu.dma_semaphore, #tpu.memory_space<semaphore_mem>>
    %976 = tpu.memref_squeeze %975 : memref<1x!tpu.dma_semaphore, #tpu.memory_space<semaphore_mem>> -> memref<!tpu.dma_semaphore, #tpu.memory_space<semaphore_mem>>
    tpu.wait_dma2 semaphore(%976 : memref<!tpu.dma_semaphore, #tpu.memory_space<semaphore_mem>>) src(%973 : memref<1x16xi32, #tpu.memory_space<any>>) dst(%974 : memref<1x16xi32, #tpu.memory_space<vmem>>)
    %c0_i32_592 = arith.constant 0 : i32
    %c0_i32_593 = arith.constant 0 : i32
    %977 = tpu.memref_slice %arg2[%143, %c0_i32_593] : memref<100x16xi32, #tpu.memory_space<any>> -> memref<1x16xi32, #tpu.memory_space<any>>
    %c20_i32_594 = arith.constant 20 : i32
    %c0_i32_595 = arith.constant 0 : i32
    %978 = tpu.memref_slice %arg3[%c20_i32_594, %c0_i32_595] : memref<128x16xi32, #tpu.memory_space<vmem>> -> memref<1x16xi32, #tpu.memory_space<vmem>>
    %979 = tpu.memref_slice %arg4[%c0_i32_592] : memref<1x!tpu.dma_semaphore, #tpu.memory_space<semaphore_mem>> -> memref<1x!tpu.dma_semaphore, #tpu.memory_space<semaphore_mem>>
    %980 = tpu.memref_squeeze %979 : memref<1x!tpu.dma_semaphore, #tpu.memory_space<semaphore_mem>> -> memref<!tpu.dma_semaphore, #tpu.memory_space<semaphore_mem>>
    tpu.wait_dma2 semaphore(%980 : memref<!tpu.dma_semaphore, #tpu.memory_space<semaphore_mem>>) src(%977 : memref<1x16xi32, #tpu.memory_space<any>>) dst(%978 : memref<1x16xi32, #tpu.memory_space<vmem>>)
    %c0_i32_596 = arith.constant 0 : i32
    %c0_i32_597 = arith.constant 0 : i32
    %981 = tpu.memref_slice %arg2[%150, %c0_i32_597] : memref<100x16xi32, #tpu.memory_space<any>> -> memref<1x16xi32, #tpu.memory_space<any>>
    %c21_i32_598 = arith.constant 21 : i32
    %c0_i32_599 = arith.constant 0 : i32
    %982 = tpu.memref_slice %arg3[%c21_i32_598, %c0_i32_599] : memref<128x16xi32, #tpu.memory_space<vmem>> -> memref<1x16xi32, #tpu.memory_space<vmem>>
    %983 = tpu.memref_slice %arg4[%c0_i32_596] : memref<1x!tpu.dma_semaphore, #tpu.memory_space<semaphore_mem>> -> memref<1x!tpu.dma_semaphore, #tpu.memory_space<semaphore_mem>>
    %984 = tpu.memref_squeeze %983 : memref<1x!tpu.dma_semaphore, #tpu.memory_space<semaphore_mem>> -> memref<!tpu.dma_semaphore, #tpu.memory_space<semaphore_mem>>
    tpu.wait_dma2 semaphore(%984 : memref<!tpu.dma_semaphore, #tpu.memory_space<semaphore_mem>>) src(%981 : memref<1x16xi32, #tpu.memory_space<any>>) dst(%982 : memref<1x16xi32, #tpu.memory_space<vmem>>)
    %c0_i32_600 = arith.constant 0 : i32
    %c0_i32_601 = arith.constant 0 : i32
    %985 = tpu.memref_slice %arg2[%157, %c0_i32_601] : memref<100x16xi32, #tpu.memory_space<any>> -> memref<1x16xi32, #tpu.memory_space<any>>
    %c22_i32_602 = arith.constant 22 : i32
    %c0_i32_603 = arith.constant 0 : i32
    %986 = tpu.memref_slice %arg3[%c22_i32_602, %c0_i32_603] : memref<128x16xi32, #tpu.memory_space<vmem>> -> memref<1x16xi32, #tpu.memory_space<vmem>>
    %987 = tpu.memref_slice %arg4[%c0_i32_600] : memref<1x!tpu.dma_semaphore, #tpu.memory_space<semaphore_mem>> -> memref<1x!tpu.dma_semaphore, #tpu.memory_space<semaphore_mem>>
    %988 = tpu.memref_squeeze %987 : memref<1x!tpu.dma_semaphore, #tpu.memory_space<semaphore_mem>> -> memref<!tpu.dma_semaphore, #tpu.memory_space<semaphore_mem>>
    tpu.wait_dma2 semaphore(%988 : memref<!tpu.dma_semaphore, #tpu.memory_space<semaphore_mem>>) src(%985 : memref<1x16xi32, #tpu.memory_space<any>>) dst(%986 : memref<1x16xi32, #tpu.memory_space<vmem>>)
    %c0_i32_604 = arith.constant 0 : i32
    %c0_i32_605 = arith.constant 0 : i32
    %989 = tpu.memref_slice %arg2[%164, %c0_i32_605] : memref<100x16xi32, #tpu.memory_space<any>> -> memref<1x16xi32, #tpu.memory_space<any>>
    %c23_i32_606 = arith.constant 23 : i32
    %c0_i32_607 = arith.constant 0 : i32
    %990 = tpu.memref_slice %arg3[%c23_i32_606, %c0_i32_607] : memref<128x16xi32, #tpu.memory_space<vmem>> -> memref<1x16xi32, #tpu.memory_space<vmem>>
    %991 = tpu.memref_slice %arg4[%c0_i32_604] : memref<1x!tpu.dma_semaphore, #tpu.memory_space<semaphore_mem>> -> memref<1x!tpu.dma_semaphore, #tpu.memory_space<semaphore_mem>>
    %992 = tpu.memref_squeeze %991 : memref<1x!tpu.dma_semaphore, #tpu.memory_space<semaphore_mem>> -> memref<!tpu.dma_semaphore, #tpu.memory_space<semaphore_mem>>
    tpu.wait_dma2 semaphore(%992 : memref<!tpu.dma_semaphore, #tpu.memory_space<semaphore_mem>>) src(%989 : memref<1x16xi32, #tpu.memory_space<any>>) dst(%990 : memref<1x16xi32, #tpu.memory_space<vmem>>)
    %c0_i32_608 = arith.constant 0 : i32
    %c0_i32_609 = arith.constant 0 : i32
    %993 = tpu.memref_slice %arg2[%171, %c0_i32_609] : memref<100x16xi32, #tpu.memory_space<any>> -> memref<1x16xi32, #tpu.memory_space<any>>
    %c24_i32_610 = arith.constant 24 : i32
    %c0_i32_611 = arith.constant 0 : i32
    %994 = tpu.memref_slice %arg3[%c24_i32_610, %c0_i32_611] : memref<128x16xi32, #tpu.memory_space<vmem>> -> memref<1x16xi32, #tpu.memory_space<vmem>>
    %995 = tpu.memref_slice %arg4[%c0_i32_608] : memref<1x!tpu.dma_semaphore, #tpu.memory_space<semaphore_mem>> -> memref<1x!tpu.dma_semaphore, #tpu.memory_space<semaphore_mem>>
    %996 = tpu.memref_squeeze %995 : memref<1x!tpu.dma_semaphore, #tpu.memory_space<semaphore_mem>> -> memref<!tpu.dma_semaphore, #tpu.memory_space<semaphore_mem>>
    tpu.wait_dma2 semaphore(%996 : memref<!tpu.dma_semaphore, #tpu.memory_space<semaphore_mem>>) src(%993 : memref<1x16xi32, #tpu.memory_space<any>>) dst(%994 : memref<1x16xi32, #tpu.memory_space<vmem>>)
    %c0_i32_612 = arith.constant 0 : i32
    %c0_i32_613 = arith.constant 0 : i32
    %997 = tpu.memref_slice %arg2[%178, %c0_i32_613] : memref<100x16xi32, #tpu.memory_space<any>> -> memref<1x16xi32, #tpu.memory_space<any>>
    %c25_i32_614 = arith.constant 25 : i32
    %c0_i32_615 = arith.constant 0 : i32
    %998 = tpu.memref_slice %arg3[%c25_i32_614, %c0_i32_615] : memref<128x16xi32, #tpu.memory_space<vmem>> -> memref<1x16xi32, #tpu.memory_space<vmem>>
    %999 = tpu.memref_slice %arg4[%c0_i32_612] : memref<1x!tpu.dma_semaphore, #tpu.memory_space<semaphore_mem>> -> memref<1x!tpu.dma_semaphore, #tpu.memory_space<semaphore_mem>>
    %1000 = tpu.memref_squeeze %999 : memref<1x!tpu.dma_semaphore, #tpu.memory_space<semaphore_mem>> -> memref<!tpu.dma_semaphore, #tpu.memory_space<semaphore_mem>>
    tpu.wait_dma2 semaphore(%1000 : memref<!tpu.dma_semaphore, #tpu.memory_space<semaphore_mem>>) src(%997 : memref<1x16xi32, #tpu.memory_space<any>>) dst(%998 : memref<1x16xi32, #tpu.memory_space<vmem>>)
    %c0_i32_616 = arith.constant 0 : i32
    %c0_i32_617 = arith.constant 0 : i32
    %1001 = tpu.memref_slice %arg2[%185, %c0_i32_617] : memref<100x16xi32, #tpu.memory_space<any>> -> memref<1x16xi32, #tpu.memory_space<any>>
    %c26_i32_618 = arith.constant 26 : i32
    %c0_i32_619 = arith.constant 0 : i32
    %1002 = tpu.memref_slice %arg3[%c26_i32_618, %c0_i32_619] : memref<128x16xi32, #tpu.memory_space<vmem>> -> memref<1x16xi32, #tpu.memory_space<vmem>>
    %1003 = tpu.memref_slice %arg4[%c0_i32_616] : memref<1x!tpu.dma_semaphore, #tpu.memory_space<semaphore_mem>> -> memref<1x!tpu.dma_semaphore, #tpu.memory_space<semaphore_mem>>
    %1004 = tpu.memref_squeeze %1003 : memref<1x!tpu.dma_semaphore, #tpu.memory_space<semaphore_mem>> -> memref<!tpu.dma_semaphore, #tpu.memory_space<semaphore_mem>>
    tpu.wait_dma2 semaphore(%1004 : memref<!tpu.dma_semaphore, #tpu.memory_space<semaphore_mem>>) src(%1001 : memref<1x16xi32, #tpu.memory_space<any>>) dst(%1002 : memref<1x16xi32, #tpu.memory_space<vmem>>)
    %c0_i32_620 = arith.constant 0 : i32
    %c0_i32_621 = arith.constant 0 : i32
    %1005 = tpu.memref_slice %arg2[%192, %c0_i32_621] : memref<100x16xi32, #tpu.memory_space<any>> -> memref<1x16xi32, #tpu.memory_space<any>>
    %c27_i32_622 = arith.constant 27 : i32
    %c0_i32_623 = arith.constant 0 : i32
    %1006 = tpu.memref_slice %arg3[%c27_i32_622, %c0_i32_623] : memref<128x16xi32, #tpu.memory_space<vmem>> -> memref<1x16xi32, #tpu.memory_space<vmem>>
    %1007 = tpu.memref_slice %arg4[%c0_i32_620] : memref<1x!tpu.dma_semaphore, #tpu.memory_space<semaphore_mem>> -> memref<1x!tpu.dma_semaphore, #tpu.memory_space<semaphore_mem>>
    %1008 = tpu.memref_squeeze %1007 : memref<1x!tpu.dma_semaphore, #tpu.memory_space<semaphore_mem>> -> memref<!tpu.dma_semaphore, #tpu.memory_space<semaphore_mem>>
    tpu.wait_dma2 semaphore(%1008 : memref<!tpu.dma_semaphore, #tpu.memory_space<semaphore_mem>>) src(%1005 : memref<1x16xi32, #tpu.memory_space<any>>) dst(%1006 : memref<1x16xi32, #tpu.memory_space<vmem>>)
    %c0_i32_624 = arith.constant 0 : i32
    %c0_i32_625 = arith.constant 0 : i32
    %1009 = tpu.memref_slice %arg2[%199, %c0_i32_625] : memref<100x16xi32, #tpu.memory_space<any>> -> memref<1x16xi32, #tpu.memory_space<any>>
    %c28_i32_626 = arith.constant 28 : i32
    %c0_i32_627 = arith.constant 0 : i32
    %1010 = tpu.memref_slice %arg3[%c28_i32_626, %c0_i32_627] : memref<128x16xi32, #tpu.memory_space<vmem>> -> memref<1x16xi32, #tpu.memory_space<vmem>>
    %1011 = tpu.memref_slice %arg4[%c0_i32_624] : memref<1x!tpu.dma_semaphore, #tpu.memory_space<semaphore_mem>> -> memref<1x!tpu.dma_semaphore, #tpu.memory_space<semaphore_mem>>
    %1012 = tpu.memref_squeeze %1011 : memref<1x!tpu.dma_semaphore, #tpu.memory_space<semaphore_mem>> -> memref<!tpu.dma_semaphore, #tpu.memory_space<semaphore_mem>>
    tpu.wait_dma2 semaphore(%1012 : memref<!tpu.dma_semaphore, #tpu.memory_space<semaphore_mem>>) src(%1009 : memref<1x16xi32, #tpu.memory_space<any>>) dst(%1010 : memref<1x16xi32, #tpu.memory_space<vmem>>)
    %c0_i32_628 = arith.constant 0 : i32
    %c0_i32_629 = arith.constant 0 : i32
    %1013 = tpu.memref_slice %arg2[%206, %c0_i32_629] : memref<100x16xi32, #tpu.memory_space<any>> -> memref<1x16xi32, #tpu.memory_space<any>>
    %c29_i32_630 = arith.constant 29 : i32
    %c0_i32_631 = arith.constant 0 : i32
    %1014 = tpu.memref_slice %arg3[%c29_i32_630, %c0_i32_631] : memref<128x16xi32, #tpu.memory_space<vmem>> -> memref<1x16xi32, #tpu.memory_space<vmem>>
    %1015 = tpu.memref_slice %arg4[%c0_i32_628] : memref<1x!tpu.dma_semaphore, #tpu.memory_space<semaphore_mem>> -> memref<1x!tpu.dma_semaphore, #tpu.memory_space<semaphore_mem>>
    %1016 = tpu.memref_squeeze %1015 : memref<1x!tpu.dma_semaphore, #tpu.memory_space<semaphore_mem>> -> memref<!tpu.dma_semaphore, #tpu.memory_space<semaphore_mem>>
    tpu.wait_dma2 semaphore(%1016 : memref<!tpu.dma_semaphore, #tpu.memory_space<semaphore_mem>>) src(%1013 : memref<1x16xi32, #tpu.memory_space<any>>) dst(%1014 : memref<1x16xi32, #tpu.memory_space<vmem>>)
    %c0_i32_632 = arith.constant 0 : i32
    %c0_i32_633 = arith.constant 0 : i32
    %1017 = tpu.memref_slice %arg2[%213, %c0_i32_633] : memref<100x16xi32, #tpu.memory_space<any>> -> memref<1x16xi32, #tpu.memory_space<any>>
    %c30_i32_634 = arith.constant 30 : i32
    %c0_i32_635 = arith.constant 0 : i32
    %1018 = tpu.memref_slice %arg3[%c30_i32_634, %c0_i32_635] : memref<128x16xi32, #tpu.memory_space<vmem>> -> memref<1x16xi32, #tpu.memory_space<vmem>>
    %1019 = tpu.memref_slice %arg4[%c0_i32_632] : memref<1x!tpu.dma_semaphore, #tpu.memory_space<semaphore_mem>> -> memref<1x!tpu.dma_semaphore, #tpu.memory_space<semaphore_mem>>
    %1020 = tpu.memref_squeeze %1019 : memref<1x!tpu.dma_semaphore, #tpu.memory_space<semaphore_mem>> -> memref<!tpu.dma_semaphore, #tpu.memory_space<semaphore_mem>>
    tpu.wait_dma2 semaphore(%1020 : memref<!tpu.dma_semaphore, #tpu.memory_space<semaphore_mem>>) src(%1017 : memref<1x16xi32, #tpu.memory_space<any>>) dst(%1018 : memref<1x16xi32, #tpu.memory_space<vmem>>)
    %c0_i32_636 = arith.constant 0 : i32
    %c0_i32_637 = arith.constant 0 : i32
    %1021 = tpu.memref_slice %arg2[%220, %c0_i32_637] : memref<100x16xi32, #tpu.memory_space<any>> -> memref<1x16xi32, #tpu.memory_space<any>>
    %c31_i32_638 = arith.constant 31 : i32
    %c0_i32_639 = arith.constant 0 : i32
    %1022 = tpu.memref_slice %arg3[%c31_i32_638, %c0_i32_639] : memref<128x16xi32, #tpu.memory_space<vmem>> -> memref<1x16xi32, #tpu.memory_space<vmem>>
    %1023 = tpu.memref_slice %arg4[%c0_i32_636] : memref<1x!tpu.dma_semaphore, #tpu.memory_space<semaphore_mem>> -> memref<1x!tpu.dma_semaphore, #tpu.memory_space<semaphore_mem>>
    %1024 = tpu.memref_squeeze %1023 : memref<1x!tpu.dma_semaphore, #tpu.memory_space<semaphore_mem>> -> memref<!tpu.dma_semaphore, #tpu.memory_space<semaphore_mem>>
    tpu.wait_dma2 semaphore(%1024 : memref<!tpu.dma_semaphore, #tpu.memory_space<semaphore_mem>>) src(%1021 : memref<1x16xi32, #tpu.memory_space<any>>) dst(%1022 : memref<1x16xi32, #tpu.memory_space<vmem>>)
    %c0_i32_640 = arith.constant 0 : i32
    %c0_i32_641 = arith.constant 0 : i32
    %1025 = tpu.memref_slice %arg2[%227, %c0_i32_641] : memref<100x16xi32, #tpu.memory_space<any>> -> memref<1x16xi32, #tpu.memory_space<any>>
    %c32_i32_642 = arith.constant 32 : i32
    %c0_i32_643 = arith.constant 0 : i32
    %1026 = tpu.memref_slice %arg3[%c32_i32_642, %c0_i32_643] : memref<128x16xi32, #tpu.memory_space<vmem>> -> memref<1x16xi32, #tpu.memory_space<vmem>>
    %1027 = tpu.memref_slice %arg4[%c0_i32_640] : memref<1x!tpu.dma_semaphore, #tpu.memory_space<semaphore_mem>> -> memref<1x!tpu.dma_semaphore, #tpu.memory_space<semaphore_mem>>
    %1028 = tpu.memref_squeeze %1027 : memref<1x!tpu.dma_semaphore, #tpu.memory_space<semaphore_mem>> -> memref<!tpu.dma_semaphore, #tpu.memory_space<semaphore_mem>>
    tpu.wait_dma2 semaphore(%1028 : memref<!tpu.dma_semaphore, #tpu.memory_space<semaphore_mem>>) src(%1025 : memref<1x16xi32, #tpu.memory_space<any>>) dst(%1026 : memref<1x16xi32, #tpu.memory_space<vmem>>)
    %c0_i32_644 = arith.constant 0 : i32
    %c0_i32_645 = arith.constant 0 : i32
    %1029 = tpu.memref_slice %arg2[%234, %c0_i32_645] : memref<100x16xi32, #tpu.memory_space<any>> -> memref<1x16xi32, #tpu.memory_space<any>>
    %c33_i32_646 = arith.constant 33 : i32
    %c0_i32_647 = arith.constant 0 : i32
    %1030 = tpu.memref_slice %arg3[%c33_i32_646, %c0_i32_647] : memref<128x16xi32, #tpu.memory_space<vmem>> -> memref<1x16xi32, #tpu.memory_space<vmem>>
    %1031 = tpu.memref_slice %arg4[%c0_i32_644] : memref<1x!tpu.dma_semaphore, #tpu.memory_space<semaphore_mem>> -> memref<1x!tpu.dma_semaphore, #tpu.memory_space<semaphore_mem>>
    %1032 = tpu.memref_squeeze %1031 : memref<1x!tpu.dma_semaphore, #tpu.memory_space<semaphore_mem>> -> memref<!tpu.dma_semaphore, #tpu.memory_space<semaphore_mem>>
    tpu.wait_dma2 semaphore(%1032 : memref<!tpu.dma_semaphore, #tpu.memory_space<semaphore_mem>>) src(%1029 : memref<1x16xi32, #tpu.memory_space<any>>) dst(%1030 : memref<1x16xi32, #tpu.memory_space<vmem>>)
    %c0_i32_648 = arith.constant 0 : i32
    %c0_i32_649 = arith.constant 0 : i32
    %1033 = tpu.memref_slice %arg2[%241, %c0_i32_649] : memref<100x16xi32, #tpu.memory_space<any>> -> memref<1x16xi32, #tpu.memory_space<any>>
    %c34_i32_650 = arith.constant 34 : i32
    %c0_i32_651 = arith.constant 0 : i32
    %1034 = tpu.memref_slice %arg3[%c34_i32_650, %c0_i32_651] : memref<128x16xi32, #tpu.memory_space<vmem>> -> memref<1x16xi32, #tpu.memory_space<vmem>>
    %1035 = tpu.memref_slice %arg4[%c0_i32_648] : memref<1x!tpu.dma_semaphore, #tpu.memory_space<semaphore_mem>> -> memref<1x!tpu.dma_semaphore, #tpu.memory_space<semaphore_mem>>
    %1036 = tpu.memref_squeeze %1035 : memref<1x!tpu.dma_semaphore, #tpu.memory_space<semaphore_mem>> -> memref<!tpu.dma_semaphore, #tpu.memory_space<semaphore_mem>>
    tpu.wait_dma2 semaphore(%1036 : memref<!tpu.dma_semaphore, #tpu.memory_space<semaphore_mem>>) src(%1033 : memref<1x16xi32, #tpu.memory_space<any>>) dst(%1034 : memref<1x16xi32, #tpu.memory_space<vmem>>)
    %c0_i32_652 = arith.constant 0 : i32
    %c0_i32_653 = arith.constant 0 : i32
    %1037 = tpu.memref_slice %arg2[%248, %c0_i32_653] : memref<100x16xi32, #tpu.memory_space<any>> -> memref<1x16xi32, #tpu.memory_space<any>>
    %c35_i32_654 = arith.constant 35 : i32
    %c0_i32_655 = arith.constant 0 : i32
    %1038 = tpu.memref_slice %arg3[%c35_i32_654, %c0_i32_655] : memref<128x16xi32, #tpu.memory_space<vmem>> -> memref<1x16xi32, #tpu.memory_space<vmem>>
    %1039 = tpu.memref_slice %arg4[%c0_i32_652] : memref<1x!tpu.dma_semaphore, #tpu.memory_space<semaphore_mem>> -> memref<1x!tpu.dma_semaphore, #tpu.memory_space<semaphore_mem>>
    %1040 = tpu.memref_squeeze %1039 : memref<1x!tpu.dma_semaphore, #tpu.memory_space<semaphore_mem>> -> memref<!tpu.dma_semaphore, #tpu.memory_space<semaphore_mem>>
    tpu.wait_dma2 semaphore(%1040 : memref<!tpu.dma_semaphore, #tpu.memory_space<semaphore_mem>>) src(%1037 : memref<1x16xi32, #tpu.memory_space<any>>) dst(%1038 : memref<1x16xi32, #tpu.memory_space<vmem>>)
    %c0_i32_656 = arith.constant 0 : i32
    %c0_i32_657 = arith.constant 0 : i32
    %1041 = tpu.memref_slice %arg2[%255, %c0_i32_657] : memref<100x16xi32, #tpu.memory_space<any>> -> memref<1x16xi32, #tpu.memory_space<any>>
    %c36_i32_658 = arith.constant 36 : i32
    %c0_i32_659 = arith.constant 0 : i32
    %1042 = tpu.memref_slice %arg3[%c36_i32_658, %c0_i32_659] : memref<128x16xi32, #tpu.memory_space<vmem>> -> memref<1x16xi32, #tpu.memory_space<vmem>>
    %1043 = tpu.memref_slice %arg4[%c0_i32_656] : memref<1x!tpu.dma_semaphore, #tpu.memory_space<semaphore_mem>> -> memref<1x!tpu.dma_semaphore, #tpu.memory_space<semaphore_mem>>
    %1044 = tpu.memref_squeeze %1043 : memref<1x!tpu.dma_semaphore, #tpu.memory_space<semaphore_mem>> -> memref<!tpu.dma_semaphore, #tpu.memory_space<semaphore_mem>>
    tpu.wait_dma2 semaphore(%1044 : memref<!tpu.dma_semaphore, #tpu.memory_space<semaphore_mem>>) src(%1041 : memref<1x16xi32, #tpu.memory_space<any>>) dst(%1042 : memref<1x16xi32, #tpu.memory_space<vmem>>)
    %c0_i32_660 = arith.constant 0 : i32
    %c0_i32_661 = arith.constant 0 : i32
    %1045 = tpu.memref_slice %arg2[%262, %c0_i32_661] : memref<100x16xi32, #tpu.memory_space<any>> -> memref<1x16xi32, #tpu.memory_space<any>>
    %c37_i32_662 = arith.constant 37 : i32
    %c0_i32_663 = arith.constant 0 : i32
    %1046 = tpu.memref_slice %arg3[%c37_i32_662, %c0_i32_663] : memref<128x16xi32, #tpu.memory_space<vmem>> -> memref<1x16xi32, #tpu.memory_space<vmem>>
    %1047 = tpu.memref_slice %arg4[%c0_i32_660] : memref<1x!tpu.dma_semaphore, #tpu.memory_space<semaphore_mem>> -> memref<1x!tpu.dma_semaphore, #tpu.memory_space<semaphore_mem>>
    %1048 = tpu.memref_squeeze %1047 : memref<1x!tpu.dma_semaphore, #tpu.memory_space<semaphore_mem>> -> memref<!tpu.dma_semaphore, #tpu.memory_space<semaphore_mem>>
    tpu.wait_dma2 semaphore(%1048 : memref<!tpu.dma_semaphore, #tpu.memory_space<semaphore_mem>>) src(%1045 : memref<1x16xi32, #tpu.memory_space<any>>) dst(%1046 : memref<1x16xi32, #tpu.memory_space<vmem>>)
    %c0_i32_664 = arith.constant 0 : i32
    %c0_i32_665 = arith.constant 0 : i32
    %1049 = tpu.memref_slice %arg2[%269, %c0_i32_665] : memref<100x16xi32, #tpu.memory_space<any>> -> memref<1x16xi32, #tpu.memory_space<any>>
    %c38_i32_666 = arith.constant 38 : i32
    %c0_i32_667 = arith.constant 0 : i32
    %1050 = tpu.memref_slice %arg3[%c38_i32_666, %c0_i32_667] : memref<128x16xi32, #tpu.memory_space<vmem>> -> memref<1x16xi32, #tpu.memory_space<vmem>>
    %1051 = tpu.memref_slice %arg4[%c0_i32_664] : memref<1x!tpu.dma_semaphore, #tpu.memory_space<semaphore_mem>> -> memref<1x!tpu.dma_semaphore, #tpu.memory_space<semaphore_mem>>
    %1052 = tpu.memref_squeeze %1051 : memref<1x!tpu.dma_semaphore, #tpu.memory_space<semaphore_mem>> -> memref<!tpu.dma_semaphore, #tpu.memory_space<semaphore_mem>>
    tpu.wait_dma2 semaphore(%1052 : memref<!tpu.dma_semaphore, #tpu.memory_space<semaphore_mem>>) src(%1049 : memref<1x16xi32, #tpu.memory_space<any>>) dst(%1050 : memref<1x16xi32, #tpu.memory_space<vmem>>)
    %c0_i32_668 = arith.constant 0 : i32
    %c0_i32_669 = arith.constant 0 : i32
    %1053 = tpu.memref_slice %arg2[%276, %c0_i32_669] : memref<100x16xi32, #tpu.memory_space<any>> -> memref<1x16xi32, #tpu.memory_space<any>>
    %c39_i32_670 = arith.constant 39 : i32
    %c0_i32_671 = arith.constant 0 : i32
    %1054 = tpu.memref_slice %arg3[%c39_i32_670, %c0_i32_671] : memref<128x16xi32, #tpu.memory_space<vmem>> -> memref<1x16xi32, #tpu.memory_space<vmem>>
    %1055 = tpu.memref_slice %arg4[%c0_i32_668] : memref<1x!tpu.dma_semaphore, #tpu.memory_space<semaphore_mem>> -> memref<1x!tpu.dma_semaphore, #tpu.memory_space<semaphore_mem>>
    %1056 = tpu.memref_squeeze %1055 : memref<1x!tpu.dma_semaphore, #tpu.memory_space<semaphore_mem>> -> memref<!tpu.dma_semaphore, #tpu.memory_space<semaphore_mem>>
    tpu.wait_dma2 semaphore(%1056 : memref<!tpu.dma_semaphore, #tpu.memory_space<semaphore_mem>>) src(%1053 : memref<1x16xi32, #tpu.memory_space<any>>) dst(%1054 : memref<1x16xi32, #tpu.memory_space<vmem>>)
    %c0_i32_672 = arith.constant 0 : i32
    %c0_i32_673 = arith.constant 0 : i32
    %1057 = tpu.memref_slice %arg2[%283, %c0_i32_673] : memref<100x16xi32, #tpu.memory_space<any>> -> memref<1x16xi32, #tpu.memory_space<any>>
    %c40_i32_674 = arith.constant 40 : i32
    %c0_i32_675 = arith.constant 0 : i32
    %1058 = tpu.memref_slice %arg3[%c40_i32_674, %c0_i32_675] : memref<128x16xi32, #tpu.memory_space<vmem>> -> memref<1x16xi32, #tpu.memory_space<vmem>>
    %1059 = tpu.memref_slice %arg4[%c0_i32_672] : memref<1x!tpu.dma_semaphore, #tpu.memory_space<semaphore_mem>> -> memref<1x!tpu.dma_semaphore, #tpu.memory_space<semaphore_mem>>
    %1060 = tpu.memref_squeeze %1059 : memref<1x!tpu.dma_semaphore, #tpu.memory_space<semaphore_mem>> -> memref<!tpu.dma_semaphore, #tpu.memory_space<semaphore_mem>>
    tpu.wait_dma2 semaphore(%1060 : memref<!tpu.dma_semaphore, #tpu.memory_space<semaphore_mem>>) src(%1057 : memref<1x16xi32, #tpu.memory_space<any>>) dst(%1058 : memref<1x16xi32, #tpu.memory_space<vmem>>)
    %c0_i32_676 = arith.constant 0 : i32
    %c0_i32_677 = arith.constant 0 : i32
    %1061 = tpu.memref_slice %arg2[%290, %c0_i32_677] : memref<100x16xi32, #tpu.memory_space<any>> -> memref<1x16xi32, #tpu.memory_space<any>>
    %c41_i32_678 = arith.constant 41 : i32
    %c0_i32_679 = arith.constant 0 : i32
    %1062 = tpu.memref_slice %arg3[%c41_i32_678, %c0_i32_679] : memref<128x16xi32, #tpu.memory_space<vmem>> -> memref<1x16xi32, #tpu.memory_space<vmem>>
    %1063 = tpu.memref_slice %arg4[%c0_i32_676] : memref<1x!tpu.dma_semaphore, #tpu.memory_space<semaphore_mem>> -> memref<1x!tpu.dma_semaphore, #tpu.memory_space<semaphore_mem>>
    %1064 = tpu.memref_squeeze %1063 : memref<1x!tpu.dma_semaphore, #tpu.memory_space<semaphore_mem>> -> memref<!tpu.dma_semaphore, #tpu.memory_space<semaphore_mem>>
    tpu.wait_dma2 semaphore(%1064 : memref<!tpu.dma_semaphore, #tpu.memory_space<semaphore_mem>>) src(%1061 : memref<1x16xi32, #tpu.memory_space<any>>) dst(%1062 : memref<1x16xi32, #tpu.memory_space<vmem>>)
    %c0_i32_680 = arith.constant 0 : i32
    %c0_i32_681 = arith.constant 0 : i32
    %1065 = tpu.memref_slice %arg2[%297, %c0_i32_681] : memref<100x16xi32, #tpu.memory_space<any>> -> memref<1x16xi32, #tpu.memory_space<any>>
    %c42_i32_682 = arith.constant 42 : i32
    %c0_i32_683 = arith.constant 0 : i32
    %1066 = tpu.memref_slice %arg3[%c42_i32_682, %c0_i32_683] : memref<128x16xi32, #tpu.memory_space<vmem>> -> memref<1x16xi32, #tpu.memory_space<vmem>>
    %1067 = tpu.memref_slice %arg4[%c0_i32_680] : memref<1x!tpu.dma_semaphore, #tpu.memory_space<semaphore_mem>> -> memref<1x!tpu.dma_semaphore, #tpu.memory_space<semaphore_mem>>
    %1068 = tpu.memref_squeeze %1067 : memref<1x!tpu.dma_semaphore, #tpu.memory_space<semaphore_mem>> -> memref<!tpu.dma_semaphore, #tpu.memory_space<semaphore_mem>>
    tpu.wait_dma2 semaphore(%1068 : memref<!tpu.dma_semaphore, #tpu.memory_space<semaphore_mem>>) src(%1065 : memref<1x16xi32, #tpu.memory_space<any>>) dst(%1066 : memref<1x16xi32, #tpu.memory_space<vmem>>)
    %c0_i32_684 = arith.constant 0 : i32
    %c0_i32_685 = arith.constant 0 : i32
    %1069 = tpu.memref_slice %arg2[%304, %c0_i32_685] : memref<100x16xi32, #tpu.memory_space<any>> -> memref<1x16xi32, #tpu.memory_space<any>>
    %c43_i32_686 = arith.constant 43 : i32
    %c0_i32_687 = arith.constant 0 : i32
    %1070 = tpu.memref_slice %arg3[%c43_i32_686, %c0_i32_687] : memref<128x16xi32, #tpu.memory_space<vmem>> -> memref<1x16xi32, #tpu.memory_space<vmem>>
    %1071 = tpu.memref_slice %arg4[%c0_i32_684] : memref<1x!tpu.dma_semaphore, #tpu.memory_space<semaphore_mem>> -> memref<1x!tpu.dma_semaphore, #tpu.memory_space<semaphore_mem>>
    %1072 = tpu.memref_squeeze %1071 : memref<1x!tpu.dma_semaphore, #tpu.memory_space<semaphore_mem>> -> memref<!tpu.dma_semaphore, #tpu.memory_space<semaphore_mem>>
    tpu.wait_dma2 semaphore(%1072 : memref<!tpu.dma_semaphore, #tpu.memory_space<semaphore_mem>>) src(%1069 : memref<1x16xi32, #tpu.memory_space<any>>) dst(%1070 : memref<1x16xi32, #tpu.memory_space<vmem>>)
    %c0_i32_688 = arith.constant 0 : i32
    %c0_i32_689 = arith.constant 0 : i32
    %1073 = tpu.memref_slice %arg2[%311, %c0_i32_689] : memref<100x16xi32, #tpu.memory_space<any>> -> memref<1x16xi32, #tpu.memory_space<any>>
    %c44_i32_690 = arith.constant 44 : i32
    %c0_i32_691 = arith.constant 0 : i32
    %1074 = tpu.memref_slice %arg3[%c44_i32_690, %c0_i32_691] : memref<128x16xi32, #tpu.memory_space<vmem>> -> memref<1x16xi32, #tpu.memory_space<vmem>>
    %1075 = tpu.memref_slice %arg4[%c0_i32_688] : memref<1x!tpu.dma_semaphore, #tpu.memory_space<semaphore_mem>> -> memref<1x!tpu.dma_semaphore, #tpu.memory_space<semaphore_mem>>
    %1076 = tpu.memref_squeeze %1075 : memref<1x!tpu.dma_semaphore, #tpu.memory_space<semaphore_mem>> -> memref<!tpu.dma_semaphore, #tpu.memory_space<semaphore_mem>>
    tpu.wait_dma2 semaphore(%1076 : memref<!tpu.dma_semaphore, #tpu.memory_space<semaphore_mem>>) src(%1073 : memref<1x16xi32, #tpu.memory_space<any>>) dst(%1074 : memref<1x16xi32, #tpu.memory_space<vmem>>)
    %c0_i32_692 = arith.constant 0 : i32
    %c0_i32_693 = arith.constant 0 : i32
    %1077 = tpu.memref_slice %arg2[%318, %c0_i32_693] : memref<100x16xi32, #tpu.memory_space<any>> -> memref<1x16xi32, #tpu.memory_space<any>>
    %c45_i32_694 = arith.constant 45 : i32
    %c0_i32_695 = arith.constant 0 : i32
    %1078 = tpu.memref_slice %arg3[%c45_i32_694, %c0_i32_695] : memref<128x16xi32, #tpu.memory_space<vmem>> -> memref<1x16xi32, #tpu.memory_space<vmem>>
    %1079 = tpu.memref_slice %arg4[%c0_i32_692] : memref<1x!tpu.dma_semaphore, #tpu.memory_space<semaphore_mem>> -> memref<1x!tpu.dma_semaphore, #tpu.memory_space<semaphore_mem>>
    %1080 = tpu.memref_squeeze %1079 : memref<1x!tpu.dma_semaphore, #tpu.memory_space<semaphore_mem>> -> memref<!tpu.dma_semaphore, #tpu.memory_space<semaphore_mem>>
    tpu.wait_dma2 semaphore(%1080 : memref<!tpu.dma_semaphore, #tpu.memory_space<semaphore_mem>>) src(%1077 : memref<1x16xi32, #tpu.memory_space<any>>) dst(%1078 : memref<1x16xi32, #tpu.memory_space<vmem>>)
    %c0_i32_696 = arith.constant 0 : i32
    %c0_i32_697 = arith.constant 0 : i32
    %1081 = tpu.memref_slice %arg2[%325, %c0_i32_697] : memref<100x16xi32, #tpu.memory_space<any>> -> memref<1x16xi32, #tpu.memory_space<any>>
    %c46_i32_698 = arith.constant 46 : i32
    %c0_i32_699 = arith.constant 0 : i32
    %1082 = tpu.memref_slice %arg3[%c46_i32_698, %c0_i32_699] : memref<128x16xi32, #tpu.memory_space<vmem>> -> memref<1x16xi32, #tpu.memory_space<vmem>>
    %1083 = tpu.memref_slice %arg4[%c0_i32_696] : memref<1x!tpu.dma_semaphore, #tpu.memory_space<semaphore_mem>> -> memref<1x!tpu.dma_semaphore, #tpu.memory_space<semaphore_mem>>
    %1084 = tpu.memref_squeeze %1083 : memref<1x!tpu.dma_semaphore, #tpu.memory_space<semaphore_mem>> -> memref<!tpu.dma_semaphore, #tpu.memory_space<semaphore_mem>>
    tpu.wait_dma2 semaphore(%1084 : memref<!tpu.dma_semaphore, #tpu.memory_space<semaphore_mem>>) src(%1081 : memref<1x16xi32, #tpu.memory_space<any>>) dst(%1082 : memref<1x16xi32, #tpu.memory_space<vmem>>)
    %c0_i32_700 = arith.constant 0 : i32
    %c0_i32_701 = arith.constant 0 : i32
    %1085 = tpu.memref_slice %arg2[%332, %c0_i32_701] : memref<100x16xi32, #tpu.memory_space<any>> -> memref<1x16xi32, #tpu.memory_space<any>>
    %c47_i32_702 = arith.constant 47 : i32
    %c0_i32_703 = arith.constant 0 : i32
    %1086 = tpu.memref_slice %arg3[%c47_i32_702, %c0_i32_703] : memref<128x16xi32, #tpu.memory_space<vmem>> -> memref<1x16xi32, #tpu.memory_space<vmem>>
    %1087 = tpu.memref_slice %arg4[%c0_i32_700] : memref<1x!tpu.dma_semaphore, #tpu.memory_space<semaphore_mem>> -> memref<1x!tpu.dma_semaphore, #tpu.memory_space<semaphore_mem>>
    %1088 = tpu.memref_squeeze %1087 : memref<1x!tpu.dma_semaphore, #tpu.memory_space<semaphore_mem>> -> memref<!tpu.dma_semaphore, #tpu.memory_space<semaphore_mem>>
    tpu.wait_dma2 semaphore(%1088 : memref<!tpu.dma_semaphore, #tpu.memory_space<semaphore_mem>>) src(%1085 : memref<1x16xi32, #tpu.memory_space<any>>) dst(%1086 : memref<1x16xi32, #tpu.memory_space<vmem>>)
    %c0_i32_704 = arith.constant 0 : i32
    %c0_i32_705 = arith.constant 0 : i32
    %1089 = tpu.memref_slice %arg2[%339, %c0_i32_705] : memref<100x16xi32, #tpu.memory_space<any>> -> memref<1x16xi32, #tpu.memory_space<any>>
    %c48_i32_706 = arith.constant 48 : i32
    %c0_i32_707 = arith.constant 0 : i32
    %1090 = tpu.memref_slice %arg3[%c48_i32_706, %c0_i32_707] : memref<128x16xi32, #tpu.memory_space<vmem>> -> memref<1x16xi32, #tpu.memory_space<vmem>>
    %1091 = tpu.memref_slice %arg4[%c0_i32_704] : memref<1x!tpu.dma_semaphore, #tpu.memory_space<semaphore_mem>> -> memref<1x!tpu.dma_semaphore, #tpu.memory_space<semaphore_mem>>
    %1092 = tpu.memref_squeeze %1091 : memref<1x!tpu.dma_semaphore, #tpu.memory_space<semaphore_mem>> -> memref<!tpu.dma_semaphore, #tpu.memory_space<semaphore_mem>>
    tpu.wait_dma2 semaphore(%1092 : memref<!tpu.dma_semaphore, #tpu.memory_space<semaphore_mem>>) src(%1089 : memref<1x16xi32, #tpu.memory_space<any>>) dst(%1090 : memref<1x16xi32, #tpu.memory_space<vmem>>)
    %c0_i32_708 = arith.constant 0 : i32
    %c0_i32_709 = arith.constant 0 : i32
    %1093 = tpu.memref_slice %arg2[%346, %c0_i32_709] : memref<100x16xi32, #tpu.memory_space<any>> -> memref<1x16xi32, #tpu.memory_space<any>>
    %c49_i32_710 = arith.constant 49 : i32
    %c0_i32_711 = arith.constant 0 : i32
    %1094 = tpu.memref_slice %arg3[%c49_i32_710, %c0_i32_711] : memref<128x16xi32, #tpu.memory_space<vmem>> -> memref<1x16xi32, #tpu.memory_space<vmem>>
    %1095 = tpu.memref_slice %arg4[%c0_i32_708] : memref<1x!tpu.dma_semaphore, #tpu.memory_space<semaphore_mem>> -> memref<1x!tpu.dma_semaphore, #tpu.memory_space<semaphore_mem>>
    %1096 = tpu.memref_squeeze %1095 : memref<1x!tpu.dma_semaphore, #tpu.memory_space<semaphore_mem>> -> memref<!tpu.dma_semaphore, #tpu.memory_space<semaphore_mem>>
    tpu.wait_dma2 semaphore(%1096 : memref<!tpu.dma_semaphore, #tpu.memory_space<semaphore_mem>>) src(%1093 : memref<1x16xi32, #tpu.memory_space<any>>) dst(%1094 : memref<1x16xi32, #tpu.memory_space<vmem>>)
    %c0_i32_712 = arith.constant 0 : i32
    %c0_i32_713 = arith.constant 0 : i32
    %1097 = tpu.memref_slice %arg2[%353, %c0_i32_713] : memref<100x16xi32, #tpu.memory_space<any>> -> memref<1x16xi32, #tpu.memory_space<any>>
    %c50_i32_714 = arith.constant 50 : i32
    %c0_i32_715 = arith.constant 0 : i32
    %1098 = tpu.memref_slice %arg3[%c50_i32_714, %c0_i32_715] : memref<128x16xi32, #tpu.memory_space<vmem>> -> memref<1x16xi32, #tpu.memory_space<vmem>>
    %1099 = tpu.memref_slice %arg4[%c0_i32_712] : memref<1x!tpu.dma_semaphore, #tpu.memory_space<semaphore_mem>> -> memref<1x!tpu.dma_semaphore, #tpu.memory_space<semaphore_mem>>
    %1100 = tpu.memref_squeeze %1099 : memref<1x!tpu.dma_semaphore, #tpu.memory_space<semaphore_mem>> -> memref<!tpu.dma_semaphore, #tpu.memory_space<semaphore_mem>>
    tpu.wait_dma2 semaphore(%1100 : memref<!tpu.dma_semaphore, #tpu.memory_space<semaphore_mem>>) src(%1097 : memref<1x16xi32, #tpu.memory_space<any>>) dst(%1098 : memref<1x16xi32, #tpu.memory_space<vmem>>)
    %c0_i32_716 = arith.constant 0 : i32
    %c0_i32_717 = arith.constant 0 : i32
    %1101 = tpu.memref_slice %arg2[%360, %c0_i32_717] : memref<100x16xi32, #tpu.memory_space<any>> -> memref<1x16xi32, #tpu.memory_space<any>>
    %c51_i32_718 = arith.constant 51 : i32
    %c0_i32_719 = arith.constant 0 : i32
    %1102 = tpu.memref_slice %arg3[%c51_i32_718, %c0_i32_719] : memref<128x16xi32, #tpu.memory_space<vmem>> -> memref<1x16xi32, #tpu.memory_space<vmem>>
    %1103 = tpu.memref_slice %arg4[%c0_i32_716] : memref<1x!tpu.dma_semaphore, #tpu.memory_space<semaphore_mem>> -> memref<1x!tpu.dma_semaphore, #tpu.memory_space<semaphore_mem>>
    %1104 = tpu.memref_squeeze %1103 : memref<1x!tpu.dma_semaphore, #tpu.memory_space<semaphore_mem>> -> memref<!tpu.dma_semaphore, #tpu.memory_space<semaphore_mem>>
    tpu.wait_dma2 semaphore(%1104 : memref<!tpu.dma_semaphore, #tpu.memory_space<semaphore_mem>>) src(%1101 : memref<1x16xi32, #tpu.memory_space<any>>) dst(%1102 : memref<1x16xi32, #tpu.memory_space<vmem>>)
    %c0_i32_720 = arith.constant 0 : i32
    %c0_i32_721 = arith.constant 0 : i32
    %1105 = tpu.memref_slice %arg2[%367, %c0_i32_721] : memref<100x16xi32, #tpu.memory_space<any>> -> memref<1x16xi32, #tpu.memory_space<any>>
    %c52_i32_722 = arith.constant 52 : i32
    %c0_i32_723 = arith.constant 0 : i32
    %1106 = tpu.memref_slice %arg3[%c52_i32_722, %c0_i32_723] : memref<128x16xi32, #tpu.memory_space<vmem>> -> memref<1x16xi32, #tpu.memory_space<vmem>>
    %1107 = tpu.memref_slice %arg4[%c0_i32_720] : memref<1x!tpu.dma_semaphore, #tpu.memory_space<semaphore_mem>> -> memref<1x!tpu.dma_semaphore, #tpu.memory_space<semaphore_mem>>
    %1108 = tpu.memref_squeeze %1107 : memref<1x!tpu.dma_semaphore, #tpu.memory_space<semaphore_mem>> -> memref<!tpu.dma_semaphore, #tpu.memory_space<semaphore_mem>>
    tpu.wait_dma2 semaphore(%1108 : memref<!tpu.dma_semaphore, #tpu.memory_space<semaphore_mem>>) src(%1105 : memref<1x16xi32, #tpu.memory_space<any>>) dst(%1106 : memref<1x16xi32, #tpu.memory_space<vmem>>)
    %c0_i32_724 = arith.constant 0 : i32
    %c0_i32_725 = arith.constant 0 : i32
    %1109 = tpu.memref_slice %arg2[%374, %c0_i32_725] : memref<100x16xi32, #tpu.memory_space<any>> -> memref<1x16xi32, #tpu.memory_space<any>>
    %c53_i32_726 = arith.constant 53 : i32
    %c0_i32_727 = arith.constant 0 : i32
    %1110 = tpu.memref_slice %arg3[%c53_i32_726, %c0_i32_727] : memref<128x16xi32, #tpu.memory_space<vmem>> -> memref<1x16xi32, #tpu.memory_space<vmem>>
    %1111 = tpu.memref_slice %arg4[%c0_i32_724] : memref<1x!tpu.dma_semaphore, #tpu.memory_space<semaphore_mem>> -> memref<1x!tpu.dma_semaphore, #tpu.memory_space<semaphore_mem>>
    %1112 = tpu.memref_squeeze %1111 : memref<1x!tpu.dma_semaphore, #tpu.memory_space<semaphore_mem>> -> memref<!tpu.dma_semaphore, #tpu.memory_space<semaphore_mem>>
    tpu.wait_dma2 semaphore(%1112 : memref<!tpu.dma_semaphore, #tpu.memory_space<semaphore_mem>>) src(%1109 : memref<1x16xi32, #tpu.memory_space<any>>) dst(%1110 : memref<1x16xi32, #tpu.memory_space<vmem>>)
    %c0_i32_728 = arith.constant 0 : i32
    %c0_i32_729 = arith.constant 0 : i32
    %1113 = tpu.memref_slice %arg2[%381, %c0_i32_729] : memref<100x16xi32, #tpu.memory_space<any>> -> memref<1x16xi32, #tpu.memory_space<any>>
    %c54_i32_730 = arith.constant 54 : i32
    %c0_i32_731 = arith.constant 0 : i32
    %1114 = tpu.memref_slice %arg3[%c54_i32_730, %c0_i32_731] : memref<128x16xi32, #tpu.memory_space<vmem>> -> memref<1x16xi32, #tpu.memory_space<vmem>>
    %1115 = tpu.memref_slice %arg4[%c0_i32_728] : memref<1x!tpu.dma_semaphore, #tpu.memory_space<semaphore_mem>> -> memref<1x!tpu.dma_semaphore, #tpu.memory_space<semaphore_mem>>
    %1116 = tpu.memref_squeeze %1115 : memref<1x!tpu.dma_semaphore, #tpu.memory_space<semaphore_mem>> -> memref<!tpu.dma_semaphore, #tpu.memory_space<semaphore_mem>>
    tpu.wait_dma2 semaphore(%1116 : memref<!tpu.dma_semaphore, #tpu.memory_space<semaphore_mem>>) src(%1113 : memref<1x16xi32, #tpu.memory_space<any>>) dst(%1114 : memref<1x16xi32, #tpu.memory_space<vmem>>)
    %c0_i32_732 = arith.constant 0 : i32
    %c0_i32_733 = arith.constant 0 : i32
    %1117 = tpu.memref_slice %arg2[%388, %c0_i32_733] : memref<100x16xi32, #tpu.memory_space<any>> -> memref<1x16xi32, #tpu.memory_space<any>>
    %c55_i32_734 = arith.constant 55 : i32
    %c0_i32_735 = arith.constant 0 : i32
    %1118 = tpu.memref_slice %arg3[%c55_i32_734, %c0_i32_735] : memref<128x16xi32, #tpu.memory_space<vmem>> -> memref<1x16xi32, #tpu.memory_space<vmem>>
    %1119 = tpu.memref_slice %arg4[%c0_i32_732] : memref<1x!tpu.dma_semaphore, #tpu.memory_space<semaphore_mem>> -> memref<1x!tpu.dma_semaphore, #tpu.memory_space<semaphore_mem>>
    %1120 = tpu.memref_squeeze %1119 : memref<1x!tpu.dma_semaphore, #tpu.memory_space<semaphore_mem>> -> memref<!tpu.dma_semaphore, #tpu.memory_space<semaphore_mem>>
    tpu.wait_dma2 semaphore(%1120 : memref<!tpu.dma_semaphore, #tpu.memory_space<semaphore_mem>>) src(%1117 : memref<1x16xi32, #tpu.memory_space<any>>) dst(%1118 : memref<1x16xi32, #tpu.memory_space<vmem>>)
    %c0_i32_736 = arith.constant 0 : i32
    %c0_i32_737 = arith.constant 0 : i32
    %1121 = tpu.memref_slice %arg2[%395, %c0_i32_737] : memref<100x16xi32, #tpu.memory_space<any>> -> memref<1x16xi32, #tpu.memory_space<any>>
    %c56_i32_738 = arith.constant 56 : i32
    %c0_i32_739 = arith.constant 0 : i32
    %1122 = tpu.memref_slice %arg3[%c56_i32_738, %c0_i32_739] : memref<128x16xi32, #tpu.memory_space<vmem>> -> memref<1x16xi32, #tpu.memory_space<vmem>>
    %1123 = tpu.memref_slice %arg4[%c0_i32_736] : memref<1x!tpu.dma_semaphore, #tpu.memory_space<semaphore_mem>> -> memref<1x!tpu.dma_semaphore, #tpu.memory_space<semaphore_mem>>
    %1124 = tpu.memref_squeeze %1123 : memref<1x!tpu.dma_semaphore, #tpu.memory_space<semaphore_mem>> -> memref<!tpu.dma_semaphore, #tpu.memory_space<semaphore_mem>>
    tpu.wait_dma2 semaphore(%1124 : memref<!tpu.dma_semaphore, #tpu.memory_space<semaphore_mem>>) src(%1121 : memref<1x16xi32, #tpu.memory_space<any>>) dst(%1122 : memref<1x16xi32, #tpu.memory_space<vmem>>)
    %c0_i32_740 = arith.constant 0 : i32
    %c0_i32_741 = arith.constant 0 : i32
    %1125 = tpu.memref_slice %arg2[%402, %c0_i32_741] : memref<100x16xi32, #tpu.memory_space<any>> -> memref<1x16xi32, #tpu.memory_space<any>>
    %c57_i32_742 = arith.constant 57 : i32
    %c0_i32_743 = arith.constant 0 : i32
    %1126 = tpu.memref_slice %arg3[%c57_i32_742, %c0_i32_743] : memref<128x16xi32, #tpu.memory_space<vmem>> -> memref<1x16xi32, #tpu.memory_space<vmem>>
    %1127 = tpu.memref_slice %arg4[%c0_i32_740] : memref<1x!tpu.dma_semaphore, #tpu.memory_space<semaphore_mem>> -> memref<1x!tpu.dma_semaphore, #tpu.memory_space<semaphore_mem>>
    %1128 = tpu.memref_squeeze %1127 : memref<1x!tpu.dma_semaphore, #tpu.memory_space<semaphore_mem>> -> memref<!tpu.dma_semaphore, #tpu.memory_space<semaphore_mem>>
    tpu.wait_dma2 semaphore(%1128 : memref<!tpu.dma_semaphore, #tpu.memory_space<semaphore_mem>>) src(%1125 : memref<1x16xi32, #tpu.memory_space<any>>) dst(%1126 : memref<1x16xi32, #tpu.memory_space<vmem>>)
    %c0_i32_744 = arith.constant 0 : i32
    %c0_i32_745 = arith.constant 0 : i32
    %1129 = tpu.memref_slice %arg2[%409, %c0_i32_745] : memref<100x16xi32, #tpu.memory_space<any>> -> memref<1x16xi32, #tpu.memory_space<any>>
    %c58_i32_746 = arith.constant 58 : i32
    %c0_i32_747 = arith.constant 0 : i32
    %1130 = tpu.memref_slice %arg3[%c58_i32_746, %c0_i32_747] : memref<128x16xi32, #tpu.memory_space<vmem>> -> memref<1x16xi32, #tpu.memory_space<vmem>>
    %1131 = tpu.memref_slice %arg4[%c0_i32_744] : memref<1x!tpu.dma_semaphore, #tpu.memory_space<semaphore_mem>> -> memref<1x!tpu.dma_semaphore, #tpu.memory_space<semaphore_mem>>
    %1132 = tpu.memref_squeeze %1131 : memref<1x!tpu.dma_semaphore, #tpu.memory_space<semaphore_mem>> -> memref<!tpu.dma_semaphore, #tpu.memory_space<semaphore_mem>>
    tpu.wait_dma2 semaphore(%1132 : memref<!tpu.dma_semaphore, #tpu.memory_space<semaphore_mem>>) src(%1129 : memref<1x16xi32, #tpu.memory_space<any>>) dst(%1130 : memref<1x16xi32, #tpu.memory_space<vmem>>)
    %c0_i32_748 = arith.constant 0 : i32
    %c0_i32_749 = arith.constant 0 : i32
    %1133 = tpu.memref_slice %arg2[%416, %c0_i32_749] : memref<100x16xi32, #tpu.memory_space<any>> -> memref<1x16xi32, #tpu.memory_space<any>>
    %c59_i32_750 = arith.constant 59 : i32
    %c0_i32_751 = arith.constant 0 : i32
    %1134 = tpu.memref_slice %arg3[%c59_i32_750, %c0_i32_751] : memref<128x16xi32, #tpu.memory_space<vmem>> -> memref<1x16xi32, #tpu.memory_space<vmem>>
    %1135 = tpu.memref_slice %arg4[%c0_i32_748] : memref<1x!tpu.dma_semaphore, #tpu.memory_space<semaphore_mem>> -> memref<1x!tpu.dma_semaphore, #tpu.memory_space<semaphore_mem>>
    %1136 = tpu.memref_squeeze %1135 : memref<1x!tpu.dma_semaphore, #tpu.memory_space<semaphore_mem>> -> memref<!tpu.dma_semaphore, #tpu.memory_space<semaphore_mem>>
    tpu.wait_dma2 semaphore(%1136 : memref<!tpu.dma_semaphore, #tpu.memory_space<semaphore_mem>>) src(%1133 : memref<1x16xi32, #tpu.memory_space<any>>) dst(%1134 : memref<1x16xi32, #tpu.memory_space<vmem>>)
    %c0_i32_752 = arith.constant 0 : i32
    %c0_i32_753 = arith.constant 0 : i32
    %1137 = tpu.memref_slice %arg2[%423, %c0_i32_753] : memref<100x16xi32, #tpu.memory_space<any>> -> memref<1x16xi32, #tpu.memory_space<any>>
    %c60_i32_754 = arith.constant 60 : i32
    %c0_i32_755 = arith.constant 0 : i32
    %1138 = tpu.memref_slice %arg3[%c60_i32_754, %c0_i32_755] : memref<128x16xi32, #tpu.memory_space<vmem>> -> memref<1x16xi32, #tpu.memory_space<vmem>>
    %1139 = tpu.memref_slice %arg4[%c0_i32_752] : memref<1x!tpu.dma_semaphore, #tpu.memory_space<semaphore_mem>> -> memref<1x!tpu.dma_semaphore, #tpu.memory_space<semaphore_mem>>
    %1140 = tpu.memref_squeeze %1139 : memref<1x!tpu.dma_semaphore, #tpu.memory_space<semaphore_mem>> -> memref<!tpu.dma_semaphore, #tpu.memory_space<semaphore_mem>>
    tpu.wait_dma2 semaphore(%1140 : memref<!tpu.dma_semaphore, #tpu.memory_space<semaphore_mem>>) src(%1137 : memref<1x16xi32, #tpu.memory_space<any>>) dst(%1138 : memref<1x16xi32, #tpu.memory_space<vmem>>)
    %c0_i32_756 = arith.constant 0 : i32
    %c0_i32_757 = arith.constant 0 : i32
    %1141 = tpu.memref_slice %arg2[%430, %c0_i32_757] : memref<100x16xi32, #tpu.memory_space<any>> -> memref<1x16xi32, #tpu.memory_space<any>>
    %c61_i32_758 = arith.constant 61 : i32
    %c0_i32_759 = arith.constant 0 : i32
    %1142 = tpu.memref_slice %arg3[%c61_i32_758, %c0_i32_759] : memref<128x16xi32, #tpu.memory_space<vmem>> -> memref<1x16xi32, #tpu.memory_space<vmem>>
    %1143 = tpu.memref_slice %arg4[%c0_i32_756] : memref<1x!tpu.dma_semaphore, #tpu.memory_space<semaphore_mem>> -> memref<1x!tpu.dma_semaphore, #tpu.memory_space<semaphore_mem>>
    %1144 = tpu.memref_squeeze %1143 : memref<1x!tpu.dma_semaphore, #tpu.memory_space<semaphore_mem>> -> memref<!tpu.dma_semaphore, #tpu.memory_space<semaphore_mem>>
    tpu.wait_dma2 semaphore(%1144 : memref<!tpu.dma_semaphore, #tpu.memory_space<semaphore_mem>>) src(%1141 : memref<1x16xi32, #tpu.memory_space<any>>) dst(%1142 : memref<1x16xi32, #tpu.memory_space<vmem>>)
    %c0_i32_760 = arith.constant 0 : i32
    %c0_i32_761 = arith.constant 0 : i32
    %1145 = tpu.memref_slice %arg2[%437, %c0_i32_761] : memref<100x16xi32, #tpu.memory_space<any>> -> memref<1x16xi32, #tpu.memory_space<any>>
    %c62_i32_762 = arith.constant 62 : i32
    %c0_i32_763 = arith.constant 0 : i32
    %1146 = tpu.memref_slice %arg3[%c62_i32_762, %c0_i32_763] : memref<128x16xi32, #tpu.memory_space<vmem>> -> memref<1x16xi32, #tpu.memory_space<vmem>>
    %1147 = tpu.memref_slice %arg4[%c0_i32_760] : memref<1x!tpu.dma_semaphore, #tpu.memory_space<semaphore_mem>> -> memref<1x!tpu.dma_semaphore, #tpu.memory_space<semaphore_mem>>
    %1148 = tpu.memref_squeeze %1147 : memref<1x!tpu.dma_semaphore, #tpu.memory_space<semaphore_mem>> -> memref<!tpu.dma_semaphore, #tpu.memory_space<semaphore_mem>>
    tpu.wait_dma2 semaphore(%1148 : memref<!tpu.dma_semaphore, #tpu.memory_space<semaphore_mem>>) src(%1145 : memref<1x16xi32, #tpu.memory_space<any>>) dst(%1146 : memref<1x16xi32, #tpu.memory_space<vmem>>)
    %c0_i32_764 = arith.constant 0 : i32
    %c0_i32_765 = arith.constant 0 : i32
    %1149 = tpu.memref_slice %arg2[%444, %c0_i32_765] : memref<100x16xi32, #tpu.memory_space<any>> -> memref<1x16xi32, #tpu.memory_space<any>>
    %c63_i32_766 = arith.constant 63 : i32
    %c0_i32_767 = arith.constant 0 : i32
    %1150 = tpu.memref_slice %arg3[%c63_i32_766, %c0_i32_767] : memref<128x16xi32, #tpu.memory_space<vmem>> -> memref<1x16xi32, #tpu.memory_space<vmem>>
    %1151 = tpu.memref_slice %arg4[%c0_i32_764] : memref<1x!tpu.dma_semaphore, #tpu.memory_space<semaphore_mem>> -> memref<1x!tpu.dma_semaphore, #tpu.memory_space<semaphore_mem>>
    %1152 = tpu.memref_squeeze %1151 : memref<1x!tpu.dma_semaphore, #tpu.memory_space<semaphore_mem>> -> memref<!tpu.dma_semaphore, #tpu.memory_space<semaphore_mem>>
    tpu.wait_dma2 semaphore(%1152 : memref<!tpu.dma_semaphore, #tpu.memory_space<semaphore_mem>>) src(%1149 : memref<1x16xi32, #tpu.memory_space<any>>) dst(%1150 : memref<1x16xi32, #tpu.memory_space<vmem>>)
    %c0_i32_768 = arith.constant 0 : i32
    %c0_i32_769 = arith.constant 0 : i32
    %1153 = tpu.memref_slice %arg2[%451, %c0_i32_769] : memref<100x16xi32, #tpu.memory_space<any>> -> memref<1x16xi32, #tpu.memory_space<any>>
    %c64_i32_770 = arith.constant 64 : i32
    %c0_i32_771 = arith.constant 0 : i32
    %1154 = tpu.memref_slice %arg3[%c64_i32_770, %c0_i32_771] : memref<128x16xi32, #tpu.memory_space<vmem>> -> memref<1x16xi32, #tpu.memory_space<vmem>>
    %1155 = tpu.memref_slice %arg4[%c0_i32_768] : memref<1x!tpu.dma_semaphore, #tpu.memory_space<semaphore_mem>> -> memref<1x!tpu.dma_semaphore, #tpu.memory_space<semaphore_mem>>
    %1156 = tpu.memref_squeeze %1155 : memref<1x!tpu.dma_semaphore, #tpu.memory_space<semaphore_mem>> -> memref<!tpu.dma_semaphore, #tpu.memory_space<semaphore_mem>>
    tpu.wait_dma2 semaphore(%1156 : memref<!tpu.dma_semaphore, #tpu.memory_space<semaphore_mem>>) src(%1153 : memref<1x16xi32, #tpu.memory_space<any>>) dst(%1154 : memref<1x16xi32, #tpu.memory_space<vmem>>)
    %c0_i32_772 = arith.constant 0 : i32
    %c0_i32_773 = arith.constant 0 : i32
    %1157 = tpu.memref_slice %arg2[%458, %c0_i32_773] : memref<100x16xi32, #tpu.memory_space<any>> -> memref<1x16xi32, #tpu.memory_space<any>>
    %c65_i32_774 = arith.constant 65 : i32
    %c0_i32_775 = arith.constant 0 : i32
    %1158 = tpu.memref_slice %arg3[%c65_i32_774, %c0_i32_775] : memref<128x16xi32, #tpu.memory_space<vmem>> -> memref<1x16xi32, #tpu.memory_space<vmem>>
    %1159 = tpu.memref_slice %arg4[%c0_i32_772] : memref<1x!tpu.dma_semaphore, #tpu.memory_space<semaphore_mem>> -> memref<1x!tpu.dma_semaphore, #tpu.memory_space<semaphore_mem>>
    %1160 = tpu.memref_squeeze %1159 : memref<1x!tpu.dma_semaphore, #tpu.memory_space<semaphore_mem>> -> memref<!tpu.dma_semaphore, #tpu.memory_space<semaphore_mem>>
    tpu.wait_dma2 semaphore(%1160 : memref<!tpu.dma_semaphore, #tpu.memory_space<semaphore_mem>>) src(%1157 : memref<1x16xi32, #tpu.memory_space<any>>) dst(%1158 : memref<1x16xi32, #tpu.memory_space<vmem>>)
    %c0_i32_776 = arith.constant 0 : i32
    %c0_i32_777 = arith.constant 0 : i32
    %1161 = tpu.memref_slice %arg2[%465, %c0_i32_777] : memref<100x16xi32, #tpu.memory_space<any>> -> memref<1x16xi32, #tpu.memory_space<any>>
    %c66_i32_778 = arith.constant 66 : i32
    %c0_i32_779 = arith.constant 0 : i32
    %1162 = tpu.memref_slice %arg3[%c66_i32_778, %c0_i32_779] : memref<128x16xi32, #tpu.memory_space<vmem>> -> memref<1x16xi32, #tpu.memory_space<vmem>>
    %1163 = tpu.memref_slice %arg4[%c0_i32_776] : memref<1x!tpu.dma_semaphore, #tpu.memory_space<semaphore_mem>> -> memref<1x!tpu.dma_semaphore, #tpu.memory_space<semaphore_mem>>
    %1164 = tpu.memref_squeeze %1163 : memref<1x!tpu.dma_semaphore, #tpu.memory_space<semaphore_mem>> -> memref<!tpu.dma_semaphore, #tpu.memory_space<semaphore_mem>>
    tpu.wait_dma2 semaphore(%1164 : memref<!tpu.dma_semaphore, #tpu.memory_space<semaphore_mem>>) src(%1161 : memref<1x16xi32, #tpu.memory_space<any>>) dst(%1162 : memref<1x16xi32, #tpu.memory_space<vmem>>)
    %c0_i32_780 = arith.constant 0 : i32
    %c0_i32_781 = arith.constant 0 : i32
    %1165 = tpu.memref_slice %arg2[%472, %c0_i32_781] : memref<100x16xi32, #tpu.memory_space<any>> -> memref<1x16xi32, #tpu.memory_space<any>>
    %c67_i32_782 = arith.constant 67 : i32
    %c0_i32_783 = arith.constant 0 : i32
    %1166 = tpu.memref_slice %arg3[%c67_i32_782, %c0_i32_783] : memref<128x16xi32, #tpu.memory_space<vmem>> -> memref<1x16xi32, #tpu.memory_space<vmem>>
    %1167 = tpu.memref_slice %arg4[%c0_i32_780] : memref<1x!tpu.dma_semaphore, #tpu.memory_space<semaphore_mem>> -> memref<1x!tpu.dma_semaphore, #tpu.memory_space<semaphore_mem>>
    %1168 = tpu.memref_squeeze %1167 : memref<1x!tpu.dma_semaphore, #tpu.memory_space<semaphore_mem>> -> memref<!tpu.dma_semaphore, #tpu.memory_space<semaphore_mem>>
    tpu.wait_dma2 semaphore(%1168 : memref<!tpu.dma_semaphore, #tpu.memory_space<semaphore_mem>>) src(%1165 : memref<1x16xi32, #tpu.memory_space<any>>) dst(%1166 : memref<1x16xi32, #tpu.memory_space<vmem>>)
    %c0_i32_784 = arith.constant 0 : i32
    %c0_i32_785 = arith.constant 0 : i32
    %1169 = tpu.memref_slice %arg2[%479, %c0_i32_785] : memref<100x16xi32, #tpu.memory_space<any>> -> memref<1x16xi32, #tpu.memory_space<any>>
    %c68_i32_786 = arith.constant 68 : i32
    %c0_i32_787 = arith.constant 0 : i32
    %1170 = tpu.memref_slice %arg3[%c68_i32_786, %c0_i32_787] : memref<128x16xi32, #tpu.memory_space<vmem>> -> memref<1x16xi32, #tpu.memory_space<vmem>>
    %1171 = tpu.memref_slice %arg4[%c0_i32_784] : memref<1x!tpu.dma_semaphore, #tpu.memory_space<semaphore_mem>> -> memref<1x!tpu.dma_semaphore, #tpu.memory_space<semaphore_mem>>
    %1172 = tpu.memref_squeeze %1171 : memref<1x!tpu.dma_semaphore, #tpu.memory_space<semaphore_mem>> -> memref<!tpu.dma_semaphore, #tpu.memory_space<semaphore_mem>>
    tpu.wait_dma2 semaphore(%1172 : memref<!tpu.dma_semaphore, #tpu.memory_space<semaphore_mem>>) src(%1169 : memref<1x16xi32, #tpu.memory_space<any>>) dst(%1170 : memref<1x16xi32, #tpu.memory_space<vmem>>)
    %c0_i32_788 = arith.constant 0 : i32
    %c0_i32_789 = arith.constant 0 : i32
    %1173 = tpu.memref_slice %arg2[%486, %c0_i32_789] : memref<100x16xi32, #tpu.memory_space<any>> -> memref<1x16xi32, #tpu.memory_space<any>>
    %c69_i32_790 = arith.constant 69 : i32
    %c0_i32_791 = arith.constant 0 : i32
    %1174 = tpu.memref_slice %arg3[%c69_i32_790, %c0_i32_791] : memref<128x16xi32, #tpu.memory_space<vmem>> -> memref<1x16xi32, #tpu.memory_space<vmem>>
    %1175 = tpu.memref_slice %arg4[%c0_i32_788] : memref<1x!tpu.dma_semaphore, #tpu.memory_space<semaphore_mem>> -> memref<1x!tpu.dma_semaphore, #tpu.memory_space<semaphore_mem>>
    %1176 = tpu.memref_squeeze %1175 : memref<1x!tpu.dma_semaphore, #tpu.memory_space<semaphore_mem>> -> memref<!tpu.dma_semaphore, #tpu.memory_space<semaphore_mem>>
    tpu.wait_dma2 semaphore(%1176 : memref<!tpu.dma_semaphore, #tpu.memory_space<semaphore_mem>>) src(%1173 : memref<1x16xi32, #tpu.memory_space<any>>) dst(%1174 : memref<1x16xi32, #tpu.memory_space<vmem>>)
    %c0_i32_792 = arith.constant 0 : i32
    %c0_i32_793 = arith.constant 0 : i32
    %1177 = tpu.memref_slice %arg2[%493, %c0_i32_793] : memref<100x16xi32, #tpu.memory_space<any>> -> memref<1x16xi32, #tpu.memory_space<any>>
    %c70_i32_794 = arith.constant 70 : i32
    %c0_i32_795 = arith.constant 0 : i32
    %1178 = tpu.memref_slice %arg3[%c70_i32_794, %c0_i32_795] : memref<128x16xi32, #tpu.memory_space<vmem>> -> memref<1x16xi32, #tpu.memory_space<vmem>>
    %1179 = tpu.memref_slice %arg4[%c0_i32_792] : memref<1x!tpu.dma_semaphore, #tpu.memory_space<semaphore_mem>> -> memref<1x!tpu.dma_semaphore, #tpu.memory_space<semaphore_mem>>
    %1180 = tpu.memref_squeeze %1179 : memref<1x!tpu.dma_semaphore, #tpu.memory_space<semaphore_mem>> -> memref<!tpu.dma_semaphore, #tpu.memory_space<semaphore_mem>>
    tpu.wait_dma2 semaphore(%1180 : memref<!tpu.dma_semaphore, #tpu.memory_space<semaphore_mem>>) src(%1177 : memref<1x16xi32, #tpu.memory_space<any>>) dst(%1178 : memref<1x16xi32, #tpu.memory_space<vmem>>)
    %c0_i32_796 = arith.constant 0 : i32
    %c0_i32_797 = arith.constant 0 : i32
    %1181 = tpu.memref_slice %arg2[%500, %c0_i32_797] : memref<100x16xi32, #tpu.memory_space<any>> -> memref<1x16xi32, #tpu.memory_space<any>>
    %c71_i32_798 = arith.constant 71 : i32
    %c0_i32_799 = arith.constant 0 : i32
    %1182 = tpu.memref_slice %arg3[%c71_i32_798, %c0_i32_799] : memref<128x16xi32, #tpu.memory_space<vmem>> -> memref<1x16xi32, #tpu.memory_space<vmem>>
    %1183 = tpu.memref_slice %arg4[%c0_i32_796] : memref<1x!tpu.dma_semaphore, #tpu.memory_space<semaphore_mem>> -> memref<1x!tpu.dma_semaphore, #tpu.memory_space<semaphore_mem>>
    %1184 = tpu.memref_squeeze %1183 : memref<1x!tpu.dma_semaphore, #tpu.memory_space<semaphore_mem>> -> memref<!tpu.dma_semaphore, #tpu.memory_space<semaphore_mem>>
    tpu.wait_dma2 semaphore(%1184 : memref<!tpu.dma_semaphore, #tpu.memory_space<semaphore_mem>>) src(%1181 : memref<1x16xi32, #tpu.memory_space<any>>) dst(%1182 : memref<1x16xi32, #tpu.memory_space<vmem>>)
    %c0_i32_800 = arith.constant 0 : i32
    %c0_i32_801 = arith.constant 0 : i32
    %1185 = tpu.memref_slice %arg2[%507, %c0_i32_801] : memref<100x16xi32, #tpu.memory_space<any>> -> memref<1x16xi32, #tpu.memory_space<any>>
    %c72_i32_802 = arith.constant 72 : i32
    %c0_i32_803 = arith.constant 0 : i32
    %1186 = tpu.memref_slice %arg3[%c72_i32_802, %c0_i32_803] : memref<128x16xi32, #tpu.memory_space<vmem>> -> memref<1x16xi32, #tpu.memory_space<vmem>>
    %1187 = tpu.memref_slice %arg4[%c0_i32_800] : memref<1x!tpu.dma_semaphore, #tpu.memory_space<semaphore_mem>> -> memref<1x!tpu.dma_semaphore, #tpu.memory_space<semaphore_mem>>
    %1188 = tpu.memref_squeeze %1187 : memref<1x!tpu.dma_semaphore, #tpu.memory_space<semaphore_mem>> -> memref<!tpu.dma_semaphore, #tpu.memory_space<semaphore_mem>>
    tpu.wait_dma2 semaphore(%1188 : memref<!tpu.dma_semaphore, #tpu.memory_space<semaphore_mem>>) src(%1185 : memref<1x16xi32, #tpu.memory_space<any>>) dst(%1186 : memref<1x16xi32, #tpu.memory_space<vmem>>)
    %c0_i32_804 = arith.constant 0 : i32
    %c0_i32_805 = arith.constant 0 : i32
    %1189 = tpu.memref_slice %arg2[%514, %c0_i32_805] : memref<100x16xi32, #tpu.memory_space<any>> -> memref<1x16xi32, #tpu.memory_space<any>>
    %c73_i32_806 = arith.constant 73 : i32
    %c0_i32_807 = arith.constant 0 : i32
    %1190 = tpu.memref_slice %arg3[%c73_i32_806, %c0_i32_807] : memref<128x16xi32, #tpu.memory_space<vmem>> -> memref<1x16xi32, #tpu.memory_space<vmem>>
    %1191 = tpu.memref_slice %arg4[%c0_i32_804] : memref<1x!tpu.dma_semaphore, #tpu.memory_space<semaphore_mem>> -> memref<1x!tpu.dma_semaphore, #tpu.memory_space<semaphore_mem>>
    %1192 = tpu.memref_squeeze %1191 : memref<1x!tpu.dma_semaphore, #tpu.memory_space<semaphore_mem>> -> memref<!tpu.dma_semaphore, #tpu.memory_space<semaphore_mem>>
    tpu.wait_dma2 semaphore(%1192 : memref<!tpu.dma_semaphore, #tpu.memory_space<semaphore_mem>>) src(%1189 : memref<1x16xi32, #tpu.memory_space<any>>) dst(%1190 : memref<1x16xi32, #tpu.memory_space<vmem>>)
    %c0_i32_808 = arith.constant 0 : i32
    %c0_i32_809 = arith.constant 0 : i32
    %1193 = tpu.memref_slice %arg2[%521, %c0_i32_809] : memref<100x16xi32, #tpu.memory_space<any>> -> memref<1x16xi32, #tpu.memory_space<any>>
    %c74_i32_810 = arith.constant 74 : i32
    %c0_i32_811 = arith.constant 0 : i32
    %1194 = tpu.memref_slice %arg3[%c74_i32_810, %c0_i32_811] : memref<128x16xi32, #tpu.memory_space<vmem>> -> memref<1x16xi32, #tpu.memory_space<vmem>>
    %1195 = tpu.memref_slice %arg4[%c0_i32_808] : memref<1x!tpu.dma_semaphore, #tpu.memory_space<semaphore_mem>> -> memref<1x!tpu.dma_semaphore, #tpu.memory_space<semaphore_mem>>
    %1196 = tpu.memref_squeeze %1195 : memref<1x!tpu.dma_semaphore, #tpu.memory_space<semaphore_mem>> -> memref<!tpu.dma_semaphore, #tpu.memory_space<semaphore_mem>>
    tpu.wait_dma2 semaphore(%1196 : memref<!tpu.dma_semaphore, #tpu.memory_space<semaphore_mem>>) src(%1193 : memref<1x16xi32, #tpu.memory_space<any>>) dst(%1194 : memref<1x16xi32, #tpu.memory_space<vmem>>)
    %c0_i32_812 = arith.constant 0 : i32
    %c0_i32_813 = arith.constant 0 : i32
    %1197 = tpu.memref_slice %arg2[%528, %c0_i32_813] : memref<100x16xi32, #tpu.memory_space<any>> -> memref<1x16xi32, #tpu.memory_space<any>>
    %c75_i32_814 = arith.constant 75 : i32
    %c0_i32_815 = arith.constant 0 : i32
    %1198 = tpu.memref_slice %arg3[%c75_i32_814, %c0_i32_815] : memref<128x16xi32, #tpu.memory_space<vmem>> -> memref<1x16xi32, #tpu.memory_space<vmem>>
    %1199 = tpu.memref_slice %arg4[%c0_i32_812] : memref<1x!tpu.dma_semaphore, #tpu.memory_space<semaphore_mem>> -> memref<1x!tpu.dma_semaphore, #tpu.memory_space<semaphore_mem>>
    %1200 = tpu.memref_squeeze %1199 : memref<1x!tpu.dma_semaphore, #tpu.memory_space<semaphore_mem>> -> memref<!tpu.dma_semaphore, #tpu.memory_space<semaphore_mem>>
    tpu.wait_dma2 semaphore(%1200 : memref<!tpu.dma_semaphore, #tpu.memory_space<semaphore_mem>>) src(%1197 : memref<1x16xi32, #tpu.memory_space<any>>) dst(%1198 : memref<1x16xi32, #tpu.memory_space<vmem>>)
    %c0_i32_816 = arith.constant 0 : i32
    %c0_i32_817 = arith.constant 0 : i32
    %1201 = tpu.memref_slice %arg2[%535, %c0_i32_817] : memref<100x16xi32, #tpu.memory_space<any>> -> memref<1x16xi32, #tpu.memory_space<any>>
    %c76_i32_818 = arith.constant 76 : i32
    %c0_i32_819 = arith.constant 0 : i32
    %1202 = tpu.memref_slice %arg3[%c76_i32_818, %c0_i32_819] : memref<128x16xi32, #tpu.memory_space<vmem>> -> memref<1x16xi32, #tpu.memory_space<vmem>>
    %1203 = tpu.memref_slice %arg4[%c0_i32_816] : memref<1x!tpu.dma_semaphore, #tpu.memory_space<semaphore_mem>> -> memref<1x!tpu.dma_semaphore, #tpu.memory_space<semaphore_mem>>
    %1204 = tpu.memref_squeeze %1203 : memref<1x!tpu.dma_semaphore, #tpu.memory_space<semaphore_mem>> -> memref<!tpu.dma_semaphore, #tpu.memory_space<semaphore_mem>>
    tpu.wait_dma2 semaphore(%1204 : memref<!tpu.dma_semaphore, #tpu.memory_space<semaphore_mem>>) src(%1201 : memref<1x16xi32, #tpu.memory_space<any>>) dst(%1202 : memref<1x16xi32, #tpu.memory_space<vmem>>)
    %c0_i32_820 = arith.constant 0 : i32
    %c0_i32_821 = arith.constant 0 : i32
    %1205 = tpu.memref_slice %arg2[%542, %c0_i32_821] : memref<100x16xi32, #tpu.memory_space<any>> -> memref<1x16xi32, #tpu.memory_space<any>>
    %c77_i32_822 = arith.constant 77 : i32
    %c0_i32_823 = arith.constant 0 : i32
    %1206 = tpu.memref_slice %arg3[%c77_i32_822, %c0_i32_823] : memref<128x16xi32, #tpu.memory_space<vmem>> -> memref<1x16xi32, #tpu.memory_space<vmem>>
    %1207 = tpu.memref_slice %arg4[%c0_i32_820] : memref<1x!tpu.dma_semaphore, #tpu.memory_space<semaphore_mem>> -> memref<1x!tpu.dma_semaphore, #tpu.memory_space<semaphore_mem>>
    %1208 = tpu.memref_squeeze %1207 : memref<1x!tpu.dma_semaphore, #tpu.memory_space<semaphore_mem>> -> memref<!tpu.dma_semaphore, #tpu.memory_space<semaphore_mem>>
    tpu.wait_dma2 semaphore(%1208 : memref<!tpu.dma_semaphore, #tpu.memory_space<semaphore_mem>>) src(%1205 : memref<1x16xi32, #tpu.memory_space<any>>) dst(%1206 : memref<1x16xi32, #tpu.memory_space<vmem>>)
    %c0_i32_824 = arith.constant 0 : i32
    %c0_i32_825 = arith.constant 0 : i32
    %1209 = tpu.memref_slice %arg2[%549, %c0_i32_825] : memref<100x16xi32, #tpu.memory_space<any>> -> memref<1x16xi32, #tpu.memory_space<any>>
    %c78_i32_826 = arith.constant 78 : i32
    %c0_i32_827 = arith.constant 0 : i32
    %1210 = tpu.memref_slice %arg3[%c78_i32_826, %c0_i32_827] : memref<128x16xi32, #tpu.memory_space<vmem>> -> memref<1x16xi32, #tpu.memory_space<vmem>>
    %1211 = tpu.memref_slice %arg4[%c0_i32_824] : memref<1x!tpu.dma_semaphore, #tpu.memory_space<semaphore_mem>> -> memref<1x!tpu.dma_semaphore, #tpu.memory_space<semaphore_mem>>
    %1212 = tpu.memref_squeeze %1211 : memref<1x!tpu.dma_semaphore, #tpu.memory_space<semaphore_mem>> -> memref<!tpu.dma_semaphore, #tpu.memory_space<semaphore_mem>>
    tpu.wait_dma2 semaphore(%1212 : memref<!tpu.dma_semaphore, #tpu.memory_space<semaphore_mem>>) src(%1209 : memref<1x16xi32, #tpu.memory_space<any>>) dst(%1210 : memref<1x16xi32, #tpu.memory_space<vmem>>)
    %c0_i32_828 = arith.constant 0 : i32
    %c0_i32_829 = arith.constant 0 : i32
    %1213 = tpu.memref_slice %arg2[%556, %c0_i32_829] : memref<100x16xi32, #tpu.memory_space<any>> -> memref<1x16xi32, #tpu.memory_space<any>>
    %c79_i32_830 = arith.constant 79 : i32
    %c0_i32_831 = arith.constant 0 : i32
    %1214 = tpu.memref_slice %arg3[%c79_i32_830, %c0_i32_831] : memref<128x16xi32, #tpu.memory_space<vmem>> -> memref<1x16xi32, #tpu.memory_space<vmem>>
    %1215 = tpu.memref_slice %arg4[%c0_i32_828] : memref<1x!tpu.dma_semaphore, #tpu.memory_space<semaphore_mem>> -> memref<1x!tpu.dma_semaphore, #tpu.memory_space<semaphore_mem>>
    %1216 = tpu.memref_squeeze %1215 : memref<1x!tpu.dma_semaphore, #tpu.memory_space<semaphore_mem>> -> memref<!tpu.dma_semaphore, #tpu.memory_space<semaphore_mem>>
    tpu.wait_dma2 semaphore(%1216 : memref<!tpu.dma_semaphore, #tpu.memory_space<semaphore_mem>>) src(%1213 : memref<1x16xi32, #tpu.memory_space<any>>) dst(%1214 : memref<1x16xi32, #tpu.memory_space<vmem>>)
    %c0_i32_832 = arith.constant 0 : i32
    %c0_i32_833 = arith.constant 0 : i32
    %1217 = tpu.memref_slice %arg2[%563, %c0_i32_833] : memref<100x16xi32, #tpu.memory_space<any>> -> memref<1x16xi32, #tpu.memory_space<any>>
    %c80_i32_834 = arith.constant 80 : i32
    %c0_i32_835 = arith.constant 0 : i32
    %1218 = tpu.memref_slice %arg3[%c80_i32_834, %c0_i32_835] : memref<128x16xi32, #tpu.memory_space<vmem>> -> memref<1x16xi32, #tpu.memory_space<vmem>>
    %1219 = tpu.memref_slice %arg4[%c0_i32_832] : memref<1x!tpu.dma_semaphore, #tpu.memory_space<semaphore_mem>> -> memref<1x!tpu.dma_semaphore, #tpu.memory_space<semaphore_mem>>
    %1220 = tpu.memref_squeeze %1219 : memref<1x!tpu.dma_semaphore, #tpu.memory_space<semaphore_mem>> -> memref<!tpu.dma_semaphore, #tpu.memory_space<semaphore_mem>>
    tpu.wait_dma2 semaphore(%1220 : memref<!tpu.dma_semaphore, #tpu.memory_space<semaphore_mem>>) src(%1217 : memref<1x16xi32, #tpu.memory_space<any>>) dst(%1218 : memref<1x16xi32, #tpu.memory_space<vmem>>)
    %c0_i32_836 = arith.constant 0 : i32
    %c0_i32_837 = arith.constant 0 : i32
    %1221 = tpu.memref_slice %arg2[%570, %c0_i32_837] : memref<100x16xi32, #tpu.memory_space<any>> -> memref<1x16xi32, #tpu.memory_space<any>>
    %c81_i32_838 = arith.constant 81 : i32
    %c0_i32_839 = arith.constant 0 : i32
    %1222 = tpu.memref_slice %arg3[%c81_i32_838, %c0_i32_839] : memref<128x16xi32, #tpu.memory_space<vmem>> -> memref<1x16xi32, #tpu.memory_space<vmem>>
    %1223 = tpu.memref_slice %arg4[%c0_i32_836] : memref<1x!tpu.dma_semaphore, #tpu.memory_space<semaphore_mem>> -> memref<1x!tpu.dma_semaphore, #tpu.memory_space<semaphore_mem>>
    %1224 = tpu.memref_squeeze %1223 : memref<1x!tpu.dma_semaphore, #tpu.memory_space<semaphore_mem>> -> memref<!tpu.dma_semaphore, #tpu.memory_space<semaphore_mem>>
    tpu.wait_dma2 semaphore(%1224 : memref<!tpu.dma_semaphore, #tpu.memory_space<semaphore_mem>>) src(%1221 : memref<1x16xi32, #tpu.memory_space<any>>) dst(%1222 : memref<1x16xi32, #tpu.memory_space<vmem>>)
    %c0_i32_840 = arith.constant 0 : i32
    %c0_i32_841 = arith.constant 0 : i32
    %1225 = tpu.memref_slice %arg2[%577, %c0_i32_841] : memref<100x16xi32, #tpu.memory_space<any>> -> memref<1x16xi32, #tpu.memory_space<any>>
    %c82_i32_842 = arith.constant 82 : i32
    %c0_i32_843 = arith.constant 0 : i32
    %1226 = tpu.memref_slice %arg3[%c82_i32_842, %c0_i32_843] : memref<128x16xi32, #tpu.memory_space<vmem>> -> memref<1x16xi32, #tpu.memory_space<vmem>>
    %1227 = tpu.memref_slice %arg4[%c0_i32_840] : memref<1x!tpu.dma_semaphore, #tpu.memory_space<semaphore_mem>> -> memref<1x!tpu.dma_semaphore, #tpu.memory_space<semaphore_mem>>
    %1228 = tpu.memref_squeeze %1227 : memref<1x!tpu.dma_semaphore, #tpu.memory_space<semaphore_mem>> -> memref<!tpu.dma_semaphore, #tpu.memory_space<semaphore_mem>>
    tpu.wait_dma2 semaphore(%1228 : memref<!tpu.dma_semaphore, #tpu.memory_space<semaphore_mem>>) src(%1225 : memref<1x16xi32, #tpu.memory_space<any>>) dst(%1226 : memref<1x16xi32, #tpu.memory_space<vmem>>)
    %c0_i32_844 = arith.constant 0 : i32
    %c0_i32_845 = arith.constant 0 : i32
    %1229 = tpu.memref_slice %arg2[%584, %c0_i32_845] : memref<100x16xi32, #tpu.memory_space<any>> -> memref<1x16xi32, #tpu.memory_space<any>>
    %c83_i32_846 = arith.constant 83 : i32
    %c0_i32_847 = arith.constant 0 : i32
    %1230 = tpu.memref_slice %arg3[%c83_i32_846, %c0_i32_847] : memref<128x16xi32, #tpu.memory_space<vmem>> -> memref<1x16xi32, #tpu.memory_space<vmem>>
    %1231 = tpu.memref_slice %arg4[%c0_i32_844] : memref<1x!tpu.dma_semaphore, #tpu.memory_space<semaphore_mem>> -> memref<1x!tpu.dma_semaphore, #tpu.memory_space<semaphore_mem>>
    %1232 = tpu.memref_squeeze %1231 : memref<1x!tpu.dma_semaphore, #tpu.memory_space<semaphore_mem>> -> memref<!tpu.dma_semaphore, #tpu.memory_space<semaphore_mem>>
    tpu.wait_dma2 semaphore(%1232 : memref<!tpu.dma_semaphore, #tpu.memory_space<semaphore_mem>>) src(%1229 : memref<1x16xi32, #tpu.memory_space<any>>) dst(%1230 : memref<1x16xi32, #tpu.memory_space<vmem>>)
    %c0_i32_848 = arith.constant 0 : i32
    %c0_i32_849 = arith.constant 0 : i32
    %1233 = tpu.memref_slice %arg2[%591, %c0_i32_849] : memref<100x16xi32, #tpu.memory_space<any>> -> memref<1x16xi32, #tpu.memory_space<any>>
    %c84_i32_850 = arith.constant 84 : i32
    %c0_i32_851 = arith.constant 0 : i32
    %1234 = tpu.memref_slice %arg3[%c84_i32_850, %c0_i32_851] : memref<128x16xi32, #tpu.memory_space<vmem>> -> memref<1x16xi32, #tpu.memory_space<vmem>>
    %1235 = tpu.memref_slice %arg4[%c0_i32_848] : memref<1x!tpu.dma_semaphore, #tpu.memory_space<semaphore_mem>> -> memref<1x!tpu.dma_semaphore, #tpu.memory_space<semaphore_mem>>
    %1236 = tpu.memref_squeeze %1235 : memref<1x!tpu.dma_semaphore, #tpu.memory_space<semaphore_mem>> -> memref<!tpu.dma_semaphore, #tpu.memory_space<semaphore_mem>>
    tpu.wait_dma2 semaphore(%1236 : memref<!tpu.dma_semaphore, #tpu.memory_space<semaphore_mem>>) src(%1233 : memref<1x16xi32, #tpu.memory_space<any>>) dst(%1234 : memref<1x16xi32, #tpu.memory_space<vmem>>)
    %c0_i32_852 = arith.constant 0 : i32
    %c0_i32_853 = arith.constant 0 : i32
    %1237 = tpu.memref_slice %arg2[%598, %c0_i32_853] : memref<100x16xi32, #tpu.memory_space<any>> -> memref<1x16xi32, #tpu.memory_space<any>>
    %c85_i32_854 = arith.constant 85 : i32
    %c0_i32_855 = arith.constant 0 : i32
    %1238 = tpu.memref_slice %arg3[%c85_i32_854, %c0_i32_855] : memref<128x16xi32, #tpu.memory_space<vmem>> -> memref<1x16xi32, #tpu.memory_space<vmem>>
    %1239 = tpu.memref_slice %arg4[%c0_i32_852] : memref<1x!tpu.dma_semaphore, #tpu.memory_space<semaphore_mem>> -> memref<1x!tpu.dma_semaphore, #tpu.memory_space<semaphore_mem>>
    %1240 = tpu.memref_squeeze %1239 : memref<1x!tpu.dma_semaphore, #tpu.memory_space<semaphore_mem>> -> memref<!tpu.dma_semaphore, #tpu.memory_space<semaphore_mem>>
    tpu.wait_dma2 semaphore(%1240 : memref<!tpu.dma_semaphore, #tpu.memory_space<semaphore_mem>>) src(%1237 : memref<1x16xi32, #tpu.memory_space<any>>) dst(%1238 : memref<1x16xi32, #tpu.memory_space<vmem>>)
    %c0_i32_856 = arith.constant 0 : i32
    %c0_i32_857 = arith.constant 0 : i32
    %1241 = tpu.memref_slice %arg2[%605, %c0_i32_857] : memref<100x16xi32, #tpu.memory_space<any>> -> memref<1x16xi32, #tpu.memory_space<any>>
    %c86_i32_858 = arith.constant 86 : i32
    %c0_i32_859 = arith.constant 0 : i32
    %1242 = tpu.memref_slice %arg3[%c86_i32_858, %c0_i32_859] : memref<128x16xi32, #tpu.memory_space<vmem>> -> memref<1x16xi32, #tpu.memory_space<vmem>>
    %1243 = tpu.memref_slice %arg4[%c0_i32_856] : memref<1x!tpu.dma_semaphore, #tpu.memory_space<semaphore_mem>> -> memref<1x!tpu.dma_semaphore, #tpu.memory_space<semaphore_mem>>
    %1244 = tpu.memref_squeeze %1243 : memref<1x!tpu.dma_semaphore, #tpu.memory_space<semaphore_mem>> -> memref<!tpu.dma_semaphore, #tpu.memory_space<semaphore_mem>>
    tpu.wait_dma2 semaphore(%1244 : memref<!tpu.dma_semaphore, #tpu.memory_space<semaphore_mem>>) src(%1241 : memref<1x16xi32, #tpu.memory_space<any>>) dst(%1242 : memref<1x16xi32, #tpu.memory_space<vmem>>)
    %c0_i32_860 = arith.constant 0 : i32
    %c0_i32_861 = arith.constant 0 : i32
    %1245 = tpu.memref_slice %arg2[%612, %c0_i32_861] : memref<100x16xi32, #tpu.memory_space<any>> -> memref<1x16xi32, #tpu.memory_space<any>>
    %c87_i32_862 = arith.constant 87 : i32
    %c0_i32_863 = arith.constant 0 : i32
    %1246 = tpu.memref_slice %arg3[%c87_i32_862, %c0_i32_863] : memref<128x16xi32, #tpu.memory_space<vmem>> -> memref<1x16xi32, #tpu.memory_space<vmem>>
    %1247 = tpu.memref_slice %arg4[%c0_i32_860] : memref<1x!tpu.dma_semaphore, #tpu.memory_space<semaphore_mem>> -> memref<1x!tpu.dma_semaphore, #tpu.memory_space<semaphore_mem>>
    %1248 = tpu.memref_squeeze %1247 : memref<1x!tpu.dma_semaphore, #tpu.memory_space<semaphore_mem>> -> memref<!tpu.dma_semaphore, #tpu.memory_space<semaphore_mem>>
    tpu.wait_dma2 semaphore(%1248 : memref<!tpu.dma_semaphore, #tpu.memory_space<semaphore_mem>>) src(%1245 : memref<1x16xi32, #tpu.memory_space<any>>) dst(%1246 : memref<1x16xi32, #tpu.memory_space<vmem>>)
    %c0_i32_864 = arith.constant 0 : i32
    %c0_i32_865 = arith.constant 0 : i32
    %1249 = tpu.memref_slice %arg2[%619, %c0_i32_865] : memref<100x16xi32, #tpu.memory_space<any>> -> memref<1x16xi32, #tpu.memory_space<any>>
    %c88_i32_866 = arith.constant 88 : i32
    %c0_i32_867 = arith.constant 0 : i32
    %1250 = tpu.memref_slice %arg3[%c88_i32_866, %c0_i32_867] : memref<128x16xi32, #tpu.memory_space<vmem>> -> memref<1x16xi32, #tpu.memory_space<vmem>>
    %1251 = tpu.memref_slice %arg4[%c0_i32_864] : memref<1x!tpu.dma_semaphore, #tpu.memory_space<semaphore_mem>> -> memref<1x!tpu.dma_semaphore, #tpu.memory_space<semaphore_mem>>
    %1252 = tpu.memref_squeeze %1251 : memref<1x!tpu.dma_semaphore, #tpu.memory_space<semaphore_mem>> -> memref<!tpu.dma_semaphore, #tpu.memory_space<semaphore_mem>>
    tpu.wait_dma2 semaphore(%1252 : memref<!tpu.dma_semaphore, #tpu.memory_space<semaphore_mem>>) src(%1249 : memref<1x16xi32, #tpu.memory_space<any>>) dst(%1250 : memref<1x16xi32, #tpu.memory_space<vmem>>)
    %c0_i32_868 = arith.constant 0 : i32
    %c0_i32_869 = arith.constant 0 : i32
    %1253 = tpu.memref_slice %arg2[%626, %c0_i32_869] : memref<100x16xi32, #tpu.memory_space<any>> -> memref<1x16xi32, #tpu.memory_space<any>>
    %c89_i32_870 = arith.constant 89 : i32
    %c0_i32_871 = arith.constant 0 : i32
    %1254 = tpu.memref_slice %arg3[%c89_i32_870, %c0_i32_871] : memref<128x16xi32, #tpu.memory_space<vmem>> -> memref<1x16xi32, #tpu.memory_space<vmem>>
    %1255 = tpu.memref_slice %arg4[%c0_i32_868] : memref<1x!tpu.dma_semaphore, #tpu.memory_space<semaphore_mem>> -> memref<1x!tpu.dma_semaphore, #tpu.memory_space<semaphore_mem>>
    %1256 = tpu.memref_squeeze %1255 : memref<1x!tpu.dma_semaphore, #tpu.memory_space<semaphore_mem>> -> memref<!tpu.dma_semaphore, #tpu.memory_space<semaphore_mem>>
    tpu.wait_dma2 semaphore(%1256 : memref<!tpu.dma_semaphore, #tpu.memory_space<semaphore_mem>>) src(%1253 : memref<1x16xi32, #tpu.memory_space<any>>) dst(%1254 : memref<1x16xi32, #tpu.memory_space<vmem>>)
    %c0_i32_872 = arith.constant 0 : i32
    %c0_i32_873 = arith.constant 0 : i32
    %1257 = tpu.memref_slice %arg2[%633, %c0_i32_873] : memref<100x16xi32, #tpu.memory_space<any>> -> memref<1x16xi32, #tpu.memory_space<any>>
    %c90_i32_874 = arith.constant 90 : i32
    %c0_i32_875 = arith.constant 0 : i32
    %1258 = tpu.memref_slice %arg3[%c90_i32_874, %c0_i32_875] : memref<128x16xi32, #tpu.memory_space<vmem>> -> memref<1x16xi32, #tpu.memory_space<vmem>>
    %1259 = tpu.memref_slice %arg4[%c0_i32_872] : memref<1x!tpu.dma_semaphore, #tpu.memory_space<semaphore_mem>> -> memref<1x!tpu.dma_semaphore, #tpu.memory_space<semaphore_mem>>
    %1260 = tpu.memref_squeeze %1259 : memref<1x!tpu.dma_semaphore, #tpu.memory_space<semaphore_mem>> -> memref<!tpu.dma_semaphore, #tpu.memory_space<semaphore_mem>>
    tpu.wait_dma2 semaphore(%1260 : memref<!tpu.dma_semaphore, #tpu.memory_space<semaphore_mem>>) src(%1257 : memref<1x16xi32, #tpu.memory_space<any>>) dst(%1258 : memref<1x16xi32, #tpu.memory_space<vmem>>)
    %c0_i32_876 = arith.constant 0 : i32
    %c0_i32_877 = arith.constant 0 : i32
    %1261 = tpu.memref_slice %arg2[%640, %c0_i32_877] : memref<100x16xi32, #tpu.memory_space<any>> -> memref<1x16xi32, #tpu.memory_space<any>>
    %c91_i32_878 = arith.constant 91 : i32
    %c0_i32_879 = arith.constant 0 : i32
    %1262 = tpu.memref_slice %arg3[%c91_i32_878, %c0_i32_879] : memref<128x16xi32, #tpu.memory_space<vmem>> -> memref<1x16xi32, #tpu.memory_space<vmem>>
    %1263 = tpu.memref_slice %arg4[%c0_i32_876] : memref<1x!tpu.dma_semaphore, #tpu.memory_space<semaphore_mem>> -> memref<1x!tpu.dma_semaphore, #tpu.memory_space<semaphore_mem>>
    %1264 = tpu.memref_squeeze %1263 : memref<1x!tpu.dma_semaphore, #tpu.memory_space<semaphore_mem>> -> memref<!tpu.dma_semaphore, #tpu.memory_space<semaphore_mem>>
    tpu.wait_dma2 semaphore(%1264 : memref<!tpu.dma_semaphore, #tpu.memory_space<semaphore_mem>>) src(%1261 : memref<1x16xi32, #tpu.memory_space<any>>) dst(%1262 : memref<1x16xi32, #tpu.memory_space<vmem>>)
    %c0_i32_880 = arith.constant 0 : i32
    %c0_i32_881 = arith.constant 0 : i32
    %1265 = tpu.memref_slice %arg2[%647, %c0_i32_881] : memref<100x16xi32, #tpu.memory_space<any>> -> memref<1x16xi32, #tpu.memory_space<any>>
    %c92_i32_882 = arith.constant 92 : i32
    %c0_i32_883 = arith.constant 0 : i32
    %1266 = tpu.memref_slice %arg3[%c92_i32_882, %c0_i32_883] : memref<128x16xi32, #tpu.memory_space<vmem>> -> memref<1x16xi32, #tpu.memory_space<vmem>>
    %1267 = tpu.memref_slice %arg4[%c0_i32_880] : memref<1x!tpu.dma_semaphore, #tpu.memory_space<semaphore_mem>> -> memref<1x!tpu.dma_semaphore, #tpu.memory_space<semaphore_mem>>
    %1268 = tpu.memref_squeeze %1267 : memref<1x!tpu.dma_semaphore, #tpu.memory_space<semaphore_mem>> -> memref<!tpu.dma_semaphore, #tpu.memory_space<semaphore_mem>>
    tpu.wait_dma2 semaphore(%1268 : memref<!tpu.dma_semaphore, #tpu.memory_space<semaphore_mem>>) src(%1265 : memref<1x16xi32, #tpu.memory_space<any>>) dst(%1266 : memref<1x16xi32, #tpu.memory_space<vmem>>)
    %c0_i32_884 = arith.constant 0 : i32
    %c0_i32_885 = arith.constant 0 : i32
    %1269 = tpu.memref_slice %arg2[%654, %c0_i32_885] : memref<100x16xi32, #tpu.memory_space<any>> -> memref<1x16xi32, #tpu.memory_space<any>>
    %c93_i32_886 = arith.constant 93 : i32
    %c0_i32_887 = arith.constant 0 : i32
    %1270 = tpu.memref_slice %arg3[%c93_i32_886, %c0_i32_887] : memref<128x16xi32, #tpu.memory_space<vmem>> -> memref<1x16xi32, #tpu.memory_space<vmem>>
    %1271 = tpu.memref_slice %arg4[%c0_i32_884] : memref<1x!tpu.dma_semaphore, #tpu.memory_space<semaphore_mem>> -> memref<1x!tpu.dma_semaphore, #tpu.memory_space<semaphore_mem>>
    %1272 = tpu.memref_squeeze %1271 : memref<1x!tpu.dma_semaphore, #tpu.memory_space<semaphore_mem>> -> memref<!tpu.dma_semaphore, #tpu.memory_space<semaphore_mem>>
    tpu.wait_dma2 semaphore(%1272 : memref<!tpu.dma_semaphore, #tpu.memory_space<semaphore_mem>>) src(%1269 : memref<1x16xi32, #tpu.memory_space<any>>) dst(%1270 : memref<1x16xi32, #tpu.memory_space<vmem>>)
    %c0_i32_888 = arith.constant 0 : i32
    %c0_i32_889 = arith.constant 0 : i32
    %1273 = tpu.memref_slice %arg2[%661, %c0_i32_889] : memref<100x16xi32, #tpu.memory_space<any>> -> memref<1x16xi32, #tpu.memory_space<any>>
    %c94_i32_890 = arith.constant 94 : i32
    %c0_i32_891 = arith.constant 0 : i32
    %1274 = tpu.memref_slice %arg3[%c94_i32_890, %c0_i32_891] : memref<128x16xi32, #tpu.memory_space<vmem>> -> memref<1x16xi32, #tpu.memory_space<vmem>>
    %1275 = tpu.memref_slice %arg4[%c0_i32_888] : memref<1x!tpu.dma_semaphore, #tpu.memory_space<semaphore_mem>> -> memref<1x!tpu.dma_semaphore, #tpu.memory_space<semaphore_mem>>
    %1276 = tpu.memref_squeeze %1275 : memref<1x!tpu.dma_semaphore, #tpu.memory_space<semaphore_mem>> -> memref<!tpu.dma_semaphore, #tpu.memory_space<semaphore_mem>>
    tpu.wait_dma2 semaphore(%1276 : memref<!tpu.dma_semaphore, #tpu.memory_space<semaphore_mem>>) src(%1273 : memref<1x16xi32, #tpu.memory_space<any>>) dst(%1274 : memref<1x16xi32, #tpu.memory_space<vmem>>)
    %c0_i32_892 = arith.constant 0 : i32
    %c0_i32_893 = arith.constant 0 : i32
    %1277 = tpu.memref_slice %arg2[%668, %c0_i32_893] : memref<100x16xi32, #tpu.memory_space<any>> -> memref<1x16xi32, #tpu.memory_space<any>>
    %c95_i32_894 = arith.constant 95 : i32
    %c0_i32_895 = arith.constant 0 : i32
    %1278 = tpu.memref_slice %arg3[%c95_i32_894, %c0_i32_895] : memref<128x16xi32, #tpu.memory_space<vmem>> -> memref<1x16xi32, #tpu.memory_space<vmem>>
    %1279 = tpu.memref_slice %arg4[%c0_i32_892] : memref<1x!tpu.dma_semaphore, #tpu.memory_space<semaphore_mem>> -> memref<1x!tpu.dma_semaphore, #tpu.memory_space<semaphore_mem>>
    %1280 = tpu.memref_squeeze %1279 : memref<1x!tpu.dma_semaphore, #tpu.memory_space<semaphore_mem>> -> memref<!tpu.dma_semaphore, #tpu.memory_space<semaphore_mem>>
    tpu.wait_dma2 semaphore(%1280 : memref<!tpu.dma_semaphore, #tpu.memory_space<semaphore_mem>>) src(%1277 : memref<1x16xi32, #tpu.memory_space<any>>) dst(%1278 : memref<1x16xi32, #tpu.memory_space<vmem>>)
    %c0_i32_896 = arith.constant 0 : i32
    %c0_i32_897 = arith.constant 0 : i32
    %1281 = tpu.memref_slice %arg2[%675, %c0_i32_897] : memref<100x16xi32, #tpu.memory_space<any>> -> memref<1x16xi32, #tpu.memory_space<any>>
    %c96_i32_898 = arith.constant 96 : i32
    %c0_i32_899 = arith.constant 0 : i32
    %1282 = tpu.memref_slice %arg3[%c96_i32_898, %c0_i32_899] : memref<128x16xi32, #tpu.memory_space<vmem>> -> memref<1x16xi32, #tpu.memory_space<vmem>>
    %1283 = tpu.memref_slice %arg4[%c0_i32_896] : memref<1x!tpu.dma_semaphore, #tpu.memory_space<semaphore_mem>> -> memref<1x!tpu.dma_semaphore, #tpu.memory_space<semaphore_mem>>
    %1284 = tpu.memref_squeeze %1283 : memref<1x!tpu.dma_semaphore, #tpu.memory_space<semaphore_mem>> -> memref<!tpu.dma_semaphore, #tpu.memory_space<semaphore_mem>>
    tpu.wait_dma2 semaphore(%1284 : memref<!tpu.dma_semaphore, #tpu.memory_space<semaphore_mem>>) src(%1281 : memref<1x16xi32, #tpu.memory_space<any>>) dst(%1282 : memref<1x16xi32, #tpu.memory_space<vmem>>)
    %c0_i32_900 = arith.constant 0 : i32
    %c0_i32_901 = arith.constant 0 : i32
    %1285 = tpu.memref_slice %arg2[%682, %c0_i32_901] : memref<100x16xi32, #tpu.memory_space<any>> -> memref<1x16xi32, #tpu.memory_space<any>>
    %c97_i32_902 = arith.constant 97 : i32
    %c0_i32_903 = arith.constant 0 : i32
    %1286 = tpu.memref_slice %arg3[%c97_i32_902, %c0_i32_903] : memref<128x16xi32, #tpu.memory_space<vmem>> -> memref<1x16xi32, #tpu.memory_space<vmem>>
    %1287 = tpu.memref_slice %arg4[%c0_i32_900] : memref<1x!tpu.dma_semaphore, #tpu.memory_space<semaphore_mem>> -> memref<1x!tpu.dma_semaphore, #tpu.memory_space<semaphore_mem>>
    %1288 = tpu.memref_squeeze %1287 : memref<1x!tpu.dma_semaphore, #tpu.memory_space<semaphore_mem>> -> memref<!tpu.dma_semaphore, #tpu.memory_space<semaphore_mem>>
    tpu.wait_dma2 semaphore(%1288 : memref<!tpu.dma_semaphore, #tpu.memory_space<semaphore_mem>>) src(%1285 : memref<1x16xi32, #tpu.memory_space<any>>) dst(%1286 : memref<1x16xi32, #tpu.memory_space<vmem>>)
    %c0_i32_904 = arith.constant 0 : i32
    %c0_i32_905 = arith.constant 0 : i32
    %1289 = tpu.memref_slice %arg2[%689, %c0_i32_905] : memref<100x16xi32, #tpu.memory_space<any>> -> memref<1x16xi32, #tpu.memory_space<any>>
    %c98_i32_906 = arith.constant 98 : i32
    %c0_i32_907 = arith.constant 0 : i32
    %1290 = tpu.memref_slice %arg3[%c98_i32_906, %c0_i32_907] : memref<128x16xi32, #tpu.memory_space<vmem>> -> memref<1x16xi32, #tpu.memory_space<vmem>>
    %1291 = tpu.memref_slice %arg4[%c0_i32_904] : memref<1x!tpu.dma_semaphore, #tpu.memory_space<semaphore_mem>> -> memref<1x!tpu.dma_semaphore, #tpu.memory_space<semaphore_mem>>
    %1292 = tpu.memref_squeeze %1291 : memref<1x!tpu.dma_semaphore, #tpu.memory_space<semaphore_mem>> -> memref<!tpu.dma_semaphore, #tpu.memory_space<semaphore_mem>>
    tpu.wait_dma2 semaphore(%1292 : memref<!tpu.dma_semaphore, #tpu.memory_space<semaphore_mem>>) src(%1289 : memref<1x16xi32, #tpu.memory_space<any>>) dst(%1290 : memref<1x16xi32, #tpu.memory_space<vmem>>)
    %c0_i32_908 = arith.constant 0 : i32
    %c0_i32_909 = arith.constant 0 : i32
    %1293 = tpu.memref_slice %arg2[%696, %c0_i32_909] : memref<100x16xi32, #tpu.memory_space<any>> -> memref<1x16xi32, #tpu.memory_space<any>>
    %c99_i32_910 = arith.constant 99 : i32
    %c0_i32_911 = arith.constant 0 : i32
    %1294 = tpu.memref_slice %arg3[%c99_i32_910, %c0_i32_911] : memref<128x16xi32, #tpu.memory_space<vmem>> -> memref<1x16xi32, #tpu.memory_space<vmem>>
    %1295 = tpu.memref_slice %arg4[%c0_i32_908] : memref<1x!tpu.dma_semaphore, #tpu.memory_space<semaphore_mem>> -> memref<1x!tpu.dma_semaphore, #tpu.memory_space<semaphore_mem>>
    %1296 = tpu.memref_squeeze %1295 : memref<1x!tpu.dma_semaphore, #tpu.memory_space<semaphore_mem>> -> memref<!tpu.dma_semaphore, #tpu.memory_space<semaphore_mem>>
    tpu.wait_dma2 semaphore(%1296 : memref<!tpu.dma_semaphore, #tpu.memory_space<semaphore_mem>>) src(%1293 : memref<1x16xi32, #tpu.memory_space<any>>) dst(%1294 : memref<1x16xi32, #tpu.memory_space<vmem>>)
    %c0_i32_912 = arith.constant 0 : i32
    %c0_i32_913 = arith.constant 0 : i32
    %1297 = tpu.memref_slice %arg2[%703, %c0_i32_913] : memref<100x16xi32, #tpu.memory_space<any>> -> memref<1x16xi32, #tpu.memory_space<any>>
    %c100_i32_914 = arith.constant 100 : i32
    %c0_i32_915 = arith.constant 0 : i32
    %1298 = tpu.memref_slice %arg3[%c100_i32_914, %c0_i32_915] : memref<128x16xi32, #tpu.memory_space<vmem>> -> memref<1x16xi32, #tpu.memory_space<vmem>>
    %1299 = tpu.memref_slice %arg4[%c0_i32_912] : memref<1x!tpu.dma_semaphore, #tpu.memory_space<semaphore_mem>> -> memref<1x!tpu.dma_semaphore, #tpu.memory_space<semaphore_mem>>
    %1300 = tpu.memref_squeeze %1299 : memref<1x!tpu.dma_semaphore, #tpu.memory_space<semaphore_mem>> -> memref<!tpu.dma_semaphore, #tpu.memory_space<semaphore_mem>>
    tpu.wait_dma2 semaphore(%1300 : memref<!tpu.dma_semaphore, #tpu.memory_space<semaphore_mem>>) src(%1297 : memref<1x16xi32, #tpu.memory_space<any>>) dst(%1298 : memref<1x16xi32, #tpu.memory_space<vmem>>)
    %c0_i32_916 = arith.constant 0 : i32
    %c0_i32_917 = arith.constant 0 : i32
    %1301 = tpu.memref_slice %arg2[%710, %c0_i32_917] : memref<100x16xi32, #tpu.memory_space<any>> -> memref<1x16xi32, #tpu.memory_space<any>>
    %c101_i32_918 = arith.constant 101 : i32
    %c0_i32_919 = arith.constant 0 : i32
    %1302 = tpu.memref_slice %arg3[%c101_i32_918, %c0_i32_919] : memref<128x16xi32, #tpu.memory_space<vmem>> -> memref<1x16xi32, #tpu.memory_space<vmem>>
    %1303 = tpu.memref_slice %arg4[%c0_i32_916] : memref<1x!tpu.dma_semaphore, #tpu.memory_space<semaphore_mem>> -> memref<1x!tpu.dma_semaphore, #tpu.memory_space<semaphore_mem>>
    %1304 = tpu.memref_squeeze %1303 : memref<1x!tpu.dma_semaphore, #tpu.memory_space<semaphore_mem>> -> memref<!tpu.dma_semaphore, #tpu.memory_space<semaphore_mem>>
    tpu.wait_dma2 semaphore(%1304 : memref<!tpu.dma_semaphore, #tpu.memory_space<semaphore_mem>>) src(%1301 : memref<1x16xi32, #tpu.memory_space<any>>) dst(%1302 : memref<1x16xi32, #tpu.memory_space<vmem>>)
    %c0_i32_920 = arith.constant 0 : i32
    %c0_i32_921 = arith.constant 0 : i32
    %1305 = tpu.memref_slice %arg2[%717, %c0_i32_921] : memref<100x16xi32, #tpu.memory_space<any>> -> memref<1x16xi32, #tpu.memory_space<any>>
    %c102_i32_922 = arith.constant 102 : i32
    %c0_i32_923 = arith.constant 0 : i32
    %1306 = tpu.memref_slice %arg3[%c102_i32_922, %c0_i32_923] : memref<128x16xi32, #tpu.memory_space<vmem>> -> memref<1x16xi32, #tpu.memory_space<vmem>>
    %1307 = tpu.memref_slice %arg4[%c0_i32_920] : memref<1x!tpu.dma_semaphore, #tpu.memory_space<semaphore_mem>> -> memref<1x!tpu.dma_semaphore, #tpu.memory_space<semaphore_mem>>
    %1308 = tpu.memref_squeeze %1307 : memref<1x!tpu.dma_semaphore, #tpu.memory_space<semaphore_mem>> -> memref<!tpu.dma_semaphore, #tpu.memory_space<semaphore_mem>>
    tpu.wait_dma2 semaphore(%1308 : memref<!tpu.dma_semaphore, #tpu.memory_space<semaphore_mem>>) src(%1305 : memref<1x16xi32, #tpu.memory_space<any>>) dst(%1306 : memref<1x16xi32, #tpu.memory_space<vmem>>)
    %c0_i32_924 = arith.constant 0 : i32
    %c0_i32_925 = arith.constant 0 : i32
    %1309 = tpu.memref_slice %arg2[%724, %c0_i32_925] : memref<100x16xi32, #tpu.memory_space<any>> -> memref<1x16xi32, #tpu.memory_space<any>>
    %c103_i32_926 = arith.constant 103 : i32
    %c0_i32_927 = arith.constant 0 : i32
    %1310 = tpu.memref_slice %arg3[%c103_i32_926, %c0_i32_927] : memref<128x16xi32, #tpu.memory_space<vmem>> -> memref<1x16xi32, #tpu.memory_space<vmem>>
    %1311 = tpu.memref_slice %arg4[%c0_i32_924] : memref<1x!tpu.dma_semaphore, #tpu.memory_space<semaphore_mem>> -> memref<1x!tpu.dma_semaphore, #tpu.memory_space<semaphore_mem>>
    %1312 = tpu.memref_squeeze %1311 : memref<1x!tpu.dma_semaphore, #tpu.memory_space<semaphore_mem>> -> memref<!tpu.dma_semaphore, #tpu.memory_space<semaphore_mem>>
    tpu.wait_dma2 semaphore(%1312 : memref<!tpu.dma_semaphore, #tpu.memory_space<semaphore_mem>>) src(%1309 : memref<1x16xi32, #tpu.memory_space<any>>) dst(%1310 : memref<1x16xi32, #tpu.memory_space<vmem>>)
    %c0_i32_928 = arith.constant 0 : i32
    %c0_i32_929 = arith.constant 0 : i32
    %1313 = tpu.memref_slice %arg2[%731, %c0_i32_929] : memref<100x16xi32, #tpu.memory_space<any>> -> memref<1x16xi32, #tpu.memory_space<any>>
    %c104_i32_930 = arith.constant 104 : i32
    %c0_i32_931 = arith.constant 0 : i32
    %1314 = tpu.memref_slice %arg3[%c104_i32_930, %c0_i32_931] : memref<128x16xi32, #tpu.memory_space<vmem>> -> memref<1x16xi32, #tpu.memory_space<vmem>>
    %1315 = tpu.memref_slice %arg4[%c0_i32_928] : memref<1x!tpu.dma_semaphore, #tpu.memory_space<semaphore_mem>> -> memref<1x!tpu.dma_semaphore, #tpu.memory_space<semaphore_mem>>
    %1316 = tpu.memref_squeeze %1315 : memref<1x!tpu.dma_semaphore, #tpu.memory_space<semaphore_mem>> -> memref<!tpu.dma_semaphore, #tpu.memory_space<semaphore_mem>>
    tpu.wait_dma2 semaphore(%1316 : memref<!tpu.dma_semaphore, #tpu.memory_space<semaphore_mem>>) src(%1313 : memref<1x16xi32, #tpu.memory_space<any>>) dst(%1314 : memref<1x16xi32, #tpu.memory_space<vmem>>)
    %c0_i32_932 = arith.constant 0 : i32
    %c0_i32_933 = arith.constant 0 : i32
    %1317 = tpu.memref_slice %arg2[%738, %c0_i32_933] : memref<100x16xi32, #tpu.memory_space<any>> -> memref<1x16xi32, #tpu.memory_space<any>>
    %c105_i32_934 = arith.constant 105 : i32
    %c0_i32_935 = arith.constant 0 : i32
    %1318 = tpu.memref_slice %arg3[%c105_i32_934, %c0_i32_935] : memref<128x16xi32, #tpu.memory_space<vmem>> -> memref<1x16xi32, #tpu.memory_space<vmem>>
    %1319 = tpu.memref_slice %arg4[%c0_i32_932] : memref<1x!tpu.dma_semaphore, #tpu.memory_space<semaphore_mem>> -> memref<1x!tpu.dma_semaphore, #tpu.memory_space<semaphore_mem>>
    %1320 = tpu.memref_squeeze %1319 : memref<1x!tpu.dma_semaphore, #tpu.memory_space<semaphore_mem>> -> memref<!tpu.dma_semaphore, #tpu.memory_space<semaphore_mem>>
    tpu.wait_dma2 semaphore(%1320 : memref<!tpu.dma_semaphore, #tpu.memory_space<semaphore_mem>>) src(%1317 : memref<1x16xi32, #tpu.memory_space<any>>) dst(%1318 : memref<1x16xi32, #tpu.memory_space<vmem>>)
    %c0_i32_936 = arith.constant 0 : i32
    %c0_i32_937 = arith.constant 0 : i32
    %1321 = tpu.memref_slice %arg2[%745, %c0_i32_937] : memref<100x16xi32, #tpu.memory_space<any>> -> memref<1x16xi32, #tpu.memory_space<any>>
    %c106_i32_938 = arith.constant 106 : i32
    %c0_i32_939 = arith.constant 0 : i32
    %1322 = tpu.memref_slice %arg3[%c106_i32_938, %c0_i32_939] : memref<128x16xi32, #tpu.memory_space<vmem>> -> memref<1x16xi32, #tpu.memory_space<vmem>>
    %1323 = tpu.memref_slice %arg4[%c0_i32_936] : memref<1x!tpu.dma_semaphore, #tpu.memory_space<semaphore_mem>> -> memref<1x!tpu.dma_semaphore, #tpu.memory_space<semaphore_mem>>
    %1324 = tpu.memref_squeeze %1323 : memref<1x!tpu.dma_semaphore, #tpu.memory_space<semaphore_mem>> -> memref<!tpu.dma_semaphore, #tpu.memory_space<semaphore_mem>>
    tpu.wait_dma2 semaphore(%1324 : memref<!tpu.dma_semaphore, #tpu.memory_space<semaphore_mem>>) src(%1321 : memref<1x16xi32, #tpu.memory_space<any>>) dst(%1322 : memref<1x16xi32, #tpu.memory_space<vmem>>)
    %c0_i32_940 = arith.constant 0 : i32
    %c0_i32_941 = arith.constant 0 : i32
    %1325 = tpu.memref_slice %arg2[%752, %c0_i32_941] : memref<100x16xi32, #tpu.memory_space<any>> -> memref<1x16xi32, #tpu.memory_space<any>>
    %c107_i32_942 = arith.constant 107 : i32
    %c0_i32_943 = arith.constant 0 : i32
    %1326 = tpu.memref_slice %arg3[%c107_i32_942, %c0_i32_943] : memref<128x16xi32, #tpu.memory_space<vmem>> -> memref<1x16xi32, #tpu.memory_space<vmem>>
    %1327 = tpu.memref_slice %arg4[%c0_i32_940] : memref<1x!tpu.dma_semaphore, #tpu.memory_space<semaphore_mem>> -> memref<1x!tpu.dma_semaphore, #tpu.memory_space<semaphore_mem>>
    %1328 = tpu.memref_squeeze %1327 : memref<1x!tpu.dma_semaphore, #tpu.memory_space<semaphore_mem>> -> memref<!tpu.dma_semaphore, #tpu.memory_space<semaphore_mem>>
    tpu.wait_dma2 semaphore(%1328 : memref<!tpu.dma_semaphore, #tpu.memory_space<semaphore_mem>>) src(%1325 : memref<1x16xi32, #tpu.memory_space<any>>) dst(%1326 : memref<1x16xi32, #tpu.memory_space<vmem>>)
    %c0_i32_944 = arith.constant 0 : i32
    %c0_i32_945 = arith.constant 0 : i32
    %1329 = tpu.memref_slice %arg2[%759, %c0_i32_945] : memref<100x16xi32, #tpu.memory_space<any>> -> memref<1x16xi32, #tpu.memory_space<any>>
    %c108_i32_946 = arith.constant 108 : i32
    %c0_i32_947 = arith.constant 0 : i32
    %1330 = tpu.memref_slice %arg3[%c108_i32_946, %c0_i32_947] : memref<128x16xi32, #tpu.memory_space<vmem>> -> memref<1x16xi32, #tpu.memory_space<vmem>>
    %1331 = tpu.memref_slice %arg4[%c0_i32_944] : memref<1x!tpu.dma_semaphore, #tpu.memory_space<semaphore_mem>> -> memref<1x!tpu.dma_semaphore, #tpu.memory_space<semaphore_mem>>
    %1332 = tpu.memref_squeeze %1331 : memref<1x!tpu.dma_semaphore, #tpu.memory_space<semaphore_mem>> -> memref<!tpu.dma_semaphore, #tpu.memory_space<semaphore_mem>>
    tpu.wait_dma2 semaphore(%1332 : memref<!tpu.dma_semaphore, #tpu.memory_space<semaphore_mem>>) src(%1329 : memref<1x16xi32, #tpu.memory_space<any>>) dst(%1330 : memref<1x16xi32, #tpu.memory_space<vmem>>)
    %c0_i32_948 = arith.constant 0 : i32
    %c0_i32_949 = arith.constant 0 : i32
    %1333 = tpu.memref_slice %arg2[%766, %c0_i32_949] : memref<100x16xi32, #tpu.memory_space<any>> -> memref<1x16xi32, #tpu.memory_space<any>>
    %c109_i32_950 = arith.constant 109 : i32
    %c0_i32_951 = arith.constant 0 : i32
    %1334 = tpu.memref_slice %arg3[%c109_i32_950, %c0_i32_951] : memref<128x16xi32, #tpu.memory_space<vmem>> -> memref<1x16xi32, #tpu.memory_space<vmem>>
    %1335 = tpu.memref_slice %arg4[%c0_i32_948] : memref<1x!tpu.dma_semaphore, #tpu.memory_space<semaphore_mem>> -> memref<1x!tpu.dma_semaphore, #tpu.memory_space<semaphore_mem>>
    %1336 = tpu.memref_squeeze %1335 : memref<1x!tpu.dma_semaphore, #tpu.memory_space<semaphore_mem>> -> memref<!tpu.dma_semaphore, #tpu.memory_space<semaphore_mem>>
    tpu.wait_dma2 semaphore(%1336 : memref<!tpu.dma_semaphore, #tpu.memory_space<semaphore_mem>>) src(%1333 : memref<1x16xi32, #tpu.memory_space<any>>) dst(%1334 : memref<1x16xi32, #tpu.memory_space<vmem>>)
    %c0_i32_952 = arith.constant 0 : i32
    %c0_i32_953 = arith.constant 0 : i32
    %1337 = tpu.memref_slice %arg2[%773, %c0_i32_953] : memref<100x16xi32, #tpu.memory_space<any>> -> memref<1x16xi32, #tpu.memory_space<any>>
    %c110_i32_954 = arith.constant 110 : i32
    %c0_i32_955 = arith.constant 0 : i32
    %1338 = tpu.memref_slice %arg3[%c110_i32_954, %c0_i32_955] : memref<128x16xi32, #tpu.memory_space<vmem>> -> memref<1x16xi32, #tpu.memory_space<vmem>>
    %1339 = tpu.memref_slice %arg4[%c0_i32_952] : memref<1x!tpu.dma_semaphore, #tpu.memory_space<semaphore_mem>> -> memref<1x!tpu.dma_semaphore, #tpu.memory_space<semaphore_mem>>
    %1340 = tpu.memref_squeeze %1339 : memref<1x!tpu.dma_semaphore, #tpu.memory_space<semaphore_mem>> -> memref<!tpu.dma_semaphore, #tpu.memory_space<semaphore_mem>>
    tpu.wait_dma2 semaphore(%1340 : memref<!tpu.dma_semaphore, #tpu.memory_space<semaphore_mem>>) src(%1337 : memref<1x16xi32, #tpu.memory_space<any>>) dst(%1338 : memref<1x16xi32, #tpu.memory_space<vmem>>)
    %c0_i32_956 = arith.constant 0 : i32
    %c0_i32_957 = arith.constant 0 : i32
    %1341 = tpu.memref_slice %arg2[%780, %c0_i32_957] : memref<100x16xi32, #tpu.memory_space<any>> -> memref<1x16xi32, #tpu.memory_space<any>>
    %c111_i32_958 = arith.constant 111 : i32
    %c0_i32_959 = arith.constant 0 : i32
    %1342 = tpu.memref_slice %arg3[%c111_i32_958, %c0_i32_959] : memref<128x16xi32, #tpu.memory_space<vmem>> -> memref<1x16xi32, #tpu.memory_space<vmem>>
    %1343 = tpu.memref_slice %arg4[%c0_i32_956] : memref<1x!tpu.dma_semaphore, #tpu.memory_space<semaphore_mem>> -> memref<1x!tpu.dma_semaphore, #tpu.memory_space<semaphore_mem>>
    %1344 = tpu.memref_squeeze %1343 : memref<1x!tpu.dma_semaphore, #tpu.memory_space<semaphore_mem>> -> memref<!tpu.dma_semaphore, #tpu.memory_space<semaphore_mem>>
    tpu.wait_dma2 semaphore(%1344 : memref<!tpu.dma_semaphore, #tpu.memory_space<semaphore_mem>>) src(%1341 : memref<1x16xi32, #tpu.memory_space<any>>) dst(%1342 : memref<1x16xi32, #tpu.memory_space<vmem>>)
    %c0_i32_960 = arith.constant 0 : i32
    %c0_i32_961 = arith.constant 0 : i32
    %1345 = tpu.memref_slice %arg2[%787, %c0_i32_961] : memref<100x16xi32, #tpu.memory_space<any>> -> memref<1x16xi32, #tpu.memory_space<any>>
    %c112_i32_962 = arith.constant 112 : i32
    %c0_i32_963 = arith.constant 0 : i32
    %1346 = tpu.memref_slice %arg3[%c112_i32_962, %c0_i32_963] : memref<128x16xi32, #tpu.memory_space<vmem>> -> memref<1x16xi32, #tpu.memory_space<vmem>>
    %1347 = tpu.memref_slice %arg4[%c0_i32_960] : memref<1x!tpu.dma_semaphore, #tpu.memory_space<semaphore_mem>> -> memref<1x!tpu.dma_semaphore, #tpu.memory_space<semaphore_mem>>
    %1348 = tpu.memref_squeeze %1347 : memref<1x!tpu.dma_semaphore, #tpu.memory_space<semaphore_mem>> -> memref<!tpu.dma_semaphore, #tpu.memory_space<semaphore_mem>>
    tpu.wait_dma2 semaphore(%1348 : memref<!tpu.dma_semaphore, #tpu.memory_space<semaphore_mem>>) src(%1345 : memref<1x16xi32, #tpu.memory_space<any>>) dst(%1346 : memref<1x16xi32, #tpu.memory_space<vmem>>)
    %c0_i32_964 = arith.constant 0 : i32
    %c0_i32_965 = arith.constant 0 : i32
    %1349 = tpu.memref_slice %arg2[%794, %c0_i32_965] : memref<100x16xi32, #tpu.memory_space<any>> -> memref<1x16xi32, #tpu.memory_space<any>>
    %c113_i32_966 = arith.constant 113 : i32
    %c0_i32_967 = arith.constant 0 : i32
    %1350 = tpu.memref_slice %arg3[%c113_i32_966, %c0_i32_967] : memref<128x16xi32, #tpu.memory_space<vmem>> -> memref<1x16xi32, #tpu.memory_space<vmem>>
    %1351 = tpu.memref_slice %arg4[%c0_i32_964] : memref<1x!tpu.dma_semaphore, #tpu.memory_space<semaphore_mem>> -> memref<1x!tpu.dma_semaphore, #tpu.memory_space<semaphore_mem>>
    %1352 = tpu.memref_squeeze %1351 : memref<1x!tpu.dma_semaphore, #tpu.memory_space<semaphore_mem>> -> memref<!tpu.dma_semaphore, #tpu.memory_space<semaphore_mem>>
    tpu.wait_dma2 semaphore(%1352 : memref<!tpu.dma_semaphore, #tpu.memory_space<semaphore_mem>>) src(%1349 : memref<1x16xi32, #tpu.memory_space<any>>) dst(%1350 : memref<1x16xi32, #tpu.memory_space<vmem>>)
    %c0_i32_968 = arith.constant 0 : i32
    %c0_i32_969 = arith.constant 0 : i32
    %1353 = tpu.memref_slice %arg2[%801, %c0_i32_969] : memref<100x16xi32, #tpu.memory_space<any>> -> memref<1x16xi32, #tpu.memory_space<any>>
    %c114_i32_970 = arith.constant 114 : i32
    %c0_i32_971 = arith.constant 0 : i32
    %1354 = tpu.memref_slice %arg3[%c114_i32_970, %c0_i32_971] : memref<128x16xi32, #tpu.memory_space<vmem>> -> memref<1x16xi32, #tpu.memory_space<vmem>>
    %1355 = tpu.memref_slice %arg4[%c0_i32_968] : memref<1x!tpu.dma_semaphore, #tpu.memory_space<semaphore_mem>> -> memref<1x!tpu.dma_semaphore, #tpu.memory_space<semaphore_mem>>
    %1356 = tpu.memref_squeeze %1355 : memref<1x!tpu.dma_semaphore, #tpu.memory_space<semaphore_mem>> -> memref<!tpu.dma_semaphore, #tpu.memory_space<semaphore_mem>>
    tpu.wait_dma2 semaphore(%1356 : memref<!tpu.dma_semaphore, #tpu.memory_space<semaphore_mem>>) src(%1353 : memref<1x16xi32, #tpu.memory_space<any>>) dst(%1354 : memref<1x16xi32, #tpu.memory_space<vmem>>)
    %c0_i32_972 = arith.constant 0 : i32
    %c0_i32_973 = arith.constant 0 : i32
    %1357 = tpu.memref_slice %arg2[%808, %c0_i32_973] : memref<100x16xi32, #tpu.memory_space<any>> -> memref<1x16xi32, #tpu.memory_space<any>>
    %c115_i32_974 = arith.constant 115 : i32
    %c0_i32_975 = arith.constant 0 : i32
    %1358 = tpu.memref_slice %arg3[%c115_i32_974, %c0_i32_975] : memref<128x16xi32, #tpu.memory_space<vmem>> -> memref<1x16xi32, #tpu.memory_space<vmem>>
    %1359 = tpu.memref_slice %arg4[%c0_i32_972] : memref<1x!tpu.dma_semaphore, #tpu.memory_space<semaphore_mem>> -> memref<1x!tpu.dma_semaphore, #tpu.memory_space<semaphore_mem>>
    %1360 = tpu.memref_squeeze %1359 : memref<1x!tpu.dma_semaphore, #tpu.memory_space<semaphore_mem>> -> memref<!tpu.dma_semaphore, #tpu.memory_space<semaphore_mem>>
    tpu.wait_dma2 semaphore(%1360 : memref<!tpu.dma_semaphore, #tpu.memory_space<semaphore_mem>>) src(%1357 : memref<1x16xi32, #tpu.memory_space<any>>) dst(%1358 : memref<1x16xi32, #tpu.memory_space<vmem>>)
    %c0_i32_976 = arith.constant 0 : i32
    %c0_i32_977 = arith.constant 0 : i32
    %1361 = tpu.memref_slice %arg2[%815, %c0_i32_977] : memref<100x16xi32, #tpu.memory_space<any>> -> memref<1x16xi32, #tpu.memory_space<any>>
    %c116_i32_978 = arith.constant 116 : i32
    %c0_i32_979 = arith.constant 0 : i32
    %1362 = tpu.memref_slice %arg3[%c116_i32_978, %c0_i32_979] : memref<128x16xi32, #tpu.memory_space<vmem>> -> memref<1x16xi32, #tpu.memory_space<vmem>>
    %1363 = tpu.memref_slice %arg4[%c0_i32_976] : memref<1x!tpu.dma_semaphore, #tpu.memory_space<semaphore_mem>> -> memref<1x!tpu.dma_semaphore, #tpu.memory_space<semaphore_mem>>
    %1364 = tpu.memref_squeeze %1363 : memref<1x!tpu.dma_semaphore, #tpu.memory_space<semaphore_mem>> -> memref<!tpu.dma_semaphore, #tpu.memory_space<semaphore_mem>>
    tpu.wait_dma2 semaphore(%1364 : memref<!tpu.dma_semaphore, #tpu.memory_space<semaphore_mem>>) src(%1361 : memref<1x16xi32, #tpu.memory_space<any>>) dst(%1362 : memref<1x16xi32, #tpu.memory_space<vmem>>)
    %c0_i32_980 = arith.constant 0 : i32
    %c0_i32_981 = arith.constant 0 : i32
    %1365 = tpu.memref_slice %arg2[%822, %c0_i32_981] : memref<100x16xi32, #tpu.memory_space<any>> -> memref<1x16xi32, #tpu.memory_space<any>>
    %c117_i32_982 = arith.constant 117 : i32
    %c0_i32_983 = arith.constant 0 : i32
    %1366 = tpu.memref_slice %arg3[%c117_i32_982, %c0_i32_983] : memref<128x16xi32, #tpu.memory_space<vmem>> -> memref<1x16xi32, #tpu.memory_space<vmem>>
    %1367 = tpu.memref_slice %arg4[%c0_i32_980] : memref<1x!tpu.dma_semaphore, #tpu.memory_space<semaphore_mem>> -> memref<1x!tpu.dma_semaphore, #tpu.memory_space<semaphore_mem>>
    %1368 = tpu.memref_squeeze %1367 : memref<1x!tpu.dma_semaphore, #tpu.memory_space<semaphore_mem>> -> memref<!tpu.dma_semaphore, #tpu.memory_space<semaphore_mem>>
    tpu.wait_dma2 semaphore(%1368 : memref<!tpu.dma_semaphore, #tpu.memory_space<semaphore_mem>>) src(%1365 : memref<1x16xi32, #tpu.memory_space<any>>) dst(%1366 : memref<1x16xi32, #tpu.memory_space<vmem>>)
    %c0_i32_984 = arith.constant 0 : i32
    %c0_i32_985 = arith.constant 0 : i32
    %1369 = tpu.memref_slice %arg2[%829, %c0_i32_985] : memref<100x16xi32, #tpu.memory_space<any>> -> memref<1x16xi32, #tpu.memory_space<any>>
    %c118_i32_986 = arith.constant 118 : i32
    %c0_i32_987 = arith.constant 0 : i32
    %1370 = tpu.memref_slice %arg3[%c118_i32_986, %c0_i32_987] : memref<128x16xi32, #tpu.memory_space<vmem>> -> memref<1x16xi32, #tpu.memory_space<vmem>>
    %1371 = tpu.memref_slice %arg4[%c0_i32_984] : memref<1x!tpu.dma_semaphore, #tpu.memory_space<semaphore_mem>> -> memref<1x!tpu.dma_semaphore, #tpu.memory_space<semaphore_mem>>
    %1372 = tpu.memref_squeeze %1371 : memref<1x!tpu.dma_semaphore, #tpu.memory_space<semaphore_mem>> -> memref<!tpu.dma_semaphore, #tpu.memory_space<semaphore_mem>>
    tpu.wait_dma2 semaphore(%1372 : memref<!tpu.dma_semaphore, #tpu.memory_space<semaphore_mem>>) src(%1369 : memref<1x16xi32, #tpu.memory_space<any>>) dst(%1370 : memref<1x16xi32, #tpu.memory_space<vmem>>)
    %c0_i32_988 = arith.constant 0 : i32
    %c0_i32_989 = arith.constant 0 : i32
    %1373 = tpu.memref_slice %arg2[%836, %c0_i32_989] : memref<100x16xi32, #tpu.memory_space<any>> -> memref<1x16xi32, #tpu.memory_space<any>>
    %c119_i32_990 = arith.constant 119 : i32
    %c0_i32_991 = arith.constant 0 : i32
    %1374 = tpu.memref_slice %arg3[%c119_i32_990, %c0_i32_991] : memref<128x16xi32, #tpu.memory_space<vmem>> -> memref<1x16xi32, #tpu.memory_space<vmem>>
    %1375 = tpu.memref_slice %arg4[%c0_i32_988] : memref<1x!tpu.dma_semaphore, #tpu.memory_space<semaphore_mem>> -> memref<1x!tpu.dma_semaphore, #tpu.memory_space<semaphore_mem>>
    %1376 = tpu.memref_squeeze %1375 : memref<1x!tpu.dma_semaphore, #tpu.memory_space<semaphore_mem>> -> memref<!tpu.dma_semaphore, #tpu.memory_space<semaphore_mem>>
    tpu.wait_dma2 semaphore(%1376 : memref<!tpu.dma_semaphore, #tpu.memory_space<semaphore_mem>>) src(%1373 : memref<1x16xi32, #tpu.memory_space<any>>) dst(%1374 : memref<1x16xi32, #tpu.memory_space<vmem>>)
    %c0_i32_992 = arith.constant 0 : i32
    %c0_i32_993 = arith.constant 0 : i32
    %1377 = tpu.memref_slice %arg2[%843, %c0_i32_993] : memref<100x16xi32, #tpu.memory_space<any>> -> memref<1x16xi32, #tpu.memory_space<any>>
    %c120_i32_994 = arith.constant 120 : i32
    %c0_i32_995 = arith.constant 0 : i32
    %1378 = tpu.memref_slice %arg3[%c120_i32_994, %c0_i32_995] : memref<128x16xi32, #tpu.memory_space<vmem>> -> memref<1x16xi32, #tpu.memory_space<vmem>>
    %1379 = tpu.memref_slice %arg4[%c0_i32_992] : memref<1x!tpu.dma_semaphore, #tpu.memory_space<semaphore_mem>> -> memref<1x!tpu.dma_semaphore, #tpu.memory_space<semaphore_mem>>
    %1380 = tpu.memref_squeeze %1379 : memref<1x!tpu.dma_semaphore, #tpu.memory_space<semaphore_mem>> -> memref<!tpu.dma_semaphore, #tpu.memory_space<semaphore_mem>>
    tpu.wait_dma2 semaphore(%1380 : memref<!tpu.dma_semaphore, #tpu.memory_space<semaphore_mem>>) src(%1377 : memref<1x16xi32, #tpu.memory_space<any>>) dst(%1378 : memref<1x16xi32, #tpu.memory_space<vmem>>)
    %c0_i32_996 = arith.constant 0 : i32
    %c0_i32_997 = arith.constant 0 : i32
    %1381 = tpu.memref_slice %arg2[%850, %c0_i32_997] : memref<100x16xi32, #tpu.memory_space<any>> -> memref<1x16xi32, #tpu.memory_space<any>>
    %c121_i32_998 = arith.constant 121 : i32
    %c0_i32_999 = arith.constant 0 : i32
    %1382 = tpu.memref_slice %arg3[%c121_i32_998, %c0_i32_999] : memref<128x16xi32, #tpu.memory_space<vmem>> -> memref<1x16xi32, #tpu.memory_space<vmem>>
    %1383 = tpu.memref_slice %arg4[%c0_i32_996] : memref<1x!tpu.dma_semaphore, #tpu.memory_space<semaphore_mem>> -> memref<1x!tpu.dma_semaphore, #tpu.memory_space<semaphore_mem>>
    %1384 = tpu.memref_squeeze %1383 : memref<1x!tpu.dma_semaphore, #tpu.memory_space<semaphore_mem>> -> memref<!tpu.dma_semaphore, #tpu.memory_space<semaphore_mem>>
    tpu.wait_dma2 semaphore(%1384 : memref<!tpu.dma_semaphore, #tpu.memory_space<semaphore_mem>>) src(%1381 : memref<1x16xi32, #tpu.memory_space<any>>) dst(%1382 : memref<1x16xi32, #tpu.memory_space<vmem>>)
    %c0_i32_1000 = arith.constant 0 : i32
    %c0_i32_1001 = arith.constant 0 : i32
    %1385 = tpu.memref_slice %arg2[%857, %c0_i32_1001] : memref<100x16xi32, #tpu.memory_space<any>> -> memref<1x16xi32, #tpu.memory_space<any>>
    %c122_i32_1002 = arith.constant 122 : i32
    %c0_i32_1003 = arith.constant 0 : i32
    %1386 = tpu.memref_slice %arg3[%c122_i32_1002, %c0_i32_1003] : memref<128x16xi32, #tpu.memory_space<vmem>> -> memref<1x16xi32, #tpu.memory_space<vmem>>
    %1387 = tpu.memref_slice %arg4[%c0_i32_1000] : memref<1x!tpu.dma_semaphore, #tpu.memory_space<semaphore_mem>> -> memref<1x!tpu.dma_semaphore, #tpu.memory_space<semaphore_mem>>
    %1388 = tpu.memref_squeeze %1387 : memref<1x!tpu.dma_semaphore, #tpu.memory_space<semaphore_mem>> -> memref<!tpu.dma_semaphore, #tpu.memory_space<semaphore_mem>>
    tpu.wait_dma2 semaphore(%1388 : memref<!tpu.dma_semaphore, #tpu.memory_space<semaphore_mem>>) src(%1385 : memref<1x16xi32, #tpu.memory_space<any>>) dst(%1386 : memref<1x16xi32, #tpu.memory_space<vmem>>)
    %c0_i32_1004 = arith.constant 0 : i32
    %c0_i32_1005 = arith.constant 0 : i32
    %1389 = tpu.memref_slice %arg2[%864, %c0_i32_1005] : memref<100x16xi32, #tpu.memory_space<any>> -> memref<1x16xi32, #tpu.memory_space<any>>
    %c123_i32_1006 = arith.constant 123 : i32
    %c0_i32_1007 = arith.constant 0 : i32
    %1390 = tpu.memref_slice %arg3[%c123_i32_1006, %c0_i32_1007] : memref<128x16xi32, #tpu.memory_space<vmem>> -> memref<1x16xi32, #tpu.memory_space<vmem>>
    %1391 = tpu.memref_slice %arg4[%c0_i32_1004] : memref<1x!tpu.dma_semaphore, #tpu.memory_space<semaphore_mem>> -> memref<1x!tpu.dma_semaphore, #tpu.memory_space<semaphore_mem>>
    %1392 = tpu.memref_squeeze %1391 : memref<1x!tpu.dma_semaphore, #tpu.memory_space<semaphore_mem>> -> memref<!tpu.dma_semaphore, #tpu.memory_space<semaphore_mem>>
    tpu.wait_dma2 semaphore(%1392 : memref<!tpu.dma_semaphore, #tpu.memory_space<semaphore_mem>>) src(%1389 : memref<1x16xi32, #tpu.memory_space<any>>) dst(%1390 : memref<1x16xi32, #tpu.memory_space<vmem>>)
    %c0_i32_1008 = arith.constant 0 : i32
    %c0_i32_1009 = arith.constant 0 : i32
    %1393 = tpu.memref_slice %arg2[%871, %c0_i32_1009] : memref<100x16xi32, #tpu.memory_space<any>> -> memref<1x16xi32, #tpu.memory_space<any>>
    %c124_i32_1010 = arith.constant 124 : i32
    %c0_i32_1011 = arith.constant 0 : i32
    %1394 = tpu.memref_slice %arg3[%c124_i32_1010, %c0_i32_1011] : memref<128x16xi32, #tpu.memory_space<vmem>> -> memref<1x16xi32, #tpu.memory_space<vmem>>
    %1395 = tpu.memref_slice %arg4[%c0_i32_1008] : memref<1x!tpu.dma_semaphore, #tpu.memory_space<semaphore_mem>> -> memref<1x!tpu.dma_semaphore, #tpu.memory_space<semaphore_mem>>
    %1396 = tpu.memref_squeeze %1395 : memref<1x!tpu.dma_semaphore, #tpu.memory_space<semaphore_mem>> -> memref<!tpu.dma_semaphore, #tpu.memory_space<semaphore_mem>>
    tpu.wait_dma2 semaphore(%1396 : memref<!tpu.dma_semaphore, #tpu.memory_space<semaphore_mem>>) src(%1393 : memref<1x16xi32, #tpu.memory_space<any>>) dst(%1394 : memref<1x16xi32, #tpu.memory_space<vmem>>)
    %c0_i32_1012 = arith.constant 0 : i32
    %c0_i32_1013 = arith.constant 0 : i32
    %1397 = tpu.memref_slice %arg2[%878, %c0_i32_1013] : memref<100x16xi32, #tpu.memory_space<any>> -> memref<1x16xi32, #tpu.memory_space<any>>
    %c125_i32_1014 = arith.constant 125 : i32
    %c0_i32_1015 = arith.constant 0 : i32
    %1398 = tpu.memref_slice %arg3[%c125_i32_1014, %c0_i32_1015] : memref<128x16xi32, #tpu.memory_space<vmem>> -> memref<1x16xi32, #tpu.memory_space<vmem>>
    %1399 = tpu.memref_slice %arg4[%c0_i32_1012] : memref<1x!tpu.dma_semaphore, #tpu.memory_space<semaphore_mem>> -> memref<1x!tpu.dma_semaphore, #tpu.memory_space<semaphore_mem>>
    %1400 = tpu.memref_squeeze %1399 : memref<1x!tpu.dma_semaphore, #tpu.memory_space<semaphore_mem>> -> memref<!tpu.dma_semaphore, #tpu.memory_space<semaphore_mem>>
    tpu.wait_dma2 semaphore(%1400 : memref<!tpu.dma_semaphore, #tpu.memory_space<semaphore_mem>>) src(%1397 : memref<1x16xi32, #tpu.memory_space<any>>) dst(%1398 : memref<1x16xi32, #tpu.memory_space<vmem>>)
    %c0_i32_1016 = arith.constant 0 : i32
    %c0_i32_1017 = arith.constant 0 : i32
    %1401 = tpu.memref_slice %arg2[%885, %c0_i32_1017] : memref<100x16xi32, #tpu.memory_space<any>> -> memref<1x16xi32, #tpu.memory_space<any>>
    %c126_i32_1018 = arith.constant 126 : i32
    %c0_i32_1019 = arith.constant 0 : i32
    %1402 = tpu.memref_slice %arg3[%c126_i32_1018, %c0_i32_1019] : memref<128x16xi32, #tpu.memory_space<vmem>> -> memref<1x16xi32, #tpu.memory_space<vmem>>
    %1403 = tpu.memref_slice %arg4[%c0_i32_1016] : memref<1x!tpu.dma_semaphore, #tpu.memory_space<semaphore_mem>> -> memref<1x!tpu.dma_semaphore, #tpu.memory_space<semaphore_mem>>
    %1404 = tpu.memref_squeeze %1403 : memref<1x!tpu.dma_semaphore, #tpu.memory_space<semaphore_mem>> -> memref<!tpu.dma_semaphore, #tpu.memory_space<semaphore_mem>>
    tpu.wait_dma2 semaphore(%1404 : memref<!tpu.dma_semaphore, #tpu.memory_space<semaphore_mem>>) src(%1401 : memref<1x16xi32, #tpu.memory_space<any>>) dst(%1402 : memref<1x16xi32, #tpu.memory_space<vmem>>)
    %c0_i32_1020 = arith.constant 0 : i32
    %c0_i32_1021 = arith.constant 0 : i32
    %1405 = tpu.memref_slice %arg2[%892, %c0_i32_1021] : memref<100x16xi32, #tpu.memory_space<any>> -> memref<1x16xi32, #tpu.memory_space<any>>
    %c127_i32_1022 = arith.constant 127 : i32
    %c0_i32_1023 = arith.constant 0 : i32
    %1406 = tpu.memref_slice %arg3[%c127_i32_1022, %c0_i32_1023] : memref<128x16xi32, #tpu.memory_space<vmem>> -> memref<1x16xi32, #tpu.memory_space<vmem>>
    %1407 = tpu.memref_slice %arg4[%c0_i32_1020] : memref<1x!tpu.dma_semaphore, #tpu.memory_space<semaphore_mem>> -> memref<1x!tpu.dma_semaphore, #tpu.memory_space<semaphore_mem>>
    %1408 = tpu.memref_squeeze %1407 : memref<1x!tpu.dma_semaphore, #tpu.memory_space<semaphore_mem>> -> memref<!tpu.dma_semaphore, #tpu.memory_space<semaphore_mem>>
    tpu.wait_dma2 semaphore(%1408 : memref<!tpu.dma_semaphore, #tpu.memory_space<semaphore_mem>>) src(%1405 : memref<1x16xi32, #tpu.memory_space<any>>) dst(%1406 : memref<1x16xi32, #tpu.memory_space<vmem>>)
    return
  }
  func.func @transform_1(%arg0: i32, %arg1: memref<128xi32, #tpu.memory_space<smem>>) -> (i32, i32) {
    %c0_i32 = arith.constant 0 : i32
    %c0_i32_0 = arith.constant 0 : i32
    return %arg0, %c0_i32 : i32, i32
  }
}

</mosaic_0001>

<bundles_post_ra>
// kernel: tpu_custom_call.1
= control target key start
LH: loop header
LB: loop body
LE: loop exit
PB: predicated region body
PF: predicated region fallthrough
CT: control target
= control target key end

     0   :  { %s9400_s0 = inlined_call_operand.vmem [shape: s32[128], index: 0, kind: input, shape index: {}]   ;;  %s9401_s1 = inlined_call_operand.vmem [shape: u32[100,16], index: 1, kind: input, shape index: {}]   ;;  %s9402_s2 = inlined_call_operand.vmem [shape: u32[128,16], index: 2, kind: output, shape index: {}]  }
   0x1   :  { %s7_s11 = sshll.u32 %s9400_s0, 4  ;;  %s8_s11 = int_to_ptr.vmem [resolvable:$true] %s7_s11 }
   0x2   :  { %s8597_s12 = scalar_lea.vmem %s8_s11, 16  ;;  %p8602_p1 = scmp.lt.s32.totalorder %s8_s11, %s8_s11 }
   0x3   :  { %p8598_p0 = scmp.ne.s32.totalorder %s8_s11, %s8597_s12  ;;  %p8603_p2 = scmp.lt.s32.totalorder %s8597_s12, %s8597_s12 }
   0x5   :  { %p8604_p3 = por %p8603_p2, %p8602_p1 }
   0x7   :  { %p8605_p4 = pnand %p8604_p3, %p8598_p0 }
   0x9   :  { %8608 = shalt.err (!%p8605_p4)  }
   0xa   :  { %s8613_s13 = smov [#allocation4]  }
   0xb   :  { %10 = dma.vmem_to_smem %s8_s11, 16, %s8613_s13, [#allocation3] }
   0xc   :  { %8609 = dma.done.wait [#allocation3], 16 }
   0xd   :  { %8610 = vsyncadd [#allocation3], 4294967280 }
   0xe   :  { %12 = sfence }
   0xf   :  { %s14_s14 = sld [smem:[#allocation4]] }
  0x15   :  { %s15_s17 = scalar_lea.vmem %s9401_s1, %s14_s14 }
  0x16   :  { %v34_v0 = vld [vmem:[%s15_s17] sm:$0x1] }
  0x17   :  { %35 = vst [vmem:[%s9402_s2] sm:$0x1] %v34_v0 }
  0x18   :  { %61 = vsyncadd [#allocation2], 16  ;;  %s8214_s19 = sld [smem:[#allocation4 + $0x1]] }
  0x1e   :  { %s64_s22 = scalar_lea.vmem %s9401_s1, %s8214_s19 }
  0x1f   :  { %v84_v1 = vld [vmem:[%s64_s22] sm:$0x1] }
  0x20   :  { %8216 = vst [vmem:[%s9402_s2 + $0x1] sm:$0x1] %v84_v1 }
  0x21   :  { %111 = vsyncadd [#allocation2], 16  ;;  %s8217_s25 = sld [smem:[#allocation4 + $0x2]] }
  0x27   :  { %s114_s28 = scalar_lea.vmem %s9401_s1, %s8217_s25 }
  0x28   :  { %v134_v2 = vld [vmem:[%s114_s28] sm:$0x1] }
  0x29   :  { %8219 = vst [vmem:[%s9402_s2 + $0x2] sm:$0x1] %v134_v2 }
  0x2a   :  { %161 = vsyncadd [#allocation2], 16  ;;  %s8220_s3 = sld [smem:[#allocation4 + $0x3]] }
  0x30   :  { %s164_s6 = scalar_lea.vmem %s9401_s1, %s8220_s3 }
  0x31   :  { %v184_v3 = vld [vmem:[%s164_s6] sm:$0x1] }
  0x32   :  { %8222 = vst [vmem:[%s9402_s2 + $0x3] sm:$0x1] %v184_v3 }
  0x33   :  { %211 = vsyncadd [#allocation2], 16  ;;  %s8223_s9 = sld [smem:[#allocation4 + $0x4]] }
  0x39   :  { %s214_s12 = scalar_lea.vmem %s9401_s1, %s8223_s9 }
  0x3a   :  { %v234_v4 = vld [vmem:[%s214_s12] sm:$0x1] }
  0x3b   :  { %8225 = vst [vmem:[%s9402_s2 + $0x4] sm:$0x1] %v234_v4 }
  0x3c   :  { %261 = vsyncadd [#allocation2], 16  ;;  %s8226_s15 = sld [smem:[#allocation4 + $0x5]] }
  0x42   :  { %s264_s0 = scalar_lea.vmem %s9401_s1, %s8226_s15 }
  0x43   :  { %v284_v5 = vld [vmem:[%s264_s0] sm:$0x1] }
  0x44   :  { %8228 = vst [vmem:[%s9402_s2 + $0x5] sm:$0x1] %v284_v5 }
  0x45   :  { %311 = vsyncadd [#allocation2], 16  ;;  %s8229_s20 = sld [smem:[#allocation4 + $0x6]] }
  0x4b   :  { %s314_s23 = scalar_lea.vmem %s9401_s1, %s8229_s20 }
  0x4c   :  { %v334_v6 = vld [vmem:[%s314_s23] sm:$0x1] }
  0x4d   :  { %8231 = vst [vmem:[%s9402_s2 + $0x6] sm:$0x1] %v334_v6 }
  0x4e   :  { %361 = vsyncadd [#allocation2], 16  ;;  %s8232_s26 = sld [smem:[#allocation4 + $0x7]] }
  0x54   :  { %s364_s29 = scalar_lea.vmem %s9401_s1, %s8232_s26 }
  0x55   :  { %v384_v7 = vld [vmem:[%s364_s29] sm:$0x1] }
  0x56   :  { %8234 = vst [vmem:[%s9402_s2 + $0x7] sm:$0x1] %v384_v7 }
  0x57   :  { %411 = vsyncadd [#allocation2], 16  ;;  %s8235_s4 = sld [smem:[#allocation4 + $0x8]] }
  0x5d   :  { %s414_s7 = scalar_lea.vmem %s9401_s1, %s8235_s4 }
  0x5e   :  { %v434_v8 = vld [vmem:[%s414_s7] sm:$0x1] }
  0x5f   :  { %8237 = vst [vmem:[%s9402_s2 + $0x8] sm:$0x1] %v434_v8 }
  0x60   :  { %461 = vsyncadd [#allocation2], 16  ;;  %s8238_s10 = sld [smem:[#allocation4 + $0x9]] }
  0x66   :  { %s464_s13 = scalar_lea.vmem %s9401_s1, %s8238_s10 }
  0x67   :  { %v484_v9 = vld [vmem:[%s464_s13] sm:$0x1] }
  0x68   :  { %8240 = vst [vmem:[%s9402_s2 + $0x9] sm:$0x1] %v484_v9 }
  0x69   :  { %511 = vsyncadd [#allocation2], 16  ;;  %s8241_s16 = sld [smem:[#allocation4 + $0xa]] }
  0x6f   :  { %s514_s18 = scalar_lea.vmem %s9401_s1, %s8241_s16 }
  0x70   :  { %v534_v10 = vld [vmem:[%s514_s18] sm:$0x1] }
  0x71   :  { %8243 = vst [vmem:[%s9402_s2 + $0xa] sm:$0x1] %v534_v10 }
  0x72   :  { %561 = vsyncadd [#allocation2], 16  ;;  %s8244_s21 = sld [smem:[#allocation4 + $0xb]] }
  0x78   :  { %s564_s24 = scalar_lea.vmem %s9401_s1, %s8244_s21 }
  0x79   :  { %v584_v11 = vld [vmem:[%s564_s24] sm:$0x1] }
  0x7a   :  { %8246 = vst [vmem:[%s9402_s2 + $0xb] sm:$0x1] %v584_v11 }
  0x7b   :  { %611 = vsyncadd [#allocation2], 16  ;;  %s8247_s27 = sld [smem:[#allocation4 + $0xc]] }
  0x81   :  { %s614_s30 = scalar_lea.vmem %s9401_s1, %s8247_s27 }
  0x82   :  { %v634_v12 = vld [vmem:[%s614_s30] sm:$0x1] }
  0x83   :  { %8249 = vst [vmem:[%s9402_s2 + $0xc] sm:$0x1] %v634_v12 }
  0x84   :  { %661 = vsyncadd [#allocation2], 16  ;;  %s8250_s5 = sld [smem:[#allocation4 + $0xd]] }
  0x8a   :  { %s664_s8 = scalar_lea.vmem %s9401_s1, %s8250_s5 }
  0x8b   :  { %v684_v13 = vld [vmem:[%s664_s8] sm:$0x1] }
  0x8c   :  { %8252 = vst [vmem:[%s9402_s2 + $0xd] sm:$0x1] %v684_v13 }
  0x8d   :  { %711 = vsyncadd [#allocation2], 16  ;;  %s8253_s11 = sld [smem:[#allocation4 + $0xe]] }
  0x93   :  { %s714_s14 = scalar_lea.vmem %s9401_s1, %s8253_s11 }
  0x94   :  { %v734_v14 = vld [vmem:[%s714_s14] sm:$0x1] }
  0x95   :  { %8255 = vst [vmem:[%s9402_s2 + $0xe] sm:$0x1] %v734_v14 }
  0x96   :  { %761 = vsyncadd [#allocation2], 16  ;;  %s8256_s17 = sld [smem:[#allocation4 + $0xf]] }
  0x9c   :  { %s764_s19 = scalar_lea.vmem %s9401_s1, %s8256_s17 }
  0x9d   :  { %v784_v15 = vld [vmem:[%s764_s19] sm:$0x1] }
  0x9e   :  { %8258 = vst [vmem:[%s9402_s2 + $0xf] sm:$0x1] %v784_v15 }
  0x9f   :  { %811 = vsyncadd [#allocation2], 16  ;;  %s8259_s22 = sld [smem:[#allocation4 + $0x10]] }
  0xa5   :  { %s814_s25 = scalar_lea.vmem %s9401_s1, %s8259_s22 }
  0xa6   :  { %v834_v16 = vld [vmem:[%s814_s25] sm:$0x1] }
  0xa7   :  { %8261 = vst [vmem:[%s9402_s2 + $0x10] sm:$0x1] %v834_v16 }
  0xa8   :  { %861 = vsyncadd [#allocation2], 16  ;;  %s8262_s28 = sld [smem:[#allocation4 + $0x11]] }
  0xae   :  { %s864_s3 = scalar_lea.vmem %s9401_s1, %s8262_s28 }
  0xaf   :  { %v884_v17 = vld [vmem:[%s864_s3] sm:$0x1] }
  0xb0   :  { %8264 = vst [vmem:[%s9402_s2 + $0x11] sm:$0x1] %v884_v17 }
  0xb1   :  { %911 = vsyncadd [#allocation2], 16  ;;  %s8265_s6 = sld [smem:[#allocation4 + $0x12]] }
  0xb7   :  { %s914_s9 = scalar_lea.vmem %s9401_s1, %s8265_s6 }
  0xb8   :  { %v934_v18 = vld [vmem:[%s914_s9] sm:$0x1] }
  0xb9   :  { %8267 = vst [vmem:[%s9402_s2 + $0x12] sm:$0x1] %v934_v18 }
  0xba   :  { %961 = vsyncadd [#allocation2], 16  ;;  %s8268_s12 = sld [smem:[#allocation4 + $0x13]] }
  0xc0   :  { %s964_s15 = scalar_lea.vmem %s9401_s1, %s8268_s12 }
  0xc1   :  { %v984_v19 = vld [vmem:[%s964_s15] sm:$0x1] }
  0xc2   :  { %8270 = vst [vmem:[%s9402_s2 + $0x13] sm:$0x1] %v984_v19 }
  0xc3   :  { %1011 = vsyncadd [#allocation2], 16  ;;  %s8271_s0 = sld [smem:[#allocation4 + $0x14]] }
  0xc9   :  { %s1014_s20 = scalar_lea.vmem %s9401_s1, %s8271_s0 }
  0xca   :  { %v1034_v20 = vld [vmem:[%s1014_s20] sm:$0x1] }
  0xcb   :  { %8273 = vst [vmem:[%s9402_s2 + $0x14] sm:$0x1] %v1034_v20 }
  0xcc   :  { %1061 = vsyncadd [#allocation2], 16  ;;  %s8274_s23 = sld [smem:[#allocation4 + $0x15]] }
  0xd2   :  { %s1064_s26 = scalar_lea.vmem %s9401_s1, %s8274_s23 }
  0xd3   :  { %v1084_v21 = vld [vmem:[%s1064_s26] sm:$0x1] }
  0xd4   :  { %8276 = vst [vmem:[%s9402_s2 + $0x15] sm:$0x1] %v1084_v21 }
  0xd5   :  { %1111 = vsyncadd [#allocation2], 16  ;;  %s8277_s29 = sld [smem:[#allocation4 + $0x16]] }
  0xdb   :  { %s1114_s4 = scalar_lea.vmem %s9401_s1, %s8277_s29 }
  0xdc   :  { %v1134_v22 = vld [vmem:[%s1114_s4] sm:$0x1] }
  0xdd   :  { %8279 = vst [vmem:[%s9402_s2 + $0x16] sm:$0x1] %v1134_v22 }
  0xde   :  { %1161 = vsyncadd [#allocation2], 16  ;;  %s8280_s7 = sld [smem:[#allocation4 + $0x17]] }
  0xe4   :  { %s1164_s10 = scalar_lea.vmem %s9401_s1, %s8280_s7 }
  0xe5   :  { %v1184_v23 = vld [vmem:[%s1164_s10] sm:$0x1] }
  0xe6   :  { %8282 = vst [vmem:[%s9402_s2 + $0x17] sm:$0x1] %v1184_v23 }
  0xe7   :  { %1211 = vsyncadd [#allocation2], 16  ;;  %s8283_s13 = sld [smem:[#allocation4 + $0x18]] }
  0xed   :  { %s1214_s16 = scalar_lea.vmem %s9401_s1, %s8283_s13 }
  0xee   :  { %v1234_v24 = vld [vmem:[%s1214_s16] sm:$0x1] }
  0xef   :  { %8285 = vst [vmem:[%s9402_s2 + $0x18] sm:$0x1] %v1234_v24 }
  0xf0   :  { %1261 = vsyncadd [#allocation2], 16  ;;  %s8286_s18 = sld [smem:[#allocation4 + $0x19]] }
  0xf6   :  { %s1264_s21 = scalar_lea.vmem %s9401_s1, %s8286_s18 }
  0xf7   :  { %v1284_v25 = vld [vmem:[%s1264_s21] sm:$0x1] }
  0xf8   :  { %8288 = vst [vmem:[%s9402_s2 + $0x19] sm:$0x1] %v1284_v25 }
  0xf9   :  { %1311 = vsyncadd [#allocation2], 16  ;;  %s8289_s24 = sld [smem:[#allocation4 + $0x1a]] }
  0xff   :  { %s1314_s27 = scalar_lea.vmem %s9401_s1, %s8289_s24 }
 0x100   :  { %v1334_v26 = vld [vmem:[%s1314_s27] sm:$0x1] }
 0x101   :  { %8291 = vst [vmem:[%s9402_s2 + $0x1a] sm:$0x1] %v1334_v26 }
 0x102   :  { %1361 = vsyncadd [#allocation2], 16  ;;  %s8292_s30 = sld [smem:[#allocation4 + $0x1b]] }
 0x108   :  { %s1364_s5 = scalar_lea.vmem %s9401_s1, %s8292_s30 }
 0x109   :  { %v1384_v27 = vld [vmem:[%s1364_s5] sm:$0x1] }
 0x10a   :  { %8294 = vst [vmem:[%s9402_s2 + $0x1b] sm:$0x1] %v1384_v27 }
 0x10b   :  { %1411 = vsyncadd [#allocation2], 16  ;;  %s8295_s8 = sld [smem:[#allocation4 + $0x1c]] }
 0x111   :  { %s1414_s11 = scalar_lea.vmem %s9401_s1, %s8295_s8 }
 0x112   :  { %v1434_v28 = vld [vmem:[%s1414_s11] sm:$0x1] }
 0x113   :  { %8297 = vst [vmem:[%s9402_s2 + $0x1c] sm:$0x1] %v1434_v28 }
 0x114   :  { %1461 = vsyncadd [#allocation2], 16  ;;  %s8298_s14 = sld [smem:[#allocation4 + $0x1d]] }
 0x11a   :  { %s1464_s17 = scalar_lea.vmem %s9401_s1, %s8298_s14 }
 0x11b   :  { %v1484_v29 = vld [vmem:[%s1464_s17] sm:$0x1] }
 0x11c   :  { %8300 = vst [vmem:[%s9402_s2 + $0x1d] sm:$0x1] %v1484_v29 }
 0x11d   :  { %1511 = vsyncadd [#allocation2], 16  ;;  %s8301_s19 = sld [smem:[#allocation4 + $0x1e]] }
 0x123   :  { %s1514_s22 = scalar_lea.vmem %s9401_s1, %s8301_s19 }
 0x124   :  { %v1534_v30 = vld [vmem:[%s1514_s22] sm:$0x1] }
 0x125   :  { %8303 = vst [vmem:[%s9402_s2 + $0x1e] sm:$0x1] %v1534_v30 }
 0x126   :  { %1561 = vsyncadd [#allocation2], 16  ;;  %s8304_s25 = sld [smem:[#allocation4 + $0x1f]] }
 0x12c   :  { %s1564_s28 = scalar_lea.vmem %s9401_s1, %s8304_s25 }
 0x12d   :  { %v1584_v31 = vld [vmem:[%s1564_s28] sm:$0x1] }
 0x12e   :  { %8306 = vst [vmem:[%s9402_s2 + $0x1f] sm:$0x1] %v1584_v31 }
 0x12f   :  { %1611 = vsyncadd [#allocation2], 16  ;;  %s8307_s3 = sld [smem:[#allocation4 + $0x20]] }
 0x135   :  { %s1614_s6 = scalar_lea.vmem %s9401_s1, %s8307_s3 }
 0x136   :  { %v1634_v32 = vld [vmem:[%s1614_s6] sm:$0x1] }
 0x137   :  { %8309 = vst [vmem:[%s9402_s2 + $0x20] sm:$0x1] %v1634_v32 }
 0x138   :  { %1661 = vsyncadd [#allocation2], 16  ;;  %s8310_s9 = sld [smem:[#allocation4 + $0x21]] }
 0x13e   :  { %s1664_s12 = scalar_lea.vmem %s9401_s1, %s8310_s9 }
 0x13f   :  { %v1684_v33 = vld [vmem:[%s1664_s12] sm:$0x1] }
 0x140   :  { %8312 = vst [vmem:[%s9402_s2 + $0x21] sm:$0x1] %v1684_v33 }
 0x141   :  { %1711 = vsyncadd [#allocation2], 16  ;;  %s8313_s15 = sld [smem:[#allocation4 + $0x22]] }
 0x147   :  { %s1714_s0 = scalar_lea.vmem %s9401_s1, %s8313_s15 }
 0x148   :  { %v1734_v34 = vld [vmem:[%s1714_s0] sm:$0x1] }
 0x149   :  { %8315 = vst [vmem:[%s9402_s2 + $0x22] sm:$0x1] %v1734_v34 }
 0x14a   :  { %1761 = vsyncadd [#allocation2], 16  ;;  %s8316_s20 = sld [smem:[#allocation4 + $0x23]] }
 0x150   :  { %s1764_s23 = scalar_lea.vmem %s9401_s1, %s8316_s20 }
 0x151   :  { %v1784_v35 = vld [vmem:[%s1764_s23] sm:$0x1] }
 0x152   :  { %8318 = vst [vmem:[%s9402_s2 + $0x23] sm:$0x1] %v1784_v35 }
 0x153   :  { %1811 = vsyncadd [#allocation2], 16  ;;  %s8319_s26 = sld [smem:[#allocation4 + $0x24]] }
 0x159   :  { %s1814_s29 = scalar_lea.vmem %s9401_s1, %s8319_s26 }
 0x15a   :  { %v1834_v36 = vld [vmem:[%s1814_s29] sm:$0x1] }
 0x15b   :  { %8321 = vst [vmem:[%s9402_s2 + $0x24] sm:$0x1] %v1834_v36 }
 0x15c   :  { %1861 = vsyncadd [#allocation2], 16  ;;  %s8322_s4 = sld [smem:[#allocation4 + $0x25]] }
 0x162   :  { %s1864_s7 = scalar_lea.vmem %s9401_s1, %s8322_s4 }
 0x163   :  { %v1884_v37 = vld [vmem:[%s1864_s7] sm:$0x1] }
 0x164   :  { %8324 = vst [vmem:[%s9402_s2 + $0x25] sm:$0x1] %v1884_v37 }
 0x165   :  { %1911 = vsyncadd [#allocation2], 16  ;;  %s8325_s10 = sld [smem:[#allocation4 + $0x26]] }
 0x16b   :  { %s1914_s13 = scalar_lea.vmem %s9401_s1, %s8325_s10 }
 0x16c   :  { %v1934_v38 = vld [vmem:[%s1914_s13] sm:$0x1] }
 0x16d   :  { %8327 = vst [vmem:[%s9402_s2 + $0x26] sm:$0x1] %v1934_v38 }
 0x16e   :  { %1961 = vsyncadd [#allocation2], 16  ;;  %s8328_s16 = sld [smem:[#allocation4 + $0x27]] }
 0x174   :  { %s1964_s18 = scalar_lea.vmem %s9401_s1, %s8328_s16 }
 0x175   :  { %v1984_v39 = vld [vmem:[%s1964_s18] sm:$0x1] }
 0x176   :  { %8330 = vst [vmem:[%s9402_s2 + $0x27] sm:$0x1] %v1984_v39 }
 0x177   :  { %2011 = vsyncadd [#allocation2], 16  ;;  %s8331_s21 = sld [smem:[#allocation4 + $0x28]] }
 0x17d   :  { %s2014_s24 = scalar_lea.vmem %s9401_s1, %s8331_s21 }
 0x17e   :  { %v2034_v40 = vld [vmem:[%s2014_s24] sm:$0x1] }
 0x17f   :  { %8333 = vst [vmem:[%s9402_s2 + $0x28] sm:$0x1] %v2034_v40 }
 0x180   :  { %2061 = vsyncadd [#allocation2], 16  ;;  %s8334_s27 = sld [smem:[#allocation4 + $0x29]] }
 0x186   :  { %s2064_s30 = scalar_lea.vmem %s9401_s1, %s8334_s27 }
 0x187   :  { %v2084_v41 = vld [vmem:[%s2064_s30] sm:$0x1] }
 0x188   :  { %8336 = vst [vmem:[%s9402_s2 + $0x29] sm:$0x1] %v2084_v41 }
 0x189   :  { %2111 = vsyncadd [#allocation2], 16  ;;  %s8337_s5 = sld [smem:[#allocation4 + $0x2a]] }
 0x18f   :  { %s2114_s8 = scalar_lea.vmem %s9401_s1, %s8337_s5 }
 0x190   :  { %v2134_v42 = vld [vmem:[%s2114_s8] sm:$0x1] }
 0x191   :  { %8339 = vst [vmem:[%s9402_s2 + $0x2a] sm:$0x1] %v2134_v42 }
 0x192   :  { %2161 = vsyncadd [#allocation2], 16  ;;  %s8340_s11 = sld [smem:[#allocation4 + $0x2b]] }
 0x198   :  { %s2164_s14 = scalar_lea.vmem %s9401_s1, %s8340_s11 }
 0x199   :  { %v2184_v43 = vld [vmem:[%s2164_s14] sm:$0x1] }
 0x19a   :  { %8342 = vst [vmem:[%s9402_s2 + $0x2b] sm:$0x1] %v2184_v43 }
 0x19b   :  { %2211 = vsyncadd [#allocation2], 16  ;;  %s8343_s17 = sld [smem:[#allocation4 + $0x2c]] }
 0x1a1   :  { %s2214_s19 = scalar_lea.vmem %s9401_s1, %s8343_s17 }
 0x1a2   :  { %v2234_v44 = vld [vmem:[%s2214_s19] sm:$0x1] }
 0x1a3   :  { %8345 = vst [vmem:[%s9402_s2 + $0x2c] sm:$0x1] %v2234_v44 }
 0x1a4   :  { %2261 = vsyncadd [#allocation2], 16  ;;  %s8346_s22 = sld [smem:[#allocation4 + $0x2d]] }
 0x1aa   :  { %s2264_s25 = scalar_lea.vmem %s9401_s1, %s8346_s22 }
 0x1ab   :  { %v2284_v45 = vld [vmem:[%s2264_s25] sm:$0x1] }
 0x1ac   :  { %8348 = vst [vmem:[%s9402_s2 + $0x2d] sm:$0x1] %v2284_v45 }
 0x1ad   :  { %2311 = vsyncadd [#allocation2], 16  ;;  %s8349_s28 = sld [smem:[#allocation4 + $0x2e]] }
 0x1b3   :  { %s2314_s3 = scalar_lea.vmem %s9401_s1, %s8349_s28 }
 0x1b4   :  { %v2334_v46 = vld [vmem:[%s2314_s3] sm:$0x1] }
 0x1b5   :  { %8351 = vst [vmem:[%s9402_s2 + $0x2e] sm:$0x1] %v2334_v46 }
 0x1b6   :  { %2361 = vsyncadd [#allocation2], 16  ;;  %s8352_s6 = sld [smem:[#allocation4 + $0x2f]] }
 0x1bc   :  { %s2364_s9 = scalar_lea.vmem %s9401_s1, %s8352_s6 }
 0x1bd   :  { %v2384_v47 = vld [vmem:[%s2364_s9] sm:$0x1] }
 0x1be   :  { %8354 = vst [vmem:[%s9402_s2 + $0x2f] sm:$0x1] %v2384_v47 }
 0x1bf   :  { %2411 = vsyncadd [#allocation2], 16  ;;  %s8355_s12 = sld [smem:[#allocation4 + $0x30]] }
 0x1c5   :  { %s2414_s15 = scalar_lea.vmem %s9401_s1, %s8355_s12 }
 0x1c6   :  { %v2434_v48 = vld [vmem:[%s2414_s15] sm:$0x1] }
 0x1c7   :  { %8357 = vst [vmem:[%s9402_s2 + $0x30] sm:$0x1] %v2434_v48 }
 0x1c8   :  { %2461 = vsyncadd [#allocation2], 16  ;;  %s8358_s0 = sld [smem:[#allocation4 + $0x31]] }
 0x1ce   :  { %s2464_s20 = scalar_lea.vmem %s9401_s1, %s8358_s0 }
 0x1cf   :  { %v2484_v49 = vld [vmem:[%s2464_s20] sm:$0x1] }
 0x1d0   :  { %8360 = vst [vmem:[%s9402_s2 + $0x31] sm:$0x1] %v2484_v49 }
 0x1d1   :  { %2511 = vsyncadd [#allocation2], 16  ;;  %s8361_s23 = sld [smem:[#allocation4 + $0x32]] }
 0x1d7   :  { %s2514_s26 = scalar_lea.vmem %s9401_s1, %s8361_s23 }
 0x1d8   :  { %v2534_v50 = vld [vmem:[%s2514_s26] sm:$0x1] }
 0x1d9   :  { %8363 = vst [vmem:[%s9402_s2 + $0x32] sm:$0x1] %v2534_v50 }
 0x1da   :  { %2561 = vsyncadd [#allocation2], 16  ;;  %s8364_s29 = sld [smem:[#allocation4 + $0x33]] }
 0x1e0   :  { %s2564_s4 = scalar_lea.vmem %s9401_s1, %s8364_s29 }
 0x1e1   :  { %v2584_v51 = vld [vmem:[%s2564_s4] sm:$0x1] }
 0x1e2   :  { %8366 = vst [vmem:[%s9402_s2 + $0x33] sm:$0x1] %v2584_v51 }
 0x1e3   :  { %2611 = vsyncadd [#allocation2], 16  ;;  %s8367_s7 = sld [smem:[#allocation4 + $0x34]] }
 0x1e9   :  { %s2614_s10 = scalar_lea.vmem %s9401_s1, %s8367_s7 }
 0x1ea   :  { %v2634_v52 = vld [vmem:[%s2614_s10] sm:$0x1] }
 0x1eb   :  { %8369 = vst [vmem:[%s9402_s2 + $0x34] sm:$0x1] %v2634_v52 }
 0x1ec   :  { %2661 = vsyncadd [#allocation2], 16  ;;  %s8370_s13 = sld [smem:[#allocation4 + $0x35]] }
 0x1f2   :  { %s2664_s16 = scalar_lea.vmem %s9401_s1, %s8370_s13 }
 0x1f3   :  { %v2684_v53 = vld [vmem:[%s2664_s16] sm:$0x1] }
 0x1f4   :  { %8372 = vst [vmem:[%s9402_s2 + $0x35] sm:$0x1] %v2684_v53 }
 0x1f5   :  { %2711 = vsyncadd [#allocation2], 16  ;;  %s8373_s18 = sld [smem:[#allocation4 + $0x36]] }
 0x1fb   :  { %s2714_s21 = scalar_lea.vmem %s9401_s1, %s8373_s18 }
 0x1fc   :  { %v2734_v54 = vld [vmem:[%s2714_s21] sm:$0x1] }
 0x1fd   :  { %8375 = vst [vmem:[%s9402_s2 + $0x36] sm:$0x1] %v2734_v54 }
 0x1fe   :  { %2761 = vsyncadd [#allocation2], 16  ;;  %s8376_s24 = sld [smem:[#allocation4 + $0x37]] }
 0x204   :  { %s2764_s27 = scalar_lea.vmem %s9401_s1, %s8376_s24 }
 0x205   :  { %v2784_v55 = vld [vmem:[%s2764_s27] sm:$0x1] }
 0x206   :  { %8378 = vst [vmem:[%s9402_s2 + $0x37] sm:$0x1] %v2784_v55 }
 0x207   :  { %2811 = vsyncadd [#allocation2], 16  ;;  %s8379_s30 = sld [smem:[#allocation4 + $0x38]] }
 0x20d   :  { %s2814_s5 = scalar_lea.vmem %s9401_s1, %s8379_s30 }
 0x20e   :  { %v2834_v56 = vld [vmem:[%s2814_s5] sm:$0x1] }
 0x20f   :  { %8381 = vst [vmem:[%s9402_s2 + $0x38] sm:$0x1] %v2834_v56 }
 0x210   :  { %2861 = vsyncadd [#allocation2], 16  ;;  %s8382_s8 = sld [smem:[#allocation4 + $0x39]] }
 0x216   :  { %s2864_s11 = scalar_lea.vmem %s9401_s1, %s8382_s8 }
 0x217   :  { %v2884_v57 = vld [vmem:[%s2864_s11] sm:$0x1] }
 0x218   :  { %8384 = vst [vmem:[%s9402_s2 + $0x39] sm:$0x1] %v2884_v57 }
 0x219   :  { %2911 = vsyncadd [#allocation2], 16  ;;  %s8385_s14 = sld [smem:[#allocation4 + $0x3a]] }
 0x21f   :  { %s2914_s17 = scalar_lea.vmem %s9401_s1, %s8385_s14 }
 0x220   :  { %v2934_v58 = vld [vmem:[%s2914_s17] sm:$0x1] }
 0x221   :  { %8387 = vst [vmem:[%s9402_s2 + $0x3a] sm:$0x1] %v2934_v58 }
 0x222   :  { %2961 = vsyncadd [#allocation2], 16  ;;  %s8388_s19 = sld [smem:[#allocation4 + $0x3b]] }
 0x228   :  { %s2964_s22 = scalar_lea.vmem %s9401_s1, %s8388_s19 }
 0x229   :  { %v2984_v59 = vld [vmem:[%s2964_s22] sm:$0x1] }
 0x22a   :  { %8390 = vst [vmem:[%s9402_s2 + $0x3b] sm:$0x1] %v2984_v59 }
 0x22b   :  { %3011 = vsyncadd [#allocation2], 16  ;;  %s8391_s25 = sld [smem:[#allocation4 + $0x3c]] }
 0x231   :  { %s3014_s28 = scalar_lea.vmem %s9401_s1, %s8391_s25 }
 0x232   :  { %v3034_v60 = vld [vmem:[%s3014_s28] sm:$0x1] }
 0x233   :  { %8393 = vst [vmem:[%s9402_s2 + $0x3c] sm:$0x1] %v3034_v60 }
 0x234   :  { %3061 = vsyncadd [#allocation2], 16  ;;  %s8394_s3 = sld [smem:[#allocation4 + $0x3d]] }
 0x23a   :  { %s3064_s6 = scalar_lea.vmem %s9401_s1, %s8394_s3 }
 0x23b   :  { %v3084_v61 = vld [vmem:[%s3064_s6] sm:$0x1] }
 0x23c   :  { %8396 = vst [vmem:[%s9402_s2 + $0x3d] sm:$0x1] %v3084_v61 }
 0x23d   :  { %3111 = vsyncadd [#allocation2], 16  ;;  %s8397_s9 = sld [smem:[#allocation4 + $0x3e]] }
 0x243   :  { %s3114_s12 = scalar_lea.vmem %s9401_s1, %s8397_s9 }
 0x244   :  { %v3134_v62 = vld [vmem:[%s3114_s12] sm:$0x1] }
 0x245   :  { %8399 = vst [vmem:[%s9402_s2 + $0x3e] sm:$0x1] %v3134_v62 }
 0x246   :  { %3161 = vsyncadd [#allocation2], 16  ;;  %s8400_s15 = sld [smem:[#allocation4 + $0x3f]] }
 0x24c   :  { %s3164_s0 = scalar_lea.vmem %s9401_s1, %s8400_s15 }
 0x24d   :  { %v3184_v63 = vld [vmem:[%s3164_s0] sm:$0x1] }
 0x24e   :  { %8402 = vst [vmem:[%s9402_s2 + $0x3f] sm:$0x1] %v3184_v63 }
 0x24f   :  { %3211 = vsyncadd [#allocation2], 16  ;;  %s8403_s20 = sld [smem:[#allocation4 + $0x40]] }
 0x255   :  { %s3214_s23 = scalar_lea.vmem %s9401_s1, %s8403_s20 }
 0x256   :  { %v3234_v0 = vld [vmem:[%s3214_s23] sm:$0x1] }
 0x257   :  { %8405 = vst [vmem:[%s9402_s2 + $0x40] sm:$0x1] %v3234_v0 }
 0x258   :  { %3261 = vsyncadd [#allocation2], 16  ;;  %s8406_s26 = sld [smem:[#allocation4 + $0x41]] }
 0x25e   :  { %s3264_s29 = scalar_lea.vmem %s9401_s1, %s8406_s26 }
 0x25f   :  { %v3284_v1 = vld [vmem:[%s3264_s29] sm:$0x1] }
 0x260   :  { %8408 = vst [vmem:[%s9402_s2 + $0x41] sm:$0x1] %v3284_v1 }
 0x261   :  { %3311 = vsyncadd [#allocation2], 16  ;;  %s8409_s4 = sld [smem:[#allocation4 + $0x42]] }
 0x267   :  { %s3314_s7 = scalar_lea.vmem %s9401_s1, %s8409_s4 }
 0x268   :  { %v3334_v2 = vld [vmem:[%s3314_s7] sm:$0x1] }
 0x269   :  { %8411 = vst [vmem:[%s9402_s2 + $0x42] sm:$0x1] %v3334_v2 }
 0x26a   :  { %3361 = vsyncadd [#allocation2], 16  ;;  %s8412_s10 = sld [smem:[#allocation4 + $0x43]] }
 0x270   :  { %s3364_s13 = scalar_lea.vmem %s9401_s1, %s8412_s10 }
 0x271   :  { %v3384_v3 = vld [vmem:[%s3364_s13] sm:$0x1] }
 0x272   :  { %8414 = vst [vmem:[%s9402_s2 + $0x43] sm:$0x1] %v3384_v3 }
 0x273   :  { %3411 = vsyncadd [#allocation2], 16  ;;  %s8415_s16 = sld [smem:[#allocation4 + $0x44]] }
 0x279   :  { %s3414_s18 = scalar_lea.vmem %s9401_s1, %s8415_s16 }
 0x27a   :  { %v3434_v4 = vld [vmem:[%s3414_s18] sm:$0x1] }
 0x27b   :  { %8417 = vst [vmem:[%s9402_s2 + $0x44] sm:$0x1] %v3434_v4 }
 0x27c   :  { %3461 = vsyncadd [#allocation2], 16  ;;  %s8418_s21 = sld [smem:[#allocation4 + $0x45]] }
 0x282   :  { %s3464_s24 = scalar_lea.vmem %s9401_s1, %s8418_s21 }
 0x283   :  { %v3484_v5 = vld [vmem:[%s3464_s24] sm:$0x1] }
 0x284   :  { %8420 = vst [vmem:[%s9402_s2 + $0x45] sm:$0x1] %v3484_v5 }
 0x285   :  { %3511 = vsyncadd [#allocation2], 16  ;;  %s8421_s27 = sld [smem:[#allocation4 + $0x46]] }
 0x28b   :  { %s3514_s30 = scalar_lea.vmem %s9401_s1, %s8421_s27 }
 0x28c   :  { %v3534_v6 = vld [vmem:[%s3514_s30] sm:$0x1] }
 0x28d   :  { %8423 = vst [vmem:[%s9402_s2 + $0x46] sm:$0x1] %v3534_v6 }
 0x28e   :  { %3561 = vsyncadd [#allocation2], 16  ;;  %s8424_s5 = sld [smem:[#allocation4 + $0x47]] }
 0x294   :  { %s3564_s8 = scalar_lea.vmem %s9401_s1, %s8424_s5 }
 0x295   :  { %v3584_v7 = vld [vmem:[%s3564_s8] sm:$0x1] }
 0x296   :  { %8426 = vst [vmem:[%s9402_s2 + $0x47] sm:$0x1] %v3584_v7 }
 0x297   :  { %3611 = vsyncadd [#allocation2], 16  ;;  %s8427_s11 = sld [smem:[#allocation4 + $0x48]] }
 0x29d   :  { %s3614_s14 = scalar_lea.vmem %s9401_s1, %s8427_s11 }
 0x29e   :  { %v3634_v8 = vld [vmem:[%s3614_s14] sm:$0x1] }
 0x29f   :  { %8429 = vst [vmem:[%s9402_s2 + $0x48] sm:$0x1] %v3634_v8 }
 0x2a0   :  { %3661 = vsyncadd [#allocation2], 16  ;;  %s8430_s17 = sld [smem:[#allocation4 + $0x49]] }
 0x2a6   :  { %s3664_s19 = scalar_lea.vmem %s9401_s1, %s8430_s17 }
 0x2a7   :  { %v3684_v9 = vld [vmem:[%s3664_s19] sm:$0x1] }
 0x2a8   :  { %8432 = vst [vmem:[%s9402_s2 + $0x49] sm:$0x1] %v3684_v9 }
 0x2a9   :  { %3711 = vsyncadd [#allocation2], 16  ;;  %s8433_s22 = sld [smem:[#allocation4 + $0x4a]] }
 0x2af   :  { %s3714_s25 = scalar_lea.vmem %s9401_s1, %s8433_s22 }
 0x2b0   :  { %v3734_v10 = vld [vmem:[%s3714_s25] sm:$0x1] }
 0x2b1   :  { %8435 = vst [vmem:[%s9402_s2 + $0x4a] sm:$0x1] %v3734_v10 }
 0x2b2   :  { %3761 = vsyncadd [#allocation2], 16  ;;  %s8436_s28 = sld [smem:[#allocation4 + $0x4b]] }
 0x2b8   :  { %s3764_s3 = scalar_lea.vmem %s9401_s1, %s8436_s28 }
 0x2b9   :  { %v3784_v11 = vld [vmem:[%s3764_s3] sm:$0x1] }
 0x2ba   :  { %8438 = vst [vmem:[%s9402_s2 + $0x4b] sm:$0x1] %v3784_v11 }
 0x2bb   :  { %3811 = vsyncadd [#allocation2], 16  ;;  %s8439_s6 = sld [smem:[#allocation4 + $0x4c]] }
 0x2c1   :  { %s3814_s9 = scalar_lea.vmem %s9401_s1, %s8439_s6 }
 0x2c2   :  { %v3834_v12 = vld [vmem:[%s3814_s9] sm:$0x1] }
 0x2c3   :  { %8441 = vst [vmem:[%s9402_s2 + $0x4c] sm:$0x1] %v3834_v12 }
 0x2c4   :  { %3861 = vsyncadd [#allocation2], 16  ;;  %s8442_s12 = sld [smem:[#allocation4 + $0x4d]] }
 0x2ca   :  { %s3864_s15 = scalar_lea.vmem %s9401_s1, %s8442_s12 }
 0x2cb   :  { %v3884_v13 = vld [vmem:[%s3864_s15] sm:$0x1] }
 0x2cc   :  { %8444 = vst [vmem:[%s9402_s2 + $0x4d] sm:$0x1] %v3884_v13 }
 0x2cd   :  { %3911 = vsyncadd [#allocation2], 16  ;;  %s8445_s0 = sld [smem:[#allocation4 + $0x4e]] }
 0x2d3   :  { %s3914_s20 = scalar_lea.vmem %s9401_s1, %s8445_s0 }
 0x2d4   :  { %v3934_v14 = vld [vmem:[%s3914_s20] sm:$0x1] }
 0x2d5   :  { %8447 = vst [vmem:[%s9402_s2 + $0x4e] sm:$0x1] %v3934_v14 }
 0x2d6   :  { %3961 = vsyncadd [#allocation2], 16  ;;  %s8448_s23 = sld [smem:[#allocation4 + $0x4f]] }
 0x2dc   :  { %s3964_s26 = scalar_lea.vmem %s9401_s1, %s8448_s23 }
 0x2dd   :  { %v3984_v15 = vld [vmem:[%s3964_s26] sm:$0x1] }
 0x2de   :  { %8450 = vst [vmem:[%s9402_s2 + $0x4f] sm:$0x1] %v3984_v15 }
 0x2df   :  { %4011 = vsyncadd [#allocation2], 16  ;;  %s8451_s29 = sld [smem:[#allocation4 + $0x50]] }
 0x2e5   :  { %s4014_s4 = scalar_lea.vmem %s9401_s1, %s8451_s29 }
 0x2e6   :  { %v4034_v16 = vld [vmem:[%s4014_s4] sm:$0x1] }
 0x2e7   :  { %8453 = vst [vmem:[%s9402_s2 + $0x50] sm:$0x1] %v4034_v16 }
 0x2e8   :  { %4061 = vsyncadd [#allocation2], 16  ;;  %s8454_s7 = sld [smem:[#allocation4 + $0x51]] }
 0x2ee   :  { %s4064_s10 = scalar_lea.vmem %s9401_s1, %s8454_s7 }
 0x2ef   :  { %v4084_v17 = vld [vmem:[%s4064_s10] sm:$0x1] }
 0x2f0   :  { %8456 = vst [vmem:[%s9402_s2 + $0x51] sm:$0x1] %v4084_v17 }
 0x2f1   :  { %4111 = vsyncadd [#allocation2], 16  ;;  %s8457_s13 = sld [smem:[#allocation4 + $0x52]] }
 0x2f7   :  { %s4114_s16 = scalar_lea.vmem %s9401_s1, %s8457_s13 }
 0x2f8   :  { %v4134_v18 = vld [vmem:[%s4114_s16] sm:$0x1] }
 0x2f9   :  { %8459 = vst [vmem:[%s9402_s2 + $0x52] sm:$0x1] %v4134_v18 }
 0x2fa   :  { %4161 = vsyncadd [#allocation2], 16  ;;  %s8460_s18 = sld [smem:[#allocation4 + $0x53]] }
 0x300   :  { %s4164_s21 = scalar_lea.vmem %s9401_s1, %s8460_s18 }
 0x301   :  { %v4184_v19 = vld [vmem:[%s4164_s21] sm:$0x1] }
 0x302   :  { %8462 = vst [vmem:[%s9402_s2 + $0x53] sm:$0x1] %v4184_v19 }
 0x303   :  { %4211 = vsyncadd [#allocation2], 16  ;;  %s8463_s24 = sld [smem:[#allocation4 + $0x54]] }
 0x309   :  { %s4214_s27 = scalar_lea.vmem %s9401_s1, %s8463_s24 }
 0x30a   :  { %v4234_v20 = vld [vmem:[%s4214_s27] sm:$0x1] }
 0x30b   :  { %8465 = vst [vmem:[%s9402_s2 + $0x54] sm:$0x1] %v4234_v20 }
 0x30c   :  { %4261 = vsyncadd [#allocation2], 16  ;;  %s8466_s30 = sld [smem:[#allocation4 + $0x55]] }
 0x312   :  { %s4264_s5 = scalar_lea.vmem %s9401_s1, %s8466_s30 }
 0x313   :  { %v4284_v21 = vld [vmem:[%s4264_s5] sm:$0x1] }
 0x314   :  { %8468 = vst [vmem:[%s9402_s2 + $0x55] sm:$0x1] %v4284_v21 }
 0x315   :  { %4311 = vsyncadd [#allocation2], 16  ;;  %s8469_s8 = sld [smem:[#allocation4 + $0x56]] }
 0x31b   :  { %s4314_s11 = scalar_lea.vmem %s9401_s1, %s8469_s8 }
 0x31c   :  { %v4334_v22 = vld [vmem:[%s4314_s11] sm:$0x1] }
 0x31d   :  { %8471 = vst [vmem:[%s9402_s2 + $0x56] sm:$0x1] %v4334_v22 }
 0x31e   :  { %4361 = vsyncadd [#allocation2], 16  ;;  %s8472_s14 = sld [smem:[#allocation4 + $0x57]] }
 0x324   :  { %s4364_s17 = scalar_lea.vmem %s9401_s1, %s8472_s14 }
 0x325   :  { %v4384_v23 = vld [vmem:[%s4364_s17] sm:$0x1] }
 0x326   :  { %8474 = vst [vmem:[%s9402_s2 + $0x57] sm:$0x1] %v4384_v23 }
 0x327   :  { %4411 = vsyncadd [#allocation2], 16  ;;  %s8475_s19 = sld [smem:[#allocation4 + $0x58]] }
 0x32d   :  { %s4414_s22 = scalar_lea.vmem %s9401_s1, %s8475_s19 }
 0x32e   :  { %v4434_v24 = vld [vmem:[%s4414_s22] sm:$0x1] }
 0x32f   :  { %8477 = vst [vmem:[%s9402_s2 + $0x58] sm:$0x1] %v4434_v24 }
 0x330   :  { %4461 = vsyncadd [#allocation2], 16  ;;  %s8478_s25 = sld [smem:[#allocation4 + $0x59]] }
 0x336   :  { %s4464_s28 = scalar_lea.vmem %s9401_s1, %s8478_s25 }
 0x337   :  { %v4484_v25 = vld [vmem:[%s4464_s28] sm:$0x1] }
 0x338   :  { %8480 = vst [vmem:[%s9402_s2 + $0x59] sm:$0x1] %v4484_v25 }
 0x339   :  { %4511 = vsyncadd [#allocation2], 16  ;;  %s8481_s3 = sld [smem:[#allocation4 + $0x5a]] }
 0x33f   :  { %s4514_s6 = scalar_lea.vmem %s9401_s1, %s8481_s3 }
 0x340   :  { %v4534_v26 = vld [vmem:[%s4514_s6] sm:$0x1] }
 0x341   :  { %8483 = vst [vmem:[%s9402_s2 + $0x5a] sm:$0x1] %v4534_v26 }
 0x342   :  { %4561 = vsyncadd [#allocation2], 16  ;;  %s8484_s9 = sld [smem:[#allocation4 + $0x5b]] }
 0x348   :  { %s4564_s12 = scalar_lea.vmem %s9401_s1, %s8484_s9 }
 0x349   :  { %v4584_v27 = vld [vmem:[%s4564_s12] sm:$0x1] }
 0x34a   :  { %8486 = vst [vmem:[%s9402_s2 + $0x5b] sm:$0x1] %v4584_v27 }
 0x34b   :  { %4611 = vsyncadd [#allocation2], 16  ;;  %s8487_s15 = sld [smem:[#allocation4 + $0x5c]] }
 0x351   :  { %s4614_s0 = scalar_lea.vmem %s9401_s1, %s8487_s15 }
 0x352   :  { %v4634_v28 = vld [vmem:[%s4614_s0] sm:$0x1] }
 0x353   :  { %8489 = vst [vmem:[%s9402_s2 + $0x5c] sm:$0x1] %v4634_v28 }
 0x354   :  { %4661 = vsyncadd [#allocation2], 16  ;;  %s8490_s20 = sld [smem:[#allocation4 + $0x5d]] }
 0x35a   :  { %s4664_s23 = scalar_lea.vmem %s9401_s1, %s8490_s20 }
 0x35b   :  { %v4684_v29 = vld [vmem:[%s4664_s23] sm:$0x1] }
 0x35c   :  { %8492 = vst [vmem:[%s9402_s2 + $0x5d] sm:$0x1] %v4684_v29 }
 0x35d   :  { %4711 = vsyncadd [#allocation2], 16  ;;  %s8493_s26 = sld [smem:[#allocation4 + $0x5e]] }
 0x363   :  { %s4714_s29 = scalar_lea.vmem %s9401_s1, %s8493_s26 }
 0x364   :  { %v4734_v30 = vld [vmem:[%s4714_s29] sm:$0x1] }
 0x365   :  { %8495 = vst [vmem:[%s9402_s2 + $0x5e] sm:$0x1] %v4734_v30 }
 0x366   :  { %4761 = vsyncadd [#allocation2], 16  ;;  %s8496_s4 = sld [smem:[#allocation4 + $0x5f]] }
 0x36c   :  { %s4764_s7 = scalar_lea.vmem %s9401_s1, %s8496_s4 }
 0x36d   :  { %v4784_v31 = vld [vmem:[%s4764_s7] sm:$0x1] }
 0x36e   :  { %8498 = vst [vmem:[%s9402_s2 + $0x5f] sm:$0x1] %v4784_v31 }
 0x36f   :  { %4811 = vsyncadd [#allocation2], 16  ;;  %s8499_s10 = sld [smem:[#allocation4 + $0x60]] }
 0x375   :  { %s4814_s13 = scalar_lea.vmem %s9401_s1, %s8499_s10 }
 0x376   :  { %v4834_v32 = vld [vmem:[%s4814_s13] sm:$0x1] }
 0x377   :  { %8501 = vst [vmem:[%s9402_s2 + $0x60] sm:$0x1] %v4834_v32 }
 0x378   :  { %4861 = vsyncadd [#allocation2], 16  ;;  %s8502_s16 = sld [smem:[#allocation4 + $0x61]] }
 0x37e   :  { %s4864_s18 = scalar_lea.vmem %s9401_s1, %s8502_s16 }
 0x37f   :  { %v4884_v33 = vld [vmem:[%s4864_s18] sm:$0x1] }
 0x380   :  { %8504 = vst [vmem:[%s9402_s2 + $0x61] sm:$0x1] %v4884_v33 }
 0x381   :  { %4911 = vsyncadd [#allocation2], 16  ;;  %s8505_s21 = sld [smem:[#allocation4 + $0x62]] }
 0x387   :  { %s4914_s24 = scalar_lea.vmem %s9401_s1, %s8505_s21 }
 0x388   :  { %v4934_v34 = vld [vmem:[%s4914_s24] sm:$0x1] }
 0x389   :  { %8507 = vst [vmem:[%s9402_s2 + $0x62] sm:$0x1] %v4934_v34 }
 0x38a   :  { %4961 = vsyncadd [#allocation2], 16  ;;  %s8508_s27 = sld [smem:[#allocation4 + $0x63]] }
 0x390   :  { %s4964_s30 = scalar_lea.vmem %s9401_s1, %s8508_s27 }
 0x391   :  { %v4984_v35 = vld [vmem:[%s4964_s30] sm:$0x1] }
 0x392   :  { %8510 = vst [vmem:[%s9402_s2 + $0x63] sm:$0x1] %v4984_v35 }
 0x393   :  { %5011 = vsyncadd [#allocation2], 16  ;;  %s8511_s5 = sld [smem:[#allocation4 + $0x64]] }
 0x399   :  { %s5014_s8 = scalar_lea.vmem %s9401_s1, %s8511_s5 }
 0x39a   :  { %v5034_v36 = vld [vmem:[%s5014_s8] sm:$0x1] }
 0x39b   :  { %8513 = vst [vmem:[%s9402_s2 + $0x64] sm:$0x1] %v5034_v36 }
 0x39c   :  { %5061 = vsyncadd [#allocation2], 16  ;;  %s8514_s11 = sld [smem:[#allocation4 + $0x65]] }
 0x3a2   :  { %s5064_s14 = scalar_lea.vmem %s9401_s1, %s8514_s11 }
 0x3a3   :  { %v5084_v37 = vld [vmem:[%s5064_s14] sm:$0x1] }
 0x3a4   :  { %8516 = vst [vmem:[%s9402_s2 + $0x65] sm:$0x1] %v5084_v37 }
 0x3a5   :  { %5111 = vsyncadd [#allocation2], 16  ;;  %s8517_s17 = sld [smem:[#allocation4 + $0x66]] }
 0x3ab   :  { %s5114_s19 = scalar_lea.vmem %s9401_s1, %s8517_s17 }
 0x3ac   :  { %v5134_v38 = vld [vmem:[%s5114_s19] sm:$0x1] }
 0x3ad   :  { %8519 = vst [vmem:[%s9402_s2 + $0x66] sm:$0x1] %v5134_v38 }
 0x3ae   :  { %5161 = vsyncadd [#allocation2], 16  ;;  %s8520_s22 = sld [smem:[#allocation4 + $0x67]] }
 0x3b4   :  { %s5164_s25 = scalar_lea.vmem %s9401_s1, %s8520_s22 }
 0x3b5   :  { %v5184_v39 = vld [vmem:[%s5164_s25] sm:$0x1] }
 0x3b6   :  { %8522 = vst [vmem:[%s9402_s2 + $0x67] sm:$0x1] %v5184_v39 }
 0x3b7   :  { %5211 = vsyncadd [#allocation2], 16  ;;  %s8523_s28 = sld [smem:[#allocation4 + $0x68]] }
 0x3bd   :  { %s5214_s3 = scalar_lea.vmem %s9401_s1, %s8523_s28 }
 0x3be   :  { %v5234_v40 = vld [vmem:[%s5214_s3] sm:$0x1] }
 0x3bf   :  { %8525 = vst [vmem:[%s9402_s2 + $0x68] sm:$0x1] %v5234_v40 }
 0x3c0   :  { %5261 = vsyncadd [#allocation2], 16  ;;  %s8526_s6 = sld [smem:[#allocation4 + $0x69]] }
 0x3c6   :  { %s5264_s9 = scalar_lea.vmem %s9401_s1, %s8526_s6 }
 0x3c7   :  { %v5284_v41 = vld [vmem:[%s5264_s9] sm:$0x1] }
 0x3c8   :  { %8528 = vst [vmem:[%s9402_s2 + $0x69] sm:$0x1] %v5284_v41 }
 0x3c9   :  { %5311 = vsyncadd [#allocation2], 16  ;;  %s8529_s12 = sld [smem:[#allocation4 + $0x6a]] }
 0x3cf   :  { %s5314_s15 = scalar_lea.vmem %s9401_s1, %s8529_s12 }
 0x3d0   :  { %v5334_v42 = vld [vmem:[%s5314_s15] sm:$0x1] }
 0x3d1   :  { %8531 = vst [vmem:[%s9402_s2 + $0x6a] sm:$0x1] %v5334_v42 }
 0x3d2   :  { %5361 = vsyncadd [#allocation2], 16  ;;  %s8532_s0 = sld [smem:[#allocation4 + $0x6b]] }
 0x3d8   :  { %s5364_s20 = scalar_lea.vmem %s9401_s1, %s8532_s0 }
 0x3d9   :  { %v5384_v43 = vld [vmem:[%s5364_s20] sm:$0x1] }
 0x3da   :  { %8534 = vst [vmem:[%s9402_s2 + $0x6b] sm:$0x1] %v5384_v43 }
 0x3db   :  { %5411 = vsyncadd [#allocation2], 16  ;;  %s8535_s23 = sld [smem:[#allocation4 + $0x6c]] }
 0x3e1   :  { %s5414_s26 = scalar_lea.vmem %s9401_s1, %s8535_s23 }
 0x3e2   :  { %v5434_v44 = vld [vmem:[%s5414_s26] sm:$0x1] }
 0x3e3   :  { %8537 = vst [vmem:[%s9402_s2 + $0x6c] sm:$0x1] %v5434_v44 }
 0x3e4   :  { %5461 = vsyncadd [#allocation2], 16  ;;  %s8538_s29 = sld [smem:[#allocation4 + $0x6d]] }
 0x3ea   :  { %s5464_s4 = scalar_lea.vmem %s9401_s1, %s8538_s29 }
 0x3eb   :  { %v5484_v45 = vld [vmem:[%s5464_s4] sm:$0x1] }
 0x3ec   :  { %8540 = vst [vmem:[%s9402_s2 + $0x6d] sm:$0x1] %v5484_v45 }
 0x3ed   :  { %5511 = vsyncadd [#allocation2], 16  ;;  %s8541_s7 = sld [smem:[#allocation4 + $0x6e]] }
 0x3f3   :  { %s5514_s10 = scalar_lea.vmem %s9401_s1, %s8541_s7 }
 0x3f4   :  { %v5534_v46 = vld [vmem:[%s5514_s10] sm:$0x1] }
 0x3f5   :  { %8543 = vst [vmem:[%s9402_s2 + $0x6e] sm:$0x1] %v5534_v46 }
 0x3f6   :  { %5561 = vsyncadd [#allocation2], 16  ;;  %s8544_s13 = sld [smem:[#allocation4 + $0x6f]] }
 0x3fc   :  { %s5564_s16 = scalar_lea.vmem %s9401_s1, %s8544_s13 }
 0x3fd   :  { %v5584_v47 = vld [vmem:[%s5564_s16] sm:$0x1] }
 0x3fe   :  { %8546 = vst [vmem:[%s9402_s2 + $0x6f] sm:$0x1] %v5584_v47 }
 0x3ff   :  { %5611 = vsyncadd [#allocation2], 16  ;;  %s8547_s18 = sld [smem:[#allocation4 + $0x70]] }
 0x405   :  { %s5614_s21 = scalar_lea.vmem %s9401_s1, %s8547_s18 }
 0x406   :  { %v5634_v48 = vld [vmem:[%s5614_s21] sm:$0x1] }
 0x407   :  { %8549 = vst [vmem:[%s9402_s2 + $0x70] sm:$0x1] %v5634_v48 }
 0x408   :  { %5661 = vsyncadd [#allocation2], 16  ;;  %s8550_s24 = sld [smem:[#allocation4 + $0x71]] }
 0x40e   :  { %s5664_s27 = scalar_lea.vmem %s9401_s1, %s8550_s24 }
 0x40f   :  { %v5684_v49 = vld [vmem:[%s5664_s27] sm:$0x1] }
 0x410   :  { %8552 = vst [vmem:[%s9402_s2 + $0x71] sm:$0x1] %v5684_v49 }
 0x411   :  { %5711 = vsyncadd [#allocation2], 16  ;;  %s8553_s30 = sld [smem:[#allocation4 + $0x72]] }
 0x417   :  { %s5714_s5 = scalar_lea.vmem %s9401_s1, %s8553_s30 }
 0x418   :  { %v5734_v50 = vld [vmem:[%s5714_s5] sm:$0x1] }
 0x419   :  { %8555 = vst [vmem:[%s9402_s2 + $0x72] sm:$0x1] %v5734_v50 }
 0x41a   :  { %5761 = vsyncadd [#allocation2], 16  ;;  %s8556_s8 = sld [smem:[#allocation4 + $0x73]] }
 0x420   :  { %s5764_s11 = scalar_lea.vmem %s9401_s1, %s8556_s8 }
 0x421   :  { %v5784_v51 = vld [vmem:[%s5764_s11] sm:$0x1] }
 0x422   :  { %8558 = vst [vmem:[%s9402_s2 + $0x73] sm:$0x1] %v5784_v51 }
 0x423   :  { %5811 = vsyncadd [#allocation2], 16  ;;  %s8559_s14 = sld [smem:[#allocation4 + $0x74]] }
 0x429   :  { %s5814_s17 = scalar_lea.vmem %s9401_s1, %s8559_s14 }
 0x42a   :  { %v5834_v52 = vld [vmem:[%s5814_s17] sm:$0x1] }
 0x42b   :  { %8561 = vst [vmem:[%s9402_s2 + $0x74] sm:$0x1] %v5834_v52 }
 0x42c   :  { %5861 = vsyncadd [#allocation2], 16  ;;  %s8562_s19 = sld [smem:[#allocation4 + $0x75]] }
 0x432   :  { %s5864_s22 = scalar_lea.vmem %s9401_s1, %s8562_s19 }
 0x433   :  { %v5884_v53 = vld [vmem:[%s5864_s22] sm:$0x1] }
 0x434   :  { %8564 = vst [vmem:[%s9402_s2 + $0x75] sm:$0x1] %v5884_v53 }
 0x435   :  { %5911 = vsyncadd [#allocation2], 16  ;;  %s8565_s25 = sld [smem:[#allocation4 + $0x76]] }
 0x43b   :  { %s5914_s28 = scalar_lea.vmem %s9401_s1, %s8565_s25 }
 0x43c   :  { %v5934_v54 = vld [vmem:[%s5914_s28] sm:$0x1] }
 0x43d   :  { %8567 = vst [vmem:[%s9402_s2 + $0x76] sm:$0x1] %v5934_v54 }
 0x43e   :  { %5961 = vsyncadd [#allocation2], 16  ;;  %s8568_s3 = sld [smem:[#allocation4 + $0x77]] }
 0x444   :  { %s5964_s6 = scalar_lea.vmem %s9401_s1, %s8568_s3 }
 0x445   :  { %v5984_v55 = vld [vmem:[%s5964_s6] sm:$0x1] }
 0x446   :  { %8570 = vst [vmem:[%s9402_s2 + $0x77] sm:$0x1] %v5984_v55 }
 0x447   :  { %6011 = vsyncadd [#allocation2], 16  ;;  %s8571_s9 = sld [smem:[#allocation4 + $0x78]] }
 0x44d   :  { %s6014_s12 = scalar_lea.vmem %s9401_s1, %s8571_s9 }
 0x44e   :  { %v6034_v56 = vld [vmem:[%s6014_s12] sm:$0x1] }
 0x44f   :  { %8573 = vst [vmem:[%s9402_s2 + $0x78] sm:$0x1] %v6034_v56 }
 0x450   :  { %6061 = vsyncadd [#allocation2], 16  ;;  %s8574_s15 = sld [smem:[#allocation4 + $0x79]] }
 0x456   :  { %s6064_s0 = scalar_lea.vmem %s9401_s1, %s8574_s15 }
 0x457   :  { %v6084_v57 = vld [vmem:[%s6064_s0] sm:$0x1] }
 0x458   :  { %8576 = vst [vmem:[%s9402_s2 + $0x79] sm:$0x1] %v6084_v57 }
 0x459   :  { %6111 = vsyncadd [#allocation2], 16  ;;  %s8577_s20 = sld [smem:[#allocation4 + $0x7a]] }
 0x45f   :  { %s6114_s23 = scalar_lea.vmem %s9401_s1, %s8577_s20 }
 0x460   :  { %v6134_v58 = vld [vmem:[%s6114_s23] sm:$0x1] }
 0x461   :  { %8579 = vst [vmem:[%s9402_s2 + $0x7a] sm:$0x1] %v6134_v58 }
 0x462   :  { %6161 = vsyncadd [#allocation2], 16  ;;  %s8580_s26 = sld [smem:[#allocation4 + $0x7b]] }
 0x468   :  { %s6164_s29 = scalar_lea.vmem %s9401_s1, %s8580_s26 }
 0x469   :  { %v6184_v59 = vld [vmem:[%s6164_s29] sm:$0x1] }
 0x46a   :  { %8582 = vst [vmem:[%s9402_s2 + $0x7b] sm:$0x1] %v6184_v59 }
 0x46b   :  { %6211 = vsyncadd [#allocation2], 16  ;;  %s8583_s4 = sld [smem:[#allocation4 + $0x7c]] }
 0x471   :  { %s6214_s7 = scalar_lea.vmem %s9401_s1, %s8583_s4 }
 0x472   :  { %v6234_v60 = vld [vmem:[%s6214_s7] sm:$0x1] }
 0x473   :  { %8585 = vst [vmem:[%s9402_s2 + $0x7c] sm:$0x1] %v6234_v60 }
 0x474   :  { %6261 = vsyncadd [#allocation2], 16  ;;  %s8586_s10 = sld [smem:[#allocation4 + $0x7d]] }
 0x47a   :  { %s6264_s13 = scalar_lea.vmem %s9401_s1, %s8586_s10 }
 0x47b   :  { %v6284_v61 = vld [vmem:[%s6264_s13] sm:$0x1] }
 0x47c   :  { %8588 = vst [vmem:[%s9402_s2 + $0x7d] sm:$0x1] %v6284_v61 }
 0x47d   :  { %6311 = vsyncadd [#allocation2], 16  ;;  %s8589_s16 = sld [smem:[#allocation4 + $0x7e]] }
 0x483   :  { %s6314_s18 = scalar_lea.vmem %s9401_s1, %s8589_s16 }
 0x484   :  { %v6334_v62 = vld [vmem:[%s6314_s18] sm:$0x1] }
 0x485   :  { %8591 = vst [vmem:[%s9402_s2 + $0x7e] sm:$0x1] %v6334_v62 }
 0x486   :  { %6361 = vsyncadd [#allocation2], 16  ;;  %s8592_s21 = sld [smem:[#allocation4 + $0x7f]] }
 0x48c   :  { %s6364_s24 = scalar_lea.vmem %s9401_s1, %s8592_s21 }
 0x48d   :  { %v6384_v63 = vld [vmem:[%s6364_s24] sm:$0x1] }
 0x48e   :  { %8594 = vst [vmem:[%s9402_s2 + $0x7f] sm:$0x1] %v6384_v63 }
 0x48f   :  { %6411 = vsyncadd [#allocation2], 16 }
 0x490   :  { %8611 = dma.done.wait [#allocation2], 2048 }
 0x491   :  { %8612 = vsyncadd [#allocation2], 4294965248 }
 0x492   :  { %6673 = vsyncmov [#allocation2] }
 0x495   :  { %s6674_s27 = vpop.sfrf %6673 }
 0x496   :  { %p8595_p5 = scmp.ne.s32.totalorder %s6674_s27, 0 }
 0x498   :  { %6678 = shalt.err (%p8595_p5)  }

</bundles_post_ra>
